<compile_context>
chip_gen: v6e
topology: v6e:2x2x1
jax: 0.10.0
libtpu: 0.0.40
codegen_flags: <defaults>
</compile_context>

<pallas_src>
import jax
import jax.numpy as jnp
from jax.experimental import pallas as pl
from jax.experimental.pallas import tpu as pltpu


_TAPS = tuple((kh, kw) for kh in range(3) for kw in range(3))


# ----------------------------------------------------------------------------
# Fused kernel: maxpool(2x2) -> conv3x3+BN+ReLU -> conv3x3+BN+ReLU
# (nb images per grid step; everything stays in VMEM between stages)
# ----------------------------------------------------------------------------
def _down_fused_kernel(x_ref, w1_ref, s1_ref, b1_ref, w2_ref, s2_ref, b2_ref,
                       o_ref, xpad1_ref, xpad2_ref, cols1_ref, cols2_ref):
    nb, Hp, Wp, Cin = xpad1_ref.shape
    H2, W2 = Hp - 2, Wp - 2
    Cmid = xpad2_ref.shape[-1]
    Cout = o_ref.shape[-1]
    M = nb * H2 * W2

    # ---- zero ONLY the 1-pixel border of the padded scratches, every step ----
    # Unconditional (no program_id gate) so it is correct when the "parallel"
    # grid axis is sharded across TensorCores; border-only keeps store count low.
    def zero_border(ref, c):
        ref[:, 0:1, :, :] = jnp.zeros((nb, 1, Wp, c), ref.dtype)
        ref[:, Hp - 1:Hp, :, :] = jnp.zeros((nb, 1, Wp, c), ref.dtype)
        ref[:, :, 0:1, :] = jnp.zeros((nb, Hp, 1, c), ref.dtype)
        ref[:, :, Wp - 1:Wp, :] = jnp.zeros((nb, Hp, 1, c), ref.dtype)

    zero_border(xpad1_ref, Cin)
    zero_border(xpad2_ref, Cmid)

    # ---- 2x2 max pool: windows pre-split onto non-lane axes by the wrapper ----
    # x_ref: (nb, H2, 2, W2, 2, Cin) -> four plain (nb, H2, W2, Cin) reads.
    a = x_ref[:, :, 0, :, 0, :]
    b = x_ref[:, :, 0, :, 1, :]
    c = x_ref[:, :, 1, :, 0, :]
    d = x_ref[:, :, 1, :, 1, :]
    pooled = jnp.maximum(jnp.maximum(a, b), jnp.maximum(c, d))
    xpad1_ref[:, 1:H2 + 1, 1:W2 + 1, :] = pooled.astype(xpad1_ref.dtype)  # bf16

    # ---- 3x3 conv (+ folded BN + ReLU) as ONE im2col MXU matmul ----
    def conv3x3_bn_relu(xpad_ref, cols_ref, w_ref, scale, bias, ci):
        # 9 one-time shifted-window copies into the im2col slab (amortizes the
        # sublane realignment of the kh/kw windows into 9 stores).
        for t, (kh, kw) in enumerate(_TAPS):
            cols_ref[:, :, :, t * ci:(t + 1) * ci] = \
                xpad_ref[:, kh:kh + H2, kw:kw + W2, :]
        cols = cols_ref[...].reshape(M, 9 * ci)                       # bf16
        acc = jnp.dot(cols, w_ref[...], preferred_element_type=jnp.float32)
        return jnp.maximum(acc * scale + bias, 0.0)                   # f32 (M, co)

    y1 = conv3x3_bn_relu(xpad1_ref, cols1_ref, w1_ref, s1_ref[...], b1_ref[...], Cin)
    xpad2_ref[:, 1:H2 + 1, 1:W2 + 1, :] = \
        y1.reshape(nb, H2, W2, Cmid).astype(xpad2_ref.dtype)          # stays in VMEM

    y2 = conv3x3_bn_relu(xpad2_ref, cols2_ref, w2_ref, s2_ref[...], b2_ref[...], Cmid)

    # NHWC-flat store: no in-kernel transpose competing with vmatmul for the
    # vector-extended slots.
    o_ref[...] = y2.reshape(nb, H2 * W2, Cout).astype(o_ref.dtype)


# ----------------------------------------------------------------------------
# Wrapper
# ----------------------------------------------------------------------------
def _pick_batch_block(N, H2, W2, Cin, C, in_itemsize):
    """Largest divisor of N whose per-step VMEM footprint fits a conservative budget."""
    HW = H2 * W2

    def vmem_bytes(nb):
        inp = 2 * nb * H2 * 2 * W2 * 2 * Cin * in_itemsize      # double-buffered input
        outp = 2 * nb * HW * C * 4                               # double-buffered output
        pads = nb * (H2 + 2) * (W2 + 2) * (Cin + C) * 2          # bf16 padded scratches
        cols = nb * HW * 9 * (Cin + C) * 2                       # bf16 im2col slabs
        wgts = 2 * ((9 * Cin * C + 9 * C * C) * 2 + 4 * C * 4)   # bf16 weights, f32 bn
        return inp + outp + pads + cols + wgts

    budget = 24 * 1024 * 1024   # conservative: leaves headroom on v7x (64 MiB VMEM/TC)
    best, best_bytes = 1, vmem_bytes(1)
    for nb in range(1, N + 1):
        if N % nb:
            continue
        bts = vmem_bytes(nb)
        if bts > budget:
            break
        best, best_bytes = nb, bts
        if nb * HW >= 512:      # M already fills the MXU; no need to grow the block
            break
    return best, best_bytes


def down_fused(x_nchw, w1, s1, b1, w2, s2, b2):
    N, Cin, H, W = x_nchw.shape
    H2, W2 = H // 2, W // 2            # floor, matches nn.MaxPool2d(2)
    C = w1.shape[-1]
    HW = H2 * W2

    nb, vmem_est = _pick_batch_block(N, H2, W2, Cin, C, x_nchw.dtype.itemsize)

    # Crop odd tails (MaxPool2d floor), NCHW -> NHWC (one XLA transpose), then a
    # FREE reshape pre-splitting the 2x2 pool windows onto non-lane axes.
    x = x_nchw[:, :, :2 * H2, :2 * W2]
    x = jnp.transpose(x, (0, 2, 3, 1)).reshape(N, H2, 2, W2, 2, Cin)

    # bf16 MXU operands (accumulation stays f32 inside the dot).
    w1r = w1.reshape(9 * Cin, C).astype(jnp.bfloat16)
    w2r = w2.reshape(9 * C, C).astype(jnp.bfloat16)
    s1r = s1.reshape(1, C).astype(jnp.float32)
    b1r = b1.reshape(1, C).astype(jnp.float32)
    s2r = s2.reshape(1, C).astype(jnp.float32)
    b2r = b2.reshape(1, C).astype(jnp.float32)

    flops = 2 * N * HW * 9 * (Cin * C + C * C)
    bytes_accessed = (x.size * x.dtype.itemsize
                      + (w1r.size + w2r.size) * 2 + 4 * C * 4
                      + N * HW * C * x_nchw.dtype.itemsize)
    vmem_limit = int(min(max(32 * 1024 * 1024, 2 * vmem_est), 100 * 1024 * 1024))

    out = pl.pallas_call(
        _down_fused_kernel,
        out_shape=jax.ShapeDtypeStruct((N, HW, C), x_nchw.dtype),
        grid=(N // nb,),
        in_specs=[
            pl.BlockSpec((nb, H2, 2, W2, 2, Cin), lambda n: (n, 0, 0, 0, 0, 0)),
            pl.BlockSpec((9 * Cin, C), lambda n: (0, 0)),
            pl.BlockSpec((1, C), lambda n: (0, 0)),
            pl.BlockSpec((1, C), lambda n: (0, 0)),
            pl.BlockSpec((9 * C, C), lambda n: (0, 0)),
            pl.BlockSpec((1, C), lambda n: (0, 0)),
            pl.BlockSpec((1, C), lambda n: (0, 0)),
        ],
        out_specs=pl.BlockSpec((nb, HW, C), lambda n: (n, 0, 0)),
        scratch_shapes=[
            pltpu.VMEM((nb, H2 + 2, W2 + 2, Cin), jnp.bfloat16),   # padded pooled input
            pltpu.VMEM((nb, H2 + 2, W2 + 2, C), jnp.bfloat16),     # padded conv1 output
            pltpu.VMEM((nb, H2, W2, 9 * Cin), jnp.bfloat16),       # im2col slab conv1
            pltpu.VMEM((nb, H2, W2, 9 * C), jnp.bfloat16),         # im2col slab conv2
        ],
        compiler_params=pltpu.CompilerParams(
            dimension_semantics=("parallel",),
            vmem_limit_bytes=vmem_limit),
        cost_estimate=pl.CostEstimate(flops=flops, transcendentals=0,
                                      bytes_accessed=bytes_accessed),
    )(x, w1r, s1r, b1r, w2r, s2r, b2r)

    # NHWC-flat -> NCHW only at the PyTorch-compatible module boundary.
    return jnp.transpose(out, (0, 2, 1)).reshape(N, C, H2, W2)


# ----------------------------------------------------------------------------
# Parameter construction (deterministic, in-script) + BN folding.
# ----------------------------------------------------------------------------
_BN_EPS = 1e-5


def _fold_bn(conv_bias, gamma, beta, mean, var):
    scale = gamma / jnp.sqrt(var + _BN_EPS)
    bias = beta + scale * (conv_bias - mean)
    return scale, bias


def init_down_params(key, in_channels, out_channels):
    ks = jax.random.split(key, 12)

    def conv_w(k, ci, co):
        bound = 1.0 / jnp.sqrt(ci * 9.0)
        return jax.random.uniform(k, (3, 3, ci, co), jnp.float32, -bound, bound)

    def conv_b(k, ci, co):
        bound = 1.0 / jnp.sqrt(ci * 9.0)
        return jax.random.uniform(k, (co,), jnp.float32, -bound, bound)

    w1 = conv_w(ks[0], in_channels, out_channels)
    b1 = conv_b(ks[1], in_channels, out_channels)
    g1 = 1.0 + 0.1 * jax.random.normal(ks[2], (out_channels,), jnp.float32)
    be1 = 0.1 * jax.random.normal(ks[3], (out_channels,), jnp.float32)
    m1 = 0.1 * jax.random.normal(ks[4], (out_channels,), jnp.float32)
    v1 = jnp.abs(jax.random.normal(ks[5], (out_channels,), jnp.float32)) + 0.5

    w2 = conv_w(ks[6], out_channels, out_channels)
    b2 = conv_b(ks[7], out_channels, out_channels)
    g2 = 1.0 + 0.1 * jax.random.normal(ks[8], (out_channels,), jnp.float32)
    be2 = 0.1 * jax.random.normal(ks[9], (out_channels,), jnp.float32)
    m2 = 0.1 * jax.random.normal(ks[10], (out_channels,), jnp.float32)
    v2 = jnp.abs(jax.random.normal(ks[11], (out_channels,), jnp.float32)) + 0.5

    s1, fb1 = _fold_bn(b1, g1, be1, m1, v1)
    s2, fb2 = _fold_bn(b2, g2, be2, m2, v2)
    return dict(w1=w1, scale1=s1, bias1=fb1, w2=w2, scale2=s2, bias2=fb2)


# ----------------------------------------------------------------------------
# Down.forward  (NCHW in, NCHW out - matches PyTorch)
# ----------------------------------------------------------------------------
@jax.jit
def down_forward(x_nchw, params):
    return down_fused(x_nchw, params["w1"], params["scale1"], params["bias1"],
                      params["w2"], params["scale2"], params["bias2"])


# ----------------------------------------------------------------------------
# Pure-JAX reference (bf16-operand / f32-accumulate, matching the kernel).
# ----------------------------------------------------------------------------
def down_forward_ref(x_nchw, params):
    def q(a):   # mimic the kernel's bf16 operand rounding
        return a.astype(jnp.bfloat16).astype(jnp.float32)

    x = jnp.transpose(x_nchw, (0, 2, 3, 1))
    x = jax.lax.reduce_window(
        x, -jnp.inf, jax.lax.max,
        window_dimensions=(1, 2, 2, 1), window_strides=(1, 2, 2, 1),
        padding="VALID",
    )

    def cbr(x, w, scale, bias):
        y = jax.lax.conv_general_dilated(
            q(x), q(w), window_strides=(1, 1), padding="SAME",
            dimension_numbers=("NHWC", "HWIO", "NHWC"),
        )
        return jnp.maximum(y * scale + bias, 0.0)

    x = cbr(x, params["w1"], params["scale1"], params["bias1"])
    x = cbr(x, params["w2"], params["scale2"], params["bias2"])
    return jnp.transpose(x, (0, 3, 1, 2))


if __name__ == "__main__":
    key = jax.random.PRNGKey(0)
    k_x, k_p = jax.random.split(key)

    N, Cin, Hs, Ws = 2, 4, 16, 16
    Cout = 8
    x = jax.random.normal(k_x, (N, Cin, Hs, Ws), jnp.float32)     # NCHW like PyTorch
    params = init_down_params(k_p, Cin, Cout)

    out = down_forward(x, params)
    out = jax.block_until_ready(out)
    assert out.shape == (N, Cout, Hs // 2, Ws // 2), out.shape

    ref = down_forward_ref(x, params)
    assert jnp.allclose(out, ref, atol=1e-2, rtol=1e-2), float(jnp.abs(out - ref).max())

    print("KERNEL_OK")
</pallas_src>

<mosaic_0001>
module attributes {stable_mosaic.version = 11 : i64} {
  func.func @_down_fused_kernel(%arg0: i32, %arg1: memref<2x8x2x8x2x4xf32, #tpu.memory_space<vmem>>, %arg2: memref<36x8xbf16, #tpu.memory_space<vmem>>, %arg3: memref<1x8xf32, #tpu.memory_space<vmem>>, %arg4: memref<1x8xf32, #tpu.memory_space<vmem>>, %arg5: memref<72x8xbf16, #tpu.memory_space<vmem>>, %arg6: memref<1x8xf32, #tpu.memory_space<vmem>>, %arg7: memref<1x8xf32, #tpu.memory_space<vmem>>, %arg8: memref<2x64x8xf32, #tpu.memory_space<vmem>>, %arg9: memref<2x10x10x4xbf16, #tpu.memory_space<vmem>>, %arg10: memref<2x10x10x8xbf16, #tpu.memory_space<vmem>>, %arg11: memref<2x8x8x36xbf16, #tpu.memory_space<vmem>>, %arg12: memref<2x8x8x72xbf16, #tpu.memory_space<vmem>>) attributes {dimension_semantics = [#tpu.dimension_semantics<parallel>], iteration_bounds = array<i64: 1>, scalar_prefetch = 0 : i64, scratch_operands = 4 : i64, tpu.core_type = #tpu.core_type<tc>, window_params = [{transform_indices = @transform_0, window_bounds = array<i64: 2, 8, 2, 8, 2, 4>}, {pipeline_mode = #tpu.pipeline_mode<synchronous>, transform_indices = @transform_1, window_bounds = array<i64: 36, 8>}, {pipeline_mode = #tpu.pipeline_mode<synchronous>, transform_indices = @transform_2, window_bounds = array<i64: 1, 8>}, {pipeline_mode = #tpu.pipeline_mode<synchronous>, transform_indices = @transform_3, window_bounds = array<i64: 1, 8>}, {pipeline_mode = #tpu.pipeline_mode<synchronous>, transform_indices = @transform_4, window_bounds = array<i64: 72, 8>}, {pipeline_mode = #tpu.pipeline_mode<synchronous>, transform_indices = @transform_5, window_bounds = array<i64: 1, 8>}, {pipeline_mode = #tpu.pipeline_mode<synchronous>, transform_indices = @transform_6, window_bounds = array<i64: 1, 8>}, {transform_indices = @transform_7, window_bounds = array<i64: 2, 64, 8>}]} {
    %cst = arith.constant 0.000000e+00 : bf16
    %0 = vector.broadcast %cst : bf16 to vector<2x1x10x4xbf16>
    %c0 = arith.constant 0 : index
    %c0_0 = arith.constant 0 : index
    %c0_1 = arith.constant 0 : index
    %c0_2 = arith.constant 0 : index
    %1 = vector.load %arg9[%c0, %c0_0, %c0_1, %c0_2] : memref<2x10x10x4xbf16, #tpu.memory_space<vmem>>, vector<2x1x10x4xbf16>
    tpu.vector_store %arg9[%c0, %c0_0, %c0_1, %c0_2], %0 {strides = array<i32>} : memref<2x10x10x4xbf16, #tpu.memory_space<vmem>>, vector<2x1x10x4xbf16>,
    %cst_3 = arith.constant 0.000000e+00 : bf16
    %2 = vector.broadcast %cst_3 : bf16 to vector<2x1x10x4xbf16>
    %c0_4 = arith.constant 0 : index
    %c9 = arith.constant 9 : index
    %c0_5 = arith.constant 0 : index
    %c0_6 = arith.constant 0 : index
    %3 = vector.load %arg9[%c0_4, %c9, %c0_5, %c0_6] : memref<2x10x10x4xbf16, #tpu.memory_space<vmem>>, vector<2x1x10x4xbf16>
    tpu.vector_store %arg9[%c0_4, %c9, %c0_5, %c0_6], %2 {strides = array<i32>} : memref<2x10x10x4xbf16, #tpu.memory_space<vmem>>, vector<2x1x10x4xbf16>,
    %cst_7 = arith.constant 0.000000e+00 : bf16
    %4 = vector.broadcast %cst_7 : bf16 to vector<2x10x1x4xbf16>
    %c0_8 = arith.constant 0 : index
    %c0_9 = arith.constant 0 : index
    %c0_10 = arith.constant 0 : index
    %c0_11 = arith.constant 0 : index
    %5 = vector.load %arg9[%c0_8, %c0_9, %c0_10, %c0_11] : memref<2x10x10x4xbf16, #tpu.memory_space<vmem>>, vector<2x10x1x4xbf16>
    tpu.vector_store %arg9[%c0_8, %c0_9, %c0_10, %c0_11], %4 {strides = array<i32>} : memref<2x10x10x4xbf16, #tpu.memory_space<vmem>>, vector<2x10x1x4xbf16>,
    %cst_12 = arith.constant 0.000000e+00 : bf16
    %6 = vector.broadcast %cst_12 : bf16 to vector<2x10x1x4xbf16>
    %c0_13 = arith.constant 0 : index
    %c0_14 = arith.constant 0 : index
    %c9_15 = arith.constant 9 : index
    %c0_16 = arith.constant 0 : index
    %7 = vector.load %arg9[%c0_13, %c0_14, %c9_15, %c0_16] : memref<2x10x10x4xbf16, #tpu.memory_space<vmem>>, vector<2x10x1x4xbf16>
    tpu.vector_store %arg9[%c0_13, %c0_14, %c9_15, %c0_16], %6 {strides = array<i32>} : memref<2x10x10x4xbf16, #tpu.memory_space<vmem>>, vector<2x10x1x4xbf16>,
    %cst_17 = arith.constant 0.000000e+00 : bf16
    %8 = vector.broadcast %cst_17 : bf16 to vector<2x1x10x8xbf16>
    %c0_18 = arith.constant 0 : index
    %c0_19 = arith.constant 0 : index
    %c0_20 = arith.constant 0 : index
    %c0_21 = arith.constant 0 : index
    %9 = vector.load %arg10[%c0_18, %c0_19, %c0_20, %c0_21] : memref<2x10x10x8xbf16, #tpu.memory_space<vmem>>, vector<2x1x10x8xbf16>
    tpu.vector_store %arg10[%c0_18, %c0_19, %c0_20, %c0_21], %8 {strides = array<i32>} : memref<2x10x10x8xbf16, #tpu.memory_space<vmem>>, vector<2x1x10x8xbf16>,
    %cst_22 = arith.constant 0.000000e+00 : bf16
    %10 = vector.broadcast %cst_22 : bf16 to vector<2x1x10x8xbf16>
    %c0_23 = arith.constant 0 : index
    %c9_24 = arith.constant 9 : index
    %c0_25 = arith.constant 0 : index
    %c0_26 = arith.constant 0 : index
    %11 = vector.load %arg10[%c0_23, %c9_24, %c0_25, %c0_26] : memref<2x10x10x8xbf16, #tpu.memory_space<vmem>>, vector<2x1x10x8xbf16>
    tpu.vector_store %arg10[%c0_23, %c9_24, %c0_25, %c0_26], %10 {strides = array<i32>} : memref<2x10x10x8xbf16, #tpu.memory_space<vmem>>, vector<2x1x10x8xbf16>,
    %cst_27 = arith.constant 0.000000e+00 : bf16
    %12 = vector.broadcast %cst_27 : bf16 to vector<2x10x1x8xbf16>
    %c0_28 = arith.constant 0 : index
    %c0_29 = arith.constant 0 : index
    %c0_30 = arith.constant 0 : index
    %c0_31 = arith.constant 0 : index
    %13 = vector.load %arg10[%c0_28, %c0_29, %c0_30, %c0_31] : memref<2x10x10x8xbf16, #tpu.memory_space<vmem>>, vector<2x10x1x8xbf16>
    tpu.vector_store %arg10[%c0_28, %c0_29, %c0_30, %c0_31], %12 {strides = array<i32>} : memref<2x10x10x8xbf16, #tpu.memory_space<vmem>>, vector<2x10x1x8xbf16>,
    %cst_32 = arith.constant 0.000000e+00 : bf16
    %14 = vector.broadcast %cst_32 : bf16 to vector<2x10x1x8xbf16>
    %c0_33 = arith.constant 0 : index
    %c0_34 = arith.constant 0 : index
    %c9_35 = arith.constant 9 : index
    %c0_36 = arith.constant 0 : index
    %15 = vector.load %arg10[%c0_33, %c0_34, %c9_35, %c0_36] : memref<2x10x10x8xbf16, #tpu.memory_space<vmem>>, vector<2x10x1x8xbf16>
    tpu.vector_store %arg10[%c0_33, %c0_34, %c9_35, %c0_36], %14 {strides = array<i32>} : memref<2x10x10x8xbf16, #tpu.memory_space<vmem>>, vector<2x10x1x8xbf16>,
    %c0_37 = arith.constant 0 : index
    %c0_38 = arith.constant 0 : index
    %c0_39 = arith.constant 0 : index
    %c0_40 = arith.constant 0 : index
    %c0_41 = arith.constant 0 : index
    %c0_42 = arith.constant 0 : index
    %16 = vector.load %arg1[%c0_37, %c0_38, %c0_39, %c0_40, %c0_41, %c0_42] : memref<2x8x2x8x2x4xf32, #tpu.memory_space<vmem>>, vector<2x8x1x8x1x4xf32>
    %17 = vector.shape_cast %16 : vector<2x8x1x8x1x4xf32> to vector<2x8x8x4xf32>
    %c0_43 = arith.constant 0 : index
    %c0_44 = arith.constant 0 : index
    %c0_45 = arith.constant 0 : index
    %c0_46 = arith.constant 0 : index
    %c1 = arith.constant 1 : index
    %c0_47 = arith.constant 0 : index
    %18 = vector.load %arg1[%c0_43, %c0_44, %c0_45, %c0_46, %c1, %c0_47] : memref<2x8x2x8x2x4xf32, #tpu.memory_space<vmem>>, vector<2x8x1x8x1x4xf32>
    %19 = vector.shape_cast %18 : vector<2x8x1x8x1x4xf32> to vector<2x8x8x4xf32>
    %c0_48 = arith.constant 0 : index
    %c0_49 = arith.constant 0 : index
    %c1_50 = arith.constant 1 : index
    %c0_51 = arith.constant 0 : index
    %c0_52 = arith.constant 0 : index
    %c0_53 = arith.constant 0 : index
    %20 = vector.load %arg1[%c0_48, %c0_49, %c1_50, %c0_51, %c0_52, %c0_53] : memref<2x8x2x8x2x4xf32, #tpu.memory_space<vmem>>, vector<2x8x1x8x1x4xf32>
    %21 = vector.shape_cast %20 : vector<2x8x1x8x1x4xf32> to vector<2x8x8x4xf32>
    %c0_54 = arith.constant 0 : index
    %c0_55 = arith.constant 0 : index
    %c1_56 = arith.constant 1 : index
    %c0_57 = arith.constant 0 : index
    %c1_58 = arith.constant 1 : index
    %c0_59 = arith.constant 0 : index
    %22 = vector.load %arg1[%c0_54, %c0_55, %c1_56, %c0_57, %c1_58, %c0_59] : memref<2x8x2x8x2x4xf32, #tpu.memory_space<vmem>>, vector<2x8x1x8x1x4xf32>
    %23 = vector.shape_cast %22 : vector<2x8x1x8x1x4xf32> to vector<2x8x8x4xf32>
    %24 = arith.maximumf %17, %19 : vector<2x8x8x4xf32>
    %25 = arith.maximumf %21, %23 : vector<2x8x8x4xf32>
    %26 = arith.maximumf %24, %25 : vector<2x8x8x4xf32>
    %27 = arith.truncf %26 : vector<2x8x8x4xf32> to vector<2x8x8x4xbf16>
    %c0_60 = arith.constant 0 : index
    %c1_61 = arith.constant 1 : index
    %c1_62 = arith.constant 1 : index
    %c0_63 = arith.constant 0 : index
    %28 = vector.load %arg9[%c0_60, %c1_61, %c1_62, %c0_63] : memref<2x10x10x4xbf16, #tpu.memory_space<vmem>>, vector<2x8x8x4xbf16>
    tpu.vector_store %arg9[%c0_60, %c1_61, %c1_62, %c0_63], %27 {strides = array<i32>} : memref<2x10x10x4xbf16, #tpu.memory_space<vmem>>, vector<2x8x8x4xbf16>,
    %c0_64 = arith.constant 0 : index
    %c0_65 = arith.constant 0 : index
    %29 = vector.load %arg3[%c0_64, %c0_65] : memref<1x8xf32, #tpu.memory_space<vmem>>, vector<1x8xf32>
    %c0_66 = arith.constant 0 : index
    %c0_67 = arith.constant 0 : index
    %30 = vector.load %arg4[%c0_66, %c0_67] : memref<1x8xf32, #tpu.memory_space<vmem>>, vector<1x8xf32>
    %c0_68 = arith.constant 0 : index
    %c0_69 = arith.constant 0 : index
    %c0_70 = arith.constant 0 : index
    %c0_71 = arith.constant 0 : index
    %31 = vector.load %arg9[%c0_68, %c0_69, %c0_70, %c0_71] : memref<2x10x10x4xbf16, #tpu.memory_space<vmem>>, vector<2x8x8x4xbf16>
    %c0_72 = arith.constant 0 : index
    %c0_73 = arith.constant 0 : index
    %c0_74 = arith.constant 0 : index
    %c0_75 = arith.constant 0 : index
    %32 = vector.load %arg11[%c0_72, %c0_73, %c0_74, %c0_75] : memref<2x8x8x36xbf16, #tpu.memory_space<vmem>>, vector<2x8x8x4xbf16>
    tpu.vector_store %arg11[%c0_72, %c0_73, %c0_74, %c0_75], %31 {strides = array<i32>} : memref<2x8x8x36xbf16, #tpu.memory_space<vmem>>, vector<2x8x8x4xbf16>,
    %c0_76 = arith.constant 0 : index
    %c0_77 = arith.constant 0 : index
    %c1_78 = arith.constant 1 : index
    %c0_79 = arith.constant 0 : index
    %33 = vector.load %arg9[%c0_76, %c0_77, %c1_78, %c0_79] : memref<2x10x10x4xbf16, #tpu.memory_space<vmem>>, vector<2x8x8x4xbf16>
    %c0_80 = arith.constant 0 : index
    %c0_81 = arith.constant 0 : index
    %c0_82 = arith.constant 0 : index
    %c4 = arith.constant 4 : index
    %34 = vector.load %arg11[%c0_80, %c0_81, %c0_82, %c4] : memref<2x8x8x36xbf16, #tpu.memory_space<vmem>>, vector<2x8x8x4xbf16>
    tpu.vector_store %arg11[%c0_80, %c0_81, %c0_82, %c4], %33 {strides = array<i32>} : memref<2x8x8x36xbf16, #tpu.memory_space<vmem>>, vector<2x8x8x4xbf16>,
    %c0_83 = arith.constant 0 : index
    %c0_84 = arith.constant 0 : index
    %c2 = arith.constant 2 : index
    %c0_85 = arith.constant 0 : index
    %35 = vector.load %arg9[%c0_83, %c0_84, %c2, %c0_85] : memref<2x10x10x4xbf16, #tpu.memory_space<vmem>>, vector<2x8x8x4xbf16>
    %c0_86 = arith.constant 0 : index
    %c0_87 = arith.constant 0 : index
    %c0_88 = arith.constant 0 : index
    %c8 = arith.constant 8 : index
    %36 = vector.load %arg11[%c0_86, %c0_87, %c0_88, %c8] : memref<2x8x8x36xbf16, #tpu.memory_space<vmem>>, vector<2x8x8x4xbf16>
    tpu.vector_store %arg11[%c0_86, %c0_87, %c0_88, %c8], %35 {strides = array<i32>} : memref<2x8x8x36xbf16, #tpu.memory_space<vmem>>, vector<2x8x8x4xbf16>,
    %c0_89 = arith.constant 0 : index
    %c1_90 = arith.constant 1 : index
    %c0_91 = arith.constant 0 : index
    %c0_92 = arith.constant 0 : index
    %37 = vector.load %arg9[%c0_89, %c1_90, %c0_91, %c0_92] : memref<2x10x10x4xbf16, #tpu.memory_space<vmem>>, vector<2x8x8x4xbf16>
    %c0_93 = arith.constant 0 : index
    %c0_94 = arith.constant 0 : index
    %c0_95 = arith.constant 0 : index
    %c12 = arith.constant 12 : index
    %38 = vector.load %arg11[%c0_93, %c0_94, %c0_95, %c12] : memref<2x8x8x36xbf16, #tpu.memory_space<vmem>>, vector<2x8x8x4xbf16>
    tpu.vector_store %arg11[%c0_93, %c0_94, %c0_95, %c12], %37 {strides = array<i32>} : memref<2x8x8x36xbf16, #tpu.memory_space<vmem>>, vector<2x8x8x4xbf16>,
    %c0_96 = arith.constant 0 : index
    %c1_97 = arith.constant 1 : index
    %c1_98 = arith.constant 1 : index
    %c0_99 = arith.constant 0 : index
    %39 = vector.load %arg9[%c0_96, %c1_97, %c1_98, %c0_99] : memref<2x10x10x4xbf16, #tpu.memory_space<vmem>>, vector<2x8x8x4xbf16>
    %c0_100 = arith.constant 0 : index
    %c0_101 = arith.constant 0 : index
    %c0_102 = arith.constant 0 : index
    %c16 = arith.constant 16 : index
    %40 = vector.load %arg11[%c0_100, %c0_101, %c0_102, %c16] : memref<2x8x8x36xbf16, #tpu.memory_space<vmem>>, vector<2x8x8x4xbf16>
    tpu.vector_store %arg11[%c0_100, %c0_101, %c0_102, %c16], %39 {strides = array<i32>} : memref<2x8x8x36xbf16, #tpu.memory_space<vmem>>, vector<2x8x8x4xbf16>,
    %c0_103 = arith.constant 0 : index
    %c1_104 = arith.constant 1 : index
    %c2_105 = arith.constant 2 : index
    %c0_106 = arith.constant 0 : index
    %41 = vector.load %arg9[%c0_103, %c1_104, %c2_105, %c0_106] : memref<2x10x10x4xbf16, #tpu.memory_space<vmem>>, vector<2x8x8x4xbf16>
    %c0_107 = arith.constant 0 : index
    %c0_108 = arith.constant 0 : index
    %c0_109 = arith.constant 0 : index
    %c20 = arith.constant 20 : index
    %42 = vector.load %arg11[%c0_107, %c0_108, %c0_109, %c20] : memref<2x8x8x36xbf16, #tpu.memory_space<vmem>>, vector<2x8x8x4xbf16>
    tpu.vector_store %arg11[%c0_107, %c0_108, %c0_109, %c20], %41 {strides = array<i32>} : memref<2x8x8x36xbf16, #tpu.memory_space<vmem>>, vector<2x8x8x4xbf16>,
    %c0_110 = arith.constant 0 : index
    %c2_111 = arith.constant 2 : index
    %c0_112 = arith.constant 0 : index
    %c0_113 = arith.constant 0 : index
    %43 = vector.load %arg9[%c0_110, %c2_111, %c0_112, %c0_113] : memref<2x10x10x4xbf16, #tpu.memory_space<vmem>>, vector<2x8x8x4xbf16>
    %c0_114 = arith.constant 0 : index
    %c0_115 = arith.constant 0 : index
    %c0_116 = arith.constant 0 : index
    %c24 = arith.constant 24 : index
    %44 = vector.load %arg11[%c0_114, %c0_115, %c0_116, %c24] : memref<2x8x8x36xbf16, #tpu.memory_space<vmem>>, vector<2x8x8x4xbf16>
    tpu.vector_store %arg11[%c0_114, %c0_115, %c0_116, %c24], %43 {strides = array<i32>} : memref<2x8x8x36xbf16, #tpu.memory_space<vmem>>, vector<2x8x8x4xbf16>,
    %c0_117 = arith.constant 0 : index
    %c2_118 = arith.constant 2 : index
    %c1_119 = arith.constant 1 : index
    %c0_120 = arith.constant 0 : index
    %45 = vector.load %arg9[%c0_117, %c2_118, %c1_119, %c0_120] : memref<2x10x10x4xbf16, #tpu.memory_space<vmem>>, vector<2x8x8x4xbf16>
    %c0_121 = arith.constant 0 : index
    %c0_122 = arith.constant 0 : index
    %c0_123 = arith.constant 0 : index
    %c28 = arith.constant 28 : index
    %46 = vector.load %arg11[%c0_121, %c0_122, %c0_123, %c28] : memref<2x8x8x36xbf16, #tpu.memory_space<vmem>>, vector<2x8x8x4xbf16>
    tpu.vector_store %arg11[%c0_121, %c0_122, %c0_123, %c28], %45 {strides = array<i32>} : memref<2x8x8x36xbf16, #tpu.memory_space<vmem>>, vector<2x8x8x4xbf16>,
    %c0_124 = arith.constant 0 : index
    %c2_125 = arith.constant 2 : index
    %c2_126 = arith.constant 2 : index
    %c0_127 = arith.constant 0 : index
    %47 = vector.load %arg9[%c0_124, %c2_125, %c2_126, %c0_127] : memref<2x10x10x4xbf16, #tpu.memory_space<vmem>>, vector<2x8x8x4xbf16>
    %c0_128 = arith.constant 0 : index
    %c0_129 = arith.constant 0 : index
    %c0_130 = arith.constant 0 : index
    %c32 = arith.constant 32 : index
    %48 = vector.load %arg11[%c0_128, %c0_129, %c0_130, %c32] : memref<2x8x8x36xbf16, #tpu.memory_space<vmem>>, vector<2x8x8x4xbf16>
    tpu.vector_store %arg11[%c0_128, %c0_129, %c0_130, %c32], %47 {strides = array<i32>} : memref<2x8x8x36xbf16, #tpu.memory_space<vmem>>, vector<2x8x8x4xbf16>,
    %c0_131 = arith.constant 0 : index
    %c0_132 = arith.constant 0 : index
    %c0_133 = arith.constant 0 : index
    %c0_134 = arith.constant 0 : index
    %49 = vector.load %arg11[%c0_131, %c0_132, %c0_133, %c0_134] : memref<2x8x8x36xbf16, #tpu.memory_space<vmem>>, vector<2x8x8x36xbf16>
    %50 = vector.shape_cast %49 : vector<2x8x8x36xbf16> to vector<128x36xbf16>
    %c0_135 = arith.constant 0 : index
    %c0_136 = arith.constant 0 : index
    %51 = vector.load %arg2[%c0_135, %c0_136] : memref<36x8xbf16, #tpu.memory_space<vmem>>, vector<36x8xbf16>
    %cst_137 = arith.constant dense<0.000000e+00> : vector<128x8xf32>
    %52 = tpu.matmul %50, %51, %cst_137 {dimension_numbers = #tpu.dot_dimension_numbers<[1], [0], [0], [1], [0, 0, 1, 1], [], []>} : vector<128x36xbf16>, vector<36x8xbf16>, vector<128x8xf32> -> vector<128x8xf32>
    %53 = vector.broadcast %29 : vector<1x8xf32> to vector<128x8xf32>
    %54 = arith.mulf %52, %53 : vector<128x8xf32>
    %55 = vector.broadcast %30 : vector<1x8xf32> to vector<128x8xf32>
    %56 = arith.addf %54, %55 : vector<128x8xf32>
    %cst_138 = arith.constant 0.000000e+00 : f32
    %57 = vector.broadcast %cst_138 : f32 to vector<128x8xf32>
    %58 = arith.maximumf %56, %57 : vector<128x8xf32>
    %59 = vector.shape_cast %58 : vector<128x8xf32> to vector<2x8x8x8xf32>
    %60 = arith.truncf %59 : vector<2x8x8x8xf32> to vector<2x8x8x8xbf16>
    %c0_139 = arith.constant 0 : index
    %c1_140 = arith.constant 1 : index
    %c1_141 = arith.constant 1 : index
    %c0_142 = arith.constant 0 : index
    %61 = vector.load %arg10[%c0_139, %c1_140, %c1_141, %c0_142] : memref<2x10x10x8xbf16, #tpu.memory_space<vmem>>, vector<2x8x8x8xbf16>
    tpu.vector_store %arg10[%c0_139, %c1_140, %c1_141, %c0_142], %60 {strides = array<i32>} : memref<2x10x10x8xbf16, #tpu.memory_space<vmem>>, vector<2x8x8x8xbf16>,
    %c0_143 = arith.constant 0 : index
    %c0_144 = arith.constant 0 : index
    %62 = vector.load %arg6[%c0_143, %c0_144] : memref<1x8xf32, #tpu.memory_space<vmem>>, vector<1x8xf32>
    %c0_145 = arith.constant 0 : index
    %c0_146 = arith.constant 0 : index
    %63 = vector.load %arg7[%c0_145, %c0_146] : memref<1x8xf32, #tpu.memory_space<vmem>>, vector<1x8xf32>
    %c0_147 = arith.constant 0 : index
    %c0_148 = arith.constant 0 : index
    %c0_149 = arith.constant 0 : index
    %c0_150 = arith.constant 0 : index
    %64 = vector.load %arg10[%c0_147, %c0_148, %c0_149, %c0_150] : memref<2x10x10x8xbf16, #tpu.memory_space<vmem>>, vector<2x8x8x8xbf16>
    %c0_151 = arith.constant 0 : index
    %c0_152 = arith.constant 0 : index
    %c0_153 = arith.constant 0 : index
    %c0_154 = arith.constant 0 : index
    %65 = vector.load %arg12[%c0_151, %c0_152, %c0_153, %c0_154] : memref<2x8x8x72xbf16, #tpu.memory_space<vmem>>, vector<2x8x8x8xbf16>
    tpu.vector_store %arg12[%c0_151, %c0_152, %c0_153, %c0_154], %64 {strides = array<i32>} : memref<2x8x8x72xbf16, #tpu.memory_space<vmem>>, vector<2x8x8x8xbf16>,
    %c0_155 = arith.constant 0 : index
    %c0_156 = arith.constant 0 : index
    %c1_157 = arith.constant 1 : index
    %c0_158 = arith.constant 0 : index
    %66 = vector.load %arg10[%c0_155, %c0_156, %c1_157, %c0_158] : memref<2x10x10x8xbf16, #tpu.memory_space<vmem>>, vector<2x8x8x8xbf16>
    %c0_159 = arith.constant 0 : index
    %c0_160 = arith.constant 0 : index
    %c0_161 = arith.constant 0 : index
    %c8_162 = arith.constant 8 : index
    %67 = vector.load %arg12[%c0_159, %c0_160, %c0_161, %c8_162] : memref<2x8x8x72xbf16, #tpu.memory_space<vmem>>, vector<2x8x8x8xbf16>
    tpu.vector_store %arg12[%c0_159, %c0_160, %c0_161, %c8_162], %66 {strides = array<i32>} : memref<2x8x8x72xbf16, #tpu.memory_space<vmem>>, vector<2x8x8x8xbf16>,
    %c0_163 = arith.constant 0 : index
    %c0_164 = arith.constant 0 : index
    %c2_165 = arith.constant 2 : index
    %c0_166 = arith.constant 0 : index
    %68 = vector.load %arg10[%c0_163, %c0_164, %c2_165, %c0_166] : memref<2x10x10x8xbf16, #tpu.memory_space<vmem>>, vector<2x8x8x8xbf16>
    %c0_167 = arith.constant 0 : index
    %c0_168 = arith.constant 0 : index
    %c0_169 = arith.constant 0 : index
    %c16_170 = arith.constant 16 : index
    %69 = vector.load %arg12[%c0_167, %c0_168, %c0_169, %c16_170] : memref<2x8x8x72xbf16, #tpu.memory_space<vmem>>, vector<2x8x8x8xbf16>
    tpu.vector_store %arg12[%c0_167, %c0_168, %c0_169, %c16_170], %68 {strides = array<i32>} : memref<2x8x8x72xbf16, #tpu.memory_space<vmem>>, vector<2x8x8x8xbf16>,
    %c0_171 = arith.constant 0 : index
    %c1_172 = arith.constant 1 : index
    %c0_173 = arith.constant 0 : index
    %c0_174 = arith.constant 0 : index
    %70 = vector.load %arg10[%c0_171, %c1_172, %c0_173, %c0_174] : memref<2x10x10x8xbf16, #tpu.memory_space<vmem>>, vector<2x8x8x8xbf16>
    %c0_175 = arith.constant 0 : index
    %c0_176 = arith.constant 0 : index
    %c0_177 = arith.constant 0 : index
    %c24_178 = arith.constant 24 : index
    %71 = vector.load %arg12[%c0_175, %c0_176, %c0_177, %c24_178] : memref<2x8x8x72xbf16, #tpu.memory_space<vmem>>, vector<2x8x8x8xbf16>
    tpu.vector_store %arg12[%c0_175, %c0_176, %c0_177, %c24_178], %70 {strides = array<i32>} : memref<2x8x8x72xbf16, #tpu.memory_space<vmem>>, vector<2x8x8x8xbf16>,
    %c0_179 = arith.constant 0 : index
    %c1_180 = arith.constant 1 : index
    %c1_181 = arith.constant 1 : index
    %c0_182 = arith.constant 0 : index
    %72 = vector.load %arg10[%c0_179, %c1_180, %c1_181, %c0_182] : memref<2x10x10x8xbf16, #tpu.memory_space<vmem>>, vector<2x8x8x8xbf16>
    %c0_183 = arith.constant 0 : index
    %c0_184 = arith.constant 0 : index
    %c0_185 = arith.constant 0 : index
    %c32_186 = arith.constant 32 : index
    %73 = vector.load %arg12[%c0_183, %c0_184, %c0_185, %c32_186] : memref<2x8x8x72xbf16, #tpu.memory_space<vmem>>, vector<2x8x8x8xbf16>
    tpu.vector_store %arg12[%c0_183, %c0_184, %c0_185, %c32_186], %72 {strides = array<i32>} : memref<2x8x8x72xbf16, #tpu.memory_space<vmem>>, vector<2x8x8x8xbf16>,
    %c0_187 = arith.constant 0 : index
    %c1_188 = arith.constant 1 : index
    %c2_189 = arith.constant 2 : index
    %c0_190 = arith.constant 0 : index
    %74 = vector.load %arg10[%c0_187, %c1_188, %c2_189, %c0_190] : memref<2x10x10x8xbf16, #tpu.memory_space<vmem>>, vector<2x8x8x8xbf16>
    %c0_191 = arith.constant 0 : index
    %c0_192 = arith.constant 0 : index
    %c0_193 = arith.constant 0 : index
    %c40 = arith.constant 40 : index
    %75 = vector.load %arg12[%c0_191, %c0_192, %c0_193, %c40] : memref<2x8x8x72xbf16, #tpu.memory_space<vmem>>, vector<2x8x8x8xbf16>
    tpu.vector_store %arg12[%c0_191, %c0_192, %c0_193, %c40], %74 {strides = array<i32>} : memref<2x8x8x72xbf16, #tpu.memory_space<vmem>>, vector<2x8x8x8xbf16>,
    %c0_194 = arith.constant 0 : index
    %c2_195 = arith.constant 2 : index
    %c0_196 = arith.constant 0 : index
    %c0_197 = arith.constant 0 : index
    %76 = vector.load %arg10[%c0_194, %c2_195, %c0_196, %c0_197] : memref<2x10x10x8xbf16, #tpu.memory_space<vmem>>, vector<2x8x8x8xbf16>
    %c0_198 = arith.constant 0 : index
    %c0_199 = arith.constant 0 : index
    %c0_200 = arith.constant 0 : index
    %c48 = arith.constant 48 : index
    %77 = vector.load %arg12[%c0_198, %c0_199, %c0_200, %c48] : memref<2x8x8x72xbf16, #tpu.memory_space<vmem>>, vector<2x8x8x8xbf16>
    tpu.vector_store %arg12[%c0_198, %c0_199, %c0_200, %c48], %76 {strides = array<i32>} : memref<2x8x8x72xbf16, #tpu.memory_space<vmem>>, vector<2x8x8x8xbf16>,
    %c0_201 = arith.constant 0 : index
    %c2_202 = arith.constant 2 : index
    %c1_203 = arith.constant 1 : index
    %c0_204 = arith.constant 0 : index
    %78 = vector.load %arg10[%c0_201, %c2_202, %c1_203, %c0_204] : memref<2x10x10x8xbf16, #tpu.memory_space<vmem>>, vector<2x8x8x8xbf16>
    %c0_205 = arith.constant 0 : index
    %c0_206 = arith.constant 0 : index
    %c0_207 = arith.constant 0 : index
    %c56 = arith.constant 56 : index
    %79 = vector.load %arg12[%c0_205, %c0_206, %c0_207, %c56] : memref<2x8x8x72xbf16, #tpu.memory_space<vmem>>, vector<2x8x8x8xbf16>
    tpu.vector_store %arg12[%c0_205, %c0_206, %c0_207, %c56], %78 {strides = array<i32>} : memref<2x8x8x72xbf16, #tpu.memory_space<vmem>>, vector<2x8x8x8xbf16>,
    %c0_208 = arith.constant 0 : index
    %c2_209 = arith.constant 2 : index
    %c2_210 = arith.constant 2 : index
    %c0_211 = arith.constant 0 : index
    %80 = vector.load %arg10[%c0_208, %c2_209, %c2_210, %c0_211] : memref<2x10x10x8xbf16, #tpu.memory_space<vmem>>, vector<2x8x8x8xbf16>
    %c0_212 = arith.constant 0 : index
    %c0_213 = arith.constant 0 : index
    %c0_214 = arith.constant 0 : index
    %c64 = arith.constant 64 : index
    %81 = vector.load %arg12[%c0_212, %c0_213, %c0_214, %c64] : memref<2x8x8x72xbf16, #tpu.memory_space<vmem>>, vector<2x8x8x8xbf16>
    tpu.vector_store %arg12[%c0_212, %c0_213, %c0_214, %c64], %80 {strides = array<i32>} : memref<2x8x8x72xbf16, #tpu.memory_space<vmem>>, vector<2x8x8x8xbf16>,
    %c0_215 = arith.constant 0 : index
    %c0_216 = arith.constant 0 : index
    %c0_217 = arith.constant 0 : index
    %c0_218 = arith.constant 0 : index
    %82 = vector.load %arg12[%c0_215, %c0_216, %c0_217, %c0_218] : memref<2x8x8x72xbf16, #tpu.memory_space<vmem>>, vector<2x8x8x72xbf16>
    %83 = vector.shape_cast %82 : vector<2x8x8x72xbf16> to vector<128x72xbf16>
    %c0_219 = arith.constant 0 : index
    %c0_220 = arith.constant 0 : index
    %84 = vector.load %arg5[%c0_219, %c0_220] : memref<72x8xbf16, #tpu.memory_space<vmem>>, vector<72x8xbf16>
    %cst_221 = arith.constant dense<0.000000e+00> : vector<128x8xf32>
    %85 = tpu.matmul %83, %84, %cst_221 {dimension_numbers = #tpu.dot_dimension_numbers<[1], [0], [0], [1], [0, 0, 1, 1], [], []>} : vector<128x72xbf16>, vector<72x8xbf16>, vector<128x8xf32> -> vector<128x8xf32>
    %86 = vector.broadcast %62 : vector<1x8xf32> to vector<128x8xf32>
    %87 = arith.mulf %85, %86 : vector<128x8xf32>
    %88 = vector.broadcast %63 : vector<1x8xf32> to vector<128x8xf32>
    %89 = arith.addf %87, %88 : vector<128x8xf32>
    %cst_222 = arith.constant 0.000000e+00 : f32
    %90 = vector.broadcast %cst_222 : f32 to vector<128x8xf32>
    %91 = arith.maximumf %89, %90 : vector<128x8xf32>
    %92 = vector.shape_cast %91 : vector<128x8xf32> to vector<2x64x8xf32>
    %c0_223 = arith.constant 0 : index
    %c0_224 = arith.constant 0 : index
    %c0_225 = arith.constant 0 : index
    %93 = vector.load %arg8[%c0_223, %c0_224, %c0_225] : memref<2x64x8xf32, #tpu.memory_space<vmem>>, vector<2x64x8xf32>
    tpu.vector_store %arg8[%c0_223, %c0_224, %c0_225], %92 {strides = array<i32>} : memref<2x64x8xf32, #tpu.memory_space<vmem>>, vector<2x64x8xf32>,
    return
  }
  func.func @transform_0(%arg0: i32) -> (i32, i32, i32, i32, i32, i32) {
    %c0_i32 = arith.constant 0 : i32
    %c0_i32_0 = arith.constant 0 : i32
    %c0_i32_1 = arith.constant 0 : i32
    %c0_i32_2 = arith.constant 0 : i32
    %c0_i32_3 = arith.constant 0 : i32
    %c0_i32_4 = arith.constant 0 : i32
    return %arg0, %c0_i32, %c0_i32_0, %c0_i32_1, %c0_i32_2, %c0_i32_3 : i32, i32, i32, i32, i32, i32
  }
  func.func @transform_1(%arg0: i32) -> (i32, i32) {
    %c0_i32 = arith.constant 0 : i32
    %c0_i32_0 = arith.constant 0 : i32
    %c0_i32_1 = arith.constant 0 : i32
    return %c0_i32, %c0_i32_0 : i32, i32
  }
  func.func @transform_2(%arg0: i32) -> (i32, i32) {
    %c0_i32 = arith.constant 0 : i32
    %c0_i32_0 = arith.constant 0 : i32
    %c0_i32_1 = arith.constant 0 : i32
    return %c0_i32, %c0_i32_0 : i32, i32
  }
  func.func @transform_3(%arg0: i32) -> (i32, i32) {
    %c0_i32 = arith.constant 0 : i32
    %c0_i32_0 = arith.constant 0 : i32
    %c0_i32_1 = arith.constant 0 : i32
    return %c0_i32, %c0_i32_0 : i32, i32
  }
  func.func @transform_4(%arg0: i32) -> (i32, i32) {
    %c0_i32 = arith.constant 0 : i32
    %c0_i32_0 = arith.constant 0 : i32
    %c0_i32_1 = arith.constant 0 : i32
    return %c0_i32, %c0_i32_0 : i32, i32
  }
  func.func @transform_5(%arg0: i32) -> (i32, i32) {
    %c0_i32 = arith.constant 0 : i32
    %c0_i32_0 = arith.constant 0 : i32
    %c0_i32_1 = arith.constant 0 : i32
    return %c0_i32, %c0_i32_0 : i32, i32
  }
  func.func @transform_6(%arg0: i32) -> (i32, i32) {
    %c0_i32 = arith.constant 0 : i32
    %c0_i32_0 = arith.constant 0 : i32
    %c0_i32_1 = arith.constant 0 : i32
    return %c0_i32, %c0_i32_0 : i32, i32
  }
  func.func @transform_7(%arg0: i32) -> (i32, i32, i32) {
    %c0_i32 = arith.constant 0 : i32
    %c0_i32_0 = arith.constant 0 : i32
    %c0_i32_1 = arith.constant 0 : i32
    return %arg0, %c0_i32, %c0_i32_0 : i32, i32, i32
  }
}

</mosaic_0001>

<bundles_post_ra>
// kernel: down_forward.1
= control target key start
LH: loop header
LB: loop body
LE: loop exit
PB: predicated region body
PF: predicated region fallthrough
CT: control target
= control target key end

     0   :  { %vm27_vm0 = vcmask 27648   ;;  %vm29_vm1 = vcmask 24576   ;;  %vm11987_vm2 = vsmask.f32 256  ;;  %v11985_v0 = vmov 0   ;;  %s7473_s11 = smov 8   ;;  %s11975_s0 = inlined_call_operand.vmem [shape: f32[2,8,2,8,2,4], index: 0, kind: input, shape index: {}]   ;;  %s11976_s1 = inlined_call_operand.vmem [shape: bf16[36,8], index: 1, kind: input, shape index: {}]   ;;  %s11977_s2 = inlined_call_operand.vmem [shape: f32[1,8], index: 2, kind: input, shape index: {}]   ;;  %s11978_s3 = inlined_call_operand.vmem [shape: f32[1,8], index: 3, kind: input, shape index: {}]   ;;  %s11979_s4 = inlined_call_operand.vmem [shape: bf16[72,8], index: 4, kind: input, shape index: {}]   ;;  %s11980_s5 = inlined_call_operand.vmem [shape: f32[1,8], index: 5, kind: input, shape index: {}]   ;;  %s11981_s6 = inlined_call_operand.vmem [shape: f32[1,8], index: 6, kind: input, shape index: {}]   ;;  %s11982_s7 = inlined_call_operand.vmem [shape: f32[2,64,8], index: 7, kind: output, shape index: {}]  }
   0x1   :  { %28 = vst.msk [vmem:[#allocation2] sm:$0xf] %vm27_vm0, %v11985_v0  ;;  %vm11983_vm3 = vcmask 60416   ;;  %31 = vst.msk [vmem:[#allocation2 + $0x50] sm:$0xf] %vm27_vm0, %v11985_v0  ;;  %vm2633_vm7 = vcmask 1042432  }
   0x2   :  { %30 = vst.msk [vmem:[#allocation2 + $0x4] sm:$0x1] %vm29_vm1, %v11985_v0  ;;  %32 = vst.msk [vmem:[#allocation2 + $0x54] sm:$0x1] %vm29_vm1, %v11985_v0  ;;  %v47_v2 = vld [vmem:[#allocation2 + $0x10] sm:$0x1] }
   0x3   :  { %34 = vst.msk [vmem:[#allocation2 + $0x48] sm:$0xf] %vm27_vm0, %v11985_v0  ;;  %36 = vst.msk [vmem:[#allocation2 + $0x98] sm:$0xf] %vm27_vm0, %v11985_v0  ;;  %vm11984_vm5 = vsmask.f32 7938 }
   0x4   :  { %35 = vst.msk [vmem:[#allocation2 + $0x4c] sm:$0x1] %vm29_vm1, %v11985_v0  ;;  %37 = vst.msk [vmem:[#allocation2 + $0x9c] sm:$0x1] %vm29_vm1, %v11985_v0  ;;  %v305_v5 = vld [vmem:[%s11975_s0 + $0x20] sm:$0x1] }
   0x5   :  { %vm7543_vm4 = vmand %vm29_vm1, %vm11987_vm2  ;;  %164 = vst.msk [vmem:[#allocation3] sm:$0xf] %vm11983_vm3, %v11985_v0  ;;  %v306_v6 = vld [vmem:[%s11975_s0 + $0x22] sm:$0x1]  ;;  %v307_v7 = vld [vmem:[%s11975_s0 + $0x24] sm:$0x1] }
   0x6   :  { %167 = vst.msk [vmem:[#allocation3 + $0x50] sm:$0xf] %vm11983_vm3, %v11985_v0  ;;  %170 = vst.msk [vmem:[#allocation3 + $0x48] sm:$0xf] %vm11983_vm3, %v11985_v0  ;;  %v48_v3 = vsel %vm7543_vm4, 0, %v47_v2  ;;  %vm2634_vm8 = vcmask 1046532  }
   0x7   :  { %172 = vst.msk [vmem:[#allocation3 + $0x98] sm:$0xf] %vm11983_vm3, %v11985_v0  ;;  %49 = vst [vmem:[#allocation2 + $0x10] sm:$0x1] %v48_v3  ;;  %v433_v8 = vld [vmem:[%s11975_s0 + $0x21] sm:$0x1] }
   0x8   :  { %vm7559_vm6 = vmand %vm29_vm1, %vm11984_vm5  ;;  %v434_v9 = vld [vmem:[%s11975_s0 + $0x23] sm:$0x1]  ;;  %v435_v10 = vld [vmem:[%s11975_s0 + $0x25] sm:$0x1]  ;;  %vm2277_vm9 = vsmask.f32 3328  ;;  %v818_v32 = vmax.f32 %v305_v5, %v433_v8 }
   0x9   :  { %v103_v11 = vld [vmem:[#allocation2 + $0x4] sm:$0x1]  ;;  %v7581_v12 = vld [vmem:[#allocation2] sm:$0xe]  ;;  %v41_v13 = vld [vmem:[#allocation2] sm:$0x1]  ;;  %v819_v33 = vmax.f32 %v306_v6, %v434_v9  ;;  %v820_v34 = vmax.f32 %v307_v7, %v435_v10 }
   0xa   :  { %v308_v14 = vld [vmem:[%s11975_s0 + $0x26] sm:$0x1]  ;;  %v309_v15 = vld [vmem:[%s11975_s0 + $0x28] sm:$0x1]  ;;  %v310_v16 = vld [vmem:[%s11975_s0 + $0x2a] sm:$0x1] }
   0xb   :  { %v436_v17 = vld [vmem:[%s11975_s0 + $0x27] sm:$0x1]  ;;  %v104_v18 = vsel %vm7559_vm6, 0, %v103_v11  ;;  %v7043_v19 = vrot.slane %v7581_v12, 9  ;;  %v42_v20 = vsel %vm7543_vm4, 0, %v41_v13  ;;  %vm1836_vm11 = vcmask 1042434   ;;  %vm7656_vm12 = vmor %vm2633_vm7, %vm2634_vm8 }
   0xc   :  { %vm2278_vm10 = vsmask.f32 7440  ;;  %v437_v21 = vld [vmem:[%s11975_s0 + $0x29] sm:$0x1]  ;;  %105 = vst [vmem:[#allocation2 + $0x4] sm:$0x1] %v104_v18  ;;  %v821_v38 = vmax.f32 %v308_v14, %v436_v17 }
   0xd   :  { %43 = vst [vmem:[#allocation2] sm:$0x1] %v42_v20  ;;  %v311_v22 = vld [vmem:[%s11975_s0 + $0x2c] sm:$0x1]  ;;  %v438_v23 = vld [vmem:[%s11975_s0 + $0x2b] sm:$0x1]  ;;  %v822_v39 = vmax.f32 %v309_v15, %v437_v21  ;;  %vm7664_vm7 = vmor %vm2277_vm9, %vm2278_vm10 }
   0xe   :  { %v439_v24 = vld [vmem:[%s11975_s0 + $0x2d] sm:$0x1]  ;;  %v6651_v25 = vld [vmem:[%s11975_s0 + $0x30] sm:$0x1]  ;;  %v6652_v26 = vld [vmem:[%s11975_s0 + $0x32] sm:$0x1]  ;;  %v823_v40 = vmax.f32 %v310_v16, %v438_v23 }
   0xf   :  { %v6653_v27 = vld [vmem:[%s11975_s0 + $0x34] sm:$0x1]  ;;  %v6654_v28 = vld [vmem:[%s11975_s0 + $0x36] sm:$0x1]  ;;  %v6655_v29 = vld [vmem:[%s11975_s0 + $0x38] sm:$0x1]  ;;  %v824_v48 = vmax.f32 %v311_v22, %v439_v24 }
  0x10   :  { %v6656_v30 = vld [vmem:[%s11975_s0 + $0x3a] sm:$0x1]  ;;  %v6657_v31 = vld [vmem:[%s11975_s0 + $0x3c] sm:$0x1]  ;;  %v6779_v35 = vld [vmem:[%s11975_s0 + $0x31] sm:$0x1] }
  0x11   :  { %v6780_v36 = vld [vmem:[%s11975_s0 + $0x33] sm:$0x1]  ;;  %v6781_v37 = vld [vmem:[%s11975_s0 + $0x35] sm:$0x1]  ;;  %v6782_v41 = vld [vmem:[%s11975_s0 + $0x37] sm:$0x1]  ;;  %v946_v44 = vmax.f32 %v6651_v25, %v6779_v35 }
  0x12   :  { %v6783_v42 = vld [vmem:[%s11975_s0 + $0x39] sm:$0x1]  ;;  %v6784_v43 = vld [vmem:[%s11975_s0 + $0x3b] sm:$0x1]  ;;  %v947_v45 = vmax.f32 %v6652_v26, %v6780_v36  ;;  %v948_v46 = vmax.f32 %v6653_v27, %v6781_v37  ;;  %v6785_v47 = vld [vmem:[%s11975_s0 + $0x3d] sm:$0x1]  ;;  %v949_v49 = vmax.f32 %v6654_v28, %v6782_v41 }
  0x13   :  { %v950_v50 = vmax.f32 %v6655_v29, %v6783_v42  ;;  %v951_v51 = vmax.f32 %v6656_v30, %v6784_v43  ;;  %v952_v53 = vmax.f32 %v6657_v31, %v6785_v47  ;;  %v1074_v54 = vmax.f32 %v818_v32, %v946_v44  ;;  %v2570_v57 = vld [vmem:[#allocation2 + $0x4] sm:$0x1]  ;;  %v44_v20 = vld [vmem:[#allocation2 + $0x8] sm:$0x1]  ;;  %v7677_v21 = vld [vmem:[%s11975_s0 + $0x1] sm:$0x1] }
  0x14   :  { %v1075_v55 = vmax.f32 %v819_v33, %v947_v45  ;;  %v1076_v56 = vmax.f32 %v820_v34, %v948_v46  ;;  %vm11993_vm13 = vcmask 1043459   ;;  %v2245_v58 = vld [vmem:[#allocation2] sm:$0xf]  ;;  %v2246_v59 = vld [vmem:[#allocation2 + $0x4] sm:$0x1]  ;;  %v1077_v60 = vmax.f32 %v821_v38, %v949_v49  ;;  %s7474_s9 = smov 4   ;;  %vm7789_vm9 = vmand %vm27_vm0, %vm11984_vm5 }
  0x15   :  { %v1078_v61 = vmax.f32 %v822_v39, %v950_v50  ;;  %v1079_v62 = vmax.f32 %v823_v40, %v951_v51  ;;  %vm11989_vm14 = vcmask 1044484   ;;  %v2638_v63 = vrot.slane %v2570_v57, 5  ;;  %v7682_v26 = vld [vmem:[%s11975_s0 + $0x2] sm:$0x1]  ;;  %v7687_v27 = vld [vmem:[%s11975_s0 + $0x4] sm:$0x1] }
  0x16   :  { %v2281_v2 = vshrl.u32 %v2245_v58, 16  ;;  %v2284_v3 = vshll.u32 %v2245_v58, 16  ;;  %v2290_v5 = vshll.u32 %v2246_v59, 16  ;;  %vm1845_vm15 = vcmask 1045509   ;;  %v7692_v28 = vld [vmem:[%s11975_s0 + $0x6] sm:$0x1] }
  0x17   :  { %v1080_v6 = vmax.f32 %v824_v48, %v952_v53  ;;  %v7207_v7 = vpack.c.bf16 %v1074_v54, %v1074_v54  ;;  %v7208_v8 = vpack.c.bf16 %v1075_v55, %v1075_v55  ;;  %v7209_v9 = vpack.c.bf16 %v1076_v56, %v1076_v56  ;;  %v7697_v29 = vld [vmem:[%s11975_s0 + $0x3] sm:$0x1]  ;;  %v7702_v30 = vld [vmem:[%s11975_s0 + $0x5] sm:$0x1]  ;;  %v7707_v31 = vld [vmem:[%s11975_s0 + $0x7] sm:$0x1] }
  0x18   :  { %vm1848_vm1 = vcmask 1046534   ;;  %v2639_v10 = vsel %vm7656_vm12, %v7043_v19, %v2638_v63  ;;  %v2283_v12 = vrot.slane %v2281_v2, 4  ;;  %v2286_v13 = vrot.slane %v2284_v3, 5  ;;  %v7672_v19 = vld [vmem:[%s11975_s0] sm:$0x1]  ;;  %s7475_s18 = smov 12  }
  0x19   :  { %v2292_v14 = vrot.slane %v2290_v5, 5  ;;  %vm1851_vm8 = vcmask 1047559   ;;  %2700 = vrot.lane.b32.xlu0 %v2639_v10, %s7473_s11  ;;  %v7210_v15 = vpack.c.bf16 %v1077_v60, %v1077_v60  ;;  %v7211_v16 = vpack.c.bf16 %v1078_v61, %v1078_v61  ;;  %v301_v36 = vld [vmem:[%s11975_s0 + $0x8] sm:$0x1]  ;;  %v302_v37 = vld [vmem:[%s11975_s0 + $0xa] sm:$0x1] }
  0x1a   :  { %v7212_v17 = vpack.c.bf16 %v1079_v62, %v1079_v62  ;;  %v7213_v18 = vpack.c.bf16 %v1080_v6, %v1080_v6  ;;  %v2287_v22 = vor.u32 %v2286_v13, %v2283_v12  ;;  %v1714_v23 = vunpack.c.l.b16 %v7207_v7  ;;  %v303_v38 = vld [vmem:[%s11975_s0 + $0xc] sm:$0x1]  ;;  %v429_v39 = vld [vmem:[%s11975_s0 + $0x9] sm:$0x1]  ;;  %v430_v40 = vld [vmem:[%s11975_s0 + $0xb] sm:$0x1] }
  0x1b   :  { %v1715_v24 = vunpack.c.l.b16 %v7208_v8  ;;  %v1716_v25 = vunpack.c.l.b16 %v7209_v9  ;;  %v1717_v32 = vunpack.c.l.b16 %v7210_v15  ;;  %v1718_v33 = vunpack.c.l.b16 %v7211_v16  ;;  %v431_v41 = vld [vmem:[%s11975_s0 + $0xd] sm:$0x1]  ;;  %v6643_v46 = vld [vmem:[%s11975_s0 + $0x10] sm:$0x1]  ;;  %v6644_v47 = vld [vmem:[%s11975_s0 + $0x12] sm:$0x1] }
  0x1c   :  { %v1719_v34 = vunpack.c.l.b16 %v7212_v17  ;;  %v1720_v35 = vunpack.c.l.b16 %v7213_v18  ;;  %v2288_v42 = vrot.slane %v2287_v22, 4  ;;  %v1853_v43 = vrot.slane %v1714_v23, 7  ;;  %v6645_v48 = vld [vmem:[%s11975_s0 + $0x14] sm:$0x1]  ;;  %v6646_v54 = vld [vmem:[%s11975_s0 + $0x16] sm:$0x1] }
  0x1d   :  { %v1854_v44 = vrot.slane %v1715_v24, 6  ;;  %v1856_v45 = vrot.slane %v1716_v25, 5  ;;  %v1858_v49 = vrot.slane %v1717_v32, 4  ;;  %v1860_v50 = vrot.slane %v1718_v33, 3  ;;  %v6647_v55 = vld [vmem:[%s11975_s0 + $0x18] sm:$0x1] }
  0x1e   :  { %v1862_v51 = vrot.slane %v1719_v34, 2  ;;  %v1864_v53 = vrot.slane %v1720_v35, 1  ;;  %v2293_v56 = vsel %vm7664_vm7, %v2288_v42, %v2292_v14  ;;  %v45_v58 = vsel %vm7543_vm4, 0, %v44_v20  ;;  %v6648_v59 = vld [vmem:[%s11975_s0 + $0x1a] sm:$0x1]  ;;  %s7476_s14 = smov 20  }
  0x1f   :  { %v1855_v57 = vsel %vm1836_vm11, %v1854_v44, %v1853_v43  ;;  %v6649_v60 = vld [vmem:[%s11975_s0 + $0x1c] sm:$0x1]  ;;  %v810_v61 = vmax.f32 %v7672_v19, %v7677_v21  ;;  %2504 = vrot.lane.b32.xlu0 %v2293_v56, %s7474_s9  ;;  %46 = vst [vmem:[#allocation2 + $0x8] sm:$0x1] %v45_v58  ;;  %v6771_v63 = vld [vmem:[%s11975_s0 + $0x11] sm:$0x1]  ;;  %v811_v5 = vmax.f32 %v7682_v26, %v7697_v29 }
  0x20   :  { %v1857_v62 = vsel %vm11993_vm13, %v1856_v45, %v1855_v57  ;;  %v6772_v2 = vld [vmem:[%s11975_s0 + $0x13] sm:$0x1]  ;;  %v6773_v3 = vld [vmem:[%s11975_s0 + $0x15] sm:$0x1]  ;;  %v812_v6 = vmax.f32 %v7687_v27, %v7702_v30  ;;  %v813_v7 = vmax.f32 %v7692_v28, %v7707_v31  ;;  %v6774_v9 = vld [vmem:[%s11975_s0 + $0x17] sm:$0x1]  ;;  %v814_v13 = vmax.f32 %v301_v36, %v429_v39 }
  0x21   :  { %v1859_v8 = vsel %vm11989_vm14, %v1858_v49, %v1857_v62  ;;  %v6775_v10 = vld [vmem:[%s11975_s0 + $0x19] sm:$0x1]  ;;  %v6776_v12 = vld [vmem:[%s11975_s0 + $0x1b] sm:$0x1]  ;;  %v815_v14 = vmax.f32 %v302_v37, %v430_v40  ;;  %v816_v15 = vmax.f32 %v303_v38, %v431_v41  ;;  %v6777_v17 = vld [vmem:[%s11975_s0 + $0x1d] sm:$0x1]  ;;  %v938_v18 = vmax.f32 %v6643_v46, %v6771_v63 }
  0x22   :  { %v1861_v16 = vsel %vm1845_vm15, %v1860_v50, %v1859_v8  ;;  %v939_v20 = vmax.f32 %v6644_v47, %v6772_v2  ;;  %v940_v19 = vmax.f32 %v6645_v48, %v6773_v3  ;;  %v941_v22 = vmax.f32 %v6646_v54, %v6774_v9  ;;  %v2121_v27 = vld [vmem:[#allocation2 + $0x10] sm:$0xf]  ;;  %v53_v39 = vld [vmem:[#allocation2 + $0x20] sm:$0x1]  ;;  %v7804_v45 = vld [vmem:[%s11975_s0 + $0x62] sm:$0x1] }
  0x23   :  { %v1863_v21 = vsel %vm1848_vm1, %v1862_v51, %v1861_v16  ;;  %v942_v23 = vmax.f32 %v6647_v55, %v6775_v10  ;;  %v943_v24 = vmax.f32 %v6648_v59, %v6776_v12  ;;  %v944_v28 = vmax.f32 %v6649_v60, %v6777_v17  ;;  %v7797_v40 = vld [vmem:[%s11975_s0 + $0x60] sm:$0x1]  ;;  %v7809_v46 = vld [vmem:[%s11975_s0 + $0x61] sm:$0x1]  ;;  %v7814_v47 = vld [vmem:[%s11975_s0 + $0x63] sm:$0x1] }
  0x24   :  { %v1865_v26 = vsel %vm1851_vm8, %v1864_v53, %v1863_v21  ;;  %v1066_v29 = vmax.f32 %v810_v61, %v938_v18  ;;  %v1067_v30 = vmax.f32 %v811_v5, %v939_v20  ;;  %v1068_v32 = vmax.f32 %v812_v6, %v940_v19  ;;  %v7819_v53 = vld [vmem:[%s11975_s0 + $0x64] sm:$0x1]  ;;  %v7824_v54 = vld [vmem:[%s11975_s0 + $0x66] sm:$0x1]  ;;  %v7829_v55 = vld [vmem:[%s11975_s0 + $0x68] sm:$0x1] }
  0x25   :  { %v2050_v31 = vpack.c.b16 %v1865_v26, %v1865_v26  ;;  %v1069_v33 = vmax.f32 %v813_v7, %v941_v22  ;;  %v1070_v34 = vmax.f32 %v814_v13, %v942_v23  ;;  %v1071_v35 = vmax.f32 %v815_v14, %v943_v24  ;;  %v451_v56 = vld [vmem:[%s11975_s0 + $0x65] sm:$0x1]  ;;  %v7837_v57 = vld [vmem:[%s11975_s0 + $0x67] sm:$0x1]  ;;  %v7842_v58 = vld [vmem:[%s11975_s0 + $0x69] sm:$0x1] }
  0x26   :  { %v1072_v36 = vmax.f32 %v816_v15, %v944_v28  ;;  %v7199_v37 = vpack.c.bf16 %v1066_v29, %v1066_v29  ;;  %v7200_v38 = vpack.c.bf16 %v1067_v30, %v1067_v30  ;;  %v7201_v42 = vpack.c.bf16 %v1068_v32, %v1068_v32  ;;  %v326_v63 = vld [vmem:[%s11975_s0 + $0x6a] sm:$0x1]  ;;  %v327_v2 = vld [vmem:[%s11975_s0 + $0x6c] sm:$0x1]  ;;  %v454_v3 = vld [vmem:[%s11975_s0 + $0x6b] sm:$0x1] }
  0x27   :  { %v2122_v41 = vsel %vm7789_vm9, %v2050_v31, %v2121_v27  ;;  %v7202_v43 = vpack.c.bf16 %v1069_v33, %v1069_v33  ;;  %v7203_v44 = vpack.c.bf16 %v1070_v34, %v1070_v34  ;;  %v7204_v48 = vpack.c.bf16 %v1071_v35, %v1071_v35  ;;  %v455_v5 = vld [vmem:[%s11975_s0 + $0x6d] sm:$0x1]  ;;  %v6667_v6 = vld [vmem:[%s11975_s0 + $0x70] sm:$0x1]  ;;  %v6668_v12 = vld [vmem:[%s11975_s0 + $0x72] sm:$0x1] }
  0x28   :  { %2123 = vst [vmem:[#allocation2 + $0x10] sm:$0xf] %v2122_v41  ;;  %v7205_v49 = vpack.c.bf16 %v1072_v36, %v1072_v36  ;;  %v1706_v50 = vunpack.c.l.b16 %v7199_v37  ;;  %v1707_v51 = vunpack.c.l.b16 %v7200_v38  ;;  %v1708_v59 = vunpack.c.l.b16 %v7201_v42  ;;  %v6669_v13 = vld [vmem:[%s11975_s0 + $0x74] sm:$0x1]  ;;  %v6670_v14 = vld [vmem:[%s11975_s0 + $0x76] sm:$0x1] }
  0x29   :  { %v1709_v60 = vunpack.c.l.b16 %v7202_v43  ;;  %v1710_v61 = vunpack.c.l.b16 %v7203_v44  ;;  %v54_v62 = vsel %vm7543_vm4, 0, %v53_v39  ;;  %v1711_v7 = vunpack.c.l.b16 %v7204_v48  ;;  %v6795_v15 = vld [vmem:[%s11975_s0 + $0x71] sm:$0x1]  ;;  %v6671_v20 = vld [vmem:[%s11975_s0 + $0x78] sm:$0x1]  ;;  %s7477_s25 = smov 16  }
  0x2a   :  { %v1712_v8 = vunpack.c.l.b16 %v7205_v49  ;;  %v1834_v9 = vrot.slane %v1706_v50, 7  ;;  %v1835_v10 = vrot.slane %v1707_v51, 6  ;;  %55 = vst [vmem:[#allocation2 + $0x20] sm:$0x1] %v54_v62  ;;  %v1838_v16 = vrot.slane %v1708_v59, 5  ;;  %s7478_s13 = smov 24  }
  0x2b   :  { %v1841_v17 = vrot.slane %v1709_v60, 4  ;;  %v1844_v18 = vrot.slane %v1710_v61, 3  ;;  %v6672_v19 = vld [vmem:[%s11975_s0 + $0x7a] sm:$0x1]  ;;  %v6673_v21 = vld [vmem:[%s11975_s0 + $0x7c] sm:$0x1]  ;;  %v834_v23 = vmax.f32 %v7797_v40, %v7809_v46  ;;  %v835_v30 = vmax.f32 %v7804_v45, %v7814_v47 }
  0x2c   :  { %v6796_v22 = vld [vmem:[%s11975_s0 + $0x73] sm:$0x1]  ;;  %v1837_v24 = vsel %vm1836_vm11, %v1835_v10, %v1834_v9  ;;  %v1847_v26 = vrot.slane %v1711_v7, 2  ;;  %v1850_v27 = vrot.slane %v1712_v8, 1  ;;  %v6797_v28 = vld [vmem:[%s11975_s0 + $0x75] sm:$0x1]  ;;  %v836_v35 = vmax.f32 %v7819_v53, %v451_v56 }
  0x2d   :  { %v6798_v29 = vld [vmem:[%s11975_s0 + $0x77] sm:$0x1]  ;;  %v1840_v31 = vsel %vm11993_vm13, %v1838_v16, %v1837_v24  ;;  %v6799_v32 = vld [vmem:[%s11975_s0 + $0x79] sm:$0x1]  ;;  %v6800_v33 = vld [vmem:[%s11975_s0 + $0x7b] sm:$0x1]  ;;  %v837_v36 = vmax.f32 %v7824_v54, %v7837_v57  ;;  %v838_v37 = vmax.f32 %v7829_v55, %v7842_v58  ;;  %v839_v39 = vmax.f32 %v326_v63, %v454_v3 }
  0x2e   :  { %v6801_v34 = vld [vmem:[%s11975_s0 + $0x7d] sm:$0x1]  ;;  %v1843_v38 = vsel %vm11989_vm14, %v1841_v17, %v1840_v31  ;;  %v840_v40 = vmax.f32 %v327_v2, %v455_v5  ;;  %v962_v41 = vmax.f32 %v6667_v6, %v6795_v15  ;;  %v963_v44 = vmax.f32 %v6668_v12, %v6796_v22  ;;  %v2115_v53 = vld [vmem:[#allocation2 + $0x8] sm:$0xf]  ;;  %v50_v3 = vld [vmem:[#allocation2 + $0x18] sm:$0x1] }
  0x2f   :  { %v2766_v42 = vld [vmem:[#allocation2 + $0x10] sm:$0xf]  ;;  %v1846_v43 = vsel %vm1845_vm15, %v1844_v18, %v1843_v38  ;;  %v964_v45 = vmax.f32 %v6669_v13, %v6797_v28  ;;  %v965_v46 = vmax.f32 %v6670_v14, %v6798_v29  ;;  %v966_v48 = vmax.f32 %v6671_v20, %v6799_v32  ;;  %v7919_v5 = vld [vmem:[%s11975_s0 + $0x40] sm:$0x1]  ;;  %v7926_v10 = vld [vmem:[%s11975_s0 + $0x42] sm:$0x1] }
  0x30   :  { %2799 = vrot.lane.b32.xlu1 %v2766_v42, %s7475_s18  ;;  %v1849_v47 = vsel %vm1848_vm1, %v1847_v26, %v1846_v43  ;;  %v967_v49 = vmax.f32 %v6672_v19, %v6800_v33  ;;  %v968_v50 = vmax.f32 %v6673_v21, %v6801_v34  ;;  %v1090_v54 = vmax.f32 %v834_v23, %v962_v41  ;;  %v7931_v12 = vld [vmem:[%s11975_s0 + $0x44] sm:$0x1]  ;;  %v7936_v13 = vld [vmem:[%s11975_s0 + $0x41] sm:$0x1]  ;;  %v7941_v14 = vld [vmem:[%s11975_s0 + $0x43] sm:$0x1] }
  0x31   :  { %v1852_v51 = vsel %vm1851_vm8, %v1850_v27, %v1849_v47  ;;  %v1091_v55 = vmax.f32 %v835_v30, %v963_v44  ;;  %v1092_v56 = vmax.f32 %v836_v35, %v964_v45  ;;  %v1093_v58 = vmax.f32 %v837_v36, %v965_v46  ;;  %v7946_v15 = vld [vmem:[%s11975_s0 + $0x45] sm:$0x1]  ;;  %v316_v19 = vld [vmem:[%s11975_s0 + $0x46] sm:$0x1]  ;;  %v7954_v21 = vld [vmem:[%s11975_s0 + $0x48] sm:$0x1] }
  0x32   :  { %v2048_v57 = vpack.c.b16 %v1852_v51, %v1852_v51  ;;  %v1094_v59 = vmax.f32 %v838_v37, %v966_v48  ;;  %v1095_v60 = vmax.f32 %v839_v39, %v967_v49  ;;  %v1096_v61 = vmax.f32 %v840_v40, %v968_v50  ;;  %v7959_v22 = vld [vmem:[%s11975_s0 + $0x4a] sm:$0x1]  ;;  %v444_v23 = vld [vmem:[%s11975_s0 + $0x47] sm:$0x1]  ;;  %v445_v24 = vld [vmem:[%s11975_s0 + $0x49] sm:$0x1] }
  0x33   :  { %v7223_v62 = vpack.c.bf16 %v1090_v54, %v1090_v54  ;;  %v7224_v63 = vpack.c.bf16 %v1091_v55, %v1091_v55  ;;  %v7225_v2 = vpack.c.bf16 %v1092_v56, %v1092_v56  ;;  %v7226_v7 = vpack.c.bf16 %v1093_v58, %v1093_v58  ;;  %v446_v26 = vld [vmem:[%s11975_s0 + $0x4b] sm:$0x1]  ;;  %v319_v31 = vld [vmem:[%s11975_s0 + $0x4c] sm:$0x1]  ;;  %v447_v32 = vld [vmem:[%s11975_s0 + $0x4d] sm:$0x1] }
  0x34   :  { %v2116_v6 = vsel %vm7789_vm9, %v2048_v57, %v2115_v53  ;;  %v7227_v8 = vpack.c.bf16 %v1094_v59, %v1094_v59  ;;  %v7228_v9 = vpack.c.bf16 %v1095_v60, %v1095_v60  ;;  %v7229_v16 = vpack.c.bf16 %v1096_v61, %v1096_v61  ;;  %v6659_v33 = vld [vmem:[%s11975_s0 + $0x50] sm:$0x1]  ;;  %v6660_v34 = vld [vmem:[%s11975_s0 + $0x52] sm:$0x1]  ;;  %v6787_v35 = vld [vmem:[%s11975_s0 + $0x51] sm:$0x1] }
  0x35   :  { %2117 = vst [vmem:[#allocation2 + $0x8] sm:$0xf] %v2116_v6  ;;  %v1730_v17 = vunpack.c.l.b16 %v7223_v62  ;;  %v1731_v18 = vunpack.c.l.b16 %v7224_v63  ;;  %v1732_v20 = vunpack.c.l.b16 %v7225_v2  ;;  %v1733_v27 = vunpack.c.l.b16 %v7226_v7  ;;  %v6661_v40 = vld [vmem:[%s11975_s0 + $0x54] sm:$0x1]  ;;  %v6662_v41 = vld [vmem:[%s11975_s0 + $0x56] sm:$0x1] }
  0x36   :  { %v1734_v28 = vunpack.c.l.b16 %v7227_v8  ;;  %v1735_v29 = vunpack.c.l.b16 %v7228_v9  ;;  %v51_v30 = vsel %vm7543_vm4, 0, %v50_v3  ;;  %v1736_v36 = vunpack.c.l.b16 %v7229_v16  ;;  %v6663_v42 = vld [vmem:[%s11975_s0 + $0x58] sm:$0x1]  ;;  %v6788_v43 = vld [vmem:[%s11975_s0 + $0x53] sm:$0x1]  ;;  %s7479_s16 = smov 28  }
  0x37   :  { %v1879_v37 = vrot.slane %v1730_v17, 7  ;;  %v1880_v38 = vrot.slane %v1731_v18, 6  ;;  %v1882_v39 = vrot.slane %v1732_v20, 5  ;;  %52 = vst [vmem:[#allocation2 + $0x18] sm:$0x1] %v51_v30  ;;  %v1884_v44 = vrot.slane %v1733_v27, 4 }
  0x38   :  { %v1886_v45 = vrot.slane %v1734_v28, 3  ;;  %v1888_v46 = vrot.slane %v1735_v29, 2  ;;  %v6664_v47 = vld [vmem:[%s11975_s0 + $0x5a] sm:$0x1]  ;;  %v6789_v48 = vld [vmem:[%s11975_s0 + $0x55] sm:$0x1]  ;;  %v826_v49 = vmax.f32 %v7919_v5, %v7936_v13  ;;  %v827_v55 = vmax.f32 %v7926_v10, %v7941_v14 }
  0x39   :  { %v1881_v50 = vsel %vm1836_vm11, %v1880_v38, %v1879_v37  ;;  %v1890_v51 = vrot.slane %v1736_v36, 1  ;;  %v6790_v53 = vld [vmem:[%s11975_s0 + $0x57] sm:$0x1]  ;;  %v6791_v54 = vld [vmem:[%s11975_s0 + $0x59] sm:$0x1]  ;;  %v828_v56 = vmax.f32 %v7931_v12, %v7946_v15  ;;  %v829_v61 = vmax.f32 %v316_v19, %v444_v23  ;;  %s7480_s20 = smov 32  }
  0x3a   :  { %v1883_v57 = vsel %vm11993_vm13, %v1882_v39, %v1881_v50  ;;  %v6665_v58 = vld [vmem:[%s11975_s0 + $0x5c] sm:$0x1]  ;;  %v6792_v59 = vld [vmem:[%s11975_s0 + $0x5b] sm:$0x1]  ;;  %v6793_v60 = vld [vmem:[%s11975_s0 + $0x5d] sm:$0x1]  ;;  %v830_v62 = vmax.f32 %v7954_v21, %v445_v24  ;;  %v831_v63 = vmax.f32 %v7959_v22, %v446_v26  ;;  %v832_v3 = vmax.f32 %v319_v31, %v447_v32 }
  0x3b   :  { %v1885_v2 = vsel %vm11989_vm14, %v1884_v44, %v1883_v57  ;;  %v954_v5 = vmax.f32 %v6659_v33, %v6787_v35  ;;  %v955_v6 = vmax.f32 %v6660_v34, %v6788_v43  ;;  %v956_v9 = vmax.f32 %v6661_v40, %v6789_v48  ;;  %v2133_v18 = vld [vmem:[#allocation2 + $0x20] sm:$0xf]  ;;  %v106_v31 = vld [vmem:[#allocation2 + $0xc] sm:$0x1]  ;;  %v304_v32 = vld [vmem:[%s11975_s0 + $0xe] sm:$0x1] }
  0x3c   :  { %v2765_v7 = vld [vmem:[#allocation2 + $0x8] sm:$0xf]  ;;  %v1887_v8 = vsel %vm1845_vm15, %v1886_v45, %v1885_v2  ;;  %v957_v10 = vmax.f32 %v6662_v41, %v6790_v53  ;;  %v958_v12 = vmax.f32 %v6663_v42, %v6791_v54  ;;  %v959_v14 = vmax.f32 %v6664_v47, %v6792_v59  ;;  %v432_v33 = vld [vmem:[%s11975_s0 + $0xf] sm:$0x1]  ;;  %v6650_v38 = vld [vmem:[%s11975_s0 + $0x1e] sm:$0x1] }
  0x3d   :  { %2797 = vrot.lane.b32.xlu0 %v2765_v7, %s7475_s18  ;;  %v1889_v13 = vsel %vm1848_vm1, %v1888_v46, %v1887_v8  ;;  %v960_v15 = vmax.f32 %v6665_v58, %v6793_v60  ;;  %v1082_v16 = vmax.f32 %v826_v49, %v954_v5  ;;  %v1083_v20 = vmax.f32 %v827_v55, %v955_v6  ;;  %v6778_v39 = vld [vmem:[%s11975_s0 + $0x1f] sm:$0x1]  ;;  %v109_v40 = vld [vmem:[#allocation2 + $0x14] sm:$0x1]  ;;  %v8049_v45 = vld [vmem:[#allocation2 + $0x8] sm:$0xe] }
  0x3e   :  { %v1891_v17 = vsel %vm1851_vm8, %v1890_v51, %v1889_v13  ;;  %v1084_v19 = vmax.f32 %v828_v56, %v956_v9  ;;  %v1085_v21 = vmax.f32 %v829_v61, %v957_v10  ;;  %v1086_v23 = vmax.f32 %v830_v62, %v958_v12  ;;  %v312_v46 = vld [vmem:[%s11975_s0 + $0x2e] sm:$0x1]  ;;  %v440_v47 = vld [vmem:[%s11975_s0 + $0x2f] sm:$0x1]  ;;  %v6658_v48 = vld [vmem:[%s11975_s0 + $0x3e] sm:$0x1] }
  0x3f   :  { %v2054_v22 = vpack.c.b16 %v1891_v17, %v1891_v17  ;;  %v1087_v24 = vmax.f32 %v831_v63, %v959_v14  ;;  %v1088_v26 = vmax.f32 %v832_v3, %v960_v15  ;;  %v7215_v27 = vpack.c.bf16 %v1082_v16, %v1082_v16  ;;  %v6786_v54 = vld [vmem:[%s11975_s0 + $0x3f] sm:$0x1]  ;;  %v112_v55 = vld [vmem:[#allocation2 + $0x1c] sm:$0x1]  ;;  %v8065_v60 = vld [vmem:[#allocation2 + $0x10] sm:$0xe] }
  0x40   :  { %v7216_v28 = vpack.c.bf16 %v1083_v20, %v1083_v20  ;;  %v7217_v29 = vpack.c.bf16 %v1084_v19, %v1084_v19  ;;  %v7218_v30 = vpack.c.bf16 %v1085_v21, %v1085_v21  ;;  %v7219_v35 = vpack.c.bf16 %v1086_v23, %v1086_v23  ;;  %v320_v61 = vld [vmem:[%s11975_s0 + $0x4e] sm:$0x1]  ;;  %v448_v3 = vld [vmem:[%s11975_s0 + $0x4f] sm:$0x1]  ;;  %v6666_v5 = vld [vmem:[%s11975_s0 + $0x5e] sm:$0x1] }
  0x41   :  { %v2134_v34 = vsel %vm7789_vm9, %v2054_v22, %v2133_v18  ;;  %v7220_v36 = vpack.c.bf16 %v1087_v24, %v1087_v24  ;;  %v7221_v37 = vpack.c.bf16 %v1088_v26, %v1088_v26  ;;  %v1722_v41 = vunpack.c.l.b16 %v7215_v27  ;;  %v6794_v10 = vld [vmem:[%s11975_s0 + $0x5f] sm:$0x1]  ;;  %v8082_v12 = vld [vmem:[#allocation2 + $0x8] sm:$0xe]  ;;  %v8086_v17 = vld [vmem:[#allocation2 + $0x10] sm:$0xe] }
  0x42   :  { %2135 = vst [vmem:[#allocation2 + $0x20] sm:$0xf] %v2134_v34  ;;  %v1723_v42 = vunpack.c.l.b16 %v7216_v28  ;;  %v1724_v43 = vunpack.c.l.b16 %v7217_v29  ;;  %v1725_v44 = vunpack.c.l.b16 %v7218_v30  ;;  %v1726_v49 = vunpack.c.l.b16 %v7219_v35  ;;  %v115_v18 = vld [vmem:[#allocation2 + $0x24] sm:$0x1]  ;;  %v328_v20 = vld [vmem:[%s11975_s0 + $0x6e] sm:$0x1] }
  0x43   :  { %v1727_v50 = vunpack.c.l.b16 %v7220_v36  ;;  %v1728_v51 = vunpack.c.l.b16 %v7221_v37  ;;  %v107_v53 = vsel %vm7559_vm6, 0, %v106_v31  ;;  %v1866_v56 = vrot.slane %v1722_v41, 7  ;;  %v456_v24 = vld [vmem:[%s11975_s0 + $0x6f] sm:$0x1]  ;;  %v6674_v26 = vld [vmem:[%s11975_s0 + $0x7e] sm:$0x1] }
  0x44   :  { %v1867_v57 = vrot.slane %v1723_v42, 6  ;;  %v1869_v58 = vrot.slane %v1724_v43, 5  ;;  %v1871_v59 = vrot.slane %v1725_v44, 4  ;;  %108 = vst [vmem:[#allocation2 + $0xc] sm:$0x1] %v107_v53  ;;  %v1873_v62 = vrot.slane %v1726_v49, 3 }
  0x45   :  { %v1875_v63 = vrot.slane %v1727_v50, 2  ;;  %v817_v2 = vmax.f32 %v304_v32, %v432_v33  ;;  %v1877_v7 = vrot.slane %v1728_v51, 1  ;;  %v945_v8 = vmax.f32 %v6650_v38, %v6778_v39  ;;  %v6802_v32 = vld [vmem:[%s11975_s0 + $0x7f] sm:$0x1]  ;;  %v2247_v37 = vld [vmem:[#allocation2 + $0x8] sm:$0xf] }
  0x46   :  { %v1868_v6 = vsel %vm1836_vm11, %v1867_v57, %v1866_v56  ;;  %v110_v9 = vsel %vm7559_vm6, 0, %v109_v40  ;;  %v7044_v14 = vrot.slane %v8049_v45, 9  ;;  %v825_v15 = vmax.f32 %v312_v46, %v440_v47  ;;  %v2249_v38 = vld [vmem:[#allocation2 + $0x10] sm:$0xf]  ;;  %v2127_v40 = vld [vmem:[#allocation2 + $0x18] sm:$0xf] }
  0x47   :  { %v1870_v13 = vsel %vm11993_vm13, %v1869_v58, %v1868_v6  ;;  %111 = vst [vmem:[#allocation2 + $0x14] sm:$0x1] %v110_v9  ;;  %v953_v16 = vmax.f32 %v6658_v48, %v6786_v54  ;;  %v1073_v21 = vmax.f32 %v817_v2, %v945_v8  ;;  %v113_v22 = vsel %vm7559_vm6, 0, %v112_v55  ;;  %v2862_v46 = vld [vmem:[#allocation2 + $0x8] sm:$0xf]  ;;  %s7484_s23 = smov 40  }
  0x48   :  { %v1872_v19 = vsel %vm11989_vm14, %v1871_v59, %v1870_v13  ;;  %v833_v23 = vmax.f32 %v320_v61, %v448_v3  ;;  %v7045_v30 = vrot.slane %v8065_v60, 9  ;;  %114 = vst [vmem:[#allocation2 + $0x1c] sm:$0x1] %v113_v22  ;;  %v961_v31 = vmax.f32 %v6666_v5, %v6794_v10  ;;  %v8133_v22 = vld [vmem:[%s11975_s0 + $0x82] sm:$0x1] }
  0x49   :  { %v2768_v27 = vld [vmem:[#allocation2 + $0x20] sm:$0xf]  ;;  %v1874_v28 = vsel %vm1845_vm15, %v1873_v62, %v1872_v19  ;;  %v1081_v29 = vmax.f32 %v825_v15, %v953_v16  ;;  %v7327_v34 = vpack.c.bf16 %v1073_v21, %v1073_v21  ;;  %v7059_v35 = vrot.slane %v8082_v12, 9  ;;  %v494_v0 = vld [vmem:[%s11975_s0 + $0x10b] sm:$0x1] }
  0x4a   :  { %2803 = vrot.lane.b32.xlu1 %v2768_v27, %s7475_s18  ;;  %v1876_v33 = vsel %vm1848_vm1, %v1875_v63, %v1874_v28  ;;  %v116_v36 = vsel %vm7559_vm6, 0, %v115_v18  ;;  %v1089_v43 = vmax.f32 %v833_v23, %v961_v31  ;;  %v841_v44 = vmax.f32 %v328_v20, %v456_v24  ;;  %v8114_v53 = vld [vmem:[#allocation2 + $0x20] sm:$0xe]  ;;  %v2864_v63 = vld [vmem:[#allocation2 + $0x10] sm:$0xf] }
  0x4b   :  { %v1878_v39 = vsel %vm1851_vm8, %v1877_v7, %v1876_v33  ;;  %v2118_v41 = vld [vmem:[#allocation2 + $0xc] sm:$0x1]  ;;  %v7328_v42 = vpack.c.bf16 %v1081_v29, %v1081_v29  ;;  %117 = vst [vmem:[#allocation2 + $0x24] sm:$0x1] %v116_v36  ;;  %v7060_v49 = vrot.slane %v8086_v17, 9  ;;  %v969_v50 = vmax.f32 %v6674_v26, %v6802_v32 }
  0x4c   :  { %v2052_v47 = vpack.c.b16 %v1878_v39, %v1878_v39  ;;  %v2119_v48 = vsel %vm7543_vm4, %v7327_v34, %v2118_v41  ;;  %v7329_v51 = vpack.c.bf16 %v1089_v43, %v1089_v43  ;;  %v2295_v54 = vshrl.u32 %v2247_v37, 16  ;;  %v8120_v7 = vld [vmem:[#allocation2 + $0x20] sm:$0xf]  ;;  %v8143_v29 = vld [vmem:[%s11975_s0 + $0x84] sm:$0x1] }
  0x4d   :  { %2120 = vst [vmem:[#allocation2 + $0xc] sm:$0x1] %v2119_v48  ;;  %v2298_v55 = vshll.u32 %v2247_v37, 16  ;;  %v2309_v56 = vshrl.u32 %v2249_v38, 16  ;;  %v1097_v59 = vmax.f32 %v841_v44, %v969_v50  ;;  %v2312_v61 = vshll.u32 %v2249_v38, 16 }
  0x4e   :  { %v2128_v57 = vsel %vm7789_vm9, %v2052_v47, %v2127_v40  ;;  %v2124_v58 = vld [vmem:[#allocation2 + $0x14] sm:$0x1]  ;;  %v2895_v62 = vshrl.u32 %v2862_v46, 16  ;;  %v2297_v3 = vrot.slane %v2295_v54, 4  ;;  %v7062_v10 = vrot.slane %v8114_v53, 9 }
  0x4f   :  { %2129 = vst [vmem:[#allocation2 + $0x18] sm:$0xf] %v2128_v57  ;;  %v2125_v2 = vsel %vm7543_vm4, %v7328_v42, %v2124_v58  ;;  %v2300_v5 = vrot.slane %v2298_v55, 5  ;;  %v2311_v6 = vrot.slane %v2309_v56, 4  ;;  %v2130_v8 = vld [vmem:[#allocation2 + $0x1c] sm:$0x1]  ;;  %v7330_v9 = vpack.c.bf16 %v1097_v59, %v1097_v59 }
  0x50   :  { %2126 = vst [vmem:[#allocation2 + $0x14] sm:$0x1] %v2125_v2  ;;  %v2314_v13 = vrot.slane %v2312_v61, 5  ;;  %v2898_v15 = vshll.u32 %v2862_v46, 16  ;;  %v2131_v16 = vsel %vm7543_vm4, %v7329_v51, %v2130_v8  ;;  %v2909_v20 = vshrl.u32 %v2864_v63, 16 }
  0x51   :  { %v2301_v18 = vor.u32 %v2300_v5, %v2297_v3  ;;  %v2912_v19 = vshll.u32 %v2864_v63, 16  ;;  %v8128_v21 = vld [vmem:[%s11975_s0 + $0x80] sm:$0x1]  ;;  %v8138_v23 = vld [vmem:[%s11975_s0 + $0x81] sm:$0x1]  ;;  %v2897_v27 = vrot.slane %v2895_v62, 4 }
  0x52   :  { %2132 = vst [vmem:[#allocation2 + $0x1c] sm:$0x1] %v2131_v16  ;;  %v2136_v24 = vld [vmem:[#allocation2 + $0x24] sm:$0x1]  ;;  %v2315_v26 = vor.u32 %v2314_v13, %v2311_v6  ;;  %v2900_v28 = vrot.slane %v2898_v15, 5  ;;  %v2937_v34 = vshrl.u32 %v8120_v7, 16  ;;  %v842_v58 = vmax.f32 %v8128_v21, %v8138_v23 }
  0x53   :  { %v8148_v31 = vld [vmem:[%s11975_s0 + $0x83] sm:$0x1]  ;;  %v2137_v32 = vsel %vm7543_vm4, %v7330_v9, %v2136_v24  ;;  %v8152_v33 = vrot.slane %v2301_v18, 4  ;;  %v2940_v36 = vshll.u32 %v8120_v7, 16  ;;  %v8159_v37 = vld [vmem:[%s11975_s0 + $0x85] sm:$0x1] }
  0x54   :  { %v2572_v38 = vld [vmem:[#allocation2 + $0xc] sm:$0x1]  ;;  %2138 = vst [vmem:[#allocation2 + $0x24] sm:$0x1] %v2137_v32  ;;  %v8164_v41 = vld [vmem:[%s11975_s0 + $0x86] sm:$0x1]  ;;  %v2901_v57 = vor.u32 %v2900_v28, %v2897_v27  ;;  %v843_v59 = vmax.f32 %v8133_v22, %v8148_v31  ;;  %v844_v5 = vmax.f32 %v8143_v29, %v8159_v37 }
  0x55   :  { %v3184_v39 = vld [vmem:[#allocation2 + $0xc] sm:$0x1]  ;;  %v8169_v42 = vld [vmem:[%s11975_s0 + $0x87] sm:$0x1]  ;;  %v2642_v43 = vrot.slane %v2572_v38, 5  ;;  %v8171_v47 = vrot.slane %v2909_v20, 4 }
  0x56   :  { %v2248_v40 = vld [vmem:[#allocation2 + $0xc] sm:$0x1]  ;;  %v3249_v44 = vrot.slane %v3184_v39, 5  ;;  %v8173_v48 = vrot.slane %v2912_v19, 5  ;;  %v8178_v50 = vld [vmem:[%s11975_s0 + $0x88] sm:$0x1]  ;;  %v845_v19 = vmax.f32 %v8164_v41, %v8169_v42 }
  0x57   :  { %v2863_v46 = vld [vmem:[#allocation2 + $0xc] sm:$0x1]  ;;  %v8183_v51 = vld [vmem:[%s11975_s0 + $0x89] sm:$0x1]  ;;  %v2767_v54 = vld [vmem:[#allocation2 + $0x18] sm:$0xf]  ;;  %v2643_v61 = vsel %vm7656_vm12, %v7044_v14, %v2642_v43 }
  0x58   :  { %v2575_v55 = vld [vmem:[#allocation2 + $0x18] sm:$0xe]  ;;  %2801 = vrot.lane.b32.xlu0 %v2767_v54, %s7475_s18  ;;  %v2574_v62 = vld [vmem:[#allocation2 + $0x14] sm:$0x1]  ;;  %v2304_v2 = vshll.u32 %v2248_v40, 16  ;;  %v8194_v3 = vrot.slane %v2315_v26, 4  ;;  %2702 = vrot.lane.b32.xlu1 %v2643_v61, %s7473_s11  ;;  %v2915_v14 = vor.u32 %v8173_v48, %v8171_v47  ;;  %v846_v38 = vmax.f32 %v8178_v50, %v8183_v51 }
  0x59   :  { %v3187_v56 = vld [vmem:[#allocation2 + $0x18] sm:$0xe]  ;;  %v3186_v63 = vld [vmem:[#allocation2 + $0x14] sm:$0x1]  ;;  %v2646_v6 = vrot.slane %v2574_v62, 5  ;;  %v7046_v8 = vrot.slane %v2575_v55, 9  ;;  %v3250_v39 = vsel %vm7656_vm12, %v7059_v35, %v3249_v44 }
  0x5a   :  { %v3253_v9 = vrot.slane %v3186_v63, 5  ;;  %v7061_v13 = vrot.slane %v3187_v56, 9  ;;  %v2250_v15 = vld [vmem:[#allocation2 + $0x14] sm:$0x1]  ;;  %v2576_v16 = vld [vmem:[#allocation2 + $0x1c] sm:$0x1] }
  0x5b   :  { %v3188_v45 = vld [vmem:[#allocation2 + $0x1c] sm:$0x1]  ;;  %v2318_v18 = vshll.u32 %v2250_v15, 16  ;;  %v2904_v20 = vshll.u32 %v2863_v46, 16  ;;  %v2647_v24 = vsel %vm7656_vm12, %v7045_v30, %v2646_v6  ;;  %v2650_v26 = vrot.slane %v2576_v16, 5 }
  0x5c   :  { %v3257_v27 = vrot.slane %v3188_v45, 5  ;;  %v2251_v28 = vld [vmem:[#allocation2 + $0x18] sm:$0xf]  ;;  %v2252_v32 = vld [vmem:[#allocation2 + $0x1c] sm:$0x1]  ;;  %2704 = vrot.lane.b32.xlu0 %v2647_v24, %s7473_s11  ;;  %v8214_v43 = vrot.slane %v2304_v2, 5  ;;  %v3254_v47 = vsel %vm7656_vm12, %v7060_v49, %v3253_v9 }
  0x5d   :  { %v3190_v40 = vld [vmem:[#allocation2 + $0x24] sm:$0x1]  ;;  %v8216_v60 = vrot.slane %v2901_v57, 4  ;;  %v2323_v30 = vshrl.u32 %v2251_v28, 16  ;;  %v2651_v46 = vsel %vm7656_vm12, %v7046_v8, %v2650_v26  ;;  %v2326_v54 = vshll.u32 %v2251_v28, 16 }
  0x5e   :  { %v3261_v48 = vrot.slane %v3190_v40, 5  ;;  %v2866_v12 = vld [vmem:[#allocation2 + $0x18] sm:$0xf]  ;;  %v2867_v55 = vld [vmem:[#allocation2 + $0x1c] sm:$0x1]  ;;  %2706 = vrot.lane.b32.xlu1 %v2651_v46, %s7473_s11  ;;  %v8225_v35 = vrot.slane %v2318_v18, 5  ;;  %v3258_v17 = vsel %vm7656_vm12, %v7061_v13, %v3257_v27  ;;  %v2307_v7 = vsel %vm7664_vm7, %v8152_v33, %v8214_v43 }
  0x5f   :  { %v8227_v44 = vrot.slane %v2904_v20, 5  ;;  %v2325_v56 = vrot.slane %v2323_v30, 4  ;;  %v2332_v57 = vshll.u32 %v2252_v32, 16  ;;  %v2865_v61 = vld [vmem:[#allocation2 + $0x14] sm:$0x1]  ;;  %v2328_v63 = vrot.slane %v2326_v54, 5 }
  0x60   :  { %v56_v62 = vld [vmem:[#allocation2 + $0x28] sm:$0x1]  ;;  %v2923_v2 = vshrl.u32 %v2866_v12, 16  ;;  %v2926_v49 = vshll.u32 %v2866_v12, 16  ;;  %v2869_v6 = vld [vmem:[#allocation2 + $0x24] sm:$0x1]  ;;  %3311 = vrot.lane.b32.xlu0 %v3250_v39, %s7476_s14  ;;  %v3262_v16 = vsel %vm7656_vm12, %v7062_v10, %v3261_v48  ;;  %v2321_v43 = vsel %vm7664_vm7, %v8194_v3, %v8225_v35 }
  0x61   :  { %v8234_v8 = vld [vmem:[%s11975_s0 + $0x8a] sm:$0x1]  ;;  %v8239_v9 = vld [vmem:[%s11975_s0 + $0x8c] sm:$0x1]  ;;  %v8244_v15 = vld [vmem:[%s11975_s0 + $0x8b] sm:$0x1]  ;;  %v2329_v26 = vor.u32 %v2328_v63, %v2325_v56 }
  0x62   :  { %v8249_v13 = vld [vmem:[%s11975_s0 + $0x8d] sm:$0x1]  ;;  %v2932_v45 = vshll.u32 %v2867_v55, 16  ;;  %v8256_v18 = vrot.slane %v2915_v14, 4  ;;  %v2918_v20 = vshll.u32 %v2865_v61, 16  ;;  %v2925_v27 = vrot.slane %v2923_v2, 4  ;;  %3313 = vrot.lane.b32.xlu1 %v3254_v47, %s7476_s14 }
  0x63   :  { %v6675_v24 = vld [vmem:[%s11975_s0 + $0x90] sm:$0x1]  ;;  %v2928_v28 = vrot.slane %v2926_v49, 5  ;;  %v2939_v32 = vrot.slane %v2937_v34, 4  ;;  %v6676_v53 = vld [vmem:[%s11975_s0 + $0x92] sm:$0x1]  ;;  %v848_v33 = vmax.f32 %v8239_v9, %v8249_v13  ;;  %v2907_v61 = vsel %vm7664_vm7, %v8216_v60, %v8227_v44 }
  0x64   :  { %v8267_v10 = vrot.slane %v2332_v57, 5  ;;  %v8269_v14 = vrot.slane %v2918_v20, 5  ;;  %v2942_v39 = vrot.slane %v2940_v36, 5  ;;  %v2946_v40 = vshll.u32 %v2869_v6, 16  ;;  %v6677_v30 = vld [vmem:[%s11975_s0 + $0x94] sm:$0x1]  ;;  %3315 = vrot.lane.b32.xlu0 %v3258_v17, %s7476_s14 }
  0x65   :  { %v8276_v46 = vrot.slane %v2329_v26, 4  ;;  %v2929_v34 = vor.u32 %v2928_v28, %v2925_v27  ;;  %v8278_v48 = vrot.slane %v2932_v45, 5  ;;  %v57_v47 = vsel %vm7543_vm4, 0, %v56_v62  ;;  %v6678_v54 = vld [vmem:[%s11975_s0 + $0x96] sm:$0x1] }
  0x66   :  { %v2943_v36 = vor.u32 %v2942_v39, %v2939_v32  ;;  %58 = vst [vmem:[#allocation2 + $0x28] sm:$0x1] %v57_v47  ;;  %v6679_v12 = vld [vmem:[%s11975_s0 + $0x98] sm:$0x1]  ;;  %v6680_v55 = vld [vmem:[%s11975_s0 + $0x9a] sm:$0x1]  ;;  %v847_v57 = vmax.f32 %v8234_v8, %v8244_v15  ;;  %v2921_v62 = vsel %vm7664_vm7, %v8256_v18, %v8269_v14  ;;  %3317 = vrot.lane.b32.xlu1 %v3262_v16, %s7476_s14 }
  0x67   :  { %v6803_v56 = vld [vmem:[%s11975_s0 + $0x91] sm:$0x1]  ;;  %v6681_v17 = vld [vmem:[%s11975_s0 + $0x9c] sm:$0x1]  ;;  %v6804_v63 = vld [vmem:[%s11975_s0 + $0x93] sm:$0x1]  ;;  %v2335_v9 = vsel %vm7664_vm7, %v8276_v46, %v8267_v10 }
  0x68   :  { %v6805_v3 = vld [vmem:[%s11975_s0 + $0x95] sm:$0x1]  ;;  %v970_v35 = vmax.f32 %v6675_v24, %v6803_v56  ;;  %v2930_v60 = vrot.slane %v2929_v34, 4  ;;  %v8325_v44 = vrot.slane %v2946_v40, 5  ;;  %v6806_v2 = vld [vmem:[%s11975_s0 + $0x97] sm:$0x1]  ;;  %v971_v6 = vmax.f32 %v6676_v53, %v6804_v63  ;;  %2506 = vrot.lane.b32.xlu0 %v2307_v7, %s7474_s9 }
  0x69   :  { %v6807_v49 = vld [vmem:[%s11975_s0 + $0x99] sm:$0x1]  ;;  %v972_v8 = vmax.f32 %v6677_v30, %v6805_v3  ;;  %v6808_v15 = vld [vmem:[%s11975_s0 + $0x9b] sm:$0x1]  ;;  %v6809_v13 = vld [vmem:[%s11975_s0 + $0x9d] sm:$0x1]  ;;  %v973_v16 = vmax.f32 %v6678_v54, %v6806_v2 }
  0x6a   :  { %v974_v45 = vmax.f32 %v6679_v12, %v6807_v49  ;;  %v1098_v20 = vmax.f32 %v842_v58, %v970_v35  ;;  %v8347_v24 = vrot.slane %v2943_v36, 4  ;;  %v975_v26 = vmax.f32 %v6680_v55, %v6808_v15  ;;  %v3476_v58 = vld [vmem:[#allocation2 + $0x18] sm:$0xf]  ;;  %2508 = vrot.lane.b32.xlu1 %v2321_v43, %s7474_s9  ;;  %v3477_v46 = vld [vmem:[#allocation2 + $0x1c] sm:$0x1] }
  0x6b   :  { %v976_v27 = vmax.f32 %v6681_v17, %v6809_v13  ;;  %v1099_v28 = vmax.f32 %v843_v59, %v971_v6  ;;  %v1100_v32 = vmax.f32 %v844_v5, %v972_v8  ;;  %v1101_v53 = vmax.f32 %v845_v19, %v973_v16  ;;  %v3474_v34 = vld [vmem:[#allocation2 + $0x10] sm:$0xf]  ;;  %v118_v12 = vld [vmem:[#allocation2 + $0x2c] sm:$0x1]  ;;  %v336_v55 = vld [vmem:[%s11975_s0 + $0x8e] sm:$0x1] }
  0x6c   :  { %v1102_v21 = vmax.f32 %v846_v38, %v974_v45  ;;  %v7231_v23 = vpack.c.bf16 %v1098_v20, %v1098_v20  ;;  %v2935_v22 = vsel %vm7664_vm7, %v2930_v60, %v8278_v48  ;;  %v1103_v31 = vmax.f32 %v847_v57, %v975_v26  ;;  %3118 = vrot.lane.b32.xlu0 %v2907_v61, %s7477_s25  ;;  %v3475_v48 = vld [vmem:[#allocation2 + $0x14] sm:$0x1]  ;;  %v3377_v57 = vld [vmem:[#allocation2 + $0x10] sm:$0xf]  ;;  %v464_v17 = vld [vmem:[%s11975_s0 + $0x8f] sm:$0x1] }
  0x6d   :  { %v1104_v59 = vmax.f32 %v848_v33, %v976_v27  ;;  %v7232_v29 = vpack.c.bf16 %v1099_v28, %v1099_v28  ;;  %v7233_v37 = vpack.c.bf16 %v1100_v32, %v1100_v32  ;;  %v7234_v5 = vpack.c.bf16 %v1101_v53, %v1101_v53  ;;  %v6682_v2 = vld [vmem:[%s11975_s0 + $0x9e] sm:$0x1]  ;;  %v3478_v20 = vld [vmem:[#allocation2 + $0x20] sm:$0xf]  ;;  %v3479_v53 = vld [vmem:[#allocation2 + $0x24] sm:$0x1] }
  0x6e   :  { %v7235_v10 = vpack.c.bf16 %v1102_v21, %v1102_v21  ;;  %v1738_v41 = vunpack.c.l.b16 %v7231_v23  ;;  %v7236_v42 = vpack.c.bf16 %v1103_v31, %v1103_v31  ;;  %v3521_v19 = vshrl.u32 %v3476_v58, 16  ;;  %2510 = vrot.lane.b32.xlu1 %v2335_v9, %s7474_s9  ;;  %v6810_v9 = vld [vmem:[%s11975_s0 + $0x9f] sm:$0x1]  ;;  %v3379_v26 = vld [vmem:[#allocation2 + $0x20] sm:$0xf] }
  0x6f   :  { %v7237_v50 = vpack.c.bf16 %v1104_v59, %v1104_v59  ;;  %v1739_v51 = vunpack.c.l.b16 %v7232_v29  ;;  %v1740_v38 = vunpack.c.l.b16 %v7233_v37  ;;  %v1741_v39 = vunpack.c.l.b16 %v7234_v5  ;;  %v2139_v14 = vld [vmem:[#allocation2 + $0x28] sm:$0xf]  ;;  %v3798_v5 = vld [vmem:[#allocation2 + $0x1c] sm:$0x1] }
  0x70   :  { %v1742_v40 = vunpack.c.l.b16 %v7235_v10  ;;  %v1892_v30 = vrot.slane %v1738_v41, 7  ;;  %v1743_v47 = vunpack.c.l.b16 %v7236_v42  ;;  %v3524_v36 = vshll.u32 %v3476_v58, 16  ;;  %3122 = vrot.lane.b32.xlu0 %v2935_v22, %s7477_s25  ;;  %v8398_v58 = vld [vmem:[#allocation2 + $0x18] sm:$0xe]  ;;  %v8401_v10 = vld [vmem:[#allocation2 + $0x10] sm:$0xe] }
  0x71   :  { %v1744_v54 = vunpack.c.l.b16 %v7237_v50  ;;  %v1893_v7 = vrot.slane %v1739_v51, 6  ;;  %v2949_v56 = vsel %vm7664_vm7, %v8347_v24, %v8325_v44  ;;  %v1895_v33 = vrot.slane %v1740_v38, 5  ;;  %v3378_v22 = vld [vmem:[#allocation2 + $0x18] sm:$0xf]  ;;  %v8404_v51 = vld [vmem:[#allocation2 + $0x14] sm:$0x1] }
  0x72   :  { %v1897_v43 = vrot.slane %v1741_v39, 4  ;;  %v1899_v61 = vrot.slane %v1742_v40, 3  ;;  %v1901_v3 = vrot.slane %v1743_v47, 2  ;;  %v3523_v35 = vrot.slane %v3521_v19, 4  ;;  %3120 = vrot.lane.b32.xlu1 %v2921_v62, %s7477_s25  ;;  %v2253_v19 = vld [vmem:[#allocation2 + $0x20] sm:$0xf] }
  0x73   :  { %v1894_v63 = vsel %vm1836_vm11, %v1893_v7, %v1892_v30  ;;  %v3526_v60 = vrot.slane %v3524_v36, 5  ;;  %v1903_v49 = vrot.slane %v1744_v54, 1  ;;  %v3507_v6 = vshrl.u32 %v3474_v34, 16  ;;  %v3799_v7 = vld [vmem:[#allocation2 + $0x20] sm:$0xe] }
  0x74   :  { %v1896_v44 = vsel %vm11993_vm13, %v1895_v33, %v1894_v63  ;;  %v3510_v8 = vshll.u32 %v3474_v34, 16  ;;  %v3530_v13 = vshll.u32 %v3477_v46, 16  ;;  %v3516_v16 = vshll.u32 %v3475_v48, 16  ;;  %3409 = vrot.lane.b32.xlu0 %v3377_v57, %s7478_s13  ;;  %v2254_v46 = vld [vmem:[#allocation2 + $0x24] sm:$0x1] }
  0x75   :  { %v1898_v15 = vsel %vm11989_vm14, %v1897_v43, %v1896_v44  ;;  %v119_v45 = vsel %vm7559_vm6, 0, %v118_v12  ;;  %v3509_v27 = vrot.slane %v3507_v6, 4  ;;  %v849_v32 = vmax.f32 %v336_v55, %v464_v17  ;;  %v3800_v36 = vld [vmem:[#allocation2 + $0x24] sm:$0x1]  ;;  %v62_v33 = vld [vmem:[#allocation2 + $0x38] sm:$0x1] }
  0x76   :  { %v1900_v24 = vsel %vm1845_vm15, %v1899_v61, %v1898_v15  ;;  %v3512_v28 = vrot.slane %v3510_v8, 5  ;;  %120 = vst [vmem:[#allocation2 + $0x2c] sm:$0x1] %v119_v45  ;;  %v3527_v62 = vor.u32 %v3526_v60, %v3523_v35  ;;  %v3518_v21 = vrot.slane %v3516_v16, 5  ;;  %3124 = vrot.lane.b32.xlu1 %v2949_v56, %s7477_s25  ;;  %v124_v43 = vld [vmem:[#allocation2 + $0x3c] sm:$0x1] }
  0x77   :  { %v1902_v18 = vsel %vm1848_vm1, %v1901_v3, %v1900_v24  ;;  %v977_v23 = vmax.f32 %v6682_v2, %v6810_v9  ;;  %v3535_v29 = vshrl.u32 %v3478_v20, 16  ;;  %v3538_v37 = vshll.u32 %v3478_v20, 16  ;;  %v8421_v60 = vld [vmem:[%s11975_s0 + $0xc0] sm:$0x1]  ;;  %v8426_v2 = vld [vmem:[%s11975_s0 + $0xc2] sm:$0x1] }
  0x78   :  { %v1904_v31 = vsel %vm1851_vm8, %v1903_v49, %v1902_v18  ;;  %v3513_v59 = vor.u32 %v3512_v28, %v3509_v27  ;;  %v3544_v50 = vshll.u32 %v3479_v53, 16  ;;  %v8406_v38 = vrot.slane %v3530_v13, 5  ;;  %3413 = vrot.lane.b32.xlu0 %v3379_v26, %s7478_s13  ;;  %v8431_v44 = vld [vmem:[%s11975_s0 + $0xc1] sm:$0x1]  ;;  %v8436_v49 = vld [vmem:[%s11975_s0 + $0xc3] sm:$0x1] }
  0x79   :  { %v2056_v41 = vpack.c.b16 %v1904_v31, %v1904_v31  ;;  %v1105_v42 = vmax.f32 %v849_v32, %v977_v23  ;;  %v3537_v40 = vrot.slane %v3535_v29, 4  ;;  %v3540_v30 = vrot.slane %v3538_v37, 5  ;;  %v8444_v13 = vld [vmem:[%s11975_s0 + $0xc4] sm:$0x1]  ;;  %v8449_v16 = vld [vmem:[%s11975_s0 + $0xc6] sm:$0x1] }
  0x7a   :  { %v3514_v39 = vrot.slane %v3513_v59, 4  ;;  %v8411_v48 = vrot.slane %v3527_v62, 4  ;;  %v7076_v54 = vrot.slane %v8398_v58, 9  ;;  %v3546_v56 = vrot.slane %v3544_v50, 5  ;;  %3411 = vrot.lane.b32.xlu1 %v3378_v22, %s7478_s13  ;;  %v8454_v45 = vld [vmem:[%s11975_s0 + $0xc8] sm:$0x1] }
  0x7b   :  { %v2140_v34 = vsel %vm7789_vm9, %v2056_v41, %v2139_v14  ;;  %v7331_v47 = vpack.c.bf16 %v1105_v42, %v1105_v42  ;;  %v3541_v55 = vor.u32 %v3540_v30, %v3537_v40  ;;  %v3865_v57 = vrot.slane %v3798_v5, 5  ;;  %v8459_v20 = vld [vmem:[%s11975_s0 + $0xca] sm:$0x1]  ;;  %v8464_v24 = vld [vmem:[%s11975_s0 + $0xc5] sm:$0x1] }
  0x7c   :  { %2141 = vst [vmem:[#allocation2 + $0x28] sm:$0xf] %v2140_v34  ;;  %v3519_v12 = vsel %vm7664_vm7, %v3514_v39, %v3518_v21  ;;  %v7075_v17 = vrot.slane %v8401_v10, 9  ;;  %v2337_v63 = vshrl.u32 %v2253_v19, 16  ;;  %v2340_v3 = vshll.u32 %v2253_v19, 16 }
  0x7d   :  { %v2142_v61 = vld [vmem:[#allocation2 + $0x2c] sm:$0x1]  ;;  %v2346_v35 = vshll.u32 %v2254_v46, 16  ;;  %v3542_v8 = vrot.slane %v3541_v55, 4  ;;  %v3861_v9 = vrot.slane %v8404_v51, 5  ;;  %v7077_v15 = vrot.slane %v3799_v7, 9  ;;  %3730 = vrot.lane.b32.xlu0 %v3519_v12, %s7479_s16 }
  0x7e   :  { %v2143_v6 = vsel %vm7543_vm4, %v7331_v47, %v2142_v61  ;;  %v2339_v26 = vrot.slane %v2337_v63, 4  ;;  %v2342_v27 = vrot.slane %v2340_v3, 5  ;;  %v3869_v28 = vrot.slane %v3800_v36, 5  ;;  %v8470_v32 = vld [vmem:[%s11975_s0 + $0xc7] sm:$0x1] }
  0x7f   :  { %2144 = vst [vmem:[#allocation2 + $0x2c] sm:$0x1] %v2143_v6  ;;  %v3547_v53 = vsel %vm7664_vm7, %v3542_v8, %v3546_v56  ;;  %v63_v18 = vsel %vm7543_vm4, 0, %v62_v33  ;;  %v125_v14 = vsel %vm7559_vm6, 0, %v124_v43  ;;  %v8481_v62 = vld [vmem:[%s11975_s0 + $0xcc] sm:$0x1]  ;;  %v3533_v58 = vsel %vm7664_vm7, %v8411_v48, %v8406_v38 }
  0x80   :  { %v8486_v21 = vld [vmem:[%s11975_s0 + $0xc9] sm:$0x1]  ;;  %v8491_v23 = vld [vmem:[%s11975_s0 + $0xcb] sm:$0x1]  ;;  %v8499_v22 = vsel %vm7656_vm12, %v7076_v54, %v3865_v57  ;;  %v2343_v31 = vor.u32 %v2342_v27, %v2339_v26  ;;  %v8501_v59 = vrot.slane %v2346_v35, 5  ;;  %v3862_v5 = vsel %vm7656_vm12, %v7075_v17, %v3861_v9 }
  0x81   :  { %64 = vst [vmem:[#allocation2 + $0x38] sm:$0x1] %v63_v18  ;;  %126 = vst [vmem:[#allocation2 + $0x3c] sm:$0x1] %v125_v14  ;;  %v8506_v29 = vld [vmem:[%s11975_s0 + $0xce] sm:$0x1]  ;;  %v8517_v10 = vsel %vm7656_vm12, %v7077_v15, %v3869_v28  ;;  %v858_v51 = vmax.f32 %v8421_v60, %v8431_v44  ;;  %v859_v19 = vmax.f32 %v8426_v2, %v8436_v49  ;;  %3734 = vrot.lane.b32.xlu0 %v3547_v53, %s7479_s16 }
  0x82   :  { %v8511_v37 = vld [vmem:[%s11975_s0 + $0xcd] sm:$0x1]  ;;  %v8522_v41 = vld [vmem:[%s11975_s0 + $0xcf] sm:$0x1]  ;;  %v6691_v42 = vld [vmem:[%s11975_s0 + $0xd0] sm:$0x1]  ;;  %v860_v30 = vmax.f32 %v8444_v13, %v8464_v24  ;;  %v861_v46 = vmax.f32 %v8449_v16, %v8470_v32  ;;  %v862_v34 = vmax.f32 %v8454_v45, %v8486_v21  ;;  %v863_v48 = vmax.f32 %v8459_v20, %v8491_v23 }
  0x83   :  { %v8530_v50 = vld [vmem:[%s11975_s0 + $0xd2] sm:$0x1]  ;;  %v3380_v38 = vld [vmem:[#allocation2 + $0x28] sm:$0xf]  ;;  %v6693_v55 = vld [vmem:[%s11975_s0 + $0xd4] sm:$0x1]  ;;  %v864_v63 = vmax.f32 %v8481_v62, %v8511_v37  ;;  %v865_v3 = vmax.f32 %v8506_v29, %v8522_v41 }
  0x84   :  { %v3480_v39 = vld [vmem:[#allocation2 + $0x28] sm:$0xf]  ;;  %3415 = vrot.lane.b32.xlu1 %v3380_v38, %s7478_s13  ;;  %v2344_v56 = vrot.slane %v2343_v31, 4  ;;  %v6694_v33 = vld [vmem:[%s11975_s0 + $0xd6] sm:$0x1]  ;;  %vm2552_vm10 = vcmask 60448  }
  0x85   :  { %v2255_v40 = vld [vmem:[#allocation2 + $0x28] sm:$0xf]  ;;  %v3549_v47 = vshrl.u32 %v3480_v39, 16  ;;  %v3552_v54 = vshll.u32 %v3480_v39, 16  ;;  %v6695_v43 = vld [vmem:[%s11975_s0 + $0xd8] sm:$0x1]  ;;  %3923 = vrot.lane.b32.xlu0 %v3862_v5, %s7480_s20 }
  0x86   :  { %v2351_v7 = vshrl.u32 %v2255_v40, 16  ;;  %v2354_v36 = vshll.u32 %v2255_v40, 16  ;;  %v3801_v12 = vld [vmem:[#allocation2 + $0x28] sm:$0xe]  ;;  %v6819_v61 = vld [vmem:[%s11975_s0 + $0xd1] sm:$0x1]  ;;  %v2349_v18 = vsel %vm7664_vm7, %v2344_v56, %v8501_v59 }
  0x87   :  { %v7078_v57 = vrot.slane %v3801_v12, 9  ;;  %v6820_v17 = vld [vmem:[%s11975_s0 + $0xd3] sm:$0x1]  ;;  %v3481_v35 = vld [vmem:[#allocation2 + $0x2c] sm:$0x1]  ;;  %v3551_v60 = vrot.slane %v3549_v47, 4  ;;  %v986_v13 = vmax.f32 %v6691_v42, %v6819_v61 }
  0x88   :  { %v3554_v44 = vrot.slane %v3552_v54, 5  ;;  %v2256_v6 = vld [vmem:[#allocation2 + $0x2c] sm:$0x1]  ;;  %v6696_v8 = vld [vmem:[%s11975_s0 + $0xda] sm:$0x1]  ;;  %v987_v16 = vmax.f32 %v8530_v50, %v6820_v17  ;;  %v3558_v24 = vshll.u32 %v3481_v35, 16  ;;  %3732 = vrot.lane.b32.xlu1 %v3533_v58, %s7479_s16 }
  0x89   :  { %v6697_v9 = vld [vmem:[%s11975_s0 + $0xdc] sm:$0x1]  ;;  %v6698_v15 = vld [vmem:[%s11975_s0 + $0xde] sm:$0x1]  ;;  %v2353_v26 = vrot.slane %v2351_v7, 4  ;;  %v2356_v27 = vrot.slane %v2354_v36, 5  ;;  %v1114_v29 = vmax.f32 %v858_v51, %v986_v13  ;;  %2512 = vrot.lane.b32.xlu0 %v2349_v18, %s7474_s9 }
  0x8a   :  { %v2360_v28 = vshll.u32 %v2256_v6, 16  ;;  %v3802_v32 = vld [vmem:[#allocation2 + $0x2c] sm:$0x1]  ;;  %v3555_v53 = vor.u32 %v3554_v44, %v3551_v60  ;;  %v6821_v62 = vld [vmem:[%s11975_s0 + $0xd5] sm:$0x1]  ;;  %v3560_v37 = vrot.slane %v3558_v24, 5  ;;  %v1115_v56 = vmax.f32 %v859_v19, %v987_v16 }
  0x8b   :  { %v3873_v14 = vrot.slane %v3802_v32, 5  ;;  %v6822_v31 = vld [vmem:[%s11975_s0 + $0xd7] sm:$0x1]  ;;  %v2357_v5 = vor.u32 %v2356_v27, %v2353_v26  ;;  %v6823_v58 = vld [vmem:[%s11975_s0 + $0xd9] sm:$0x1]  ;;  %v988_v42 = vmax.f32 %v6693_v55, %v6821_v62  ;;  %v7247_v49 = vpack.c.bf16 %v1114_v29, %v1114_v29 }
  0x8c   :  { %v8586_v41 = vrot.slane %v2360_v28, 5  ;;  %v6824_v59 = vld [vmem:[%s11975_s0 + $0xdb] sm:$0x1]  ;;  %v3556_v50 = vrot.slane %v3555_v53, 4  ;;  %v6825_v51 = vld [vmem:[%s11975_s0 + $0xdd] sm:$0x1]  ;;  %v989_v40 = vmax.f32 %v6694_v33, %v6822_v31  ;;  %v990_v47 = vmax.f32 %v6695_v43, %v6823_v58 }
  0x8d   :  { %v8596_v38 = vsel %vm7656_vm12, %v7078_v57, %v3873_v14  ;;  %v6826_v39 = vld [vmem:[%s11975_s0 + $0xdf] sm:$0x1]  ;;  %v8604_v54 = vrot.slane %v2357_v5, 4  ;;  %v991_v7 = vmax.f32 %v6696_v8, %v6824_v59  ;;  %v992_v36 = vmax.f32 %v6697_v9, %v6825_v51  ;;  %3927 = vrot.lane.b32.xlu0 %v8517_v10, %s7480_s20  ;;  %v59_v9 = vld [vmem:[#allocation2 + $0x30] sm:$0x1] }
  0x8e   :  { %v993_v12 = vmax.f32 %v6698_v15, %v6826_v39  ;;  %v3561_v55 = vsel %vm7664_vm7, %v3556_v50, %v3560_v37  ;;  %v1116_v57 = vmax.f32 %v860_v30, %v988_v42  ;;  %v1117_v61 = vmax.f32 %v861_v46, %v989_v40  ;;  %v2154_v46 = vld [vmem:[#allocation2 + $0x3c] sm:$0x1]  ;;  %v121_v45 = vld [vmem:[#allocation2 + $0x34] sm:$0x1]  ;;  %v8628_v20 = vld [vmem:[%s11975_s0 + $0xa0] sm:$0x1] }
  0x8f   :  { %3736 = vrot.lane.b32.xlu1 %v3561_v55, %s7479_s16  ;;  %v2363_v33 = vsel %vm7664_vm7, %v8604_v54, %v8586_v41  ;;  %v1118_v43 = vmax.f32 %v862_v34, %v990_v47  ;;  %v1119_v17 = vmax.f32 %v863_v48, %v991_v7  ;;  %v1120_v35 = vmax.f32 %v864_v63, %v992_v36  ;;  %v8633_v21 = vld [vmem:[%s11975_s0 + $0xa1] sm:$0x1]  ;;  %v8638_v63 = vld [vmem:[%s11975_s0 + $0xa2] sm:$0x1]  ;;  %v8648_v15 = vld [vmem:[%s11975_s0 + $0xa6] sm:$0x1] }
  0x90   :  { %v1121_v2 = vmax.f32 %v865_v3, %v993_v12  ;;  %v7248_v19 = vpack.c.bf16 %v1115_v56, %v1115_v56  ;;  %v7249_v30 = vpack.c.bf16 %v1116_v57, %v1116_v57  ;;  %v7250_v60 = vpack.c.bf16 %v1117_v61, %v1117_v61  ;;  %v8643_v3 = vld [vmem:[%s11975_s0 + $0xa4] sm:$0x1]  ;;  %v8653_v13 = vld [vmem:[%s11975_s0 + $0xa3] sm:$0x1]  ;;  %v8658_v16 = vld [vmem:[%s11975_s0 + $0xa5] sm:$0x1] }
  0x91   :  { %v7251_v44 = vpack.c.bf16 %v1118_v43, %v1118_v43  ;;  %v7252_v6 = vpack.c.bf16 %v1119_v17, %v1119_v17  ;;  %v7253_v8 = vpack.c.bf16 %v1120_v35, %v1120_v35  ;;  %v1754_v23 = vunpack.c.l.b16 %v7247_v49  ;;  %v8663_v24 = vld [vmem:[%s11975_s0 + $0xa7] sm:$0x1]  ;;  %v8670_v53 = vld [vmem:[%s11975_s0 + $0xa8] sm:$0x1]  ;;  %v8675_v18 = vld [vmem:[%s11975_s0 + $0xaa] sm:$0x1] }
  0x92   :  { %v1755_v34 = vunpack.c.l.b16 %v7248_v19  ;;  %v1756_v48 = vunpack.c.l.b16 %v7249_v30  ;;  %v7333_v10 = vpack.c.bf16 %v1121_v2, %v1121_v2  ;;  %v1757_v26 = vunpack.c.l.b16 %v7250_v60  ;;  %v8680_v14 = vld [vmem:[%s11975_s0 + $0xac] sm:$0x1]  ;;  %v8690_v62 = vld [vmem:[%s11975_s0 + $0xab] sm:$0x1]  ;;  %v8695_v31 = vld [vmem:[%s11975_s0 + $0xad] sm:$0x1] }
  0x93   :  { %3925 = vrot.lane.b32.xlu1 %v8499_v22, %s7480_s20  ;;  %v1758_v27 = vunpack.c.l.b16 %v7251_v44  ;;  %v1759_v28 = vunpack.c.l.b16 %v7252_v6  ;;  %v1760_v32 = vunpack.c.l.b16 %v7253_v8  ;;  %v8685_v22 = vld [vmem:[%s11975_s0 + $0xa9] sm:$0x1]  ;;  %v1918_v29 = vrot.slane %v1754_v23, 7  ;;  %v344_v58 = vld [vmem:[%s11975_s0 + $0xae] sm:$0x1] }
  0x94   :  { %v1919_v37 = vrot.slane %v1755_v34, 6  ;;  %v1921_v5 = vrot.slane %v1756_v48, 5  ;;  %v2155_v41 = vsel %vm7543_vm4, %v7333_v10, %v2154_v46  ;;  %v472_v59 = vld [vmem:[%s11975_s0 + $0xaf] sm:$0x1]  ;;  %v6683_v42 = vld [vmem:[%s11975_s0 + $0xb0] sm:$0x1]  ;;  %v850_v56 = vmax.f32 %v8628_v20, %v8633_v21 }
  0x95   :  { %v1923_v50 = vrot.slane %v1757_v26, 4  ;;  %v1925_v51 = vrot.slane %v1758_v27, 3  ;;  %v1927_v39 = vrot.slane %v1759_v28, 2  ;;  %v1929_v40 = vrot.slane %v1760_v32, 1  ;;  %2156 = vst [vmem:[#allocation2 + $0x3c] sm:$0x1] %v2155_v41 }
  0x96   :  { %v6684_v47 = vld [vmem:[%s11975_s0 + $0xb2] sm:$0x1]  ;;  %v1920_v54 = vsel %vm1836_vm11, %v1919_v37, %v1918_v29  ;;  %v60_v7 = vsel %vm7543_vm4, 0, %v59_v9  ;;  %v122_v36 = vsel %vm7559_vm6, 0, %v121_v45  ;;  %v6685_v12 = vld [vmem:[%s11975_s0 + $0xb4] sm:$0x1]  ;;  %v851_v35 = vmax.f32 %v8638_v63, %v8653_v13 }
  0x97   :  { %v6686_v55 = vld [vmem:[%s11975_s0 + $0xb6] sm:$0x1]  ;;  %2514 = vrot.lane.b32.xlu1 %v2363_v33, %s7474_s9  ;;  %v1922_v57 = vsel %vm11993_vm13, %v1921_v5, %v1920_v54  ;;  %61 = vst [vmem:[#allocation2 + $0x30] sm:$0x1] %v60_v7  ;;  %123 = vst [vmem:[#allocation2 + $0x34] sm:$0x1] %v122_v36  ;;  %v852_v33 = vmax.f32 %v8643_v3, %v8658_v16  ;;  %v853_v2 = vmax.f32 %v8648_v15, %v8663_v24 }
  0x98   :  { %v6687_v61 = vld [vmem:[%s11975_s0 + $0xb8] sm:$0x1]  ;;  %v6688_v43 = vld [vmem:[%s11975_s0 + $0xba] sm:$0x1]  ;;  %v6689_v17 = vld [vmem:[%s11975_s0 + $0xbc] sm:$0x1]  ;;  %v1924_v49 = vsel %vm11989_vm14, %v1923_v50, %v1922_v57  ;;  %v854_v60 = vmax.f32 %v8670_v53, %v8685_v22  ;;  %v855_v44 = vmax.f32 %v8675_v18, %v8690_v62  ;;  %v856_v6 = vmax.f32 %v8680_v14, %v8695_v31 }
  0x99   :  { %v6690_v19 = vld [vmem:[%s11975_s0 + $0xbe] sm:$0x1]  ;;  %v6811_v30 = vld [vmem:[%s11975_s0 + $0xb1] sm:$0x1]  ;;  %v6812_v46 = vld [vmem:[%s11975_s0 + $0xb3] sm:$0x1]  ;;  %v1926_v8 = vsel %vm1845_vm15, %v1925_v51, %v1924_v49  ;;  %v857_v21 = vmax.f32 %v344_v58, %v472_v59 }
  0x9a   :  { %v6813_v9 = vld [vmem:[%s11975_s0 + $0xb5] sm:$0x1]  ;;  %v6814_v45 = vld [vmem:[%s11975_s0 + $0xb7] sm:$0x1]  ;;  %v6815_v20 = vld [vmem:[%s11975_s0 + $0xb9] sm:$0x1]  ;;  %v978_v23 = vmax.f32 %v6683_v42, %v6811_v30  ;;  %v979_v34 = vmax.f32 %v6684_v47, %v6812_v46  ;;  %v1928_v48 = vsel %vm1848_vm1, %v1927_v39, %v1926_v8 }
  0x9b   :  { %v6816_v10 = vld [vmem:[%s11975_s0 + $0xbb] sm:$0x1]  ;;  %v6817_v63 = vld [vmem:[%s11975_s0 + $0xbd] sm:$0x1]  ;;  %v6818_v3 = vld [vmem:[%s11975_s0 + $0xbf] sm:$0x1]  ;;  %v980_v15 = vmax.f32 %v6685_v12, %v6813_v9  ;;  %v981_v13 = vmax.f32 %v6686_v55, %v6814_v45  ;;  %v982_v16 = vmax.f32 %v6687_v61, %v6815_v20  ;;  %3929 = vrot.lane.b32.xlu1 %v8596_v38, %s7480_s20  ;;  %v1930_v24 = vsel %vm1851_vm8, %v1929_v40, %v1928_v48 }
  0x9c   :  { %v2151_v26 = vld [vmem:[#allocation2 + $0x38] sm:$0xf]  ;;  %v983_v27 = vmax.f32 %v6688_v43, %v6816_v10  ;;  %v984_v28 = vmax.f32 %v6689_v17, %v6817_v63  ;;  %v985_v32 = vmax.f32 %v6690_v19, %v6818_v3  ;;  %v2060_v53 = vpack.c.b16 %v1930_v24, %v1930_v24  ;;  %v2260_v54 = vld [vmem:[#allocation2 + $0x3c] sm:$0x1]  ;;  %v2579_v17 = vld [vmem:[#allocation2 + $0x28] sm:$0xe] }
  0x9d   :  { %v1106_v18 = vmax.f32 %v850_v56, %v978_v23  ;;  %v1107_v14 = vmax.f32 %v851_v35, %v979_v34  ;;  %v1108_v22 = vmax.f32 %v852_v33, %v980_v15  ;;  %v1109_v62 = vmax.f32 %v853_v2, %v981_v13  ;;  %v2580_v35 = vld [vmem:[#allocation2 + $0x2c] sm:$0x1]  ;;  %v8784_v30 = vld [vmem:[#allocation2 + $0x3c] sm:$0x1]  ;;  %v65_v46 = vld [vmem:[#allocation2 + $0x40] sm:$0x1] }
  0x9e   :  { %v1110_v31 = vmax.f32 %v854_v60, %v982_v16  ;;  %v1111_v29 = vmax.f32 %v855_v44, %v983_v27  ;;  %v2152_v37 = vsel %vm7789_vm9, %v2060_v53, %v2151_v26  ;;  %v1112_v5 = vmax.f32 %v856_v6, %v984_v28  ;;  %v2148_v47 = vld [vmem:[#allocation2 + $0x34] sm:$0x1]  ;;  %v8789_v6 = vld [vmem:[%s11975_s0 + $0xe0] sm:$0x1]  ;;  %v8794_v8 = vld [vmem:[%s11975_s0 + $0xe1] sm:$0x1] }
  0x9f   :  { %v1113_v41 = vmax.f32 %v857_v21, %v985_v32  ;;  %v7239_v58 = vpack.c.bf16 %v1106_v18, %v1106_v18  ;;  %2153 = vst [vmem:[#allocation2 + $0x38] sm:$0xf] %v2152_v37  ;;  %v7240_v38 = vpack.c.bf16 %v1107_v14, %v1107_v14  ;;  %v7241_v59 = vpack.c.bf16 %v1108_v22, %v1108_v22  ;;  %v8800_v21 = vld [vmem:[%s11975_s0 + $0xe2] sm:$0x1]  ;;  %v8805_v23 = vld [vmem:[%s11975_s0 + $0xe4] sm:$0x1] }
  0xa0   :  { %v7242_v42 = vpack.c.bf16 %v1109_v62, %v1109_v62  ;;  %v7243_v50 = vpack.c.bf16 %v1110_v31, %v1110_v31  ;;  %v7244_v51 = vpack.c.bf16 %v1111_v29, %v1111_v29  ;;  %v7245_v39 = vpack.c.bf16 %v1112_v5, %v1112_v5  ;;  %v8810_v34 = vld [vmem:[%s11975_s0 + $0xe3] sm:$0x1]  ;;  %v8815_v48 = vld [vmem:[%s11975_s0 + $0xe5] sm:$0x1]  ;;  %v8823_v16 = vld [vmem:[%s11975_s0 + $0xe6] sm:$0x1] }
  0xa1   :  { %v1746_v40 = vunpack.c.l.b16 %v7239_v58  ;;  %v1747_v7 = vunpack.c.l.b16 %v7240_v38  ;;  %v1748_v36 = vunpack.c.l.b16 %v7241_v59  ;;  %v7332_v55 = vpack.c.bf16 %v1113_v41, %v1113_v41  ;;  %v8828_v24 = vld [vmem:[%s11975_s0 + $0xe8] sm:$0x1]  ;;  %v484_v26 = vld [vmem:[%s11975_s0 + $0xe7] sm:$0x1]  ;;  %v485_v27 = vld [vmem:[%s11975_s0 + $0xe9] sm:$0x1] }
  0xa2   :  { %v1749_v12 = vunpack.c.l.b16 %v7242_v42  ;;  %v1750_v56 = vunpack.c.l.b16 %v7243_v50  ;;  %v1751_v57 = vunpack.c.l.b16 %v7244_v51  ;;  %v1752_v61 = vunpack.c.l.b16 %v7245_v39  ;;  %v358_v18 = vld [vmem:[%s11975_s0 + $0xea] sm:$0x1]  ;;  %v359_v14 = vld [vmem:[%s11975_s0 + $0xec] sm:$0x1]  ;;  %v486_v22 = vld [vmem:[%s11975_s0 + $0xeb] sm:$0x1] }
  0xa3   :  { %v1905_v43 = vrot.slane %v1746_v40, 7  ;;  %v1906_v33 = vrot.slane %v1747_v7, 6  ;;  %v1908_v2 = vrot.slane %v1748_v36, 5  ;;  %v2149_v19 = vsel %vm7543_vm4, %v7332_v55, %v2148_v47  ;;  %v487_v62 = vld [vmem:[%s11975_s0 + $0xed] sm:$0x1] }
  0xa4   :  { %v1910_v49 = vrot.slane %v1749_v12, 4  ;;  %v2388_v60 = vshll.u32 %v2260_v54, 16  ;;  %v1912_v44 = vrot.slane %v1750_v56, 3  ;;  %2150 = vst [vmem:[#allocation2 + $0x34] sm:$0x1] %v2149_v19  ;;  %v1914_v45 = vrot.slane %v1751_v57, 2 }
  0xa5   :  { %v1907_v9 = vsel %vm1836_vm11, %v1906_v33, %v1905_v43  ;;  %v1916_v20 = vrot.slane %v1752_v61, 1  ;;  %v7048_v3 = vrot.slane %v2579_v17, 9  ;;  %v2658_v15 = vrot.slane %v2580_v35, 5  ;;  %v2145_v37 = vld [vmem:[#allocation2 + $0x30] sm:$0xf] }
  0xa6   :  { %v2259_v10 = vld [vmem:[#allocation2 + $0x38] sm:$0xf]  ;;  %v1909_v63 = vsel %vm11993_vm13, %v1908_v2, %v1907_v9  ;;  %v66_v13 = vsel %vm7543_vm4, 0, %v65_v46  ;;  %v2390_v31 = vrot.slane %v2388_v60, 5  ;;  %v2666_v5 = vrot.slane %v8784_v30, 5 }
  0xa7   :  { %v2379_v28 = vshrl.u32 %v2259_v10, 16  ;;  %v2382_v32 = vshll.u32 %v2259_v10, 16  ;;  %v1911_v53 = vsel %vm11989_vm14, %v1910_v49, %v1909_v63  ;;  %67 = vst [vmem:[#allocation2 + $0x40] sm:$0x1] %v66_v13  ;;  %v6699_v41 = vld [vmem:[%s11975_s0 + $0xf0] sm:$0x1]  ;;  %v866_v40 = vmax.f32 %v8789_v6, %v8794_v8 }
  0xa8   :  { %v1913_v29 = vsel %vm1845_vm15, %v1912_v44, %v1911_v53  ;;  %v6700_v58 = vld [vmem:[%s11975_s0 + $0xf2] sm:$0x1]  ;;  %v8858_v50 = vld [vmem:[#allocation2 + $0x38] sm:$0xe]  ;;  %v6701_v51 = vld [vmem:[%s11975_s0 + $0xf4] sm:$0x1]  ;;  %v2659_v54 = vsel %vm7656_vm12, %v7048_v3, %v2658_v15  ;;  %v867_v55 = vmax.f32 %v8800_v21, %v8810_v34  ;;  %v868_v56 = vmax.f32 %v8805_v23, %v8815_v48 }
  0xa9   :  { %v2381_v38 = vrot.slane %v2379_v28, 4  ;;  %v2384_v59 = vrot.slane %v2382_v32, 5  ;;  %v1915_v42 = vsel %vm1848_vm1, %v1914_v45, %v1913_v29  ;;  %v6702_v39 = vld [vmem:[%s11975_s0 + $0xf6] sm:$0x1]  ;;  %v6703_v7 = vld [vmem:[%s11975_s0 + $0xf8] sm:$0x1]  ;;  %v869_v33 = vmax.f32 %v8823_v16, %v484_v26 }
  0xaa   :  { %v1917_v47 = vsel %vm1851_vm8, %v1916_v20, %v1915_v42  ;;  %v6827_v36 = vld [vmem:[%s11975_s0 + $0xf1] sm:$0x1]  ;;  %v6828_v12 = vld [vmem:[%s11975_s0 + $0xf3] sm:$0x1]  ;;  %v6704_v43 = vld [vmem:[%s11975_s0 + $0xfa] sm:$0x1]  ;;  %v870_v2 = vmax.f32 %v8828_v24, %v485_v27  ;;  %v871_v46 = vmax.f32 %v358_v18, %v486_v22  ;;  %v872_v60 = vmax.f32 %v359_v14, %v487_v62 }
  0xab   :  { %v2385_v57 = vor.u32 %v2384_v59, %v2381_v38  ;;  %v2058_v61 = vpack.c.b16 %v1917_v47, %v1917_v47  ;;  %v6705_v17 = vld [vmem:[%s11975_s0 + $0xfc] sm:$0x1]  ;;  %v6829_v35 = vld [vmem:[%s11975_s0 + $0xf5] sm:$0x1]  ;;  %v6830_v49 = vld [vmem:[%s11975_s0 + $0xf7] sm:$0x1]  ;;  %v994_v44 = vmax.f32 %v6699_v41, %v6827_v36  ;;  %v995_v6 = vmax.f32 %v6700_v58, %v6828_v12 }
  0xac   :  { %v6831_v19 = vld [vmem:[%s11975_s0 + $0xf9] sm:$0x1]  ;;  %v6832_v45 = vld [vmem:[%s11975_s0 + $0xfb] sm:$0x1]  ;;  %v6833_v20 = vld [vmem:[%s11975_s0 + $0xfd] sm:$0x1]  ;;  %v996_v21 = vmax.f32 %v6701_v51, %v6829_v35  ;;  %v997_v23 = vmax.f32 %v6702_v39, %v6830_v49  ;;  %v2701_v39 = vpop.permute.xlu0 %2700 }
  0xad   :  { %v2386_v8 = vrot.slane %v2385_v57, 4  ;;  %v2146_v9 = vsel %vm7789_vm9, %v2058_v61, %v2145_v37  ;;  %v2258_v34 = vld [vmem:[#allocation2 + $0x34] sm:$0x1]  ;;  %v7050_v48 = vrot.slane %v8858_v50, 9  ;;  %v998_v10 = vmax.f32 %v6703_v7, %v6831_v19  ;;  %v8913_v18 = vld [vmem:[#allocation2 + $0x20] sm:$0xe] }
  0xae   :  { %2147 = vst [vmem:[#allocation2 + $0x30] sm:$0xf] %v2146_v9  ;;  %v999_v63 = vmax.f32 %v6704_v43, %v6832_v45  ;;  %v1000_v3 = vmax.f32 %v6705_v17, %v6833_v20  ;;  %v1122_v13 = vmax.f32 %v866_v40, %v994_v44  ;;  %v1123_v16 = vmax.f32 %v867_v55, %v995_v6  ;;  %v8915_v29 = vld [vmem:[#allocation2 + $0x24] sm:$0x1]  ;;  %v8920_v50 = vld [vmem:[%s11975_s0 + $0xee] sm:$0x1] }
  0xaf   :  { %v2391_v15 = vsel %vm7664_vm7, %v2386_v8, %v2390_v31  ;;  %v1124_v24 = vmax.f32 %v868_v56, %v996_v21  ;;  %v1125_v26 = vmax.f32 %v869_v33, %v997_v23  ;;  %v1126_v27 = vmax.f32 %v870_v2, %v998_v10  ;;  %v8925_v51 = vld [vmem:[%s11975_s0 + $0xef] sm:$0x1]  ;;  %v6706_v12 = vld [vmem:[%s11975_s0 + $0xfe] sm:$0x1]  ;;  %v6834_v55 = vld [vmem:[%s11975_s0 + $0xff] sm:$0x1] }
  0xb0   :  { %2518 = vrot.lane.b32.xlu1 %v2391_v15, %s7474_s9  ;;  %v1127_v28 = vmax.f32 %v871_v46, %v999_v63  ;;  %v1128_v32 = vmax.f32 %v872_v60, %v1000_v3  ;;  %v2374_v53 = vshll.u32 %v2258_v34, 16  ;;  %v7255_v14 = vpack.c.bf16 %v1122_v13, %v1122_v13  ;;  %v8940_v33 = vld [vmem:[#allocation2 + $0x34] sm:$0x1]  ;;  %v2870_v6 = vld [vmem:[#allocation2 + $0x28] sm:$0xf]  ;;  %v2505_v63 = vpop.permute.xlu0 %2504 }
  0xb1   :  { %v7256_v22 = vpack.c.bf16 %v1123_v16, %v1123_v16  ;;  %v7257_v62 = vpack.c.bf16 %v1124_v24, %v1124_v24  ;;  %v7258_v37 = vpack.c.bf16 %v1125_v26, %v1125_v26  ;;  %v7259_v31 = vpack.c.bf16 %v1126_v27, %v1126_v27  ;;  %v2873_v20 = vld [vmem:[#allocation2 + $0x34] sm:$0x1]  ;;  %v127_v24 = vld [vmem:[#allocation2 + $0x44] sm:$0x1]  ;;  %v2213_v26 = vld [vmem:[#allocation2] sm:$0xf] }
  0xb2   :  { %v7260_v41 = vpack.c.bf16 %v1127_v28, %v1127_v28  ;;  %v7261_v58 = vpack.c.bf16 %v1128_v32, %v1128_v32  ;;  %v1762_v38 = vunpack.c.l.b16 %v7255_v14  ;;  %vm2748_vm3 = vcmask 93248   ;;  %v2871_v14 = vld [vmem:[#allocation2 + $0x2c] sm:$0x1]  ;;  %2229 = vst.msk [vmem:[#allocation4] sm:$0xf] %vm27_vm0, %v2213_v26 }
  0xb3   :  { %v1763_v59 = vunpack.c.l.b16 %v7256_v22  ;;  %v1764_v42 = vunpack.c.l.b16 %v7257_v62  ;;  %v7047_v40 = vrot.slane %v8913_v18, 9  ;;  %v1765_v47 = vunpack.c.l.b16 %v7258_v37  ;;  %2553 = vst.msk [vmem:[#allocation4] sm:$0xf] %vm2552_vm10, %v2505_v63  ;;  %v8975_v18 = vld [vmem:[#allocation2 + $0x28] sm:$0xe] }
  0xb4   :  { %2710 = vrot.lane.b32.xlu1 %v2659_v54, %s7473_s11  ;;  %v1766_v7 = vunpack.c.l.b16 %v7259_v31  ;;  %v1767_v36 = vunpack.c.l.b16 %v7260_v41  ;;  %v2376_v57 = vrot.slane %v2374_v53, 5  ;;  %v2654_v61 = vrot.slane %v8915_v29, 5  ;;  %v2874_v41 = vld [vmem:[#allocation2 + $0x38] sm:$0xf]  ;;  %2749 = vst.msk [vmem:[#allocation4] sm:$0xf] %vm2748_vm3, %v2701_v39 }
  0xb5   :  { %v2257_v56 = vld [vmem:[#allocation2 + $0x30] sm:$0xf]  ;;  %v2667_v54 = vsel %vm7656_vm12, %v7050_v48, %v2666_v5  ;;  %v1768_v43 = vunpack.c.l.b16 %v7261_v58  ;;  %v1931_v2 = vrot.slane %v1762_v38, 7  ;;  %v873_v19 = vmax.f32 %v8920_v50, %v8925_v51 }
  0xb6   :  { %v2365_v17 = vshrl.u32 %v2257_v56, 16  ;;  %v2368_v35 = vshll.u32 %v2257_v56, 16  ;;  %v2872_v49 = vld [vmem:[#allocation2 + $0x30] sm:$0xf]  ;;  %v1932_v46 = vrot.slane %v1763_v59, 6  ;;  %v1934_v60 = vrot.slane %v1764_v42, 5 }
  0xb7   :  { %v1936_v44 = vrot.slane %v1765_v47, 4  ;;  %v1001_v8 = vmax.f32 %v6706_v12, %v6834_v55  ;;  %v1938_v5 = vrot.slane %v1766_v7, 3  ;;  %v1940_v45 = vrot.slane %v1767_v36, 2  ;;  %v2770_v21 = vld [vmem:[#allocation2 + $0x30] sm:$0xf] }
  0xb8   :  { %v2367_v9 = vrot.slane %v2365_v17, 4  ;;  %v2370_v30 = vrot.slane %v2368_v35, 5  ;;  %2714 = vrot.lane.b32.xlu1 %v2667_v54, %s7473_s11  ;;  %v1933_v23 = vsel %vm1836_vm11, %v1932_v46, %v1931_v2  ;;  %v1942_v34 = vrot.slane %v1768_v43, 1  ;;  %v2581_v27 = vld [vmem:[#allocation2 + $0x30] sm:$0xe] }
  0xb9   :  { %v2965_v48 = vshrl.u32 %v2872_v49, 16  ;;  %v2968_v10 = vshll.u32 %v2872_v49, 16  ;;  %v1935_v15 = vsel %vm11993_vm13, %v1934_v60, %v1933_v23  ;;  %v2951_v13 = vshrl.u32 %v2870_v6, 16  ;;  %v2157_v7 = vld [vmem:[#allocation2 + $0x40] sm:$0xf]  ;;  %v8986_v23 = vpop.permute.xlu1 %2799 }
  0xba   :  { %v2371_v3 = vor.u32 %v2370_v30, %v2367_v9  ;;  %v2954_v16 = vshll.u32 %v2870_v6, 16  ;;  %v2662_v28 = vrot.slane %v8940_v33, 5  ;;  %v1937_v32 = vsel %vm11989_vm14, %v1936_v44, %v1935_v15  ;;  %v2875_v12 = vld [vmem:[#allocation2 + $0x3c] sm:$0x1]  ;;  %v8967_v17 = vld [vmem:[#allocation2 + $0x34] sm:$0x1] }
  0xbb   :  { %v2974_v53 = vshll.u32 %v2873_v20, 16  ;;  %v1939_v62 = vsel %vm1845_vm15, %v1938_v5, %v1937_v32  ;;  %v2967_v37 = vrot.slane %v2965_v48, 4  ;;  %v2970_v31 = vrot.slane %v2968_v10, 5  ;;  %v3484_v46 = vld [vmem:[#allocation2 + $0x38] sm:$0xf] }
  0xbc   :  { %v2372_v22 = vrot.slane %v2371_v3, 4  ;;  %2807 = vrot.lane.b32.xlu1 %v2770_v21, %s7475_s18  ;;  %v1941_v58 = vsel %vm1848_vm1, %v1940_v45, %v1939_v62  ;;  %v2953_v38 = vrot.slane %v2951_v13, 4  ;;  %v2956_v59 = vrot.slane %v2954_v16, 5  ;;  %v8973_v29 = vld [vmem:[#allocation2 + $0x30] sm:$0xe] }
  0xbd   :  { %v128_v42 = vsel %vm7559_vm6, 0, %v127_v24  ;;  %v7049_v51 = vrot.slane %v2581_v27, 9  ;;  %v1943_v47 = vsel %vm1851_vm8, %v1942_v34, %v1941_v58  ;;  %v1129_v36 = vmax.f32 %v873_v19, %v1001_v8  ;;  %v68_v19 = vld [vmem:[#allocation2 + $0x48] sm:$0x1]  ;;  %v8977_v44 = vld [vmem:[#allocation2 + $0x2c] sm:$0x1]  ;;  %v2798_v58 = vpop.permute.xlu0 %2797 }
  0xbe   :  { %v2377_v50 = vsel %vm7664_vm7, %v2372_v22, %v2376_v57  ;;  %129 = vst [vmem:[#allocation2 + $0x44] sm:$0x1] %v128_v42  ;;  %v2062_v55 = vpack.c.b16 %v1943_v47, %v1943_v47  ;;  %v2960_v56 = vshll.u32 %v2871_v14, 16  ;;  %v2979_v54 = vshrl.u32 %v2874_v41, 16  ;;  %v3485_v9 = vld [vmem:[#allocation2 + $0x3c] sm:$0x1] }
  0xbf   :  { %2516 = vrot.lane.b32.xlu0 %v2377_v50, %s7474_s9  ;;  %v2982_v43 = vshll.u32 %v2874_v41, 16  ;;  %v2655_v39 = vsel %vm7656_vm12, %v7047_v40, %v2654_v61  ;;  %v2971_v57 = vor.u32 %v2970_v31, %v2967_v37  ;;  %v8971_v33 = vrot.slane %v2974_v53, 5  ;;  %v3482_v30 = vld [vmem:[#allocation2 + $0x30] sm:$0xf]  ;;  %v130_v34 = vld [vmem:[#allocation2 + $0x4c] sm:$0x1] }
  0xc0   :  { %v2158_v35 = vsel %vm7789_vm9, %v2062_v55, %v2157_v7  ;;  %v2957_v2 = vor.u32 %v2956_v59, %v2953_v38  ;;  %v2988_v49 = vshll.u32 %v2875_v12, 16  ;;  %v7334_v60 = vpack.c.bf16 %v1129_v36, %v1129_v36  ;;  %v2769_v13 = vld [vmem:[#allocation2 + $0x28] sm:$0xf]  ;;  %v8996_v24 = vld [vmem:[#allocation2 + $0x38] sm:$0xe] }
  0xc1   :  { %2159 = vst [vmem:[#allocation2 + $0x40] sm:$0xf] %v2158_v35  ;;  %v2663_v40 = vsel %vm7656_vm12, %v7049_v51, %v2662_v28  ;;  %v8982_v61 = vrot.slane %v2960_v56, 5  ;;  %v2981_v6 = vrot.slane %v2979_v54, 4  ;;  %v2984_v8 = vrot.slane %v2982_v43, 5  ;;  %v9012_v56 = vpop.permute.xlu1 %2803 }
  0xc2   :  { %v2972_v5 = vrot.slane %v2971_v57, 4  ;;  %v69_v45 = vsel %vm7543_vm4, 0, %v68_v19  ;;  %v3577_v20 = vshrl.u32 %v3484_v46, 16  ;;  %v3580_v21 = vshll.u32 %v3484_v46, 16  ;;  %v3483_v22 = vld [vmem:[#allocation2 + $0x34] sm:$0x1] }
  0xc3   :  { %2708 = vrot.lane.b32.xlu0 %v2655_v39, %s7473_s11  ;;  %v8988_v48 = vrot.slane %v2957_v2, 4  ;;  %v8990_v63 = vrot.slane %v2988_v49, 5  ;;  %v7064_v3 = vrot.slane %v8973_v29, 9  ;;  %v3269_v15 = vrot.slane %v8967_v17, 5  ;;  %70 = vst [vmem:[#allocation2 + $0x48] sm:$0x1] %v69_v45 }
  0xc4   :  { %v3579_v26 = vrot.slane %v3577_v20, 4  ;;  %v3582_v27 = vrot.slane %v3580_v21, 5  ;;  %v3563_v28 = vshrl.u32 %v3482_v30, 16  ;;  %v2985_v32 = vor.u32 %v2984_v8, %v2981_v6  ;;  %v9001_v37 = vld [vmem:[#allocation2 + $0x3c] sm:$0x1] }
  0xc5   :  { %v2160_v10 = vld [vmem:[#allocation2 + $0x44] sm:$0x1]  ;;  %v7063_v53 = vrot.slane %v8975_v18, 9  ;;  %v3265_v14 = vrot.slane %v8977_v44, 5  ;;  %v3566_v62 = vshll.u32 %v3482_v30, 16  ;;  %v3586_v31 = vshll.u32 %v3485_v9, 16 }
  0xc6   :  { %v2161_v16 = vsel %vm7543_vm4, %v7334_v60, %v2160_v10  ;;  %v3565_v41 = vrot.slane %v3563_v28, 4  ;;  %vm11994_vm5 = vcmask 126048   ;;  %v131_v38 = vsel %vm7559_vm6, 0, %v130_v34  ;;  %v2771_v47 = vld [vmem:[#allocation2 + $0x38] sm:$0xf] }
  0xc7   :  { %2712 = vrot.lane.b32.xlu0 %v2663_v40, %s7473_s11  ;;  %2162 = vst [vmem:[#allocation2 + $0x44] sm:$0x1] %v2161_v16  ;;  %v2977_v42 = vsel %vm7664_vm7, %v2972_v5, %v8971_v33  ;;  %2846 = vst.msk [vmem:[#allocation4] sm:$0xf] %vm11994_vm5, %v2798_v58  ;;  %v3583_v12 = vor.u32 %v3582_v27, %v3579_v26  ;;  %v3572_v55 = vshll.u32 %v3483_v22, 16  ;;  %v9019_v39 = vrot.slane %v2985_v32, 4 }
  0xc8   :  { %v2772_v59 = vld [vmem:[#allocation2 + $0x40] sm:$0xf]  ;;  %132 = vst [vmem:[#allocation2 + $0x4c] sm:$0x1] %v131_v38  ;;  %v9014_v54 = vld [vmem:[#allocation2 + $0x38] sm:$0xe]  ;;  %v2963_v45 = vsel %vm7664_vm7, %v8988_v48, %v8982_v61  ;;  %v3266_v17 = vsel %vm7656_vm12, %v7063_v53, %v3265_v14 }
  0xc9   :  { %v2876_v50 = vld [vmem:[#allocation2 + $0x40] sm:$0xf]  ;;  %2811 = vrot.lane.b32.xlu1 %v2772_v59, %s7475_s18  ;;  %v9016_v43 = vld [vmem:[#allocation2 + $0x3c] sm:$0x1]  ;;  %v7065_v57 = vrot.slane %v8996_v24, 9  ;;  %v3273_v35 = vrot.slane %v9001_v37, 5 }
  0xca   :  { %v9008_v51 = vld [vmem:[#allocation2 + $0x40] sm:$0xe]  ;;  %v2993_v7 = vshrl.u32 %v2876_v50, 16  ;;  %v2996_v36 = vshll.u32 %v2876_v50, 16  ;;  %v3568_v33 = vrot.slane %v3566_v62, 5  ;;  %v9024_v60 = vrot.slane %v3586_v31, 5  ;;  %v9042_v22 = vpop.permute.xlu0 %2801  ;;  %v9046_v59 = vpop.permute.xlu1 %2702 }
  0xcb   :  { %2805 = vrot.lane.b32.xlu0 %v2769_v13, %s7475_s18  ;;  %v3486_v2 = vld [vmem:[#allocation2 + $0x40] sm:$0xf]  ;;  %v7066_v46 = vrot.slane %v9008_v51, 9  ;;  %v3488_v40 = vld [vmem:[#allocation2 + $0x48] sm:$0xf]  ;;  %v9035_v10 = vrot.slane %v3583_v12, 4  ;;  %v3274_v29 = vsel %vm7656_vm12, %v7065_v57, %v3273_v35 }
  0xcc   :  { %v2995_v49 = vrot.slane %v2993_v7, 4  ;;  %v2998_v19 = vrot.slane %v2996_v36, 5  ;;  %v3569_v6 = vor.u32 %v3568_v33, %v3565_v41  ;;  %v3605_v8 = vshrl.u32 %v3488_v40, 16  ;;  %v9026_v5 = vld [vmem:[#allocation2 + $0x30] sm:$0xe] }
  0xcd   :  { %v3608_v9 = vshll.u32 %v3488_v40, 16  ;;  %v3591_v30 = vshrl.u32 %v3486_v2, 16  ;;  %3128 = vrot.lane.b32.xlu1 %v2977_v42, %s7477_s25  ;;  %v9037_v13 = vrot.slane %v3572_v55, 5  ;;  %v9039_v16 = vld [vmem:[#allocation2 + $0x34] sm:$0x1]  ;;  %v7080_v61 = vrot.slane %v9014_v54, 9 }
  0xce   :  { %v2877_v20 = vld [vmem:[#allocation2 + $0x44] sm:$0x1]  ;;  %v2999_v21 = vor.u32 %v2998_v19, %v2995_v49  ;;  %v74_v26 = vld [vmem:[#allocation2 + $0x58] sm:$0x1]  ;;  %v3607_v28 = vrot.slane %v3605_v8, 4  ;;  %v3881_v48 = vrot.slane %v9016_v43, 5 }
  0xcf   :  { %v9033_v34 = vld [vmem:[#allocation2 + $0x44] sm:$0x1]  ;;  %2809 = vrot.lane.b32.xlu0 %v2771_v47, %s7475_s18  ;;  %v3002_v27 = vshll.u32 %v2877_v20, 16  ;;  %v3489_v31 = vld [vmem:[#allocation2 + $0x4c] sm:$0x1]  ;;  %v3610_v41 = vrot.slane %v3608_v9, 5  ;;  %v9078_v20 = vpop.permute.xlu0 %2704 }
  0xd0   :  { %v3487_v32 = vld [vmem:[#allocation2 + $0x44] sm:$0x1]  ;;  %v3000_v62 = vrot.slane %v2999_v21, 4  ;;  %v3593_v58 = vrot.slane %v3591_v30, 4  ;;  %v3594_v38 = vshll.u32 %v3486_v2, 16  ;;  %v3277_v50 = vrot.slane %v9033_v34, 5 }
  0xd1   :  { %v3004_v42 = vrot.slane %v3002_v27, 5  ;;  %v9049_v47 = vrot.slane %v3569_v6, 4  ;;  %v3614_v7 = vshll.u32 %v3489_v31, 16  ;;  %v136_v36 = vld [vmem:[#allocation2 + $0x5c] sm:$0x1]  ;;  %v3611_v12 = vor.u32 %v3610_v41, %v3607_v28 }
  0xd2   :  { %v3596_v55 = vrot.slane %v3594_v38, 5  ;;  %v3600_v33 = vshll.u32 %v3487_v32, 16  ;;  %v9055_v19 = vld [vmem:[%s11975_s0 + $0x100] sm:$0x1]  ;;  %v9060_v2 = vld [vmem:[%s11975_s0 + $0x102] sm:$0x1]  ;;  %v2991_v31 = vsel %vm7664_vm7, %v9019_v39, %v8990_v63  ;;  %v3270_v39 = vsel %vm7656_vm12, %v7064_v3, %v3269_v15 }
  0xd3   :  { %v9065_v40 = vld [vmem:[%s11975_s0 + $0x101] sm:$0x1]  ;;  %v9070_v6 = vld [vmem:[%s11975_s0 + $0x103] sm:$0x1]  ;;  %3126 = vrot.lane.b32.xlu0 %v2963_v45, %s7477_s25  ;;  %v3005_v8 = vsel %vm7664_vm7, %v3000_v62, %v3004_v42  ;;  %v9075_v9 = vrot.slane %v3614_v7, 5  ;;  %v75_v21 = vsel %vm7543_vm4, 0, %v74_v26  ;;  %v3278_v24 = vsel %vm7656_vm12, %v7066_v46, %v3277_v50  ;;  %v9199_v46 = vpop.permute.xlu0 %3311 }
  0xd4   :  { %v9085_v34 = vld [vmem:[%s11975_s0 + $0x104] sm:$0x1]  ;;  %v9090_v45 = vld [vmem:[%s11975_s0 + $0x106] sm:$0x1]  ;;  %v9095_v27 = vld [vmem:[%s11975_s0 + $0x108] sm:$0x1]  ;;  %3132 = vrot.lane.b32.xlu1 %v3005_v8, %s7477_s25  ;;  %v3597_v38 = vor.u32 %v3596_v55, %v3593_v58  ;;  %v9153_v55 = vpop.permute.xlu1 %2706  ;;  %v874_v57 = vmax.f32 %v9055_v19, %v9065_v40  ;;  %v875_v35 = vmax.f32 %v9060_v2, %v9070_v6 }
  0xd5   :  { %v9100_v28 = vld [vmem:[%s11975_s0 + $0x10a] sm:$0x1]  ;;  %v9105_v26 = vld [vmem:[%s11975_s0 + $0x105] sm:$0x1]  ;;  %v9110_v32 = vld [vmem:[%s11975_s0 + $0x107] sm:$0x1] }
  0xd6   :  { %v9115_v62 = vld [vmem:[%s11975_s0 + $0x109] sm:$0x1]  ;;  %v9122_v41 = vrot.slane %v3611_v12, 4  ;;  %76 = vst [vmem:[#allocation2 + $0x58] sm:$0x1] %v75_v21  ;;  %v137_v42 = vsel %vm7559_vm6, 0, %v136_v36  ;;  %v876_v19 = vmax.f32 %v9085_v34, %v9105_v26  ;;  %v877_v2 = vmax.f32 %v9090_v45, %v9110_v32 }
  0xd7   :  { %v367_v7 = vld [vmem:[%s11975_s0 + $0x10c] sm:$0x1]  ;;  %v368_v8 = vld [vmem:[%s11975_s0 + $0x10e] sm:$0x1]  ;;  %v495_v63 = vld [vmem:[%s11975_s0 + $0x10d] sm:$0x1]  ;;  %3130 = vrot.lane.b32.xlu0 %v2991_v31, %s7477_s25  ;;  %v878_v40 = vmax.f32 %v9095_v27, %v9115_v62  ;;  %v879_v6 = vmax.f32 %v9100_v28, %v494_v0  ;;  %v9235_v0 = vsel %vm7656_vm12, %v7080_v61, %v3881_v48 }
  0xd8   :  { %138 = vst [vmem:[#allocation2 + $0x5c] sm:$0x1] %v137_v42  ;;  %v496_v58 = vld [vmem:[%s11975_s0 + $0x10f] sm:$0x1]  ;;  %v6707_v36 = vld [vmem:[%s11975_s0 + $0x110] sm:$0x1]  ;;  %3321 = vrot.lane.b32.xlu1 %v3270_v39, %s7476_s14  ;;  %v880_v26 = vmax.f32 %v367_v7, %v495_v63  ;;  %v9227_v39 = vpop.permute.xlu1 %3313 }
  0xd9   :  { %v6708_v12 = vld [vmem:[%s11975_s0 + $0x112] sm:$0x1]  ;;  %v9167_v3 = vrot.slane %v3597_v38, 4  ;;  %v9169_v15 = vrot.slane %v3600_v33, 5  ;;  %v6709_v44 = vld [vmem:[%s11975_s0 + $0x114] sm:$0x1]  ;;  %v881_v42 = vmax.f32 %v368_v8, %v496_v58 }
  0xda   :  { %v6710_v18 = vld [vmem:[%s11975_s0 + $0x116] sm:$0x1]  ;;  %v6711_v14 = vld [vmem:[%s11975_s0 + $0x118] sm:$0x1]  ;;  %v6712_v37 = vld [vmem:[%s11975_s0 + $0x11a] sm:$0x1] }
  0xdb   :  { %v6713_v51 = vld [vmem:[%s11975_s0 + $0x11c] sm:$0x1]  ;;  %v6714_v50 = vld [vmem:[%s11975_s0 + $0x11e] sm:$0x1]  ;;  %v6835_v33 = vld [vmem:[%s11975_s0 + $0x111] sm:$0x1]  ;;  %3319 = vrot.lane.b32.xlu0 %v3266_v17, %s7476_s14 }
  0xdc   :  { %v6836_v21 = vld [vmem:[%s11975_s0 + $0x113] sm:$0x1]  ;;  %v6837_v31 = vld [vmem:[%s11975_s0 + $0x115] sm:$0x1]  ;;  %v6838_v38 = vld [vmem:[%s11975_s0 + $0x117] sm:$0x1]  ;;  %v1002_v45 = vmax.f32 %v6707_v36, %v6835_v33  ;;  %3325 = vrot.lane.b32.xlu1 %v3278_v24, %s7476_s14 }
  0xdd   :  { %v6839_v34 = vld [vmem:[%s11975_s0 + $0x119] sm:$0x1]  ;;  %v1003_v32 = vmax.f32 %v6708_v12, %v6836_v21  ;;  %v6840_v27 = vld [vmem:[%s11975_s0 + $0x11b] sm:$0x1]  ;;  %v6841_v28 = vld [vmem:[%s11975_s0 + $0x11d] sm:$0x1]  ;;  %v1004_v7 = vmax.f32 %v6709_v44, %v6837_v31  ;;  %v1005_v43 = vmax.f32 %v6710_v18, %v6838_v38  ;;  %v9248_v21 = vpop.permute.xlu0 %3315 }
  0xde   :  { %v6842_v62 = vld [vmem:[%s11975_s0 + $0x11f] sm:$0x1]  ;;  %v1006_v8 = vmax.f32 %v6711_v14, %v6839_v34  ;;  %v1007_v54 = vmax.f32 %v6712_v37, %v6840_v27  ;;  %v1008_v61 = vmax.f32 %v6713_v51, %v6841_v28  ;;  %v1130_v63 = vmax.f32 %v874_v57, %v1002_v45  ;;  %v3382_v53 = vld [vmem:[#allocation2 + $0x38] sm:$0xf]  ;;  %v9250_v14 = vpop.permute.xlu1 %3317  ;;  %v3381_v17 = vld [vmem:[#allocation2 + $0x30] sm:$0xf] }
  0xdf   :  { %v1009_v48 = vmax.f32 %v6714_v50, %v6842_v62  ;;  %v1131_v58 = vmax.f32 %v875_v35, %v1003_v32  ;;  %v1132_v36 = vmax.f32 %v876_v19, %v1004_v7  ;;  %v1133_v12 = vmax.f32 %v877_v2, %v1005_v43  ;;  %v2166_v31 = vld [vmem:[#allocation2 + $0x5c] sm:$0x1]  ;;  %3323 = vrot.lane.b32.xlu0 %v3274_v29, %s7476_s14  ;;  %v3384_v24 = vld [vmem:[#allocation2 + $0x48] sm:$0xf]  ;;  %v71_v38 = vld [vmem:[#allocation2 + $0x50] sm:$0x1] }
  0xe0   :  { %v1134_v33 = vmax.f32 %v878_v40, %v1006_v8  ;;  %v1135_v49 = vmax.f32 %v879_v6, %v1007_v54  ;;  %v1136_v30 = vmax.f32 %v880_v26, %v1008_v61  ;;  %v7263_v18 = vpack.c.bf16 %v1130_v63, %v1130_v63  ;;  %v133_v6 = vld [vmem:[#allocation2 + $0x54] sm:$0x1]  ;;  %v9253_v34 = vld [vmem:[#allocation2 + $0x48] sm:$0xe]  ;;  %3419 = vrot.lane.b32.xlu1 %v3382_v53, %s7478_s13  ;;  %v3810_v27 = vld [vmem:[#allocation2 + $0x4c] sm:$0x1] }
  0xe1   :  { %v1137_v44 = vmax.f32 %v881_v42, %v1009_v48  ;;  %v7264_v37 = vpack.c.bf16 %v1131_v58, %v1131_v58  ;;  %v7265_v51 = vpack.c.bf16 %v1132_v36, %v1132_v36  ;;  %v7266_v50 = vpack.c.bf16 %v1133_v12, %v1133_v12  ;;  %v9256_v28 = vld [vmem:[#allocation2 + $0x40] sm:$0xe]  ;;  %v9258_v62 = vld [vmem:[#allocation2 + $0x44] sm:$0x1]  ;;  %v80_v43 = vld [vmem:[#allocation2 + $0x68] sm:$0x1] }
  0xe2   :  { %v7267_v57 = vpack.c.bf16 %v1134_v33, %v1134_v33  ;;  %v7268_v35 = vpack.c.bf16 %v1135_v49, %v1135_v49  ;;  %v7269_v19 = vpack.c.bf16 %v1136_v30, %v1136_v30  ;;  %v1770_v2 = vunpack.c.l.b16 %v7263_v18  ;;  %v142_v8 = vld [vmem:[#allocation2 + $0x6c] sm:$0x1]  ;;  %v9266_v53 = vpop.permute.xlu1 %2508  ;;  %v3383_v54 = vld [vmem:[#allocation2 + $0x40] sm:$0xf]  ;;  %v9278_v33 = vpop.permute.xlu0 %2506 }
  0xe3   :  { %v7335_v40 = vpack.c.bf16 %v1137_v44, %v1137_v44  ;;  %v1771_v26 = vunpack.c.l.b16 %v7264_v37  ;;  %v1772_v42 = vunpack.c.l.b16 %v7265_v51  ;;  %v1773_v45 = vunpack.c.l.b16 %v7266_v50  ;;  %v9271_v36 = vld [vmem:[%s11975_s0 + $0x140] sm:$0x1]  ;;  %v9276_v12 = vld [vmem:[%s11975_s0 + $0x141] sm:$0x1]  ;;  %3417 = vrot.lane.b32.xlu0 %v3381_v17, %s7478_s13  ;;  %v9290_v50 = vld [vmem:[%s11975_s0 + $0x142] sm:$0x1] }
  0xe4   :  { %v1774_v32 = vunpack.c.l.b16 %v7267_v57  ;;  %v9260_v29 = vunpack.c.l.b16 %v7268_v35  ;;  %v9262_v49 = vunpack.c.l.b16 %v7269_v19  ;;  %v1944_v30 = vrot.slane %v1770_v2, 7  ;;  %v9295_v57 = vld [vmem:[%s11975_s0 + $0x144] sm:$0x1]  ;;  %v9300_v17 = vld [vmem:[%s11975_s0 + $0x143] sm:$0x1]  ;;  %3423 = vrot.lane.b32.xlu1 %v3384_v24, %s7478_s13 }
  0xe5   :  { %v2167_v7 = vsel %vm7543_vm4, %v7335_v40, %v2166_v31  ;;  %v1945_v61 = vrot.slane %v1771_v26, 6  ;;  %v1947_v48 = vrot.slane %v1772_v42, 5  ;;  %v1949_v63 = vrot.slane %v1773_v45, 4  ;;  %v9309_v40 = vld [vmem:[%s11975_s0 + $0x146] sm:$0x1] }
  0xe6   :  { %v1951_v58 = vrot.slane %v1774_v32, 3  ;;  %2168 = vst [vmem:[#allocation2 + $0x5c] sm:$0x1] %v2167_v7  ;;  %v1953_v44 = vrot.slane %v9260_v29, 2  ;;  %v1955_v18 = vrot.slane %v9262_v49, 1  ;;  %v72_v37 = vsel %vm7543_vm4, 0, %v71_v38 }
  0xe7   :  { %v134_v51 = vsel %vm7559_vm6, 0, %v133_v6  ;;  %v1946_v31 = vsel %vm1836_vm11, %v1945_v61, %v1944_v30  ;;  %73 = vst [vmem:[#allocation2 + $0x50] sm:$0x1] %v72_v37  ;;  %v7082_v35 = vrot.slane %v9253_v34, 9  ;;  %v3889_v19 = vrot.slane %v3810_v27, 5  ;;  %3421 = vrot.lane.b32.xlu0 %v3383_v54, %s7478_s13 }
  0xe8   :  { %135 = vst [vmem:[#allocation2 + $0x54] sm:$0x1] %v134_v51  ;;  %v7081_v2 = vrot.slane %v9256_v28, 9  ;;  %v9314_v38 = vld [vmem:[%s11975_s0 + $0x148] sm:$0x1]  ;;  %v1948_v34 = vsel %vm11993_vm13, %v1947_v48, %v1946_v31  ;;  %v3885_v26 = vrot.slane %v9258_v62, 5  ;;  %v3575_v27 = vsel %vm7664_vm7, %v9049_v47, %v9037_v13 }
  0xe9   :  { %v9319_v24 = vld [vmem:[%s11975_s0 + $0x14a] sm:$0x1]  ;;  %v9324_v6 = vld [vmem:[%s11975_s0 + $0x145] sm:$0x1]  ;;  %v81_v42 = vsel %vm7543_vm4, 0, %v80_v43  ;;  %v143_v45 = vsel %vm7559_vm6, 0, %v142_v8  ;;  %v3617_v28 = vsel %vm7664_vm7, %v9122_v41, %v9075_v9  ;;  %v1950_v30 = vsel %vm11989_vm14, %v1949_v63, %v1948_v34  ;;  %v9379_v41 = vpop.permute.xlu1 %2510 }
  0xea   :  { %v9335_v32 = vld [vmem:[%s11975_s0 + $0x147] sm:$0x1]  ;;  %v12005_v62 = vrot.slane %v9039_v16, 5  ;;  %v12006_v29 = vrot.slane %v9026_v5, 9  ;;  %82 = vst [vmem:[#allocation2 + $0x68] sm:$0x1] %v81_v42  ;;  %v3603_v7 = vsel %vm7664_vm7, %v9167_v3, %v9169_v15  ;;  %v1952_v43 = vsel %vm1845_vm15, %v1951_v58, %v1950_v30 }
  0xeb   :  { %144 = vst [vmem:[#allocation2 + $0x6c] sm:$0x1] %v143_v45  ;;  %v9357_v13 = vld [vmem:[%s11975_s0 + $0x14c] sm:$0x1]  ;;  %v9362_v47 = vld [vmem:[%s11975_s0 + $0x14e] sm:$0x1]  ;;  %v9389_v61 = vsel %vm7656_vm12, %v7082_v35, %v3889_v19  ;;  %v890_v15 = vmax.f32 %v9271_v36, %v9276_v12  ;;  %v12007_v63 = vsel %vm7664_vm7, %v9035_v10, %v9024_v60  ;;  %v1954_v58 = vsel %vm1848_vm1, %v1953_v44, %v1952_v43  ;;  %v3119_v44 = vpop.permute.xlu0 %3118 }
  0xec   :  { %v9351_v49 = vsel %vm7656_vm12, %v12006_v29, %v12005_v62  ;;  %v9367_v5 = vld [vmem:[%s11975_s0 + $0x149] sm:$0x1]  ;;  %v9372_v16 = vld [vmem:[%s11975_s0 + $0x14b] sm:$0x1]  ;;  %v9377_v9 = vld [vmem:[%s11975_s0 + $0x14d] sm:$0x1]  ;;  %3740 = vrot.lane.b32.xlu1 %v12007_v63, %s7479_s16  ;;  %v9413_v37 = vsel %vm7656_vm12, %v7081_v2, %v3885_v26  ;;  %v891_v60 = vmax.f32 %v9290_v50, %v9300_v17  ;;  %v892_v10 = vmax.f32 %v9295_v57, %v9324_v6 }
  0xed   :  { %v2163_v8 = vld [vmem:[#allocation2 + $0x58] sm:$0xf]  ;;  %v9394_v48 = vld [vmem:[%s11975_s0 + $0x14f] sm:$0x1]  ;;  %v6723_v54 = vld [vmem:[%s11975_s0 + $0x150] sm:$0x1]  ;;  %v1956_v31 = vsel %vm1851_vm8, %v1955_v18, %v1954_v58  ;;  %v893_v50 = vmax.f32 %v9309_v40, %v9335_v32  ;;  %v894_v57 = vmax.f32 %v9314_v38, %v9367_v5  ;;  %v895_v18 = vmax.f32 %v9319_v24, %v9372_v16  ;;  %3738 = vrot.lane.b32.xlu0 %v3575_v27, %s7479_s16 }
  0xee   :  { %v6724_v3 = vld [vmem:[%s11975_s0 + $0x152] sm:$0x1]  ;;  %v6725_v51 = vld [vmem:[%s11975_s0 + $0x154] sm:$0x1]  ;;  %v6726_v36 = vld [vmem:[%s11975_s0 + $0x156] sm:$0x1]  ;;  %v2064_v17 = vpack.c.b16 %v1956_v31, %v1956_v31  ;;  %v896_v62 = vmax.f32 %v9357_v13, %v9377_v9  ;;  %v897_v29 = vmax.f32 %v9362_v47, %v9394_v48  ;;  %v9470_v9 = vpop.permute.xlu1 %3120 }
  0xef   :  { %v6727_v12 = vld [vmem:[%s11975_s0 + $0x158] sm:$0x1]  ;;  %v2264_v35 = vld [vmem:[#allocation2 + $0x5c] sm:$0x1]  ;;  %v6728_v19 = vld [vmem:[%s11975_s0 + $0x15a] sm:$0x1] }
  0xf0   :  { %v6729_v2 = vld [vmem:[%s11975_s0 + $0x15c] sm:$0x1]  ;;  %v6851_v34 = vld [vmem:[%s11975_s0 + $0x151] sm:$0x1]  ;;  %v2416_v6 = vshll.u32 %v2264_v35, 16  ;;  %vm11988_vm2 = vcmask 158848   ;;  %3744 = vrot.lane.b32.xlu1 %v3617_v28, %s7479_s16  ;;  %v2164_v27 = vsel %vm7789_vm9, %v2064_v17, %v2163_v8 }
  0xf1   :  { %v6730_v26 = vld [vmem:[%s11975_s0 + $0x15e] sm:$0x1]  ;;  %v6852_v42 = vld [vmem:[%s11975_s0 + $0x153] sm:$0x1]  ;;  %v6853_v40 = vld [vmem:[%s11975_s0 + $0x155] sm:$0x1]  ;;  %v1018_v45 = vmax.f32 %v6723_v54, %v6851_v34  ;;  %3742 = vrot.lane.b32.xlu0 %v3603_v7, %s7479_s16 }
  0xf2   :  { %v2261_v38 = vld [vmem:[#allocation2 + $0x50] sm:$0xf]  ;;  %v2262_v24 = vld [vmem:[#allocation2 + $0x54] sm:$0x1]  ;;  %v6854_v32 = vld [vmem:[%s11975_s0 + $0x157] sm:$0x1]  ;;  %v1019_v30 = vmax.f32 %v6724_v3, %v6852_v42  ;;  %v1020_v5 = vmax.f32 %v6725_v51, %v6853_v40 }
  0xf3   :  { %3167 = vst.msk [vmem:[#allocation4] sm:$0xf] %vm11988_vm2, %v3119_v44  ;;  %v9465_v16 = vrot.slane %v2416_v6, 5  ;;  %v2393_v43 = vshrl.u32 %v2261_v38, 16  ;;  %v2396_v54 = vshll.u32 %v2261_v38, 16  ;;  %v2402_v47 = vshll.u32 %v2262_v24, 16 }
  0xf4   :  { %v6855_v13 = vld [vmem:[%s11975_s0 + $0x159] sm:$0x1]  ;;  %2165 = vst [vmem:[#allocation2 + $0x58] sm:$0xf] %v2164_v27  ;;  %v6856_v48 = vld [vmem:[%s11975_s0 + $0x15b] sm:$0x1]  ;;  %v1021_v8 = vmax.f32 %v6726_v36, %v6854_v32  ;;  %v1146_v63 = vmax.f32 %v890_v15, %v1018_v45  ;;  %v1147_v6 = vmax.f32 %v891_v60, %v1019_v30  ;;  %v1148_v42 = vmax.f32 %v892_v10, %v1020_v5 }
  0xf5   :  { %v6857_v28 = vld [vmem:[%s11975_s0 + $0x15d] sm:$0x1]  ;;  %v1022_v3 = vmax.f32 %v6727_v12, %v6855_v13  ;;  %v2395_v58 = vrot.slane %v2393_v43, 4  ;;  %v2398_v51 = vrot.slane %v2396_v54, 5  ;;  %v6858_v44 = vld [vmem:[%s11975_s0 + $0x15f] sm:$0x1]  ;;  %v1023_v31 = vmax.f32 %v6728_v19, %v6856_v48  ;;  %3933 = vrot.lane.b32.xlu1 %v9235_v0, %s7480_s20  ;;  %v9486_v43 = vpop.permute.xlu1 %3124  ;;  %3931 = vrot.lane.b32.xlu0 %v9351_v49, %s7480_s20 }
  0xf6   :  { %v1024_v35 = vmax.f32 %v6729_v2, %v6857_v28  ;;  %v2404_v34 = vrot.slane %v2402_v47, 5  ;;  %v1025_v17 = vmax.f32 %v6730_v26, %v6858_v44  ;;  %v1149_v12 = vmax.f32 %v893_v50, %v1021_v8  ;;  %v139_v5 = vld [vmem:[#allocation2 + $0x64] sm:$0x1]  ;;  %v9495_v54 = vld [vmem:[%s11975_s0 + $0x120] sm:$0x1] }
  0xf7   :  { %v2399_v36 = vor.u32 %v2398_v51, %v2395_v58  ;;  %v1150_v15 = vmax.f32 %v894_v57, %v1022_v3  ;;  %v1151_v40 = vmax.f32 %v895_v18, %v1023_v31  ;;  %v7279_v24 = vpack.c.bf16 %v1146_v63, %v1146_v63  ;;  %v77_v57 = vld [vmem:[#allocation2 + $0x60] sm:$0x1]  ;;  %v9500_v49 = vld [vmem:[%s11975_s0 + $0x121] sm:$0x1]  ;;  %v2178_v8 = vld [vmem:[#allocation2 + $0x6c] sm:$0x1] }
  0xf8   :  { %v1152_v45 = vmax.f32 %v896_v62, %v1024_v35  ;;  %v9484_v38 = vmax.f32 %v897_v29, %v1025_v17  ;;  %v7280_v32 = vpack.c.bf16 %v1147_v6, %v1147_v6  ;;  %v7281_v2 = vpack.c.bf16 %v1148_v42, %v1148_v42  ;;  %v9507_v3 = vld [vmem:[%s11975_s0 + $0x122] sm:$0x1]  ;;  %v9512_v63 = vld [vmem:[%s11975_s0 + $0x124] sm:$0x1]  ;;  %v9517_v58 = vld [vmem:[%s11975_s0 + $0x123] sm:$0x1] }
  0xf9   :  { %v2400_v19 = vrot.slane %v2399_v36, 4  ;;  %v7282_v27 = vpack.c.bf16 %v1149_v12, %v1149_v12  ;;  %v7283_v7 = vpack.c.bf16 %v1150_v15, %v1150_v15  ;;  %v7284_v60 = vpack.c.bf16 %v1151_v40, %v1151_v40  ;;  %v9522_v51 = vld [vmem:[%s11975_s0 + $0x125] sm:$0x1]  ;;  %v9527_v17 = vld [vmem:[%s11975_s0 + $0x126] sm:$0x1] }
  0xfa   :  { %v7285_v0 = vpack.c.bf16 %v1152_v45, %v1152_v45  ;;  %v1786_v10 = vunpack.c.l.b16 %v7279_v24  ;;  %v1787_v50 = vunpack.c.l.b16 %v7280_v32  ;;  %v1788_v62 = vunpack.c.l.b16 %v7281_v2  ;;  %v9532_v6 = vld [vmem:[%s11975_s0 + $0x128] sm:$0x1]  ;;  %v9537_v42 = vld [vmem:[%s11975_s0 + $0x127] sm:$0x1]  ;;  %v9542_v36 = vld [vmem:[%s11975_s0 + $0x129] sm:$0x1] }
  0xfb   :  { %v2263_v18 = vld [vmem:[#allocation2 + $0x58] sm:$0xf]  ;;  %v2405_v26 = vsel %vm7664_vm7, %v2400_v19, %v2404_v34  ;;  %v1789_v29 = vunpack.c.l.b16 %v7282_v27  ;;  %v1790_v30 = vunpack.c.l.b16 %v7283_v7  ;;  %v1791_v48 = vunpack.c.l.b16 %v7284_v60  ;;  %v9548_v24 = vld [vmem:[%s11975_s0 + $0x12a] sm:$0x1]  ;;  %v9553_v32 = vld [vmem:[%s11975_s0 + $0x12c] sm:$0x1] }
  0xfc   :  { %v2407_v13 = vshrl.u32 %v2263_v18, 16  ;;  %v2410_v47 = vshll.u32 %v2263_v18, 16  ;;  %v9502_v28 = vunpack.c.l.b16 %v7285_v0  ;;  %v1970_v44 = vrot.slane %v1786_v10, 7  ;;  %2520 = vrot.lane.b32.xlu0 %v2405_v26, %s7474_s9  ;;  %v9558_v19 = vld [vmem:[%s11975_s0 + $0x12e] sm:$0x1] }
  0xfd   :  { %v1971_v31 = vrot.slane %v1787_v50, 6  ;;  %v1973_v35 = vrot.slane %v1788_v62, 5  ;;  %v1975_v34 = vrot.slane %v1789_v29, 4  ;;  %v1977_v40 = vrot.slane %v1790_v30, 3  ;;  %v9563_v2 = vld [vmem:[%s11975_s0 + $0x12b] sm:$0x1]  ;;  %v9587_v62 = vpop.permute.xlu1 %3411 }
  0xfe   :  { %v2409_v12 = vrot.slane %v2407_v13, 4  ;;  %v2412_v15 = vrot.slane %v2410_v47, 5  ;;  %v1979_v45 = vrot.slane %v1791_v48, 2  ;;  %v9568_v27 = vld [vmem:[%s11975_s0 + $0x12d] sm:$0x1]  ;;  %v1981_v0 = vrot.slane %v9502_v28, 1 }
  0xff   :  { %v9573_v7 = vld [vmem:[%s11975_s0 + $0x12f] sm:$0x1]  ;;  %v1972_v60 = vsel %vm1836_vm11, %v1971_v31, %v1970_v44  ;;  %v7337_v10 = vpack.c.bf16 %v9484_v38, %v9484_v38  ;;  %v78_v50 = vsel %vm7543_vm4, 0, %v77_v57  ;;  %v6715_v18 = vld [vmem:[%s11975_s0 + $0x130] sm:$0x1]  ;;  %v140_v38 = vsel %vm7559_vm6, 0, %v139_v5 }
 0x100   :  { %v6716_v26 = vld [vmem:[%s11975_s0 + $0x132] sm:$0x1]  ;;  %v2413_v29 = vor.u32 %v2412_v15, %v2409_v12  ;;  %v1974_v30 = vsel %vm11993_vm13, %v1973_v35, %v1972_v60  ;;  %79 = vst [vmem:[#allocation2 + $0x60] sm:$0x1] %v78_v50  ;;  %v6717_v57 = vld [vmem:[%s11975_s0 + $0x134] sm:$0x1]  ;;  %v882_v47 = vmax.f32 %v9495_v54, %v9500_v49  ;;  %v883_v54 = vmax.f32 %v9507_v3, %v9517_v58  ;;  %v3123_v50 = vpop.permute.xlu0 %3122 }
 0x101   :  { %v6718_v13 = vld [vmem:[%s11975_s0 + $0x136] sm:$0x1]  ;;  %v1976_v48 = vsel %vm11989_vm14, %v1975_v34, %v1974_v30  ;;  %v2179_v28 = vsel %vm7543_vm4, %v7337_v10, %v2178_v8  ;;  %141 = vst [vmem:[#allocation2 + $0x64] sm:$0x1] %v140_v38  ;;  %v6719_v5 = vld [vmem:[%s11975_s0 + $0x138] sm:$0x1]  ;;  %v884_v49 = vmax.f32 %v9512_v63, %v9522_v51  ;;  %3935 = vrot.lane.b32.xlu0 %v9413_v37, %s7480_s20 }
 0x102   :  { %v6720_v44 = vld [vmem:[%s11975_s0 + $0x13a] sm:$0x1]  ;;  %v6721_v31 = vld [vmem:[%s11975_s0 + $0x13c] sm:$0x1]  ;;  %v2414_v8 = vrot.slane %v2413_v29, 4  ;;  %v1978_v35 = vsel %vm1845_vm15, %v1977_v40, %v1976_v48  ;;  %v885_v3 = vmax.f32 %v9527_v17, %v9537_v42  ;;  %v886_v63 = vmax.f32 %v9532_v6, %v9542_v36  ;;  %v9662_v29 = vpop.permute.xlu1 %3415 }
 0x103   :  { %v2175_v34 = vld [vmem:[#allocation2 + $0x68] sm:$0xf]  ;;  %2180 = vst [vmem:[#allocation2 + $0x6c] sm:$0x1] %v2179_v28  ;;  %v6722_v12 = vld [vmem:[%s11975_s0 + $0x13e] sm:$0x1]  ;;  %v1980_v37 = vsel %vm1848_vm1, %v1979_v45, %v1978_v35  ;;  %v887_v17 = vmax.f32 %v9548_v24, %v9563_v2  ;;  %v888_v6 = vmax.f32 %v9553_v32, %v9568_v27  ;;  %v889_v42 = vmax.f32 %v9558_v19, %v9573_v7 }
 0x104   :  { %v6843_v15 = vld [vmem:[%s11975_s0 + $0x131] sm:$0x1]  ;;  %v6844_v58 = vld [vmem:[%s11975_s0 + $0x133] sm:$0x1]  ;;  %v6845_v51 = vld [vmem:[%s11975_s0 + $0x135] sm:$0x1]  ;;  %v2419_v36 = vsel %vm7664_vm7, %v2414_v8, %v9465_v16  ;;  %v1982_v45 = vsel %vm1851_vm8, %v1981_v0, %v1980_v37 }
 0x105   :  { %v6846_v40 = vld [vmem:[%s11975_s0 + $0x137] sm:$0x1]  ;;  %v6847_v60 = vld [vmem:[%s11975_s0 + $0x139] sm:$0x1]  ;;  %v6848_v24 = vld [vmem:[%s11975_s0 + $0x13b] sm:$0x1]  ;;  %v1010_v2 = vmax.f32 %v6715_v18, %v6843_v15  ;;  %v1011_v19 = vmax.f32 %v6716_v26, %v6844_v58  ;;  %2522 = vrot.lane.b32.xlu1 %v2419_v36, %s7474_s9  ;;  %v2068_v27 = vpack.c.b16 %v1982_v45, %v1982_v45  ;;  %v1012_v7 = vmax.f32 %v6717_v57, %v6845_v51 }
 0x106   :  { %v6849_v32 = vld [vmem:[%s11975_s0 + $0x13d] sm:$0x1]  ;;  %v6850_v16 = vld [vmem:[%s11975_s0 + $0x13f] sm:$0x1]  ;;  %v1013_v0 = vmax.f32 %v6718_v13, %v6846_v40  ;;  %v1014_v10 = vmax.f32 %v6719_v5, %v6847_v60  ;;  %v1015_v30 = vmax.f32 %v6720_v44, %v6848_v24  ;;  %v2214_v8 = vld [vmem:[#allocation2 + $0x8] sm:$0xf] }
 0x107   :  { %v1016_v38 = vmax.f32 %v6721_v31, %v6849_v32  ;;  %v1017_v48 = vmax.f32 %v6722_v12, %v6850_v16  ;;  %v1138_v28 = vmax.f32 %v882_v47, %v1010_v2  ;;  %v2176_v18 = vsel %vm7789_vm9, %v2068_v27, %v2175_v34  ;;  %2230 = vst.msk [vmem:[#allocation4 + $0x4] sm:$0xf] %vm27_vm0, %v2214_v8  ;;  %v2215_v37 = vld [vmem:[#allocation2 + $0x10] sm:$0xf]  ;;  %v2216_v57 = vld [vmem:[#allocation2 + $0x18] sm:$0xf] }
 0x108   :  { %v1139_v26 = vmax.f32 %v883_v54, %v1011_v19  ;;  %v1140_v35 = vmax.f32 %v884_v49, %v1012_v7  ;;  %v1141_v15 = vmax.f32 %v885_v3, %v1013_v0  ;;  %2177 = vst [vmem:[#allocation2 + $0x68] sm:$0xf] %v2176_v18  ;;  %v1142_v13 = vmax.f32 %v886_v63, %v1014_v10  ;;  %v2172_v60 = vld [vmem:[#allocation2 + $0x64] sm:$0x1]  ;;  %v83_v27 = vld [vmem:[#allocation2 + $0x70] sm:$0x1] }
 0x109   :  { %v1143_v5 = vmax.f32 %v887_v17, %v1015_v30  ;;  %v1144_v58 = vmax.f32 %v888_v6, %v1016_v38  ;;  %v1145_v51 = vmax.f32 %v889_v42, %v1017_v48  ;;  %2554 = vst.msk [vmem:[#allocation4 + $0x4] sm:$0xf] %vm2552_vm10, %v9278_v33  ;;  %3937 = vrot.lane.b32.xlu1 %v9389_v61, %s7480_s20  ;;  %v9679_v33 = vpop.permute.xlu0 %3409  ;;  %v2587_v6 = vld [vmem:[#allocation2 + $0x58] sm:$0xe]  ;;  %v9695_v42 = vld [vmem:[#allocation2 + $0x50] sm:$0xe] }
 0x10a   :  { %2231 = vst.msk [vmem:[#allocation4 + $0x8] sm:$0xf] %vm27_vm0, %v2215_v37  ;;  %2232 = vst.msk [vmem:[#allocation4 + $0xc] sm:$0xf] %vm27_vm0, %v2216_v57  ;;  %v2268_v47 = vld [vmem:[#allocation2 + $0x6c] sm:$0x1]  ;;  %v7271_v44 = vpack.c.bf16 %v1138_v28, %v1138_v28  ;;  %v7272_v31 = vpack.c.bf16 %v1139_v26, %v1139_v26  ;;  %v7273_v54 = vpack.c.bf16 %v1140_v35, %v1140_v35 }
 0x10b   :  { %v7274_v49 = vpack.c.bf16 %v1141_v15, %v1141_v15  ;;  %2750 = vst.msk [vmem:[#allocation4 + $0x4] sm:$0xf] %vm2748_vm3, %v9046_v59  ;;  %v2444_v34 = vshll.u32 %v2268_v47, 16  ;;  %v7275_v12 = vpack.c.bf16 %v1142_v13, %v1142_v13  ;;  %v7276_v3 = vpack.c.bf16 %v1143_v5, %v1143_v5  ;;  %v9702_v19 = vld [vmem:[#allocation2 + $0x6c] sm:$0x1] }
 0x10c   :  { %2555 = vst.msk [vmem:[#allocation4 + $0x8] sm:$0xf] %vm2552_vm10, %v9266_v53  ;;  %2556 = vst.msk [vmem:[#allocation4 + $0xc] sm:$0xf] %vm2552_vm10, %v9379_v41  ;;  %v7277_v61 = vpack.c.bf16 %v1144_v58, %v1144_v58  ;;  %v1778_v59 = vunpack.c.l.b16 %v7271_v44  ;;  %v1779_v53 = vunpack.c.l.b16 %v7272_v31  ;;  %v1780_v63 = vunpack.c.l.b16 %v7273_v54  ;;  %v9713_v30 = vld [vmem:[%s11975_s0 + $0x161] sm:$0x1] }
 0x10d   :  { %2847 = vst.msk [vmem:[#allocation4 + $0x4] sm:$0xf] %vm11994_vm5, %v8986_v23  ;;  %v1781_v40 = vunpack.c.l.b16 %v7274_v49  ;;  %v9693_v23 = vpop.permute.xlu1 %3732  ;;  %v1782_v41 = vunpack.c.l.b16 %v7275_v12  ;;  %v7336_v2 = vpack.c.bf16 %v1145_v51, %v1145_v51  ;;  %v7052_v10 = vrot.slane %v2587_v6, 9  ;;  %v9715_v38 = vpop.permute.xlu0 %3413  ;;  %v9725_v35 = vld [vmem:[%s11975_s0 + $0x162] sm:$0x1] }
 0x10e   :  { %2751 = vst.msk [vmem:[#allocation4 + $0x8] sm:$0xf] %vm2748_vm3, %v9078_v20  ;;  %2752 = vst.msk [vmem:[#allocation4 + $0xc] sm:$0xf] %vm2748_vm3, %v9153_v55  ;;  %v1783_v20 = vunpack.c.l.b16 %v7276_v3  ;;  %v1784_v17 = vunpack.c.l.b16 %v7277_v61  ;;  %v2588_v55 = vld [vmem:[#allocation2 + $0x5c] sm:$0x1] }
 0x10f   :  { %2848 = vst.msk [vmem:[#allocation4 + $0x8] sm:$0xf] %vm11994_vm5, %v9042_v22  ;;  %2849 = vst.msk [vmem:[#allocation4 + $0xc] sm:$0xf] %vm11994_vm5, %v9012_v56  ;;  %v1957_v22 = vrot.slane %v1778_v59, 7  ;;  %v1958_v36 = vrot.slane %v1779_v53, 6  ;;  %v2173_v18 = vsel %vm7543_vm4, %v7336_v2, %v2172_v60 }
 0x110   :  { %3168 = vst.msk [vmem:[#allocation4 + $0x4] sm:$0xf] %vm11988_vm2, %v9470_v9  ;;  %3169 = vst.msk [vmem:[#allocation4 + $0x8] sm:$0xf] %vm11988_vm2, %v3123_v50  ;;  %v1960_v56 = vrot.slane %v1780_v63, 5  ;;  %v1962_v45 = vrot.slane %v1781_v40, 4 }
 0x111   :  { %3170 = vst.msk [vmem:[#allocation4 + $0xc] sm:$0xf] %vm11988_vm2, %v9486_v43  ;;  %v9700_v9 = vrot.slane %v2444_v34, 5  ;;  %v1964_v24 = vrot.slane %v1782_v41, 3  ;;  %v1966_v32 = vrot.slane %v1783_v20, 2  ;;  %v1959_v7 = vsel %vm1836_vm11, %v1958_v36, %v1957_v22  ;;  %v9766_v49 = vpop.permute.xlu1 %3736 }
 0x112   :  { %v2267_v16 = vld [vmem:[#allocation2 + $0x68] sm:$0xf]  ;;  %v1968_v0 = vrot.slane %v1784_v17, 1  ;;  %v2674_v50 = vrot.slane %v2588_v55, 5  ;;  %v9708_v43 = vld [vmem:[%s11975_s0 + $0x160] sm:$0x1]  ;;  %v1961_v8 = vsel %vm11993_vm13, %v1960_v56, %v1959_v7 }
 0x113   :  { %v2435_v48 = vshrl.u32 %v2267_v16, 16  ;;  %v2438_v28 = vshll.u32 %v2267_v16, 16  ;;  %v9720_v26 = vld [vmem:[#allocation2 + $0x68] sm:$0xe]  ;;  %v9730_v15 = vld [vmem:[%s11975_s0 + $0x164] sm:$0x1]  ;;  %v1963_v5 = vsel %vm11989_vm14, %v1962_v45, %v1961_v8 }
 0x114   :  { %v9735_v37 = vld [vmem:[%s11975_s0 + $0x166] sm:$0x1]  ;;  %v9740_v57 = vld [vmem:[%s11975_s0 + $0x163] sm:$0x1]  ;;  %v9745_v13 = vld [vmem:[%s11975_s0 + $0x165] sm:$0x1]  ;;  %v1965_v3 = vsel %vm1845_vm15, %v1964_v24, %v1963_v5  ;;  %v2675_v36 = vsel %vm7656_vm12, %v7052_v10, %v2674_v50  ;;  %v9818_v50 = vpop.permute.xlu0 %3730 }
 0x115   :  { %2174 = vst [vmem:[#allocation2 + $0x64] sm:$0x1] %v2173_v18  ;;  %v7051_v58 = vrot.slane %v9695_v42, 9  ;;  %v7054_v51 = vrot.slane %v9720_v26, 9  ;;  %v9753_v47 = vld [vmem:[%s11975_s0 + $0x168] sm:$0x1]  ;;  %v1967_v40 = vsel %vm1848_vm1, %v1966_v32, %v1965_v3  ;;  %v898_v32 = vmax.f32 %v9708_v43, %v9713_v30 }
 0x116   :  { %v9758_v44 = vld [vmem:[%s11975_s0 + $0x16a] sm:$0x1]  ;;  %v516_v31 = vld [vmem:[%s11975_s0 + $0x167] sm:$0x1]  ;;  %v517_v54 = vld [vmem:[%s11975_s0 + $0x169] sm:$0x1]  ;;  %v1969_v22 = vsel %vm1851_vm8, %v1968_v0, %v1967_v40  ;;  %v899_v7 = vmax.f32 %v9725_v35, %v9740_v57  ;;  %v900_v0 = vmax.f32 %v9730_v15, %v9745_v13 }
 0x117   :  { %v2437_v34 = vrot.slane %v2435_v48, 4  ;;  %v2440_v12 = vrot.slane %v2438_v28, 5  ;;  %v2169_v61 = vld [vmem:[#allocation2 + $0x60] sm:$0xf]  ;;  %v391_v59 = vld [vmem:[%s11975_s0 + $0x16c] sm:$0x1]  ;;  %v2066_v2 = vpack.c.b16 %v1969_v22, %v1969_v22  ;;  %v901_v10 = vmax.f32 %v9735_v37, %v516_v31 }
 0x118   :  { %v518_v53 = vld [vmem:[%s11975_s0 + $0x16b] sm:$0x1]  ;;  %v519_v63 = vld [vmem:[%s11975_s0 + $0x16d] sm:$0x1]  ;;  %v2682_v41 = vrot.slane %v9702_v19, 5  ;;  %v84_v20 = vsel %vm7543_vm4, 0, %v83_v27  ;;  %v902_v28 = vmax.f32 %v9753_v47, %v517_v54  ;;  %v9839_v47 = vpop.permute.xlu1 %3925 }
 0x119   :  { %v6731_v17 = vld [vmem:[%s11975_s0 + $0x170] sm:$0x1]  ;;  %v6732_v6 = vld [vmem:[%s11975_s0 + $0x172] sm:$0x1]  ;;  %v2441_v55 = vor.u32 %v2440_v12, %v2437_v34  ;;  %v9791_v56 = vld [vmem:[#allocation2 + $0x54] sm:$0x1]  ;;  %v903_v8 = vmax.f32 %v9758_v44, %v518_v53  ;;  %v2170_v26 = vsel %vm7789_vm9, %v2066_v2, %v2169_v61  ;;  %v904_v57 = vmax.f32 %v391_v59, %v519_v63 }
 0x11a   :  { %85 = vst [vmem:[#allocation2 + $0x70] sm:$0x1] %v84_v20  ;;  %v6733_v45 = vld [vmem:[%s11975_s0 + $0x174] sm:$0x1]  ;;  %v6734_v60 = vld [vmem:[%s11975_s0 + $0x176] sm:$0x1]  ;;  %v2683_v59 = vsel %vm7656_vm12, %v7054_v51, %v2682_v41 }
 0x11b   :  { %v6735_v24 = vld [vmem:[%s11975_s0 + $0x178] sm:$0x1]  ;;  %v6736_v19 = vld [vmem:[%s11975_s0 + $0x17a] sm:$0x1]  ;;  %v6737_v27 = vld [vmem:[%s11975_s0 + $0x17c] sm:$0x1] }
 0x11c   :  { %v6859_v16 = vld [vmem:[%s11975_s0 + $0x171] sm:$0x1]  ;;  %v2442_v43 = vrot.slane %v2441_v55, 4  ;;  %v6860_v30 = vld [vmem:[%s11975_s0 + $0x173] sm:$0x1]  ;;  %v2670_v61 = vrot.slane %v9791_v56, 5 }
 0x11d   :  { %v6861_v48 = vld [vmem:[%s11975_s0 + $0x175] sm:$0x1]  ;;  %v1026_v18 = vmax.f32 %v6731_v17, %v6859_v16  ;;  %v6862_v35 = vld [vmem:[%s11975_s0 + $0x177] sm:$0x1]  ;;  %v6863_v15 = vld [vmem:[%s11975_s0 + $0x179] sm:$0x1]  ;;  %v1027_v13 = vmax.f32 %v6732_v6, %v6860_v30 }
 0x11e   :  { %v6864_v37 = vld [vmem:[%s11975_s0 + $0x17b] sm:$0x1]  ;;  %v1028_v5 = vmax.f32 %v6733_v45, %v6861_v48  ;;  %v2447_v44 = vsel %vm7664_vm7, %v2442_v43, %v9700_v9  ;;  %2171 = vst [vmem:[#allocation2 + $0x60] sm:$0xf] %v2170_v26  ;;  %v2266_v31 = vld [vmem:[#allocation2 + $0x64] sm:$0x1]  ;;  %v1029_v34 = vmax.f32 %v6734_v60, %v6862_v35  ;;  %v1030_v12 = vmax.f32 %v6735_v24, %v6863_v15  ;;  %v9853_v24 = vpop.permute.xlu0 %3734 }
 0x11f   :  { %v6865_v54 = vld [vmem:[%s11975_s0 + $0x17d] sm:$0x1]  ;;  %v1031_v3 = vmax.f32 %v6736_v19, %v6864_v37  ;;  %2526 = vrot.lane.b32.xlu1 %v2447_v44, %s7474_s9  ;;  %v1154_v63 = vmax.f32 %v898_v32, %v1026_v18  ;;  %v9851_v40 = vld [vmem:[#allocation2 + $0x64] sm:$0x1]  ;;  %v1155_v9 = vmax.f32 %v899_v7, %v1027_v13  ;;  %v2430_v55 = vshll.u32 %v2266_v31, 16  ;;  %v9859_v7 = vpop.permute.xlu1 %2514 }
 0x120   :  { %v1032_v53 = vmax.f32 %v6737_v27, %v6865_v54  ;;  %v1156_v20 = vmax.f32 %v900_v0, %v1028_v5  ;;  %v1157_v17 = vmax.f32 %v901_v10, %v1029_v34  ;;  %v1158_v6 = vmax.f32 %v902_v28, %v1030_v12  ;;  %v9855_v30 = vld [vmem:[#allocation2 + $0x64] sm:$0x1]  ;;  %v9874_v18 = vld [vmem:[%s11975_s0 + $0x17e] sm:$0x1]  ;;  %v9931_v42 = vld [vmem:[#allocation2 + $0x58] sm:$0xe] }
 0x121   :  { %v1159_v22 = vmax.f32 %v903_v8, %v1031_v3  ;;  %v7287_v60 = vpack.c.bf16 %v1154_v63, %v1154_v63  ;;  %v7288_v2 = vpack.c.bf16 %v1155_v9, %v1155_v9  ;;  %v2678_v51 = vrot.slane %v9851_v40, 5  ;;  %v9864_v8 = vld [vmem:[%s11975_s0 + $0x16e] sm:$0x1] }
 0x122   :  { %v1160_v45 = vmax.f32 %v904_v57, %v1032_v53  ;;  %v7289_v19 = vpack.c.bf16 %v1156_v20, %v1156_v20  ;;  %v7290_v16 = vpack.c.bf16 %v1157_v17, %v1157_v17  ;;  %v7291_v43 = vpack.c.bf16 %v1158_v6, %v1158_v6  ;;  %v9880_v57 = vld [vmem:[%s11975_s0 + $0x17f] sm:$0x1]  ;;  %v2878_v53 = vld [vmem:[#allocation2 + $0x58] sm:$0xf]  ;;  %v9885_v9 = vpop.permute.xlu0 %3923 }
 0x123   :  { %2718 = vrot.lane.b32.xlu1 %v2675_v36, %s7473_s11  ;;  %v7292_v41 = vpack.c.bf16 %v1159_v22, %v1159_v22  ;;  %v1794_v27 = vunpack.c.l.b16 %v7287_v60  ;;  %v1795_v0 = vunpack.c.l.b16 %v7288_v2  ;;  %v9869_v36 = vld [vmem:[%s11975_s0 + $0x16f] sm:$0x1]  ;;  %v2432_v35 = vrot.slane %v2430_v55, 5 }
 0x124   :  { %v7293_v32 = vpack.c.bf16 %v1160_v45, %v1160_v45  ;;  %v1796_v10 = vunpack.c.l.b16 %v7289_v19  ;;  %v1797_v48 = vunpack.c.l.b16 %v7290_v16  ;;  %v1798_v28 = vunpack.c.l.b16 %v7291_v43  ;;  %v9890_v16 = vpop.permute.xlu1 %3929 }
 0x125   :  { %v2265_v26 = vld [vmem:[#allocation2 + $0x60] sm:$0xf]  ;;  %v1799_v15 = vunpack.c.l.b16 %v7292_v41  ;;  %v3030_v37 = vshll.u32 %v9855_v30, 16  ;;  %v1983_v31 = vrot.slane %v1794_v27, 7  ;;  %v1984_v34 = vrot.slane %v1795_v0, 6 }
 0x126   :  { %v2421_v13 = vshrl.u32 %v2265_v26, 16  ;;  %v2424_v5 = vshll.u32 %v2265_v26, 16  ;;  %v1800_v44 = vunpack.c.l.b16 %v7293_v32  ;;  %v2880_v54 = vld [vmem:[#allocation2 + $0x60] sm:$0xf]  ;;  %v1986_v12 = vrot.slane %v1796_v10, 5 }
 0x127   :  { %2722 = vrot.lane.b32.xlu1 %v2683_v59, %s7473_s11  ;;  %v1988_v3 = vrot.slane %v1797_v48, 4  ;;  %v905_v63 = vmax.f32 %v9864_v8, %v9869_v36  ;;  %v2774_v6 = vld [vmem:[#allocation2 + $0x60] sm:$0xf]  ;;  %v1990_v55 = vrot.slane %v1798_v28, 3  ;;  %v1033_v22 = vmax.f32 %v9874_v18, %v9880_v57  ;;  %v2879_v27 = vld [vmem:[#allocation2 + $0x5c] sm:$0x1] }
 0x128   :  { %v2423_v20 = vrot.slane %v2421_v13, 4  ;;  %v2426_v17 = vrot.slane %v2424_v5, 5  ;;  %v2589_v45 = vld [vmem:[#allocation2 + $0x60] sm:$0xe]  ;;  %v1985_v60 = vsel %vm1836_vm11, %v1984_v34, %v1983_v31  ;;  %v1992_v59 = vrot.slane %v1799_v15, 2  ;;  %v9897_v34 = vpop.permute.xlu0 %2512 }
 0x129   :  { %v3021_v2 = vshrl.u32 %v2880_v54, 16  ;;  %v3024_v19 = vshll.u32 %v2880_v54, 16  ;;  %v1987_v41 = vsel %vm11993_vm13, %v1986_v12, %v1985_v60  ;;  %v1994_v32 = vrot.slane %v1800_v44, 1  ;;  %v145_v36 = vld [vmem:[#allocation2 + $0x74] sm:$0x1] }
 0x12a   :  { %v2427_v43 = vor.u32 %v2426_v17, %v2423_v20  ;;  %v3007_v0 = vshrl.u32 %v2878_v53, 16  ;;  %v1989_v10 = vsel %vm11989_vm14, %v1988_v3, %v1987_v41  ;;  %v3010_v8 = vshll.u32 %v2878_v53, 16  ;;  %v2882_v13 = vld [vmem:[#allocation2 + $0x68] sm:$0xf]  ;;  %v2883_v54 = vld [vmem:[#allocation2 + $0x6c] sm:$0x1] }
 0x12b   :  { %2815 = vrot.lane.b32.xlu1 %v2774_v6, %s7475_s18  ;;  %v3023_v48 = vrot.slane %v3021_v2, 4  ;;  %v3026_v28 = vrot.slane %v3024_v19, 5  ;;  %v7053_v26 = vrot.slane %v2589_v45, 9  ;;  %v1991_v15 = vsel %vm1845_vm15, %v1990_v55, %v1989_v10  ;;  %v2181_v53 = vld [vmem:[#allocation2 + $0x70] sm:$0xf] }
 0x12c   :  { %v2428_v18 = vrot.slane %v2427_v43, 4  ;;  %v3009_v57 = vrot.slane %v3007_v0, 4  ;;  %v1993_v5 = vsel %vm1848_vm1, %v1992_v59, %v1991_v15  ;;  %v3012_v31 = vrot.slane %v3010_v8, 5  ;;  %v9937_v6 = vld [vmem:[#allocation2 + $0x5c] sm:$0x1] }
 0x12d   :  { %v3016_v44 = vshll.u32 %v2879_v27, 16  ;;  %vm11991_vm2 = vcmask 191648   ;;  %v1995_v3 = vsel %vm1851_vm8, %v1994_v32, %v1993_v5  ;;  %v3027_v20 = vor.u32 %v3026_v28, %v3023_v48  ;;  %v9973_v41 = vld [vmem:[%s11975_s0 + $0x181] sm:$0x1]  ;;  %v3928_v32 = vpop.permute.xlu0 %3927  ;;  %v9982_v28 = vld [vmem:[%s11975_s0 + $0x182] sm:$0x1] }
 0x12e   :  { %v2433_v12 = vsel %vm7664_vm7, %v2428_v18, %v2432_v35  ;;  %vm11990_vm14 = vcmask 224448   ;;  %3361 = vst.msk [vmem:[#allocation4 + $0x4] sm:$0xf] %vm11991_vm2, %v9227_v39  ;;  %3360 = vst.msk [vmem:[#allocation4] sm:$0xf] %vm11991_vm2, %v9199_v46  ;;  %v2671_v35 = vsel %vm7656_vm12, %v7051_v58, %v2670_v61  ;;  %v2070_v17 = vpack.c.b16 %v1995_v3, %v1995_v3  ;;  %v9933_v58 = vpop.permute.xlu1 %2518 }
 0x12f   :  { %3362 = vst.msk [vmem:[#allocation4 + $0x8] sm:$0xf] %vm11991_vm2, %v9248_v21  ;;  %3363 = vst.msk [vmem:[#allocation4 + $0xc] sm:$0xf] %vm11991_vm2, %v9250_v14  ;;  %2524 = vrot.lane.b32.xlu0 %v2433_v12, %s7474_s9  ;;  %v3013_v39 = vor.u32 %v3012_v31, %v3009_v57  ;;  %v146_v46 = vsel %vm7559_vm6, 0, %v145_v36  ;;  %v3038_v56 = vshll.u32 %v2882_v13, 16 }
 0x130   :  { %3459 = vst.msk [vmem:[#allocation4 + $0x4] sm:$0xf] %vm11990_vm14, %v9587_v62  ;;  %3458 = vst.msk [vmem:[#allocation4] sm:$0xf] %vm11990_vm14, %v9679_v33  ;;  %v9927_v21 = vld [vmem:[#allocation2 + $0x60] sm:$0xe]  ;;  %v9935_v62 = vmax.f32 %v905_v63, %v1033_v22  ;;  %v2182_v55 = vsel %vm7789_vm9, %v2070_v17, %v2181_v53 }
 0x131   :  { %3461 = vst.msk [vmem:[#allocation4 + $0xc] sm:$0xf] %vm11990_vm14, %v9662_v29  ;;  %3460 = vst.msk [vmem:[#allocation4 + $0x8] sm:$0xf] %vm11990_vm14, %v9715_v38  ;;  %v9929_v14 = vld [vmem:[#allocation2 + $0x64] sm:$0x1]  ;;  %v2679_v38 = vsel %vm7656_vm12, %v7053_v26, %v2678_v51 }
 0x132   :  { %147 = vst [vmem:[#allocation2 + $0x74] sm:$0x1] %v146_v46  ;;  %v3035_v33 = vshrl.u32 %v2882_v13, 16  ;;  %v3044_v61 = vshll.u32 %v2883_v54, 16  ;;  %v9939_v29 = vld [vmem:[#allocation2 + $0x68] sm:$0xe]  ;;  %v9975_v27 = vpop.permute.xlu1 %2710 }
 0x133   :  { %v9949_v45 = vrot.slane %v3030_v37, 5  ;;  %v9951_v63 = vld [vmem:[#allocation2 + $0x6c] sm:$0x1]  ;;  %v86_v22 = vld [vmem:[#allocation2 + $0x78] sm:$0x1]  ;;  %v9953_v60 = vrot.slane %v3027_v20, 4  ;;  %2716 = vrot.lane.b32.xlu0 %v2671_v35, %s7473_s11  ;;  %v7338_v37 = vpack.c.bf16 %v9935_v62, %v9935_v62 }
 0x134   :  { %2183 = vst [vmem:[#allocation2 + $0x70] sm:$0xf] %v2182_v55  ;;  %v9955_v59 = vrot.slane %v3016_v44, 5  ;;  %v3037_v2 = vrot.slane %v3035_v33, 4  ;;  %v3040_v40 = vrot.slane %v3038_v56, 5  ;;  %v9963_v30 = vrot.slane %v3013_v39, 4 }
 0x135   :  { %v9960_v51 = vld [vmem:[%s11975_s0 + $0x180] sm:$0x1]  ;;  %v9967_v19 = vrot.slane %v3044_v61, 5  ;;  %v7068_v43 = vrot.slane %v9927_v21, 9  ;;  %v3285_v10 = vrot.slane %v9929_v14, 5  ;;  %v7067_v48 = vrot.slane %v9931_v42, 9 }
 0x136   :  { %v3041_v0 = vor.u32 %v3040_v40, %v3037_v2  ;;  %vm3778_vm14 = vcmask 257248   ;;  %v9987_v8 = vld [vmem:[%s11975_s0 + $0x184] sm:$0x1]  ;;  %v9992_v36 = vld [vmem:[%s11975_s0 + $0x186] sm:$0x1]  ;;  %v3281_v57 = vrot.slane %v9937_v6, 5  ;;  %v906_v35 = vmax.f32 %v9960_v51, %v9973_v41  ;;  %v10096_v33 = vpop.permute.xlu1 %2714 }
 0x137   :  { %v9997_v18 = vld [vmem:[%s11975_s0 + $0x183] sm:$0x1]  ;;  %v10002_v26 = vld [vmem:[%s11975_s0 + $0x185] sm:$0x1]  ;;  %v10007_v15 = vld [vmem:[%s11975_s0 + $0x187] sm:$0x1]  ;;  %2720 = vrot.lane.b32.xlu0 %v2679_v38, %s7473_s11  ;;  %v3019_v17 = vsel %vm7664_vm7, %v9963_v30, %v9955_v59  ;;  %v10085_v46 = vsel %vm7656_vm12, %v7068_v43, %v3285_v10 }
 0x138   :  { %3780 = vst.msk [vmem:[#allocation4 + $0x4] sm:$0xf] %vm3778_vm14, %v9693_v23  ;;  %3779 = vst.msk [vmem:[#allocation4] sm:$0xf] %vm3778_vm14, %v9818_v50  ;;  %v7069_v13 = vrot.slane %v9939_v29, 9  ;;  %vm11992_vm2 = vcmask 290048   ;;  %v907_v55 = vmax.f32 %v9982_v28, %v9997_v18 }
 0x139   :  { %3782 = vst.msk [vmem:[#allocation4 + $0xc] sm:$0xf] %vm3778_vm14, %v9766_v49  ;;  %3781 = vst.msk [vmem:[#allocation4 + $0x8] sm:$0xf] %vm3778_vm14, %v9853_v24  ;;  %v87_v5 = vsel %vm7543_vm4, 0, %v86_v22  ;;  %v10041_v44 = vrot.slane %v3041_v0, 4  ;;  %v909_v22 = vmax.f32 %v9992_v36, %v10007_v15 }
 0x13a   :  { %v10024_v31 = vld [vmem:[%s11975_s0 + $0x188] sm:$0x1]  ;;  %v10029_v23 = vld [vmem:[%s11975_s0 + $0x18a] sm:$0x1]  ;;  %v10034_v49 = vld [vmem:[%s11975_s0 + $0x189] sm:$0x1] }
 0x13b   :  { %v10039_v50 = vld [vmem:[%s11975_s0 + $0x18b] sm:$0x1]  ;;  %v2773_v24 = vld [vmem:[#allocation2 + $0x58] sm:$0xf]  ;;  %v3289_v54 = vrot.slane %v9951_v63, 5  ;;  %v910_v41 = vmax.f32 %v10024_v31, %v10034_v49  ;;  %v3047_v0 = vsel %vm7664_vm7, %v10041_v44, %v9967_v19  ;;  %v3282_v19 = vsel %vm7656_vm12, %v7067_v48, %v3281_v57 }
 0x13c   :  { %3973 = vst.msk [vmem:[#allocation4 + $0x4] sm:$0xf] %vm11992_vm2, %v9839_v47  ;;  %3972 = vst.msk [vmem:[#allocation4] sm:$0xf] %vm11992_vm2, %v9885_v9  ;;  %v10051_v12 = vld [vmem:[%s11975_s0 + $0x18c] sm:$0x1]  ;;  %2813 = vrot.lane.b32.xlu0 %v2773_v24, %s7475_s18 }
 0x13d   :  { %88 = vst [vmem:[#allocation2 + $0x78] sm:$0x1] %v87_v5  ;;  %v10056_v3 = vld [vmem:[%s11975_s0 + $0x18d] sm:$0x1]  ;;  %v6739_v53 = vld [vmem:[%s11975_s0 + $0x190] sm:$0x1]  ;;  %v3290_v48 = vsel %vm7656_vm12, %v7069_v13, %v3289_v54 }
 0x13e   :  { %3975 = vst.msk [vmem:[#allocation4 + $0xc] sm:$0xf] %vm11992_vm2, %v9890_v16  ;;  %3974 = vst.msk [vmem:[#allocation4 + $0x8] sm:$0xf] %vm11992_vm2, %v3928_v32  ;;  %v2184_v47 = vld [vmem:[#allocation2 + $0x74] sm:$0x1]  ;;  %v3033_v16 = vsel %vm7664_vm7, %v9953_v60, %v9949_v45  ;;  %v908_v45 = vmax.f32 %v9987_v8, %v10002_v26  ;;  %v911_v32 = vmax.f32 %v10029_v23, %v10039_v50 }
 0x13f   :  { %v6740_v9 = vld [vmem:[%s11975_s0 + $0x192] sm:$0x1]  ;;  %v6741_v20 = vld [vmem:[%s11975_s0 + $0x194] sm:$0x1]  ;;  %v2185_v39 = vsel %vm7543_vm4, %v7338_v37, %v2184_v47  ;;  %v6742_v21 = vld [vmem:[%s11975_s0 + $0x196] sm:$0x1]  ;;  %v912_v36 = vmax.f32 %v10051_v12, %v10056_v3 }
 0x140   :  { %v6743_v14 = vld [vmem:[%s11975_s0 + $0x198] sm:$0x1]  ;;  %v6867_v62 = vld [vmem:[%s11975_s0 + $0x191] sm:$0x1]  ;;  %2186 = vst [vmem:[#allocation2 + $0x74] sm:$0x1] %v2185_v39 }
 0x141   :  { %v2776_v56 = vld [vmem:[#allocation2 + $0x70] sm:$0xf]  ;;  %v6744_v38 = vld [vmem:[%s11975_s0 + $0x19a] sm:$0x1]  ;;  %v1034_v60 = vmax.f32 %v6739_v53, %v6867_v62  ;;  %v2775_v2 = vld [vmem:[#allocation2 + $0x68] sm:$0xf] }
 0x142   :  { %v2884_v61 = vld [vmem:[#allocation2 + $0x70] sm:$0xf]  ;;  %2819 = vrot.lane.b32.xlu1 %v2776_v56, %s7475_s18  ;;  %v6745_v37 = vld [vmem:[%s11975_s0 + $0x19c] sm:$0x1]  ;;  %v6869_v10 = vld [vmem:[%s11975_s0 + $0x195] sm:$0x1]  ;;  %2817 = vrot.lane.b32.xlu0 %v2775_v2, %s7475_s18 }
 0x143   :  { %v3049_v40 = vshrl.u32 %v2884_v61, 16  ;;  %v3052_v51 = vshll.u32 %v2884_v61, 16  ;;  %v6868_v43 = vld [vmem:[%s11975_s0 + $0x193] sm:$0x1]  ;;  %v6870_v28 = vld [vmem:[%s11975_s0 + $0x197] sm:$0x1]  ;;  %v1162_v26 = vmax.f32 %v906_v35, %v1034_v60  ;;  %v1036_v49 = vmax.f32 %v6741_v20, %v6869_v10  ;;  %v10142_v61 = vpop.permute.xlu0 %2516  ;;  %v2808_v60 = vpop.permute.xlu1 %2807 }
 0x144   :  { %v6871_v8 = vld [vmem:[%s11975_s0 + $0x199] sm:$0x1]  ;;  %v1035_v18 = vmax.f32 %v6740_v9, %v6868_v43  ;;  %v6872_v31 = vld [vmem:[%s11975_s0 + $0x19b] sm:$0x1]  ;;  %v6873_v23 = vld [vmem:[%s11975_s0 + $0x19d] sm:$0x1]  ;;  %v1037_v50 = vmax.f32 %v6742_v21, %v6870_v28 }
 0x145   :  { %v3051_v15 = vrot.slane %v3049_v40, 4  ;;  %v3054_v5 = vrot.slane %v3052_v51, 5  ;;  %v1038_v24 = vmax.f32 %v6743_v14, %v6871_v8  ;;  %v1039_v53 = vmax.f32 %v6744_v38, %v6872_v31  ;;  %v2218_v62 = vld [vmem:[#allocation2 + $0x28] sm:$0xf]  ;;  %v2217_v56 = vld [vmem:[#allocation2 + $0x20] sm:$0xf] }
 0x146   :  { %v1040_v47 = vmax.f32 %v6745_v37, %v6873_v23  ;;  %v1163_v39 = vmax.f32 %v907_v55, %v1035_v18  ;;  %3136 = vrot.lane.b32.xlu1 %v3033_v16, %s7477_s25  ;;  %v1164_v3 = vmax.f32 %v908_v45, %v1036_v49  ;;  %v1165_v9 = vmax.f32 %v909_v22, %v1037_v50  ;;  %v10148_v55 = vld [vmem:[#allocation2 + $0x70] sm:$0xe]  ;;  %v3490_v50 = vld [vmem:[#allocation2 + $0x60] sm:$0xf] }
 0x147   :  { %v3055_v12 = vor.u32 %v3054_v5, %v3051_v15  ;;  %v7295_v35 = vpack.c.bf16 %v1162_v26, %v1162_v26  ;;  %2234 = vst.msk [vmem:[#allocation4 + $0x14] sm:$0xf] %vm27_vm0, %v2218_v62  ;;  %v1166_v20 = vmax.f32 %v910_v41, %v1038_v24  ;;  %v1167_v21 = vmax.f32 %v911_v32, %v1039_v53  ;;  %v2885_v16 = vld [vmem:[#allocation2 + $0x74] sm:$0x1]  ;;  %v3492_v15 = vld [vmem:[#allocation2 + $0x68] sm:$0xf] }
 0x148   :  { %v1168_v14 = vmax.f32 %v912_v36, %v1040_v47  ;;  %v7296_v38 = vpack.c.bf16 %v1163_v39, %v1163_v39  ;;  %2558 = vst.msk [vmem:[#allocation4 + $0x14] sm:$0xf] %vm2552_vm10, %v9859_v7  ;;  %v7297_v45 = vpack.c.bf16 %v1164_v3, %v1164_v3  ;;  %v7298_v22 = vpack.c.bf16 %v1165_v9, %v1165_v9  ;;  %v7446_v7 = vld [vmem:[%s11976_s1 + $0x10] ss:$0 sps:$4 sm:$0x33]   ;;  %v7448_v42 = vld [vmem:[#allocation4] sm:$0xff]  }
 0x149   :  { %2233 = vst.msk [vmem:[#allocation4 + $0x10] sm:$0xf] %vm27_vm0, %v2217_v56  ;;  %v1802_v40 = vunpack.c.l.b16 %v7295_v35  ;;  %vm4089_vm2 = vcmask 1041408   ;;  %v3056_v2 = vrot.slane %v3055_v12, 4  ;;  %v3058_v51 = vshll.u32 %v2885_v16, 16  ;;  %3134 = vrot.lane.b32.xlu0 %v3019_v17, %s7477_s25  ;;  %v7447_v16 = vld [vmem:[%s11976_s1 + $0x8] sm:$0xff]  }
 0x14a   :  { %2557 = vst.msk [vmem:[#allocation4 + $0x10] sm:$0xf] %vm2552_vm10, %v9897_v34  ;;  %v7299_v37 = vpack.c.bf16 %v1166_v20, %v1166_v20  ;;  %v7300_v43 = vpack.c.bf16 %v1167_v21, %v1167_v21  ;;  %v3206_v41 = vld [vmem:[#allocation2 + $0x74] sm:$0x1]  ;;  %v7301_v32 = vpack.c.bf16 %v1168_v14, %v1168_v14  ;;  %v1803_v10 = vunpack.c.l.b16 %v7296_v38  ;;  %v2709_v34 = vpop.permute.xlu0 %2708  ;;  %7431 = vmatprep.subr.msk.bf16.mxu0 %vm4089_vm2, %v7446_v7  ;;  %v148_v12 = vld [vmem:[#allocation2 + $0x7c] sm:$0x1] }
 0x14b   :  { %2754 = vst.msk [vmem:[#allocation4 + $0x14] sm:$0xf] %vm2748_vm3, %v9975_v27  ;;  %v1804_v28 = vunpack.c.l.b16 %v7297_v45  ;;  %v1805_v8 = vunpack.c.l.b16 %v7298_v22  ;;  %v3060_v27 = vrot.slane %v3058_v51, 5  ;;  %v7070_v36 = vrot.slane %v10148_v55, 9  ;;  %2753 = vst.msk [vmem:[#allocation4 + $0x10] sm:$0xf] %vm2748_vm3, %v2709_v34  ;;  %v2812_v51 = vpop.permute.xlu1 %2811 }
 0x14c   :  { %2851 = vst.msk [vmem:[#allocation4 + $0x14] sm:$0xf] %vm11994_vm5, %v2808_v60  ;;  %v1806_v18 = vunpack.c.l.b16 %v7299_v37  ;;  %v1807_v26 = vunpack.c.l.b16 %v7300_v43  ;;  %v1808_v5 = vunpack.c.l.b16 %v7301_v32  ;;  %v1996_v31 = vrot.slane %v1802_v40, 7  ;;  %v400_v3 = vld [vmem:[%s11975_s0 + $0x18e] sm:$0x1] }
 0x14d   :  { %v1997_v23 = vrot.slane %v1803_v10, 6  ;;  %v1999_v49 = vrot.slane %v1804_v28, 5  ;;  %v3061_v24 = vsel %vm7664_vm7, %v3056_v2, %v3060_v27  ;;  %v3293_v59 = vrot.slane %v3206_v41, 5  ;;  %v528_v9 = vld [vmem:[%s11975_s0 + $0x18f] sm:$0x1]  ;;  %3138 = vrot.lane.b32.xlu0 %v3047_v0, %s7477_s25  ;;  %v7449_v27 = vld [vmem:[%s11976_s1] sm:$0xff]  }
 0x14e   :  { %v2001_v30 = vrot.slane %v1805_v8, 4  ;;  %v2003_v17 = vrot.slane %v1806_v18, 3  ;;  %3140 = vrot.lane.b32.xlu1 %v3061_v24, %s7477_s25  ;;  %v2005_v47 = vrot.slane %v1807_v26, 2  ;;  %v3633_v39 = vshrl.u32 %v3492_v15, 16  ;;  %v2713_v35 = vpop.permute.xlu0 %2712  ;;  %v10184_v20 = vld [vmem:[#allocation2 + $0x6c] sm:$0x1] }
 0x14f   :  { %v1998_v53 = vsel %vm1836_vm11, %v1997_v23, %v1996_v31  ;;  %v3636_v62 = vshll.u32 %v3492_v15, 16  ;;  %v2007_v60 = vrot.slane %v1808_v5, 1  ;;  %v3619_v21 = vshrl.u32 %v3490_v50, 16  ;;  %v6746_v38 = vld [vmem:[%s11975_s0 + $0x19e] sm:$0x1] }
 0x150   :  { %v2000_v56 = vsel %vm11993_vm13, %v1999_v49, %v1998_v53  ;;  %v3622_v14 = vshll.u32 %v3490_v50, 16  ;;  %vm12008_vm13 = vcmask 1044484   ;;  %v10199_v0 = vld [vmem:[#allocation2 + $0x64] sm:$0x1]  ;;  %v6874_v55 = vld [vmem:[%s11975_s0 + $0x19f] sm:$0x1]  ;;  %v913_v13 = vmax.f32 %v400_v3, %v528_v9 }
 0x151   :  { %v2002_v44 = vsel %vm12008_vm13, %v2001_v30, %v2000_v56  ;;  %v3494_v45 = vld [vmem:[#allocation2 + $0x70] sm:$0xf]  ;;  %v10205_v40 = vrot.slane %v3633_v39, 4  ;;  %v10207_v2 = vrot.slane %v3636_v62, 5  ;;  %v10209_v6 = vrot.slane %v3619_v21, 4  ;;  %3327 = vrot.lane.b32.xlu0 %v3282_v19, %s7476_s14  ;;  %v7450_v53 = vld [vmem:[#allocation4 + $0x8] sm:$0xff]  }
 0x152   :  { %v2004_v22 = vsel %vm1845_vm15, %v2003_v17, %v2002_v44  ;;  %3329 = vrot.lane.b32.xlu1 %v10085_v46, %s7476_s14  ;;  %v3624_v37 = vrot.slane %v3622_v14, 5  ;;  %v4091_v43 = vsel %vm4089_vm2, %v7446_v7, 0  ;;  %v2220_v41 = vld [vmem:[#allocation2 + $0x38] sm:$0xf]  ;;  %v2219_v32 = vld [vmem:[#allocation2 + $0x30] sm:$0xf]  ;;  %v2806_v10 = vpop.permute.xlu0 %2805  ;;  %v3294_v46 = vsel %vm7656_vm12, %v7070_v36, %v3293_v59 }
 0x153   :  { %v2006_v57 = vsel %vm1848_vm1, %v2005_v47, %v2004_v22  ;;  %v2187_v28 = vld [vmem:[#allocation2 + $0x78] sm:$0xf]  ;;  %7384 = vmatpush3.bf16.msra.mxu0 %v4091_v43  ;;  %v149_v29 = vsel %vm7559_vm6, 0, %v148_v12  ;;  %2236 = vst.msk [vmem:[#allocation4 + $0x1c] sm:$0xf] %vm27_vm0, %v2220_v41  ;;  %v3642_v7 = vshll.u32 %v10184_v20, 16  ;;  %v1041_v8 = vmax.f32 %v6746_v38, %v6874_v55 }
 0x154   :  { %v2008_v63 = vsel %vm1851_vm8, %v2007_v60, %v2006_v57  ;;  %2235 = vst.msk [vmem:[#allocation4 + $0x18] sm:$0xf] %vm27_vm0, %v2219_v32  ;;  %150 = vst [vmem:[#allocation2 + $0x7c] sm:$0x1] %v149_v29  ;;  %v3647_v34 = vshrl.u32 %v3494_v45, 16  ;;  %7385 = vmatprep.subr.bf16.mxu0 %v7447_v16  ;;  %v3639_v36 = vor.u32 %v10207_v2, %v10205_v40  ;;  %v3628_v18 = vshll.u32 %v10199_v0, 16 }
 0x155   :  { %2850 = vst.msk [vmem:[#allocation4 + $0x10] sm:$0xf] %vm11994_vm5, %v2806_v10  ;;  %v2072_v54 = vpack.c.b16 %v2008_v63, %v2008_v63  ;;  %v3650_v26 = vshll.u32 %v3494_v45, 16  ;;  %vm4064_vm2 = vcmask 293888   ;;  %v3625_v15 = vor.u32 %v3624_v37, %v10209_v6  ;;  %v3495_v31 = vld [vmem:[#allocation2 + $0x74] sm:$0x1]  ;;  %3331 = vrot.lane.b32.xlu0 %v3290_v48, %s7476_s14 }
 0x156   :  { %2560 = vst.msk [vmem:[#allocation4 + $0x1c] sm:$0xf] %vm2552_vm10, %v9933_v58  ;;  %2559 = vst.msk [vmem:[#allocation4 + $0x18] sm:$0xf] %vm2552_vm10, %v10142_v61  ;;  %v3129_v58 = vpop.permute.xlu1 %3128  ;;  %3333 = vrot.lane.b32.xlu1 %v3294_v46, %s7476_s14  ;;  %v1169_v5 = vmax.f32 %v913_v13, %v1041_v8  ;;  %7389 = vmatprep.mubr.msk.bf16.mxu0 %vm4064_vm2, %v7448_v42  ;;  %v2269_v23 = vld [vmem:[#allocation2 + $0x70] sm:$0xf]  ;;  %v2810_v49 = vpop.permute.xlu0 %2809 }
 0x157   :  { %2756 = vst.msk [vmem:[#allocation4 + $0x1c] sm:$0xf] %vm2748_vm3, %v10096_v33  ;;  %2755 = vst.msk [vmem:[#allocation4 + $0x18] sm:$0xf] %vm2748_vm3, %v2713_v35  ;;  %v2188_v61 = vsel %vm7789_vm9, %v2072_v54, %v2187_v28  ;;  %vm12009_vm13 = vcmask 158848   ;;  %7386 = vmatpush3.bf16.msra.mxu0 %v7447_v16  ;;  %v10253_v24 = vrot.slane %v3642_v7, 5 }
 0x158   :  { %2853 = vst.msk [vmem:[#allocation4 + $0x1c] sm:$0xf] %vm11994_vm5, %v2812_v51  ;;  %v3386_v33 = vld [vmem:[#allocation2 + $0x68] sm:$0xf]  ;;  %v3385_v50 = vld [vmem:[#allocation2 + $0x60] sm:$0xf]  ;;  %v7339_v59 = vpack.c.bf16 %v1169_v5, %v1169_v5  ;;  %7387 = vmatprep.subr.bf16.mxu0 %v7449_v27 }
 0x159   :  { %3172 = vst.msk [vmem:[#allocation4 + $0x14] sm:$0xf] %vm12009_vm13, %v3129_v58  ;;  %2189 = vst [vmem:[#allocation2 + $0x78] sm:$0xf] %v2188_v61  ;;  %v3649_v30 = vrot.slane %v3647_v34, 4  ;;  %v3652_v17 = vrot.slane %v3650_v26, 5  ;;  %3425 = vrot.lane.b32.xlu0 %v3385_v50, %s7478_s13 }
 0x15a   :  { %2852 = vst.msk [vmem:[#allocation4 + $0x18] sm:$0xf] %vm11994_vm5, %v2810_v49  ;;  %v10255_v47 = vrot.slane %v3628_v18, 5  ;;  %v3656_v39 = vshll.u32 %v3495_v31, 16  ;;  %v2449_v62 = vshrl.u32 %v2269_v23, 16  ;;  %v2452_v12 = vshll.u32 %v2269_v23, 16  ;;  %3427 = vrot.lane.b32.xlu1 %v3386_v33, %s7478_s13  ;;  %v3127_v20 = vpop.permute.xlu0 %3126  ;;  %v3133_v44 = vpop.permute.xlu1 %3132  ;;  %vm12010_vm5 = vmmov %vm12009_vm13 }
 0x15b   :  { %v3387_v3 = vld [vmem:[#allocation2 + $0x70] sm:$0xf]  ;;  %v3640_v9 = vrot.slane %v3639_v36, 4  ;;  %v3626_v35 = vrot.slane %v3625_v15, 4  ;;  %v2270_v56 = vld [vmem:[#allocation2 + $0x74] sm:$0x1]  ;;  %7388 = vmatpush3.bf16.msra.mxu0 %v7449_v27  ;;  %v3653_v55 = vor.u32 %v3652_v17, %v3649_v30 }
 0x15c   :  { %v92_v60 = vld [vmem:[#allocation2 + $0x88] sm:$0x1]  ;;  %v2190_v21 = vld [vmem:[#allocation2 + $0x7c] sm:$0x1]  ;;  %v10259_v14 = vld [vmem:[#allocation2 + $0x68] sm:$0xe] }
 0x15d   :  { %v10261_v38 = vld [vmem:[#allocation2 + $0x6c] sm:$0x1]  ;;  %v2451_v16 = vrot.slane %v2449_v62, 4  ;;  %v2454_v19 = vrot.slane %v2452_v12, 5  ;;  %3171 = vst.msk [vmem:[#allocation4 + $0x10] sm:$0xf] %vm12009_vm13, %v3127_v20  ;;  %v2191_v0 = vsel %vm7543_vm4, %v7339_v59, %v2190_v21  ;;  %v3645_v37 = vsel %vm7664_vm7, %v3640_v9, %v10253_v24  ;;  %3429 = vrot.lane.b32.xlu0 %v3387_v3, %s7478_s13 }
 0x15e   :  { %v10266_v45 = vld [vmem:[#allocation2 + $0x60] sm:$0xe]  ;;  %v93_v22 = vsel %vm7543_vm4, 0, %v92_v60  ;;  %v154_v40 = vld [vmem:[#allocation2 + $0x8c] sm:$0x1]  ;;  %v10271_v2 = vrot.slane %v3656_v39, 5  ;;  %v3631_v43 = vsel %vm7664_vm7, %v3626_v35, %v10255_v47  ;;  %7390 = vmatmul.mubr.msk.bf16.vlgmr.msra.gmra.mxu0 %vm4064_vm2, %v7450_v53  ;;  %v3131_v46 = vpop.permute.xlu0 %3130  ;;  %v3322_v7 = vpop.permute.xlu1 %3321 }
 0x15f   :  { %3174 = vst.msk [vmem:[#allocation4 + $0x1c] sm:$0xf] %vm12010_vm5, %v3133_v44  ;;  %2192 = vst [vmem:[#allocation2 + $0x7c] sm:$0x1] %v2191_v0  ;;  %v10273_v6 = vld [vmem:[#allocation2 + $0x64] sm:$0x1]  ;;  %v2455_v10 = vor.u32 %v2454_v19, %v2451_v16 }
 0x160   :  { %v2458_v42 = vshll.u32 %v2270_v56, 16  ;;  %v10275_v51 = vld [vmem:[#allocation2 + $0x70] sm:$0xe]  ;;  %94 = vst [vmem:[#allocation2 + $0x88] sm:$0x1] %v93_v22  ;;  %v155_v48 = vsel %vm7559_vm6, 0, %v154_v40 }
 0x161   :  { %v3388_v57 = vld [vmem:[#allocation2 + $0x78] sm:$0xf]  ;;  %156 = vst [vmem:[#allocation2 + $0x8c] sm:$0x1] %v155_v48  ;;  %v10288_v54 = vld [vmem:[#allocation2 + $0x74] sm:$0x1]  ;;  %3746 = vrot.lane.b32.xlu0 %v3631_v43, %s7479_s16 }
 0x162   :  { %v3496_v41 = vld [vmem:[#allocation2 + $0x78] sm:$0xf]  ;;  %3431 = vrot.lane.b32.xlu1 %v3388_v57, %s7478_s13  ;;  %3173 = vst.msk [vmem:[#allocation4 + $0x18] sm:$0xf] %vm12010_vm5, %v3131_v46  ;;  %v3654_v8 = vrot.slane %v3653_v55, 4  ;;  %v7084_v34 = vrot.slane %v10259_v14, 9  ;;  %v3320_v33 = vpop.permute.xlu0 %3319  ;;  %v3326_v53 = vpop.permute.xlu1 %3325 }
 0x163   :  { %v2271_v32 = vld [vmem:[#allocation2 + $0x78] sm:$0xf]  ;;  %v3661_v63 = vshrl.u32 %v3496_v41, 16  ;;  %v3664_v28 = vshll.u32 %v3496_v41, 16  ;;  %v3897_v27 = vrot.slane %v10261_v38, 5  ;;  %v7083_v36 = vrot.slane %v10266_v45, 9 }
 0x164   :  { %v2463_v29 = vshrl.u32 %v2271_v32, 16  ;;  %v2466_v13 = vshll.u32 %v2271_v32, 16  ;;  %v10294_v18 = vld [vmem:[#allocation2 + $0x78] sm:$0xe]  ;;  %vm12011_vm13 = vcmask 191648   ;;  %v3893_v5 = vrot.slane %v10273_v6, 5 }
 0x165   :  { %3365 = vst.msk [vmem:[#allocation4 + $0x14] sm:$0xf] %vm12011_vm13, %v3322_v7  ;;  %v3663_v26 = vrot.slane %v3661_v63, 4  ;;  %v3666_v58 = vrot.slane %v3664_v28, 5  ;;  %v10298_v31 = vrot.slane %v2458_v42, 5  ;;  %v7085_v23 = vrot.slane %v10275_v51, 9  ;;  %vm12012_vm5 = vmmov %vm12011_vm13 }
 0x166   :  { %v2465_v61 = vrot.slane %v2463_v29, 4  ;;  %v2468_v15 = vrot.slane %v2466_v13, 5  ;;  %v3901_v49 = vrot.slane %v10288_v54, 5  ;;  %3748 = vrot.lane.b32.xlu1 %v3645_v37, %s7479_s16  ;;  %v10304_v59 = vrot.slane %v2455_v10, 4  ;;  %v89_v17 = vld [vmem:[#allocation2 + $0x80] sm:$0x1]  ;;  %vm12013_vm13 = vmmov %vm12012_vm5  ;;  %v3324_v42 = vpop.permute.xlu0 %3323  ;;  %v3420_v41 = vpop.permute.xlu1 %3419 }
 0x167   :  { %v3667_v50 = vor.u32 %v3666_v58, %v3663_v26  ;;  %v7086_v30 = vrot.slane %v10294_v18, 9  ;;  %3364 = vst.msk [vmem:[#allocation4 + $0x10] sm:$0xf] %vm12012_vm5, %v3320_v33  ;;  %v3497_v47 = vld [vmem:[#allocation2 + $0x7c] sm:$0x1]  ;;  %v3659_v39 = vsel %vm7664_vm7, %v3654_v8, %v10271_v2  ;;  %v90_v6 = vsel %vm7543_vm4, 0, %v89_v17 }
 0x168   :  { %v2469_v24 = vor.u32 %v2468_v15, %v2465_v61  ;;  %v2272_v62 = vld [vmem:[#allocation2 + $0x7c] sm:$0x1]  ;;  %3367 = vst.msk [vmem:[#allocation4 + $0x1c] sm:$0xf] %vm12013_vm13, %v3326_v53  ;;  %v3670_v9 = vshll.u32 %v3497_v47, 16  ;;  %3750 = vrot.lane.b32.xlu0 %v3659_v39, %s7479_s16  ;;  %v3894_v32 = vsel %vm7656_vm12, %v7083_v36, %v3893_v5  ;;  %vm12014_vm13 = vcmask 224448  }
 0x169   :  { %v3818_v12 = vld [vmem:[#allocation2 + $0x7c] sm:$0x1]  ;;  %v3668_v3 = vrot.slane %v3667_v50, 4  ;;  %v2472_v56 = vshll.u32 %v2272_v62, 16  ;;  %v10317_v60 = vld [vmem:[%s11975_s0 + $0x1c0] sm:$0x1]  ;;  %v3898_v29 = vsel %vm7656_vm12, %v7084_v34, %v3897_v27  ;;  %v2461_v13 = vsel %vm7664_vm7, %v10304_v59, %v10298_v31 }
 0x16a   :  { %v10312_v35 = vrot.slane %v2469_v24, 4  ;;  %v10322_v20 = vld [vmem:[%s11975_s0 + $0x1c2] sm:$0x1]  ;;  %v10327_v21 = vld [vmem:[%s11975_s0 + $0x1c4] sm:$0x1]  ;;  %v3905_v0 = vrot.slane %v3818_v12, 5  ;;  %v10417_v54 = vsel %vm7656_vm12, %v7085_v23, %v3901_v49  ;;  %v3418_v15 = vpop.permute.xlu0 %3417  ;;  %v3424_v59 = vpop.permute.xlu1 %3423 }
 0x16b   :  { %v10332_v38 = vld [vmem:[%s11975_s0 + $0x1c6] sm:$0x1]  ;;  %v10337_v16 = vld [vmem:[%s11975_s0 + $0x1c1] sm:$0x1]  ;;  %v10342_v19 = vld [vmem:[%s11975_s0 + $0x1c3] sm:$0x1] }
 0x16c   :  { %v10347_v44 = vld [vmem:[%s11975_s0 + $0x1c5] sm:$0x1]  ;;  %v10352_v55 = vld [vmem:[%s11975_s0 + $0x1c8] sm:$0x1]  ;;  %v10357_v45 = vld [vmem:[%s11975_s0 + $0x1ca] sm:$0x1]  ;;  %v922_v18 = vmax.f32 %v10317_v60, %v10337_v16  ;;  %v923_v26 = vmax.f32 %v10322_v20, %v10342_v19  ;;  %3939 = vrot.lane.b32.xlu0 %v3894_v32, %s7480_s20  ;;  %v10449_v5 = vsel %vm7656_vm12, %v7086_v30, %v3905_v0 }
 0x16d   :  { %v10362_v22 = vld [vmem:[%s11975_s0 + $0x1cc] sm:$0x1]  ;;  %v10367_v40 = vld [vmem:[%s11975_s0 + $0x1c7] sm:$0x1]  ;;  %v10372_v2 = vld [vmem:[%s11975_s0 + $0x1c9] sm:$0x1]  ;;  %v924_v58 = vmax.f32 %v10327_v21, %v10347_v44 }
 0x16e   :  { %v3672_v51 = vrot.slane %v3670_v9, 5  ;;  %v10377_v48 = vrot.slane %v2472_v56, 5  ;;  %v10382_v57 = vld [vmem:[%s11975_s0 + $0x1ce] sm:$0x1]  ;;  %v542_v37 = vld [vmem:[%s11975_s0 + $0x1cb] sm:$0x1]  ;;  %v925_v61 = vmax.f32 %v10332_v38, %v10367_v40  ;;  %v926_v33 = vmax.f32 %v10352_v55, %v10372_v2  ;;  %v3422_v0 = vpop.permute.xlu0 %3421  ;;  %v3741_v40 = vpop.permute.xlu1 %3740 }
 0x16f   :  { %v10390_v43 = vld [vmem:[%s11975_s0 + $0x1cd] sm:$0x1]  ;;  %91 = vst [vmem:[#allocation2 + $0x80] sm:$0x1] %v90_v6  ;;  %3366 = vst.msk [vmem:[#allocation4 + $0x18] sm:$0xf] %vm12012_vm5, %v3324_v42  ;;  %v927_v50 = vmax.f32 %v10357_v45, %v542_v37 }
 0x170   :  { %v544_v10 = vld [vmem:[%s11975_s0 + $0x1cf] sm:$0x1]  ;;  %v6755_v46 = vld [vmem:[%s11975_s0 + $0x1d0] sm:$0x1]  ;;  %v6756_v63 = vld [vmem:[%s11975_s0 + $0x1d2] sm:$0x1]  ;;  %v3673_v28 = vsel %vm7664_vm7, %v3668_v3, %v3672_v51  ;;  %v928_v24 = vmax.f32 %v10362_v22, %v10390_v43  ;;  %v2475_v3 = vsel %vm7664_vm7, %v10312_v35, %v10377_v48  ;;  %2528 = vrot.lane.b32.xlu0 %v2461_v13, %s7474_s9 }
 0x171   :  { %3463 = vst.msk [vmem:[#allocation4 + $0x14] sm:$0xf] %vm12014_vm13, %v3420_v41  ;;  %v6757_v7 = vld [vmem:[%s11975_s0 + $0x1d4] sm:$0x1]  ;;  %v6758_v14 = vld [vmem:[%s11975_s0 + $0x1d6] sm:$0x1]  ;;  %3752 = vrot.lane.b32.xlu1 %v3673_v28, %s7479_s16  ;;  %vm12015_vm5 = vmmov %vm12014_vm13  ;;  %v929_v47 = vmax.f32 %v10382_v57, %v544_v10 }
 0x172   :  { %v6759_v8 = vld [vmem:[%s11975_s0 + $0x1d8] sm:$0x1]  ;;  %v6760_v34 = vld [vmem:[%s11975_s0 + $0x1da] sm:$0x1]  ;;  %v6761_v27 = vld [vmem:[%s11975_s0 + $0x1dc] sm:$0x1] }
 0x173   :  { %v6762_v36 = vld [vmem:[%s11975_s0 + $0x1de] sm:$0x1]  ;;  %v6883_v31 = vld [vmem:[%s11975_s0 + $0x1d1] sm:$0x1]  ;;  %v6884_v23 = vld [vmem:[%s11975_s0 + $0x1d3] sm:$0x1] }
 0x174   :  { %v6885_v49 = vld [vmem:[%s11975_s0 + $0x1d5] sm:$0x1]  ;;  %3462 = vst.msk [vmem:[#allocation4 + $0x10] sm:$0xf] %vm12015_vm5, %v3418_v15  ;;  %v6886_v30 = vld [vmem:[%s11975_s0 + $0x1d7] sm:$0x1]  ;;  %v1050_v39 = vmax.f32 %v6755_v46, %v6883_v31  ;;  %v1051_v62 = vmax.f32 %v6756_v63, %v6884_v23  ;;  %vm12016_vm13 = vmmov %vm12015_vm5  ;;  %3943 = vrot.lane.b32.xlu0 %v10417_v54, %s7480_s20 }
 0x175   :  { %v6887_v17 = vld [vmem:[%s11975_s0 + $0x1d9] sm:$0x1]  ;;  %v6888_v53 = vld [vmem:[%s11975_s0 + $0x1db] sm:$0x1]  ;;  %v1052_v12 = vmax.f32 %v6757_v7, %v6885_v49  ;;  %3465 = vst.msk [vmem:[#allocation4 + $0x1c] sm:$0xf] %vm12016_vm13, %v3424_v59  ;;  %v1053_v60 = vmax.f32 %v6758_v14, %v6886_v30  ;;  %3941 = vrot.lane.b32.xlu1 %v3898_v29, %s7480_s20 }
 0x176   :  { %v6889_v9 = vld [vmem:[%s11975_s0 + $0x1dd] sm:$0x1]  ;;  %v6890_v56 = vld [vmem:[%s11975_s0 + $0x1df] sm:$0x1]  ;;  %v1054_v20 = vmax.f32 %v6759_v8, %v6887_v17  ;;  %v1055_v21 = vmax.f32 %v6760_v34, %v6888_v53  ;;  %v1178_v19 = vmax.f32 %v922_v18, %v1050_v39  ;;  %v1179_v44 = vmax.f32 %v923_v26, %v1051_v62  ;;  %3464 = vst.msk [vmem:[#allocation4 + $0x18] sm:$0xf] %vm12015_vm5, %v3422_v0  ;;  %v3739_v18 = vpop.permute.xlu0 %3738 }
 0x177   :  { %v1056_v38 = vmax.f32 %v6761_v27, %v6889_v9  ;;  %v1057_v16 = vmax.f32 %v6762_v36, %v6890_v56  ;;  %v1180_v35 = vmax.f32 %v924_v58, %v1052_v12  ;;  %v1181_v55 = vmax.f32 %v925_v61, %v1053_v60  ;;  %v2202_v48 = vld [vmem:[#allocation2 + $0x8c] sm:$0x1]  ;;  %3784 = vst.msk [vmem:[#allocation4 + $0x14] sm:$0xf] %vm3778_vm14, %v3741_v40  ;;  %v151_v32 = vld [vmem:[#allocation2 + $0x84] sm:$0x1] }
 0x178   :  { %v1182_v45 = vmax.f32 %v926_v33, %v1054_v20  ;;  %v1183_v22 = vmax.f32 %v927_v50, %v1055_v21  ;;  %v7311_v42 = vpack.c.bf16 %v1178_v19, %v1178_v19  ;;  %v7312_v51 = vpack.c.bf16 %v1179_v44, %v1179_v44  ;;  %v10494_v10 = vld [vmem:[%s11975_s0 + $0x1a0] sm:$0x1]  ;;  %v10499_v46 = vld [vmem:[%s11975_s0 + $0x1a1] sm:$0x1]  ;;  %v10505_v7 = vld [vmem:[%s11975_s0 + $0x1a2] sm:$0x1] }
 0x179   :  { %v1184_v2 = vmax.f32 %v928_v24, %v1056_v38  ;;  %v1185_v6 = vmax.f32 %v929_v47, %v1057_v16  ;;  %v7313_v57 = vpack.c.bf16 %v1180_v35, %v1180_v35  ;;  %v7314_v37 = vpack.c.bf16 %v1181_v55, %v1181_v55  ;;  %2530 = vrot.lane.b32.xlu1 %v2475_v3, %s7474_s9  ;;  %v10510_v14 = vld [vmem:[%s11975_s0 + $0x1a4] sm:$0x1]  ;;  %v10515_v8 = vld [vmem:[%s11975_s0 + $0x1a6] sm:$0x1]  ;;  %v10520_v34 = vld [vmem:[%s11975_s0 + $0x1a3] sm:$0x1]  ;;  %v3745_v24 = vpop.permute.xlu1 %3744 }
 0x17a   :  { %v7315_v43 = vpack.c.bf16 %v1182_v45, %v1182_v45  ;;  %v7316_v41 = vpack.c.bf16 %v1183_v22, %v1183_v22  ;;  %v1818_v28 = vunpack.c.l.b16 %v7311_v42  ;;  %v1819_v29 = vunpack.c.l.b16 %v7312_v51  ;;  %v10525_v27 = vld [vmem:[%s11975_s0 + $0x1a5] sm:$0x1]  ;;  %v10530_v36 = vld [vmem:[%s11975_s0 + $0x1a7] sm:$0x1]  ;;  %v10537_v31 = vld [vmem:[%s11975_s0 + $0x1a8] sm:$0x1]  ;;  %v3743_v35 = vpop.permute.xlu0 %3742 }
 0x17b   :  { %v7317_v63 = vpack.c.bf16 %v1184_v2, %v1184_v2  ;;  %v7341_v13 = vpack.c.bf16 %v1185_v6, %v1185_v6  ;;  %v1820_v26 = vunpack.c.l.b16 %v7313_v57  ;;  %v1821_v58 = vunpack.c.l.b16 %v7314_v37  ;;  %v10542_v23 = vld [vmem:[%s11975_s0 + $0x1aa] sm:$0x1]  ;;  %v10547_v49 = vld [vmem:[%s11975_s0 + $0x1ac] sm:$0x1]  ;;  %v10552_v54 = vld [vmem:[%s11975_s0 + $0x1a9] sm:$0x1] }
 0x17c   :  { %v1822_v61 = vunpack.c.l.b16 %v7315_v43  ;;  %v1823_v15 = vunpack.c.l.b16 %v7316_v41  ;;  %v10557_v33 = vld [vmem:[%s11975_s0 + $0x1ab] sm:$0x1]  ;;  %v10562_v50 = vld [vmem:[%s11975_s0 + $0x1ad] sm:$0x1]  ;;  %3783 = vst.msk [vmem:[#allocation4 + $0x10] sm:$0xf] %vm3778_vm14, %v3739_v18  ;;  %v914_v0 = vmax.f32 %v10494_v10, %v10499_v46  ;;  %v915_v40 = vmax.f32 %v10505_v7, %v10520_v34 }
 0x17d   :  { %v1824_v59 = vunpack.c.l.b16 %v7317_v63  ;;  %v2022_v30 = vrot.slane %v1818_v28, 7  ;;  %v2023_v17 = vrot.slane %v1819_v29, 6  ;;  %v2203_v53 = vsel %vm7543_vm4, %v7341_v13, %v2202_v48  ;;  %v10570_v47 = vld [vmem:[%s11975_s0 + $0x1ae] sm:$0x1]  ;;  %v10575_v39 = vld [vmem:[%s11975_s0 + $0x1af] sm:$0x1]  ;;  %3945 = vrot.lane.b32.xlu1 %v10449_v5, %s7480_s20  ;;  %v3934_v42 = vpop.permute.xlu1 %3933 }
 0x17e   :  { %v6747_v62 = vld [vmem:[%s11975_s0 + $0x1b0] sm:$0x1]  ;;  %v6748_v12 = vld [vmem:[%s11975_s0 + $0x1b2] sm:$0x1]  ;;  %3786 = vst.msk [vmem:[#allocation4 + $0x1c] sm:$0xf] %vm3778_vm14, %v3745_v24  ;;  %v916_v2 = vmax.f32 %v10510_v14, %v10525_v27  ;;  %v917_v6 = vmax.f32 %v10515_v8, %v10530_v36  ;;  %v918_v43 = vmax.f32 %v10537_v31, %v10552_v54  ;;  %v919_v41 = vmax.f32 %v10542_v23, %v10557_v33 }
 0x17f   :  { %v2025_v3 = vrot.slane %v1820_v26, 5  ;;  %v2027_v9 = vrot.slane %v1821_v58, 4  ;;  %v2029_v56 = vrot.slane %v1822_v61, 3  ;;  %v2031_v60 = vrot.slane %v1823_v15, 2  ;;  %2204 = vst [vmem:[#allocation2 + $0x8c] sm:$0x1] %v2203_v53  ;;  %v3932_v26 = vpop.permute.xlu0 %3931 }
 0x180   :  { %v6749_v20 = vld [vmem:[%s11975_s0 + $0x1b4] sm:$0x1]  ;;  %v2024_v21 = vsel %vm1836_vm11, %v2023_v17, %v2022_v30  ;;  %v2033_v38 = vrot.slane %v1824_v59, 1  ;;  %v152_v16 = vsel %vm7559_vm6, 0, %v151_v32  ;;  %v6750_v19 = vld [vmem:[%s11975_s0 + $0x1b6] sm:$0x1]  ;;  %v920_v32 = vmax.f32 %v10547_v49, %v10562_v50 }
 0x181   :  { %v6751_v44 = vld [vmem:[%s11975_s0 + $0x1b8] sm:$0x1]  ;;  %vm12017_vm13 = vcmask 1043459   ;;  %153 = vst [vmem:[#allocation2 + $0x84] sm:$0x1] %v152_v16  ;;  %vm12018_vm5 = vcmask 1044484   ;;  %v921_v29 = vmax.f32 %v10570_v47, %v10575_v39 }
 0x182   :  { %v2026_v5 = vsel %vm12017_vm13, %v2025_v3, %v2024_v21  ;;  %v6752_v55 = vld [vmem:[%s11975_s0 + $0x1ba] sm:$0x1]  ;;  %v6753_v45 = vld [vmem:[%s11975_s0 + $0x1bc] sm:$0x1]  ;;  %v6754_v22 = vld [vmem:[%s11975_s0 + $0x1be] sm:$0x1] }
 0x183   :  { %3785 = vst.msk [vmem:[#allocation4 + $0x18] sm:$0xf] %vm3778_vm14, %v3743_v35  ;;  %v2028_v51 = vsel %vm12018_vm5, %v2027_v9, %v2026_v5  ;;  %v6875_v48 = vld [vmem:[%s11975_s0 + $0x1b1] sm:$0x1]  ;;  %v6876_v57 = vld [vmem:[%s11975_s0 + $0x1b3] sm:$0x1] }
 0x184   :  { %v6877_v37 = vld [vmem:[%s11975_s0 + $0x1b5] sm:$0x1]  ;;  %vm12019_vm13 = vcmask 290048   ;;  %v2030_v10 = vsel %vm1845_vm15, %v2029_v56, %v2028_v51  ;;  %v6878_v46 = vld [vmem:[%s11975_s0 + $0x1b7] sm:$0x1]  ;;  %v1042_v13 = vmax.f32 %v6747_v62, %v6875_v48  ;;  %v1043_v7 = vmax.f32 %v6748_v12, %v6876_v57  ;;  %v10657_v12 = vpop.permute.xlu0 %2520 }
 0x185   :  { %3977 = vst.msk [vmem:[#allocation4 + $0x14] sm:$0xf] %vm12019_vm13, %v3934_v42  ;;  %v6879_v63 = vld [vmem:[%s11975_s0 + $0x1b9] sm:$0x1]  ;;  %v6880_v28 = vld [vmem:[%s11975_s0 + $0x1bb] sm:$0x1]  ;;  %v2032_v14 = vsel %vm1848_vm1, %v2031_v60, %v2030_v10  ;;  %v1044_v27 = vmax.f32 %v6749_v20, %v6877_v37  ;;  %v1045_v36 = vmax.f32 %v6750_v19, %v6878_v46  ;;  %vm12020_vm5 = vmmov %vm12019_vm13 }
 0x186   :  { %v6881_v8 = vld [vmem:[%s11975_s0 + $0x1bd] sm:$0x1]  ;;  %v6882_v34 = vld [vmem:[%s11975_s0 + $0x1bf] sm:$0x1]  ;;  %v1046_v18 = vmax.f32 %v6751_v44, %v6879_v63  ;;  %v2034_v58 = vsel %vm1851_vm8, %v2033_v38, %v2032_v14  ;;  %v2199_v61 = vld [vmem:[#allocation2 + $0x88] sm:$0xf]  ;;  %v1047_v15 = vmax.f32 %v6752_v55, %v6880_v28  ;;  %v1170_v33 = vmax.f32 %v914_v0, %v1042_v13 }
 0x187   :  { %v1048_v31 = vmax.f32 %v6753_v45, %v6881_v8  ;;  %v1049_v23 = vmax.f32 %v6754_v22, %v6882_v34  ;;  %3976 = vst.msk [vmem:[#allocation4 + $0x10] sm:$0xf] %vm12020_vm5, %v3932_v26  ;;  %v2076_v49 = vpack.c.b16 %v2034_v58, %v2034_v58  ;;  %v2276_v54 = vld [vmem:[#allocation2 + $0x8c] sm:$0x1]  ;;  %v1171_v50 = vmax.f32 %v915_v40, %v1043_v7  ;;  %vm12021_vm13 = vmmov %vm12020_vm5  ;;  %v10680_v13 = vld [vmem:[%s11975_s0 + $0x1e2] sm:$0x1] }
 0x188   :  { %v1172_v24 = vmax.f32 %v916_v2, %v1044_v27  ;;  %v1173_v59 = vmax.f32 %v917_v6, %v1045_v36  ;;  %v1174_v30 = vmax.f32 %v918_v43, %v1046_v18  ;;  %v1175_v17 = vmax.f32 %v919_v41, %v1047_v15  ;;  %v2196_v19 = vld [vmem:[#allocation2 + $0x84] sm:$0x1]  ;;  %v10659_v2 = vld [vmem:[#allocation2 + $0x78] sm:$0xe]  ;;  %v3936_v6 = vpop.permute.xlu0 %3935  ;;  %v95_v43 = vld [vmem:[#allocation2 + $0x90] sm:$0x1]  ;;  %v10702_v27 = vpop.permute.xlu1 %2522 }
 0x189   :  { %v2200_v53 = vsel %vm7789_vm9, %v2076_v49, %v2199_v61  ;;  %v1176_v47 = vmax.f32 %v920_v32, %v1048_v31  ;;  %v1177_v39 = vmax.f32 %v921_v29, %v1049_v23  ;;  %v7303_v62 = vpack.c.bf16 %v1170_v33, %v1170_v33  ;;  %3978 = vst.msk [vmem:[#allocation4 + $0x18] sm:$0xf] %vm12021_vm13, %v3936_v6  ;;  %v10664_v32 = vld [vmem:[#allocation2 + $0x7c] sm:$0x1]  ;;  %v10666_v10 = vld [vmem:[#allocation2 + $0x8c] sm:$0x1] }
 0x18a   :  { %2201 = vst [vmem:[#allocation2 + $0x88] sm:$0xf] %v2200_v53  ;;  %v2500_v3 = vshll.u32 %v2276_v54, 16  ;;  %v7304_v9 = vpack.c.bf16 %v1171_v50, %v1171_v50  ;;  %v7305_v56 = vpack.c.bf16 %v1172_v24, %v1172_v24  ;;  %v7306_v60 = vpack.c.bf16 %v1173_v59, %v1173_v59  ;;  %v10675_v29 = vld [vmem:[%s11975_s0 + $0x1e0] sm:$0x1] }
 0x18b   :  { %v7307_v20 = vpack.c.bf16 %v1174_v30, %v1174_v30  ;;  %v7308_v21 = vpack.c.bf16 %v1175_v17, %v1175_v17  ;;  %v7309_v38 = vpack.c.bf16 %v1176_v47, %v1176_v47  ;;  %v1810_v16 = vunpack.c.l.b16 %v7303_v62  ;;  %v10685_v7 = vld [vmem:[%s11975_s0 + $0x1e4] sm:$0x1]  ;;  %v10690_v14 = vld [vmem:[%s11975_s0 + $0x1e1] sm:$0x1]  ;;  %v10695_v8 = vld [vmem:[%s11975_s0 + $0x1e3] sm:$0x1] }
 0x18c   :  { %v1811_v44 = vunpack.c.l.b16 %v7304_v9  ;;  %v1812_v0 = vunpack.c.l.b16 %v7305_v56  ;;  %v1813_v35 = vunpack.c.l.b16 %v7306_v60  ;;  %v7340_v5 = vpack.c.bf16 %v1177_v39, %v1177_v39  ;;  %v10700_v34 = vld [vmem:[%s11975_s0 + $0x1e5] sm:$0x1]  ;;  %v10711_v15 = vld [vmem:[%s11975_s0 + $0x1e6] sm:$0x1]  ;;  %v10716_v31 = vld [vmem:[%s11975_s0 + $0x1e8] sm:$0x1] }
 0x18d   :  { %v1814_v55 = vunpack.c.l.b16 %v7307_v20  ;;  %v1815_v45 = vunpack.c.l.b16 %v7308_v21  ;;  %v1816_v22 = vunpack.c.l.b16 %v7309_v38  ;;  %v2009_v40 = vrot.slane %v1810_v16, 7  ;;  %v548_v23 = vld [vmem:[%s11975_s0 + $0x1e7] sm:$0x1]  ;;  %v549_v49 = vld [vmem:[%s11975_s0 + $0x1e9] sm:$0x1] }
 0x18e   :  { %v7451_v42 = vld [vmem:[#allocation4 + $0x10] sm:$0xff]   ;;  %v2010_v51 = vrot.slane %v1811_v44, 6  ;;  %v2012_v48 = vrot.slane %v1812_v0, 5  ;;  %v2014_v57 = vrot.slane %v1813_v35, 4  ;;  %v2197_v37 = vsel %vm7543_vm4, %v7340_v5, %v2196_v19  ;;  %v422_v24 = vld [vmem:[%s11975_s0 + $0x1ea] sm:$0x1]  ;;  %v3938_v19 = vpop.permute.xlu1 %3937 }
 0x18f   :  { %v2016_v41 = vrot.slane %v1814_v55, 3  ;;  %2198 = vst [vmem:[#allocation2 + $0x84] sm:$0x1] %v2197_v37  ;;  %7393 = vmatprep.mubr.msk.bf16.mxu0 %vm4064_vm2, %v7451_v42  ;;  %v10669_v46 = vrot.slane %v2500_v3, 5  ;;  %v2018_v28 = vrot.slane %v1815_v45, 2  ;;  %vm12022_vm5 = vcmask 1043459  }
 0x190   :  { %v2011_v63 = vsel %vm1836_vm11, %v2010_v51, %v2009_v40  ;;  %v2020_v26 = vrot.slane %v1816_v22, 1  ;;  %v7056_v58 = vrot.slane %v10659_v2, 9  ;;  %v96_v61 = vsel %vm7543_vm4, 0, %v95_v43  ;;  %v423_v59 = vld [vmem:[%s11975_s0 + $0x1ec] sm:$0x1] }
 0x191   :  { %v2275_v36 = vld [vmem:[#allocation2 + $0x88] sm:$0xf]  ;;  %v2013_v18 = vsel %vm12022_vm5, %v2012_v48, %v2011_v63  ;;  %vm12023_vm13 = vcmask 1044484   ;;  %97 = vst [vmem:[#allocation2 + $0x90] sm:$0x1] %v96_v61  ;;  %v2690_v62 = vrot.slane %v10664_v32, 5  ;;  %v930_v55 = vmax.f32 %v10675_v29, %v10690_v14 }
 0x192   :  { %v2491_v54 = vshrl.u32 %v2275_v36, 16  ;;  %v2494_v33 = vshll.u32 %v2275_v36, 16  ;;  %v2015_v50 = vsel %vm12023_vm13, %v2014_v57, %v2013_v18  ;;  %v550_v30 = vld [vmem:[%s11975_s0 + $0x1eb] sm:$0x1]  ;;  %v551_v17 = vld [vmem:[%s11975_s0 + $0x1ed] sm:$0x1]  ;;  %v931_v45 = vmax.f32 %v10680_v13, %v10695_v8 }
 0x193   :  { %v6763_v53 = vld [vmem:[%s11975_s0 + $0x1f0] sm:$0x1]  ;;  %v2017_v47 = vsel %vm1845_vm15, %v2016_v41, %v2015_v50  ;;  %v2193_v39 = vld [vmem:[#allocation2 + $0x80] sm:$0xf]  ;;  %v2698_v3 = vrot.slane %v10666_v10, 5  ;;  %v932_v22 = vmax.f32 %v10685_v7, %v10700_v34  ;;  %vm12024_vm5 = vcmask 290048  }
 0x194   :  { %v6764_v9 = vld [vmem:[%s11975_s0 + $0x1f2] sm:$0x1]  ;;  %v6765_v56 = vld [vmem:[%s11975_s0 + $0x1f4] sm:$0x1]  ;;  %v2493_v60 = vrot.slane %v2491_v54, 4  ;;  %v2496_v20 = vrot.slane %v2494_v33, 5  ;;  %v2019_v21 = vsel %vm1848_vm1, %v2018_v28, %v2017_v47  ;;  %v933_v48 = vmax.f32 %v10711_v15, %v548_v23 }
 0x195   :  { %v6766_v38 = vld [vmem:[%s11975_s0 + $0x1f6] sm:$0x1]  ;;  %v6767_v16 = vld [vmem:[%s11975_s0 + $0x1f8] sm:$0x1]  ;;  %v2021_v44 = vsel %vm1851_vm8, %v2020_v26, %v2019_v21  ;;  %v6891_v0 = vld [vmem:[%s11975_s0 + $0x1f1] sm:$0x1]  ;;  %v934_v57 = vmax.f32 %v10716_v31, %v549_v49  ;;  %v935_v41 = vmax.f32 %v422_v24, %v550_v30  ;;  %v936_v32 = vmax.f32 %v423_v59, %v551_v17 }
 0x196   :  { %v6892_v35 = vld [vmem:[%s11975_s0 + $0x1f3] sm:$0x1]  ;;  %v6893_v5 = vld [vmem:[%s11975_s0 + $0x1f5] sm:$0x1]  ;;  %3979 = vst.msk [vmem:[#allocation4 + $0x1c] sm:$0xf] %vm12024_vm5, %v3938_v19  ;;  %v2497_v40 = vor.u32 %v2496_v20, %v2493_v60  ;;  %v2074_v2 = vpack.c.b16 %v2021_v44, %v2021_v44  ;;  %v1058_v63 = vmax.f32 %v6763_v53, %v6891_v0  ;;  %v2691_v34 = vsel %vm7656_vm12, %v7056_v58, %v2690_v62 }
 0x197   :  { %v6768_v6 = vld [vmem:[%s11975_s0 + $0x1fa] sm:$0x1]  ;;  %v6769_v42 = vld [vmem:[%s11975_s0 + $0x1fc] sm:$0x1]  ;;  %v6894_v51 = vld [vmem:[%s11975_s0 + $0x1f7] sm:$0x1]  ;;  %v1059_v28 = vmax.f32 %v6764_v9, %v6892_v35  ;;  %v1060_v14 = vmax.f32 %v6765_v56, %v6893_v5 }
 0x198   :  { %v6895_v37 = vld [vmem:[%s11975_s0 + $0x1f9] sm:$0x1]  ;;  %v6896_v43 = vld [vmem:[%s11975_s0 + $0x1fb] sm:$0x1]  ;;  %v2498_v29 = vrot.slane %v2497_v40, 4  ;;  %v2194_v13 = vsel %vm7789_vm9, %v2074_v2, %v2193_v39  ;;  %v1061_v8 = vmax.f32 %v6766_v38, %v6894_v51  ;;  %v1186_v31 = vmax.f32 %v930_v55, %v1058_v63 }
 0x199   :  { %v6897_v7 = vld [vmem:[%s11975_s0 + $0x1fd] sm:$0x1]  ;;  %2195 = vst [vmem:[#allocation2 + $0x80] sm:$0xf] %v2194_v13  ;;  %v2599_v36 = vld [vmem:[#allocation2 + $0x88] sm:$0xe]  ;;  %v1062_v18 = vmax.f32 %v6767_v16, %v6895_v37  ;;  %v1063_v26 = vmax.f32 %v6768_v6, %v6896_v43  ;;  %v1187_v23 = vmax.f32 %v931_v45, %v1059_v28  ;;  %v1188_v49 = vmax.f32 %v932_v22, %v1060_v14 }
 0x19a   :  { %v1064_v61 = vmax.f32 %v6769_v42, %v6897_v7  ;;  %v2503_v15 = vsel %vm7664_vm7, %v2498_v29, %v10669_v46  ;;  %v1189_v54 = vmax.f32 %v933_v48, %v1061_v8  ;;  %v2274_v59 = vld [vmem:[#allocation2 + $0x84] sm:$0x1]  ;;  %v7058_v30 = vrot.slane %v2599_v36, 9  ;;  %v424_v35 = vld [vmem:[%s11975_s0 + $0x1ee] sm:$0x1]  ;;  %v2527_v8 = vpop.permute.xlu1 %2526 }
 0x19b   :  { %2534 = vrot.lane.b32.xlu1 %v2503_v15, %s7474_s9  ;;  %v1190_v33 = vmax.f32 %v934_v57, %v1062_v18  ;;  %v1191_v50 = vmax.f32 %v935_v41, %v1063_v26  ;;  %v7319_v58 = vpack.c.bf16 %v1186_v31, %v1186_v31  ;;  %v7320_v17 = vpack.c.bf16 %v1187_v23, %v1187_v23  ;;  %v552_v5 = vld [vmem:[%s11975_s0 + $0x1ef] sm:$0x1]  ;;  %v6770_v10 = vld [vmem:[%s11975_s0 + $0x1fe] sm:$0x1]  ;;  %v2593_v2 = vld [vmem:[#allocation2 + $0x70] sm:$0xe] }
 0x19c   :  { %v1192_v24 = vmax.f32 %v936_v32, %v1064_v61  ;;  %v7321_v53 = vpack.c.bf16 %v1188_v49, %v1188_v49  ;;  %v7322_v39 = vpack.c.bf16 %v1189_v54, %v1189_v54  ;;  %v2486_v21 = vshll.u32 %v2274_v59, 16  ;;  %v2594_v6 = vld [vmem:[#allocation2 + $0x74] sm:$0x1]  ;;  %v6898_v48 = vld [vmem:[%s11975_s0 + $0x1ff] sm:$0x1]  ;;  %s7481_s0 = smov 48  }
 0x19d   :  { %v7452_v47 = vld [vmem:[#allocation4 + $0x18] sm:$0xff]   ;;  %v7323_v62 = vpack.c.bf16 %v1190_v33, %v1190_v33  ;;  %v7324_v9 = vpack.c.bf16 %v1191_v50, %v1191_v50  ;;  %v1826_v46 = vunpack.c.l.b16 %v7319_v58  ;;  %v1827_v60 = vunpack.c.l.b16 %v7320_v17  ;;  %v157_v26 = vld [vmem:[#allocation2 + $0x94] sm:$0x1]  ;;  %v2221_v15 = vld [vmem:[#allocation2 + $0x50] sm:$0xf] }
 0x19e   :  { %v7325_v56 = vpack.c.bf16 %v1192_v24, %v1192_v24  ;;  %v1828_v20 = vunpack.c.l.b16 %v7321_v53  ;;  %7394 = vmatmul.mubr.msk.bf16.gmra.mxu0 %vm4064_vm2, %v7452_v47  ;;  %v1829_v38 = vunpack.c.l.b16 %v7322_v39  ;;  %v2699_v44 = vsel %vm7656_vm12, %v7058_v30, %v2698_v3  ;;  %v10820_v32 = vld [vmem:[#allocation2 + $0x78] sm:$0xf]  ;;  %2237 = vst.msk [vmem:[#allocation4 + $0x20] sm:$0xf] %vm27_vm0, %v2221_v15  ;;  %v2598_v24 = vld [vmem:[#allocation2 + $0x84] sm:$0x1]  ;;  %v2719_v47 = vpop.permute.xlu1 %2718 }
 0x19f   :  { %2726 = vrot.lane.b32.xlu1 %v2691_v34, %s7473_s11  ;;  %v1830_v16 = vunpack.c.l.b16 %v7323_v62  ;;  %v1831_v0 = vunpack.c.l.b16 %v7324_v9  ;;  %v2035_v40 = vrot.slane %v1826_v46, 7  ;;  %v2036_v3 = vrot.slane %v1827_v60, 6  ;;  %v2222_v14 = vld [vmem:[#allocation2 + $0x58] sm:$0xf]  ;;  %2561 = vst.msk [vmem:[#allocation4 + $0x20] sm:$0xf] %vm2552_vm10, %v10657_v12 }
 0x1a0   :  { %v2273_v19 = vld [vmem:[#allocation2 + $0x80] sm:$0xf]  ;;  %v1832_v22 = vunpack.c.l.b16 %v7325_v56  ;;  %v2038_v42 = vrot.slane %v1828_v20, 5  ;;  %v2040_v51 = vrot.slane %v1829_v38, 4  ;;  %v2488_v63 = vrot.slane %v2486_v21, 5 }
 0x1a1   :  { %v2477_v55 = vshrl.u32 %v2273_v19, 16  ;;  %v2480_v45 = vshll.u32 %v2273_v19, 16  ;;  %v2042_v43 = vrot.slane %v1830_v16, 3  ;;  %v2888_v41 = vld [vmem:[#allocation2 + $0x80] sm:$0xf]  ;;  %v2037_v29 = vsel %vm1836_vm11, %v2036_v3, %v2035_v40 }
 0x1a2   :  { %v2778_v28 = vld [vmem:[#allocation2 + $0x80] sm:$0xf]  ;;  %v2044_v13 = vrot.slane %v1831_v0, 2  ;;  %v937_v7 = vmax.f32 %v424_v35, %v552_v5  ;;  %vm12025_vm13 = vcmask 1043459   ;;  %v2046_v18 = vrot.slane %v1832_v22, 1 }
 0x1a3   :  { %v2479_v57 = vrot.slane %v2477_v55, 4  ;;  %v2482_v37 = vrot.slane %v2480_v45, 5  ;;  %2730 = vrot.lane.b32.xlu1 %v2699_v44, %s7473_s11  ;;  %v2039_v36 = vsel %vm12025_vm13, %v2038_v42, %v2037_v29  ;;  %v1065_v61 = vmax.f32 %v6770_v10, %v6898_v48  ;;  %2238 = vst.msk [vmem:[#allocation4 + $0x24] sm:$0xf] %vm27_vm0, %v2222_v14  ;;  %v2597_v30 = vld [vmem:[#allocation2 + $0x80] sm:$0xe]  ;;  %v2723_v55 = vpop.permute.xlu1 %2722 }
 0x1a4   :  { %vm12026_vm5 = vcmask 1044484   ;;  %v3077_v23 = vshrl.u32 %v2888_v41, 16  ;;  %v3080_v49 = vshll.u32 %v2888_v41, 16  ;;  %2562 = vst.msk [vmem:[#allocation4 + $0x24] sm:$0xf] %vm2552_vm10, %v10702_v27  ;;  %v7055_v33 = vrot.slane %v2593_v2, 9 }
 0x1a5   :  { %v2483_v34 = vor.u32 %v2482_v37, %v2479_v57  ;;  %v2041_v31 = vsel %vm12026_vm5, %v2040_v51, %v2039_v36  ;;  %v2686_v50 = vrot.slane %v2594_v6, 5  ;;  %v2205_v17 = vld [vmem:[#allocation2 + $0x90] sm:$0xf]  ;;  %v3063_v53 = vshrl.u32 %v10820_v32, 16  ;;  %v2224_v56 = vld [vmem:[#allocation2 + $0x68] sm:$0xf] }
 0x1a6   :  { %v2043_v59 = vsel %vm1845_vm15, %v2042_v43, %v2041_v31  ;;  %v158_v27 = vsel %vm7559_vm6, 0, %v157_v26  ;;  %v1193_v9 = vmax.f32 %v937_v7, %v1065_v61  ;;  %2758 = vst.msk [vmem:[#allocation4 + $0x24] sm:$0xf] %vm2748_vm3, %v2719_v47  ;;  %v3079_v46 = vrot.slane %v3077_v23, 4  ;;  %v2223_v21 = vld [vmem:[#allocation2 + $0x60] sm:$0xf]  ;;  %v2525_v61 = vpop.permute.xlu0 %2524 }
 0x1a7   :  { %v2484_v54 = vrot.slane %v2483_v34, 4  ;;  %2823 = vrot.lane.b32.xlu1 %v2778_v28, %s7475_s18  ;;  %v2045_v58 = vsel %vm1848_vm1, %v2044_v13, %v2043_v59  ;;  %159 = vst [vmem:[#allocation2 + $0x94] sm:$0x1] %v158_v27  ;;  %v3082_v60 = vrot.slane %v3080_v49, 5  ;;  %v3066_v20 = vshll.u32 %v10820_v32, 16  ;;  %v2816_v37 = vpop.permute.xlu1 %2815 }
 0x1a8   :  { %v2047_v62 = vsel %vm1851_vm8, %v2046_v18, %v2045_v58  ;;  %2240 = vst.msk [vmem:[#allocation4 + $0x2c] sm:$0xf] %vm27_vm0, %v2224_v56  ;;  %v2687_v38 = vsel %vm7656_vm12, %v7055_v33, %v2686_v50  ;;  %v7057_v16 = vrot.slane %v2597_v30, 9  ;;  %v2694_v19 = vrot.slane %v2598_v24, 5  ;;  %v2889_v44 = vld [vmem:[#allocation2 + $0x84] sm:$0x1] }
 0x1a9   :  { %v2489_v39 = vsel %vm7664_vm7, %v2484_v54, %v2488_v63  ;;  %v2078_v12 = vpack.c.b16 %v2047_v62, %v2047_v62  ;;  %2564 = vst.msk [vmem:[#allocation4 + $0x2c] sm:$0xf] %vm2552_vm10, %v2527_v8  ;;  %v2890_v35 = vld [vmem:[#allocation2 + $0x88] sm:$0xf]  ;;  %v98_v5 = vld [vmem:[#allocation2 + $0x98] sm:$0x1]  ;;  %v7342_v45 = vpack.c.bf16 %v1193_v9, %v1193_v9  ;;  %v3083_v22 = vor.u32 %v3082_v60, %v3079_v46 }
 0x1aa   :  { %2532 = vrot.lane.b32.xlu0 %v2489_v39, %s7474_s9  ;;  %2239 = vst.msk [vmem:[#allocation4 + $0x28] sm:$0xf] %vm27_vm0, %v2223_v21  ;;  %v3086_v40 = vshll.u32 %v2889_v44, 16  ;;  %v2887_v10 = vld [vmem:[#allocation2 + $0x7c] sm:$0x1]  ;;  %v3065_v2 = vrot.slane %v3063_v53, 4  ;;  %v2695_v3 = vsel %vm7656_vm12, %v7057_v16, %v2694_v19  ;;  %v2717_v30 = vpop.permute.xlu0 %2716 }
 0x1ab   :  { %v2206_v0 = vsel %vm7789_vm9, %v2078_v12, %v2205_v17  ;;  %2760 = vst.msk [vmem:[#allocation4 + $0x2c] sm:$0xf] %vm2748_vm3, %v2723_v55  ;;  %v3068_v6 = vrot.slane %v3066_v20, 5  ;;  %v3091_v42 = vshrl.u32 %v2890_v35, 16  ;;  %v3094_v25 = vshll.u32 %v2890_v35, 16  ;;  %s7482_s9 = smov 56  }
 0x1ac   :  { %2207 = vst [vmem:[#allocation2 + $0x90] sm:$0xf] %v2206_v0  ;;  %v99_v51 = vsel %vm7543_vm4, 0, %v98_v5  ;;  %v160_v57 = vld [vmem:[#allocation2 + $0x9c] sm:$0x1]  ;;  %vm12027_vm11 = vcmask 126048  }
 0x1ad   :  { %100 = vst [vmem:[#allocation2 + $0x98] sm:$0x1] %v99_v51  ;;  %v2777_v43 = vld [vmem:[#allocation2 + $0x78] sm:$0xf]  ;;  %2855 = vst.msk [vmem:[#allocation4 + $0x24] sm:$0xf] %vm12027_vm11, %v2816_v37  ;;  %v3069_v29 = vor.u32 %v3068_v6, %v3065_v2 }
 0x1ae   :  { %2724 = vrot.lane.b32.xlu0 %v2687_v38, %s7473_s11  ;;  %v2208_v48 = vld [vmem:[#allocation2 + $0x94] sm:$0x1]  ;;  %v2226_v32 = vld [vmem:[#allocation2 + $0x78] sm:$0xf]  ;;  %v3084_v63 = vrot.slane %v3083_v22, 4  ;;  %v3088_v28 = vrot.slane %v3086_v40, 5  ;;  %v2721_v16 = vpop.permute.xlu0 %2720 }
 0x1af   :  { %v2209_v41 = vsel %vm7543_vm4, %v7342_v45, %v2208_v48  ;;  %v3072_v13 = vshll.u32 %v2887_v10, 16  ;;  %2242 = vst.msk [vmem:[#allocation4 + $0x34] sm:$0xf] %vm27_vm0, %v2226_v32  ;;  %v2225_v7 = vld [vmem:[#allocation2 + $0x70] sm:$0xf]  ;;  %v3093_v14 = vrot.slane %v3091_v42, 4 }
 0x1b0   :  { %2210 = vst [vmem:[#allocation2 + $0x94] sm:$0x1] %v2209_v41  ;;  %v3096_v8 = vrot.slane %v3094_v25, 5  ;;  %v161_v34 = vsel %vm7559_vm6, 0, %v160_v57  ;;  %2241 = vst.msk [vmem:[#allocation4 + $0x30] sm:$0xf] %vm27_vm0, %v2225_v7  ;;  %v3089_v4 = vsel %vm7664_vm7, %v3084_v63, %v3088_v28 }
 0x1b1   :  { %v2228_v1 = vld [vmem:[#allocation2 + $0x88] sm:$0xf]  ;;  %v2891_v26 = vld [vmem:[#allocation2 + $0x8c] sm:$0x1]  ;;  %162 = vst [vmem:[#allocation2 + $0x9c] sm:$0x1] %v161_v34 }
 0x1b2   :  { %2728 = vrot.lane.b32.xlu0 %v2695_v3, %s7473_s11  ;;  %2244 = vst.msk [vmem:[#allocation4 + $0x3c] sm:$0xf] %vm27_vm0, %v2228_v1  ;;  %v3070_v23 = vrot.slane %v3069_v29, 4  ;;  %v3074_v49 = vrot.slane %v3072_v13, 5  ;;  %v2779_v54 = vld [vmem:[#allocation2 + $0x88] sm:$0xf]  ;;  %v3097_v24 = vor.u32 %v3096_v8, %v3093_v14  ;;  %v2814_v48 = vpop.permute.xlu0 %2813 }
 0x1b3   :  { %v2780_v36 = vld [vmem:[#allocation2 + $0x90] sm:$0xf]  ;;  %2563 = vst.msk [vmem:[#allocation4 + $0x28] sm:$0xf] %vm2552_vm10, %v2525_v61  ;;  %v3100_v59 = vshll.u32 %v2891_v26, 16  ;;  %vm12030_vm6 = vcmask 158848  }
 0x1b4   :  { %v2892_v18 = vld [vmem:[#allocation2 + $0x90] sm:$0xf]  ;;  %2827 = vrot.lane.b32.xlu1 %v2780_v36, %s7475_s18  ;;  %v3209_v53 = vld [vmem:[#allocation2 + $0x80] sm:$0xe]  ;;  %v3210_v27 = vld [vmem:[#allocation2 + $0x84] sm:$0x1]  ;;  %v3075_v9 = vsel %vm7664_vm7, %v3070_v23, %v3074_v49  ;;  %v2820_v2 = vpop.permute.xlu1 %2819 }
 0x1b5   :  { %v3105_v15 = vshrl.u32 %v2892_v18, 16  ;;  %v3108_v31 = vshll.u32 %v2892_v18, 16  ;;  %2757 = vst.msk [vmem:[#allocation4 + $0x20] sm:$0xf] %vm2748_vm3, %v2717_v30  ;;  %v3207_v39 = vld [vmem:[#allocation2 + $0x78] sm:$0xe]  ;;  %vm12032_vm1 = vmmov %vm12030_vm6 }
 0x1b6   :  { %2821 = vrot.lane.b32.xlu0 %v2777_v43, %s7475_s18  ;;  %v3208_v62 = vld [vmem:[#allocation2 + $0x7c] sm:$0x1]  ;;  %v3098_v12 = vrot.slane %v3097_v24, 4  ;;  %v3102_v46 = vrot.slane %v3100_v59, 5  ;;  %v3500_v60 = vld [vmem:[#allocation2 + $0x88] sm:$0xf]  ;;  %v2818_v36 = vpop.permute.xlu0 %2817  ;;  %vm12033_vm8 = vmmov %vm12032_vm1 }
 0x1b7   :  { %v3107_v33 = vrot.slane %v3105_v15, 4  ;;  %v3110_v50 = vrot.slane %v3108_v31, 5  ;;  %v2893_v58 = vld [vmem:[#allocation2 + $0x94] sm:$0x1]  ;;  %v7072_v21 = vrot.slane %v3209_v53, 9  ;;  %v3301_v38 = vrot.slane %v3210_v27, 5  ;;  %vm12034_vm9 = vmmov %vm12032_vm1 }
 0x1b8   :  { %3144 = vrot.lane.b32.xlu1 %v3089_v4, %s7477_s25  ;;  %v3114_v47 = vshll.u32 %v2893_v58, 16  ;;  %v2227_v19 = vld [vmem:[#allocation2 + $0x80] sm:$0xf]  ;;  %v3213_v44 = vld [vmem:[#allocation2 + $0x90] sm:$0xe]  ;;  %v3103_v55 = vsel %vm7664_vm7, %v3098_v12, %v3102_v46  ;;  %v7071_v45 = vrot.slane %v3207_v39, 9  ;;  %v3137_v13 = vpop.permute.xlu1 %3136 }
 0x1b9   :  { %v3111_v17 = vor.u32 %v3110_v50, %v3107_v33  ;;  %v3214_v0 = vld [vmem:[#allocation2 + $0x94] sm:$0x1]  ;;  %2759 = vst.msk [vmem:[#allocation4 + $0x28] sm:$0xf] %vm2748_vm3, %v2721_v16  ;;  %v3211_v5 = vld [vmem:[#allocation2 + $0x88] sm:$0xe]  ;;  %v3302_v6 = vsel %vm7656_vm12, %v7072_v21, %v3301_v38 }
 0x1ba   :  { %2825 = vrot.lane.b32.xlu0 %v2779_v54, %s7475_s18  ;;  %v3116_v20 = vrot.slane %v3114_v47, 5  ;;  %2243 = vst.msk [vmem:[#allocation4 + $0x38] sm:$0xf] %vm27_vm0, %v2227_v19  ;;  %v3297_v22 = vrot.slane %v3208_v62, 5  ;;  %v3212_v40 = vld [vmem:[#allocation2 + $0x8c] sm:$0x1]  ;;  %vm12028_vm0 = vmmov %vm12027_vm11 }
 0x1bb   :  { %v3112_v56 = vrot.slane %v3111_v17, 4  ;;  %v3689_v10 = vshrl.u32 %v3500_v60, 16  ;;  %v7074_v3 = vrot.slane %v3213_v44, 9  ;;  %v3309_v42 = vrot.slane %v3214_v0, 5  ;;  %v3498_v51 = vld [vmem:[#allocation2 + $0x80] sm:$0xf]  ;;  %vm12029_vm4 = vmmov %vm12028_vm0  ;;  %v3135_v24 = vpop.permute.xlu0 %3134 }
 0x1bc   :  { %v3692_v25 = vshll.u32 %v3500_v60, 16  ;;  %2857 = vst.msk [vmem:[#allocation4 + $0x2c] sm:$0xf] %vm12028_vm0, %v2820_v2  ;;  %v3504_v57 = vld [vmem:[#allocation2 + $0x98] sm:$0xf]  ;;  %v7073_v37 = vrot.slane %v3211_v5, 9  ;;  %v3298_v41 = vsel %vm7656_vm12, %v7071_v45, %v3297_v22  ;;  %vm12031_vm15 = vmmov %vm12028_vm0 }
 0x1bd   :  { %v3117_v35 = vsel %vm7664_vm7, %v3112_v56, %v3116_v20  ;;  %2854 = vst.msk [vmem:[#allocation4 + $0x20] sm:$0xf] %vm12029_vm4, %v2814_v48  ;;  %v3305_v43 = vrot.slane %v3212_v40, 5  ;;  %v3501_v32 = vld [vmem:[#allocation2 + $0x8c] sm:$0x1]  ;;  %v3691_v63 = vrot.slane %v3689_v10, 4  ;;  %v3310_v7 = vsel %vm7656_vm12, %v7074_v3, %v3309_v42 }
 0x1be   :  { %3142 = vrot.lane.b32.xlu0 %v3075_v9, %s7477_s25  ;;  %3148 = vrot.lane.b32.xlu1 %v3117_v35, %s7477_s25  ;;  %v3675_v28 = vshrl.u32 %v3498_v51, 16  ;;  %v3678_v29 = vshll.u32 %v3498_v51, 16  ;;  %v3694_v14 = vrot.slane %v3692_v25, 5  ;;  %v3717_v8 = vshrl.u32 %v3504_v57, 16  ;;  %v3502_v1 = vld [vmem:[#allocation2 + $0x90] sm:$0xf] }
 0x1bf   :  { %v3720_v34 = vshll.u32 %v3504_v57, 16  ;;  %3176 = vst.msk [vmem:[#allocation4 + $0x24] sm:$0xf] %vm12030_vm6, %v3137_v13  ;;  %v3306_v18 = vsel %vm7656_vm12, %v7073_v37, %v3305_v43  ;;  %v3698_v26 = vshll.u32 %v3501_v32, 16  ;;  %v3703_v31 = vshrl.u32 %v3502_v1, 16  ;;  %v3139_v60 = vpop.permute.xlu0 %3138  ;;  %s7483_s18 = smov 64  }
 0x1c0   :  { %2856 = vst.msk [vmem:[#allocation4 + $0x28] sm:$0xf] %vm12031_vm15, %v2818_v36  ;;  %v3677_v61 = vrot.slane %v3675_v28, 4  ;;  %v3680_v15 = vrot.slane %v3678_v29, 5  ;;  %v3706_v4 = vshll.u32 %v3502_v1, 16  ;;  %v3695_v49 = vor.u32 %v3694_v14, %v3691_v63  ;;  %v3141_v39 = vpop.permute.xlu1 %3140 }
 0x1c1   :  { %v3390_v23 = vld [vmem:[#allocation2 + $0x88] sm:$0xf]  ;;  %v3499_v54 = vld [vmem:[#allocation2 + $0x84] sm:$0x1]  ;;  %v3719_v33 = vrot.slane %v3717_v8, 4  ;;  %v3722_v50 = vrot.slane %v3720_v34, 5 }
 0x1c2   :  { %3146 = vrot.lane.b32.xlu0 %v3103_v55, %s7477_s25  ;;  %3337 = vrot.lane.b32.xlu1 %v3302_v6, %s7476_s14  ;;  %v3505_v59 = vld [vmem:[#allocation2 + $0x9c] sm:$0x1]  ;;  %3175 = vst.msk [vmem:[#allocation4 + $0x20] sm:$0xf] %vm12032_vm1, %v3135_v24  ;;  %v3700_v30 = vrot.slane %v3698_v26, 5  ;;  %v3681_v17 = vor.u32 %v3680_v15, %v3677_v61  ;;  %v3684_v53 = vshll.u32 %v3499_v54, 16 }
 0x1c3   :  { %v3389_v58 = vld [vmem:[#allocation2 + $0x80] sm:$0xf]  ;;  %v3705_v27 = vrot.slane %v3703_v31, 4  ;;  %v3708_v47 = vrot.slane %v3706_v4, 5  ;;  %v3392_v62 = vld [vmem:[#allocation2 + $0x98] sm:$0xf]  ;;  %v3723_v56 = vor.u32 %v3722_v50, %v3719_v33  ;;  %v3328_v55 = vpop.permute.xlu0 %3327 }
 0x1c4   :  { %v3696_v9 = vrot.slane %v3695_v49, 4  ;;  %v3726_v12 = vshll.u32 %v3505_v59, 16  ;;  %v3503_v46 = vld [vmem:[#allocation2 + $0x94] sm:$0x1]  ;;  %3178 = vst.msk [vmem:[#allocation4 + $0x2c] sm:$0xf] %vm12033_vm8, %v3141_v39  ;;  %v3330_v44 = vpop.permute.xlu1 %3329 }
 0x1c5   :  { %3177 = vst.msk [vmem:[#allocation4 + $0x28] sm:$0xf] %vm12034_vm9, %v3139_v60  ;;  %v3391_v20 = vld [vmem:[#allocation2 + $0x90] sm:$0xf]  ;;  %v3682_v21 = vrot.slane %v3681_v17, 4  ;;  %v3686_v38 = vrot.slane %v3684_v53, 5  ;;  %v3709_v16 = vor.u32 %v3708_v47, %v3705_v27 }
 0x1c6   :  { %3335 = vrot.lane.b32.xlu0 %v3298_v41, %s7476_s14  ;;  %3341 = vrot.lane.b32.xlu1 %v3310_v7, %s7476_s14  ;;  %v3712_v19 = vshll.u32 %v3503_v46, 16  ;;  %v3701_v0 = vsel %vm7664_vm7, %v3696_v9, %v3700_v30  ;;  %v3724_v35 = vrot.slane %v3723_v56, 4  ;;  %v3728_v5 = vrot.slane %v3726_v12, 5  ;;  %v3821_v45 = vld [vmem:[#allocation2 + $0x88] sm:$0xe] }
 0x1c7   :  { %vm12035_vm13 = vcmask 191648   ;;  %v3822_v22 = vld [vmem:[#allocation2 + $0x8c] sm:$0x1]  ;;  %v3687_v40 = vsel %vm7664_vm7, %v3682_v21, %v3686_v38  ;;  %v3710_v10 = vrot.slane %v3709_v16, 4  ;;  %vm165_vm11 = vcmask 57344   ;;  %v3332_v57 = vpop.permute.xlu0 %3331 }
 0x1c8   :  { %3369 = vst.msk [vmem:[#allocation4 + $0x24] sm:$0xf] %vm12035_vm13, %v3330_v44  ;;  %vm12036_vm5 = vmmov %vm12035_vm13  ;;  %v3714_v2 = vrot.slane %v3712_v19, 5  ;;  %v3334_v6 = vpop.permute.xlu1 %3333  ;;  %v3729_v3 = vsel %vm7664_vm7, %v3724_v35, %v3728_v5  ;;  %v7088_v42 = vrot.slane %v3821_v45, 9  ;;  %v3913_v25 = vrot.slane %v3822_v22, 5 }
 0x1c9   :  { %3368 = vst.msk [vmem:[#allocation4 + $0x20] sm:$0xf] %vm12036_vm5, %v3328_v55  ;;  %v3819_v51 = vld [vmem:[#allocation2 + $0x80] sm:$0xe]  ;;  %v3820_v48 = vld [vmem:[#allocation2 + $0x84] sm:$0x1]  ;;  %vm12037_vm0 = vmmov %vm12036_vm5 }
 0x1ca   :  { %3339 = vrot.lane.b32.xlu0 %v3306_v18, %s7476_s14  ;;  %3435 = vrot.lane.b32.xlu1 %v3390_v23, %s7478_s13  ;;  %3371 = vst.msk [vmem:[#allocation4 + $0x2c] sm:$0xf] %vm12037_vm0, %v3334_v6  ;;  %v12038_v37 = vmov 0   ;;  %v3825_v43 = vld [vmem:[#allocation2 + $0x98] sm:$0xe]  ;;  %vm12039_vm4 = vmmov %vm12037_vm0  ;;  %v3715_v32 = vsel %vm7664_vm7, %v3710_v10, %v3714_v2  ;;  %v7087_v63 = vrot.slane %v3819_v51, 9  ;;  %v3914_v8 = vsel %vm7656_vm12, %v7088_v42, %v3913_v25 }
 0x1cb   :  { %166 = vst.msk [vmem:[#allocation3 + $0x4] sm:$0x1] %vm165_vm11, %v12038_v37  ;;  %168 = vst.msk [vmem:[#allocation3 + $0x54] sm:$0x1] %vm165_vm11, %v12038_v37  ;;  %v3826_v41 = vld [vmem:[#allocation2 + $0x9c] sm:$0x1]  ;;  %v3426_v18 = vpop.permute.xlu0 %3425 }
 0x1cc   :  { %171 = vst.msk [vmem:[#allocation3 + $0x4c] sm:$0x1] %vm165_vm11, %v12038_v37  ;;  %173 = vst.msk [vmem:[#allocation3 + $0x9c] sm:$0x1] %vm165_vm11, %v12038_v37  ;;  %v3909_v28 = vrot.slane %v3820_v48, 5  ;;  %v3428_v13 = vpop.permute.xlu1 %3427  ;;  %v7090_v34 = vrot.slane %v3825_v43, 9 }
 0x1cd   :  { %3370 = vst.msk [vmem:[#allocation4 + $0x28] sm:$0xf] %vm12039_vm4, %v3332_v57  ;;  %v3823_v29 = vld [vmem:[#allocation2 + $0x90] sm:$0xe]  ;;  %vm12040_vm6 = vsmask.f32 256 }
 0x1ce   :  { %3433 = vrot.lane.b32.xlu0 %v3389_v58, %s7478_s13  ;;  %3439 = vrot.lane.b32.xlu1 %v3392_v62, %s7478_s13  ;;  %vm10932_vm15 = vmand %vm165_vm11, %vm12040_vm6  ;;  %v176_v14 = vld [vmem:[#allocation3] sm:$0x1]  ;;  %v3921_v1 = vrot.slane %v3826_v41, 5  ;;  %v3824_v36 = vld [vmem:[#allocation2 + $0x94] sm:$0x1]  ;;  %vm12043_vm1 = vcmask 224448   ;;  %v3910_v61 = vsel %vm7656_vm12, %v7087_v63, %v3909_v28 }
 0x1cf   :  { %3467 = vst.msk [vmem:[#allocation4 + $0x24] sm:$0xf] %vm12043_vm1, %v3428_v13  ;;  %v177_v26 = vsel %vm10932_vm15, 0, %v176_v14  ;;  %vm12044_vm8 = vmmov %vm12043_vm1  ;;  %v7089_v15 = vrot.slane %v3823_v29, 9  ;;  %v3917_v31 = vrot.slane %v3824_v36, 5  ;;  %v3430_v33 = vpop.permute.xlu0 %3429 }
 0x1d0   :  { %3466 = vst.msk [vmem:[#allocation4 + $0x20] sm:$0xf] %vm12044_vm8, %v3426_v18  ;;  %178 = vst [vmem:[#allocation3] sm:$0x1] %v177_v26  ;;  %vm12045_vm9 = vsmask.f32 7938  ;;  %v3922_v49 = vsel %vm7656_vm12, %v7090_v34, %v3921_v1 }
 0x1d1   :  { %vm10948_vm13 = vmand %vm165_vm11, %vm12045_vm9  ;;  %v185_v24 = vld [vmem:[#allocation3 + $0x18] sm:$0x1]  ;;  %v246_v59 = vld [vmem:[#allocation3 + $0x1c] sm:$0x1]  ;;  %v3918_v58 = vsel %vm7656_vm12, %v7089_v15, %v3917_v31  ;;  %vm12050_vm11 = vcmask 290048   ;;  %vm12054_vm8 = vcmask 60416  }
 0x1d2   :  { %3437 = vrot.lane.b32.xlu0 %v3391_v20, %s7478_s13  ;;  %3756 = vrot.lane.b32.xlu1 %v3701_v0, %s7479_s16  ;;  %v237_v23 = vld [vmem:[#allocation3 + $0x4] sm:$0x1]  ;;  %vm12048_vm5 = vmmov %vm12043_vm1  ;;  %v179_v30 = vld [vmem:[#allocation3 + $0x8] sm:$0x1]  ;;  %v186_v17 = vsel %vm10932_vm15, 0, %v185_v24  ;;  %v247_v53 = vsel %vm10948_vm13, 0, %v246_v59 }
 0x1d3   :  { %v238_v50 = vsel %vm10948_vm13, 0, %v237_v23  ;;  %vm12049_vm0 = vmmov %vm12043_vm1  ;;  %v3747_v47 = vpop.permute.xlu0 %3746  ;;  %187 = vst [vmem:[#allocation3 + $0x18] sm:$0x1] %v186_v17  ;;  %v180_v39 = vsel %vm10932_vm15, 0, %v179_v30  ;;  %v240_v62 = vld [vmem:[#allocation3 + $0xc] sm:$0x1] }
 0x1d4   :  { %v3432_v54 = vpop.permute.xlu1 %3431  ;;  %3468 = vst.msk [vmem:[#allocation4 + $0x28] sm:$0xf] %vm12049_vm0, %v3430_v33  ;;  %239 = vst [vmem:[#allocation3 + $0x4] sm:$0x1] %v238_v50  ;;  %v188_v9 = vld [vmem:[#allocation3 + $0x20] sm:$0x1] }
 0x1d5   :  { %3469 = vst.msk [vmem:[#allocation4 + $0x2c] sm:$0xf] %vm12048_vm5, %v3432_v54  ;;  %248 = vst [vmem:[#allocation3 + $0x1c] sm:$0x1] %v247_v53  ;;  %v241_v56 = vsel %vm10948_vm13, 0, %v240_v62  ;;  %v189_v12 = vsel %vm10932_vm15, 0, %v188_v9 }
 0x1d6   :  { %3754 = vrot.lane.b32.xlu0 %v3687_v40, %s7479_s16  ;;  %3760 = vrot.lane.b32.xlu1 %v3729_v3, %s7479_s16  ;;  %3787 = vst.msk [vmem:[#allocation4 + $0x20] sm:$0xf] %vm3778_vm14, %v3747_v47  ;;  %181 = vst [vmem:[#allocation3 + $0x8] sm:$0x1] %v180_v39  ;;  %v249_v46 = vld [vmem:[#allocation3 + $0x24] sm:$0x1] }
 0x1d7   :  { %v182_v60 = vld [vmem:[#allocation3 + $0x10] sm:$0x1]  ;;  %242 = vst [vmem:[#allocation3 + $0xc] sm:$0x1] %v241_v56  ;;  %190 = vst [vmem:[#allocation3 + $0x20] sm:$0x1] %v189_v12 }
 0x1d8   :  { %v3749_v27 = vpop.permute.xlu1 %3748  ;;  %v250_v20 = vsel %vm10948_vm13, 0, %v249_v46  ;;  %v183_v21 = vsel %vm10932_vm15, 0, %v182_v60  ;;  %v243_v38 = vld [vmem:[#allocation3 + $0x14] sm:$0x1]  ;;  %v4607_v16 = vld [vmem:[#allocation3] sm:$0xf]  ;;  %vm12051_vm4 = vmmov %vm12050_vm11 }
 0x1d9   :  { %3788 = vst.msk [vmem:[#allocation4 + $0x24] sm:$0xf] %vm3778_vm14, %v3749_v27  ;;  %251 = vst [vmem:[#allocation3 + $0x24] sm:$0x1] %v250_v20  ;;  %v244_v19 = vsel %vm10948_vm13, 0, %v243_v38  ;;  %v4640_v44 = vshrl.u32 %v4607_v16, 16 }
 0x1da   :  { %3758 = vrot.lane.b32.xlu0 %v3715_v32, %s7479_s16  ;;  %3949 = vrot.lane.b32.xlu1 %v3914_v8, %s7480_s20  ;;  %184 = vst [vmem:[#allocation3 + $0x10] sm:$0x1] %v183_v21  ;;  %v4643_v0 = vshll.u32 %v4607_v16, 16  ;;  %v203_v35 = vld [vmem:[#allocation3 + $0x48] sm:$0x1]  ;;  %v3751_v5 = vpop.permute.xlu0 %3750  ;;  %vm12052_vm6 = vmmov %vm12051_vm4  ;;  %vm12055_vm9 = vcmask 126048  }
 0x1db   :  { %245 = vst [vmem:[#allocation3 + $0x14] sm:$0x1] %v244_v19  ;;  %v4608_v55 = vld [vmem:[#allocation3 + $0x4] sm:$0x1]  ;;  %v204_v45 = vsel %vm10932_vm15, 0, %v203_v35  ;;  %v4642_v22 = vrot.slane %v4640_v44, 4  ;;  %vm12053_vm1 = vmmov %vm12051_vm4 }
 0x1dc   :  { %3789 = vst.msk [vmem:[#allocation4 + $0x28] sm:$0xf] %vm3778_vm14, %v3751_v5  ;;  %v4645_v40 = vrot.slane %v4643_v0, 5  ;;  %v4649_v10 = vshll.u32 %v4608_v55, 16  ;;  %205 = vst [vmem:[#allocation3 + $0x48] sm:$0x1] %v204_v45 }
 0x1dd   :  { %v4928_v2 = vld [vmem:[#allocation3] sm:$0xe]  ;;  %v4929_v6 = vld [vmem:[#allocation3 + $0x4] sm:$0x1]  ;;  %v264_v3 = vld [vmem:[#allocation3 + $0x4c] sm:$0x1] }
 0x1de   :  { %3947 = vrot.lane.b32.xlu0 %v3910_v61, %s7480_s20  ;;  %3953 = vrot.lane.b32.xlu1 %v3922_v49, %s7480_s20  ;;  %v206_v42 = vld [vmem:[#allocation3 + $0x50] sm:$0x1]  ;;  %v4646_v51 = vor.u32 %v4645_v40, %v4642_v22  ;;  %v4651_v48 = vrot.slane %v4649_v10, 5  ;;  %v265_v57 = vsel %vm10948_vm13, 0, %v264_v3  ;;  %v3940_v37 = vpop.permute.xlu0 %3939  ;;  %v267_v41 = vld [vmem:[#allocation3 + $0x54] sm:$0x1]  ;;  %vm12057_vm5 = vmmov %vm12055_vm9 }
 0x1df   :  { %266 = vst [vmem:[#allocation3 + $0x4c] sm:$0x1] %v265_v57  ;;  %v207_v43 = vsel %vm10932_vm15, 0, %v206_v42  ;;  %3980 = vst.msk [vmem:[#allocation4 + $0x20] sm:$0xf] %vm12050_vm11, %v3940_v37  ;;  %v7128_v63 = vrot.slane %v4928_v2, 9 }
 0x1e0   :  { %v4647_v32 = vrot.slane %v4646_v51, 4  ;;  %v4994_v28 = vrot.slane %v4929_v6, 5  ;;  %208 = vst [vmem:[#allocation3 + $0x50] sm:$0x1] %v207_v43  ;;  %v268_v29 = vsel %vm10948_vm13, 0, %v267_v41  ;;  %vm12059_vm0 = vmmov %vm12057_vm5 }
 0x1e1   :  { %269 = vst [vmem:[#allocation3 + $0x54] sm:$0x1] %v268_v29  ;;  %v10996_v36 = vld [vmem:[#allocation3 + $0x48] sm:$0xe]  ;;  %v197_v15 = vld [vmem:[#allocation3 + $0x38] sm:$0x1] }
 0x1e2   :  { %3951 = vrot.lane.b32.xlu0 %v3918_v58, %s7480_s20  ;;  %v4652_v14 = vsel %vm7664_vm7, %v4647_v32, %v4651_v48  ;;  %v2529_v8 = vpop.permute.xlu0 %2528  ;;  %v4995_v18 = vsel %vm7656_vm12, %v7128_v63, %v4994_v28  ;;  %v258_v31 = vld [vmem:[#allocation3 + $0x3c] sm:$0x1]  ;;  %v198_v23 = vsel %vm10932_vm15, 0, %v197_v15  ;;  %v191_v30 = vld [vmem:[#allocation3 + $0x28] sm:$0x1]  ;;  %v7167_v47 = vrot.slane %v10996_v36, 9 }
 0x1e3   :  { %v3753_v25 = vpop.permute.xlu1 %3752  ;;  %v5740_v34 = vld [vmem:[#allocation3 + $0x48] sm:$0xf]  ;;  %2565 = vst.msk [vmem:[#allocation4 + $0x30] sm:$0xf] %vm2552_vm10, %v2529_v8  ;;  %v259_v49 = vsel %vm10948_vm13, 0, %v258_v31  ;;  %v192_v55 = vsel %vm10932_vm15, 0, %v191_v30 }
 0x1e4   :  { %3790 = vst.msk [vmem:[#allocation4 + $0x2c] sm:$0xf] %vm3778_vm14, %v3753_v25  ;;  %v5844_v1 = vld [vmem:[#allocation3 + $0x48] sm:$0xf]  ;;  %5779 = vrot.lane.b32.xlu1 %v5740_v34, %s7481_s0  ;;  %199 = vst [vmem:[#allocation3 + $0x38] sm:$0x1] %v198_v23 }
 0x1e5   :  { %v5961_v26 = vshrl.u32 %v5844_v1, 16  ;;  %v5964_v61 = vshll.u32 %v5844_v1, 16  ;;  %260 = vst [vmem:[#allocation3 + $0x3c] sm:$0x1] %v259_v49  ;;  %v252_v58 = vld [vmem:[#allocation3 + $0x2c] sm:$0x1] }
 0x1e6   :  { %4863 = vrot.lane.b32.xlu0 %v4652_v14, %s7473_s11  ;;  %v5845_v33 = vld [vmem:[#allocation3 + $0x4c] sm:$0x1]  ;;  %v3944_v17 = vpop.permute.xlu0 %3943  ;;  %v4944_v20 = vld [vmem:[#allocation3 + $0x50] sm:$0xe]  ;;  %v200_v38 = vld [vmem:[#allocation3 + $0x40] sm:$0x1] }
 0x1e7   :  { %v3942_v13 = vpop.permute.xlu1 %3941  ;;  %v5963_v50 = vrot.slane %v5961_v26, 4  ;;  %v5966_v24 = vrot.slane %v5964_v61, 5  ;;  %v6166_v59 = vld [vmem:[#allocation3 + $0x4c] sm:$0x1]  ;;  %v5970_v53 = vshll.u32 %v5845_v33, 16  ;;  %v253_v45 = vsel %vm10948_vm13, 0, %v252_v58 }
 0x1e8   :  { %3981 = vst.msk [vmem:[#allocation4 + $0x24] sm:$0xf] %vm12051_vm4, %v3942_v13  ;;  %v4623_v27 = vld [vmem:[#allocation3 + $0x50] sm:$0xf]  ;;  %v4624_v62 = vld [vmem:[#allocation3 + $0x54] sm:$0x1] }
 0x1e9   :  { %3982 = vst.msk [vmem:[#allocation4 + $0x28] sm:$0xf] %vm12052_vm6, %v3944_v17  ;;  %v5967_v39 = vor.u32 %v5966_v24, %v5963_v50  ;;  %v4752_v9 = vshrl.u32 %v4623_v27, 16  ;;  %v4755_v56 = vshll.u32 %v4623_v27, 16  ;;  %v6245_v12 = vrot.slane %v6166_v59, 5 }
 0x1ea   :  { %5056 = vrot.lane.b32.xlu0 %v4995_v18, %s7477_s25  ;;  %v5972_v46 = vrot.slane %v5970_v53, 5  ;;  %v4761_v60 = vshll.u32 %v4624_v62, 16  ;;  %v4945_v21 = vld [vmem:[#allocation3 + $0x54] sm:$0x1]  ;;  %v261_v22 = vld [vmem:[#allocation3 + $0x44] sm:$0x1] }
 0x1eb   :  { %v2531_v54 = vpop.permute.xlu1 %2530  ;;  %v5968_v44 = vrot.slane %v5967_v39, 4  ;;  %v4754_v0 = vrot.slane %v4752_v9, 4  ;;  %v4757_v35 = vrot.slane %v4755_v56, 5  ;;  %193 = vst [vmem:[#allocation3 + $0x28] sm:$0x1] %v192_v55  ;;  %v201_v2 = vsel %vm10932_vm15, 0, %v200_v38 }
 0x1ec   :  { %2566 = vst.msk [vmem:[#allocation4 + $0x34] sm:$0xf] %vm2552_vm10, %v2531_v54  ;;  %v4763_v5 = vrot.slane %v4761_v60, 5  ;;  %254 = vst [vmem:[#allocation3 + $0x2c] sm:$0x1] %v253_v45  ;;  %v262_v6 = vsel %vm10948_vm13, 0, %v261_v22  ;;  %v6246_v57 = vsel %vm7656_vm12, %v7167_v47, %v6245_v12 }
 0x1ed   :  { %v5973_v40 = vsel %vm7664_vm7, %v5968_v44, %v5972_v46  ;;  %v4758_v10 = vor.u32 %v4757_v35, %v4754_v0  ;;  %v194_v3 = vld [vmem:[#allocation3 + $0x30] sm:$0x1]  ;;  %v255_v42 = vld [vmem:[#allocation3 + $0x34] sm:$0x1]  ;;  %202 = vst [vmem:[#allocation3 + $0x40] sm:$0x1] %v201_v2 }
 0x1ee   :  { %6100 = vrot.lane.b32.xlu1 %v5973_v40, %s7482_s9  ;;  %263 = vst [vmem:[#allocation3 + $0x44] sm:$0x1] %v262_v6  ;;  %v195_v25 = vsel %vm10932_vm15, 0, %v194_v3  ;;  %v256_v51 = vsel %vm10948_vm13, 0, %v255_v42  ;;  %v7136_v37 = vrot.slane %v4944_v20, 9  ;;  %v5026_v43 = vrot.slane %v4945_v21, 5 }
 0x1ef   :  { %v3946_v16 = vpop.permute.xlu1 %3945  ;;  %v7453_v19 = vld [vmem:[#allocation4 + $0x20] sm:$0xff]   ;;  %v4759_v48 = vrot.slane %v4758_v10, 4  ;;  %196 = vst [vmem:[#allocation3 + $0x30] sm:$0x1] %v195_v25  ;;  %257 = vst [vmem:[#allocation3 + $0x34] sm:$0x1] %v256_v51 }
 0x1f0   :  { %3983 = vst.msk [vmem:[#allocation4 + $0x2c] sm:$0xf] %vm12053_vm1, %v3946_v16  ;;  %7397 = vmatprep.mubr.msk.bf16.mxu0 %vm4064_vm2, %v7453_v19  ;;  %v5027_v63 = vsel %vm7656_vm12, %v7136_v37, %v5026_v43  ;;  %v4575_v14 = vld [vmem:[#allocation3] sm:$0xf]  ;;  %v215_v1 = vld [vmem:[#allocation3 + $0x68] sm:$0x1]  ;;  %vm12063_vm1 = vmmov %vm12054_vm8 }
 0x1f1   :  { %v4764_v41 = vsel %vm7664_vm7, %v4759_v48, %v4763_v5  ;;  %4591 = vst.msk [vmem:[#allocation5] sm:$0xf] %vm12054_vm8, %v4575_v14  ;;  %v276_v36 = vld [vmem:[#allocation3 + $0x6c] sm:$0x1]  ;;  %v216_v18 = vsel %vm10932_vm15, 0, %v215_v1 }
 0x1f2   :  { %4879 = vrot.lane.b32.xlu0 %v4764_v41, %s7473_s11  ;;  %6293 = vrot.lane.b32.xlu1 %v6246_v57, %s7483_s18  ;;  %v277_v26 = vsel %vm10948_vm13, 0, %v276_v36  ;;  %217 = vst [vmem:[#allocation3 + $0x68] sm:$0x1] %v216_v18  ;;  %v11052_v23 = vld [vmem:[%s11977_s2] ss:$0 sm:$0xff] }
 0x1f3   :  { %278 = vst [vmem:[#allocation3 + $0x6c] sm:$0x1] %v277_v26  ;;  %v11059_v54 = vld [vmem:[%s11978_s3] ss:$0 sm:$0xff]  ;;  %vm12062_vm6 = vsmask.f32 7938 }
 0x1f4   :  { %vm11075_vm8 = vmand %vm12063_vm1, %vm12062_vm6  ;;  %v4489_v40 = vld [vmem:[#allocation3 + $0x18] sm:$0xf]  ;;  %v4492_v10 = vld [vmem:[#allocation3 + $0x1c] sm:$0x1] }
 0x1f5   :  { %v4477_v48 = vld [vmem:[#allocation3 + $0x8] sm:$0xf]  ;;  %v4480_v57 = vld [vmem:[#allocation3 + $0xc] sm:$0x1]  ;;  %v4495_v36 = vld [vmem:[#allocation3 + $0x20] sm:$0xf] }
 0x1f6   :  { %5072 = vrot.lane.b32.xlu0 %v5027_v63, %s7477_s25  ;;  %v4498_v18 = vld [vmem:[#allocation3 + $0x24] sm:$0x1] }
 0x1f7   :  { %v7454_v32 = vld [vmem:[#allocation4 + $0x28] sm:$0xff]  }
 0x1f8   :  { %7398 = vmatmul.mubr.msk.bf16.gmra.mxu0 %vm4064_vm2, %v7454_v32 }
 0x20d   :  { %v2535_v28 = vpop.permute.xlu1 %2534 }
 0x20e   :  { %2568 = vst.msk [vmem:[#allocation4 + $0x3c] sm:$0xf] %vm2552_vm10, %v2535_v28 }
 0x211   :  { %v2727_v29 = vpop.permute.xlu1 %2726 }
 0x212   :  { %2762 = vst.msk [vmem:[#allocation4 + $0x34] sm:$0xf] %vm2748_vm3, %v2727_v29 }
 0x215   :  { %v2731_v13 = vpop.permute.xlu1 %2730 }
 0x216   :  { %2764 = vst.msk [vmem:[#allocation4 + $0x3c] sm:$0xf] %vm2748_vm3, %v2731_v13 }
 0x219   :  { %v2824_v8 = vpop.permute.xlu1 %2823 }
 0x21a   :  { %2859 = vst.msk [vmem:[#allocation4 + $0x34] sm:$0xf] %vm12055_vm9, %v2824_v8 }
 0x21c   :  { %v2533_v34 = vpop.permute.xlu0 %2532 }
 0x21d   :  { %2567 = vst.msk [vmem:[#allocation4 + $0x38] sm:$0xf] %vm2552_vm10, %v2533_v34  ;;  %vm12056_vm10 = vmmov %vm12055_vm9 }
 0x21e   :  { %v7391_v33 = vpop.f32.mrf.mxu0 }
 0x21f   :  { %v4198_v50 = vmul.f32 %v7391_v33, %v11052_v23  ;;  %v4483_v33 = vld [vmem:[#allocation3 + $0x10] sm:$0xf] }
 0x220   :  { %v2725_v61 = vpop.permute.xlu0 %2724  ;;  %v4127_v59 = vpop.f32.mrf.mxu0 }
 0x221   :  { %2761 = vst.msk [vmem:[#allocation4 + $0x30] sm:$0xf] %vm2748_vm3, %v2725_v61  ;;  %v4220_v58 = vadd.f32 %v11059_v54, %v4198_v50  ;;  %v4196_v17 = vmul.f32 %v11052_v23, %v4127_v59  ;;  %v4486_v50 = vld [vmem:[#allocation3 + $0x14] sm:$0x1] }
 0x222   :  { %v7392_v53 = vpop.f32.mrf.mxu0 }
 0x223   :  { %v4236_v27 = vmax.f32 %v4220_v58, 0.0  ;;  %v4218_v47 = vadd.f32 %v11059_v54, %v4196_v17  ;;  %v4199_v39 = vmul.f32 %v7392_v53, %v11052_v23 }
 0x224   :  { %v2729_v15 = vpop.permute.xlu0 %2728  ;;  %v4130_v62 = vpop.f32.mrf.mxu0 }
 0x225   :  { %2763 = vst.msk [vmem:[#allocation4 + $0x38] sm:$0xf] %vm2748_vm3, %v2729_v15  ;;  %vm12058_vm3 = vcmask 158848   ;;  %v7345_v56 = vpack.c.bf16 %v4236_v27, %v4236_v27  ;;  %v4234_v12 = vmax.f32 %v4218_v47, 0.0  ;;  %v4221_v46 = vadd.f32 %v11059_v54, %v4199_v39 }
 0x226   :  { %v2828_v31 = vpop.permute.xlu1 %2827  ;;  %v4197_v60 = vmul.f32 %v11052_v23, %v4130_v62  ;;  %vm12060_vm11 = vmmov %vm12058_vm3 }
 0x227   :  { %2861 = vst.msk [vmem:[#allocation4 + $0x3c] sm:$0xf] %vm12056_vm10, %v2828_v31  ;;  %vm12061_vm4 = vmmov %vm12058_vm3  ;;  %v4331_v21 = vshrl.u32 %v7345_v56, 16  ;;  %v7343_v38 = vpack.c.bf16 %v4234_v12, %v4234_v12  ;;  %v4237_v16 = vmax.f32 %v4221_v46, 0.0  ;;  %v4334_v35 = vshll.u32 %v7345_v56, 16 }
 0x228   :  { %v2822_v49 = vpop.permute.xlu0 %2821  ;;  %v4219_v19 = vadd.f32 %v11059_v54, %v4197_v60  ;;  %vm12066_vm9 = vmmov %vm12058_vm3  ;;  %vm12067_vm10 = vcmask 191648  }
 0x229   :  { %2858 = vst.msk [vmem:[#allocation4 + $0x30] sm:$0xf] %vm12057_vm5, %v2822_v49  ;;  %v4333_v0 = vrot.slane %v4331_v21, 7  ;;  %v4315_v5 = vshrl.u32 %v7343_v38, 16  ;;  %v7346_v55 = vpack.c.bf16 %v4237_v16, %v4237_v16  ;;  %v4318_v2 = vshll.u32 %v7343_v38, 16  ;;  %vm12068_vm5 = vmmov %vm12067_vm10 }
 0x22a   :  { %v3145_v24 = vpop.permute.xlu1 %3144  ;;  %v4235_v6 = vmax.f32 %v4219_v19, 0.0 }
 0x22b   :  { %3180 = vst.msk [vmem:[#allocation4 + $0x34] sm:$0xf] %vm12058_vm3, %v3145_v24  ;;  %v4336_v3 = vor.u32 %v4334_v35, %v4333_v0  ;;  %v4337_v42 = vrot.slane %v4333_v0, 4  ;;  %v4317_v25 = vrot.slane %v4315_v5, 7  ;;  %v4339_v51 = vshrl.u32 %v7346_v55, 16  ;;  %vm12069_vm3 = vmmov %vm12068_vm5 }
 0x22c   :  { %v2826_v30 = vpop.permute.xlu0 %2825  ;;  %v7344_v37 = vpack.c.bf16 %v4235_v6, %v4235_v6  ;;  %v4342_v14 = vshll.u32 %v7346_v55, 16 }
 0x22d   :  { %2860 = vst.msk [vmem:[#allocation4 + $0x38] sm:$0xf] %vm12059_vm0, %v2826_v30  ;;  %v4490_v41 = vsel %vm11075_vm8, %v4336_v3, %v4489_v40  ;;  %v4493_v32 = vsel %vm10932_vm15, %v4337_v42, %v4492_v10  ;;  %v4320_v63 = vor.u32 %v4318_v2, %v4317_v25  ;;  %v4321_v28 = vrot.slane %v4317_v25, 4  ;;  %vm12070_vm0 = vmmov %vm12069_vm3 }
 0x22e   :  { %4491 = vst [vmem:[#allocation3 + $0x18] sm:$0xf] %v4490_v41  ;;  %4494 = vst [vmem:[#allocation3 + $0x1c] sm:$0x1] %v4493_v32  ;;  %v4341_v13 = vrot.slane %v4339_v51, 7  ;;  %v4323_v8 = vshrl.u32 %v7344_v37, 16 }
 0x22f   :  { %v4478_v34 = vsel %vm11075_vm8, %v4320_v63, %v4477_v48  ;;  %v4481_v1 = vsel %vm10932_vm15, %v4321_v28, %v4480_v57  ;;  %v4326_v31 = vshll.u32 %v7344_v37, 16 }
 0x230   :  { %v3143_v9 = vpop.permute.xlu0 %3142  ;;  %v3149_v20 = vpop.permute.xlu1 %3148  ;;  %4479 = vst [vmem:[#allocation3 + $0x8] sm:$0xf] %v4478_v34  ;;  %4482 = vst [vmem:[#allocation3 + $0xc] sm:$0x1] %v4481_v1  ;;  %v4344_v26 = vor.u32 %v4342_v14, %v4341_v13  ;;  %v4345_v61 = vrot.slane %v4341_v13, 4  ;;  %v4325_v15 = vrot.slane %v4323_v8, 7 }
 0x231   :  { %3179 = vst.msk [vmem:[#allocation4 + $0x30] sm:$0xf] %vm12060_vm11, %v3143_v9  ;;  %vm12071_vm11 = vcmask 224448  }
 0x232   :  { %3182 = vst.msk [vmem:[#allocation4 + $0x3c] sm:$0xf] %vm12061_vm4, %v3149_v20  ;;  %v4496_v59 = vsel %vm11075_vm8, %v4344_v26, %v4495_v36  ;;  %v4499_v30 = vsel %vm10932_vm15, %v4345_v61, %v4498_v18  ;;  %v4328_v58 = vor.u32 %v4326_v31, %v4325_v15  ;;  %v4329_v17 = vrot.slane %v4325_v15, 4  ;;  %vm12072_vm4 = vmmov %vm12071_vm11 }
 0x233   :  { %4497 = vst [vmem:[#allocation3 + $0x20] sm:$0xf] %v4496_v59  ;;  %4500 = vst [vmem:[#allocation3 + $0x24] sm:$0x1] %v4499_v30 }
 0x234   :  { %v3147_v44 = vpop.permute.xlu0 %3146  ;;  %v3338_v22 = vpop.permute.xlu1 %3337  ;;  %v4484_v53 = vsel %vm11075_vm8, %v4328_v58, %v4483_v33  ;;  %v4487_v27 = vsel %vm10932_vm15, %v4329_v17, %v4486_v50  ;;  %vm12073_vm6 = vmmov %vm12072_vm4 }
 0x235   :  { %3181 = vst.msk [vmem:[#allocation4 + $0x38] sm:$0xf] %vm12066_vm9, %v3147_v44  ;;  %4485 = vst [vmem:[#allocation3 + $0x10] sm:$0xf] %v4484_v53  ;;  %v5734_v39 = vld [vmem:[#allocation3 + $0x18] sm:$0xf] }
 0x236   :  { %3373 = vst.msk [vmem:[#allocation4 + $0x34] sm:$0xf] %vm12067_vm10, %v3338_v22  ;;  %4488 = vst [vmem:[#allocation3 + $0x14] sm:$0x1] %v4487_v27  ;;  %v5123_v62 = vld [vmem:[#allocation3 + $0x18] sm:$0xf]  ;;  %5767 = vrot.lane.b32.xlu1 %v5734_v39, %s7481_s0 }
 0x237   :  { %v4934_v9 = vld [vmem:[#allocation3 + $0x18] sm:$0xe]  ;;  %5157 = vrot.lane.b32.xlu0 %v5123_v62, %s7478_s13  ;;  %v4935_v12 = vld [vmem:[#allocation3 + $0x1c] sm:$0x1]  ;;  %v5121_v35 = vld [vmem:[#allocation3 + $0x8] sm:$0xf] }
 0x238   :  { %v3336_v43 = vpop.permute.xlu0 %3335  ;;  %v3342_v29 = vpop.permute.xlu1 %3341  ;;  %v7131_v46 = vrot.slane %v4934_v9, 9  ;;  %v6153_v60 = vld [vmem:[#allocation3 + $0x18] sm:$0xe]  ;;  %v5006_v20 = vrot.slane %v4935_v12, 5  ;;  %v6154_v21 = vld [vmem:[#allocation3 + $0x1c] sm:$0x1]  ;;  %vm12074_vm1 = vmmov %vm12072_vm4 }
 0x239   :  { %3372 = vst.msk [vmem:[#allocation4 + $0x30] sm:$0xf] %vm12068_vm5, %v3336_v43  ;;  %v7161_v38 = vrot.slane %v6153_v60, 9  ;;  %v5543_v16 = vld [vmem:[#allocation3 + $0x18] sm:$0xe]  ;;  %v6221_v5 = vrot.slane %v6154_v21, 5 }
 0x23a   :  { %3375 = vst.msk [vmem:[#allocation4 + $0x3c] sm:$0xf] %vm12069_vm3, %v3342_v29  ;;  %v5544_v19 = vld [vmem:[#allocation3 + $0x1c] sm:$0x1]  ;;  %v5007_v0 = vsel %vm7656_vm12, %v7131_v46, %v5006_v20  ;;  %v7146_v55 = vrot.slane %v5543_v16, 9  ;;  %vm12075_vm9 = vcmask 290048  }
 0x23b   :  { %v5613_v22 = vrot.slane %v5544_v19, 5  ;;  %5062 = vrot.lane.b32.xlu1 %v5007_v0, %s7477_s25  ;;  %5153 = vrot.lane.b32.xlu0 %v5121_v35, %s7478_s13  ;;  %v6222_v2 = vsel %vm7656_vm12, %v7161_v38, %v6221_v5  ;;  %v5539_v3 = vld [vmem:[#allocation3 + $0x8] sm:$0xe]  ;;  %v5540_v25 = vld [vmem:[#allocation3 + $0xc] sm:$0x1]  ;;  %vm12076_vm10 = vmmov %vm12075_vm9  ;;  %vm4911_vm3 = vcmask 126016  }
 0x23c   :  { %v3340_v49 = vpop.permute.xlu0 %3339  ;;  %v3436_v24 = vpop.permute.xlu1 %3435  ;;  %v4930_v51 = vld [vmem:[#allocation3 + $0x8] sm:$0xe]  ;;  %v4931_v48 = vld [vmem:[#allocation3 + $0xc] sm:$0x1]  ;;  %v5735_v57 = vld [vmem:[#allocation3 + $0x20] sm:$0xf] }
 0x23d   :  { %3374 = vst.msk [vmem:[#allocation4 + $0x38] sm:$0xf] %vm12070_vm0, %v3340_v49  ;;  %v5614_v6 = vsel %vm7656_vm12, %v7146_v55, %v5613_v22  ;;  %v5124_v43 = vld [vmem:[#allocation3 + $0x20] sm:$0xf]  ;;  %v7144_v41 = vrot.slane %v5539_v3, 9  ;;  %v5605_v32 = vrot.slane %v5540_v25, 5  ;;  %vm12078_vm5 = vmmov %vm12075_vm9 }
 0x23e   :  { %3471 = vst.msk [vmem:[#allocation4 + $0x34] sm:$0xf] %vm12071_vm11, %v3436_v24  ;;  %v7129_v63 = vrot.slane %v4930_v51, 9  ;;  %v4998_v28 = vrot.slane %v4931_v48, 5  ;;  %v6155_v34 = vld [vmem:[#allocation3 + $0x20] sm:$0xe] }
 0x23f   :  { %6281 = vrot.lane.b32.xlu1 %v6222_v2, %s7483_s18  ;;  %5671 = vrot.lane.b32.xlu0 %v5614_v6, %s7484_s23  ;;  %v5606_v14 = vsel %vm7656_vm12, %v7144_v41, %v5605_v32  ;;  %v6156_v36 = vld [vmem:[#allocation3 + $0x24] sm:$0x1]  ;;  %v5545_v18 = vld [vmem:[#allocation3 + $0x20] sm:$0xe]  ;;  %v5733_v61 = vld [vmem:[#allocation3 + $0x10] sm:$0xf] }
 0x240   :  { %v3434_v47 = vpop.permute.xlu0 %3433  ;;  %v3440_v56 = vpop.permute.xlu1 %3439  ;;  %v4999_v8 = vsel %vm7656_vm12, %v7129_v63, %v4998_v28  ;;  %v5546_v26 = vld [vmem:[#allocation3 + $0x24] sm:$0x1]  ;;  %v5122_v31 = vld [vmem:[#allocation3 + $0x10] sm:$0xf]  ;;  %v7162_v49 = vrot.slane %v6155_v34, 9  ;;  %v6225_v33 = vrot.slane %v6156_v36, 5 }
 0x241   :  { %3470 = vst.msk [vmem:[#allocation4 + $0x30] sm:$0xf] %vm12072_vm4, %v3434_v47  ;;  %v7147_v50 = vrot.slane %v5545_v18, 9  ;;  %v5617_v24 = vrot.slane %v5546_v26, 5  ;;  %v4936_v59 = vld [vmem:[#allocation3 + $0x20] sm:$0xe] }
 0x242   :  { %3473 = vst.msk [vmem:[#allocation4 + $0x3c] sm:$0xf] %vm12073_vm6, %v3440_v56  ;;  %v4937_v30 = vld [vmem:[#allocation3 + $0x24] sm:$0x1]  ;;  %v6226_v17 = vsel %vm7656_vm12, %v7162_v49, %v6225_v33  ;;  %v7132_v27 = vrot.slane %v4936_v59, 9  ;;  %vm5104_vm0 = vcmask 191616  }
 0x243   :  { %5769 = vrot.lane.b32.xlu0 %v5735_v57, %s7481_s0  ;;  %5159 = vrot.lane.b32.xlu1 %v5124_v43, %s7478_s13  ;;  %v5618_v53 = vsel %vm7656_vm12, %v7147_v50, %v5617_v24  ;;  %v5010_v47 = vrot.slane %v4937_v30, 5  ;;  %v4583_v60 = vld [vmem:[#allocation3 + $0x50] sm:$0xf]  ;;  %v209_v20 = vld [vmem:[#allocation3 + $0x58] sm:$0x1]  ;;  %vm12079_vm11 = vcmask 60416  }
 0x244   :  { %v3438_v44 = vpop.permute.xlu0 %3437  ;;  %v3757_v40 = vpop.permute.xlu1 %3756  ;;  %4599 = vst.msk [vmem:[#allocation5 + $0x20] sm:$0xf] %vm12079_vm11, %v4583_v60  ;;  %v270_v16 = vld [vmem:[#allocation3 + $0x5c] sm:$0x1]  ;;  %v218_v19 = vld [vmem:[#allocation3 + $0x70] sm:$0x1] }
 0x245   :  { %3472 = vst.msk [vmem:[#allocation4 + $0x38] sm:$0xf] %vm12074_vm1, %v3438_v44  ;;  %v5011_v62 = vsel %vm7656_vm12, %v7132_v27, %v5010_v47  ;;  %v4613_v0 = vld [vmem:[#allocation3 + $0x18] sm:$0xf]  ;;  %v210_v5 = vsel %vm10932_vm15, 0, %v209_v20  ;;  %v271_v55 = vsel %vm10948_vm13, 0, %v270_v16 }
 0x246   :  { %3792 = vst.msk [vmem:[#allocation4 + $0x34] sm:$0xf] %vm3778_vm14, %v3757_v40  ;;  %v279_v22 = vld [vmem:[#allocation3 + $0x74] sm:$0x1]  ;;  %211 = vst [vmem:[#allocation3 + $0x58] sm:$0x1] %v210_v5 }
 0x247   :  { %5667 = vrot.lane.b32.xlu0 %v5606_v14, %s7484_s23  ;;  %5058 = vrot.lane.b32.xlu1 %v4999_v8, %s7477_s25  ;;  %272 = vst [vmem:[#allocation3 + $0x5c] sm:$0x1] %v271_v55  ;;  %v212_v6 = vld [vmem:[#allocation3 + $0x60] sm:$0x1]  ;;  %v273_v3 = vld [vmem:[#allocation3 + $0x64] sm:$0x1] }
 0x248   :  { %v3755_v10 = vpop.permute.xlu0 %3754  ;;  %v3761_v42 = vpop.permute.xlu1 %3760  ;;  %v219_v25 = vsel %vm10932_vm15, 0, %v218_v19  ;;  %v280_v51 = vsel %vm10948_vm13, 0, %v279_v22  ;;  %v213_v48 = vsel %vm10932_vm15, 0, %v212_v6  ;;  %v4682_v32 = vshrl.u32 %v4613_v0, 16  ;;  %v4513_v8 = vld [vmem:[#allocation3 + $0x38] sm:$0xf] }
 0x249   :  { %3791 = vst.msk [vmem:[#allocation4 + $0x30] sm:$0xf] %vm3778_vm14, %v3755_v10  ;;  %3794 = vst.msk [vmem:[#allocation4 + $0x3c] sm:$0xf] %vm3778_vm14, %v3761_v42  ;;  %v4685_v63 = vshll.u32 %v4613_v0, 16  ;;  %v274_v28 = vsel %vm10948_vm13, 0, %v273_v3 }
 0x24a   :  { %220 = vst [vmem:[#allocation3 + $0x70] sm:$0x1] %v219_v25  ;;  %281 = vst [vmem:[#allocation3 + $0x74] sm:$0x1] %v280_v51  ;;  %v4516_v34 = vld [vmem:[#allocation3 + $0x3c] sm:$0x1] }
 0x24b   :  { %5765 = vrot.lane.b32.xlu0 %v5733_v61, %s7481_s0  ;;  %5155 = vrot.lane.b32.xlu1 %v5122_v31, %s7478_s13  ;;  %214 = vst [vmem:[#allocation3 + $0x60] sm:$0x1] %v213_v48  ;;  %275 = vst [vmem:[#allocation3 + $0x64] sm:$0x1] %v274_v28  ;;  %v5222_v36 = vld [vmem:[#allocation3 + $0x18] sm:$0xf] }
 0x24c   :  { %v3759_v37 = vpop.permute.xlu0 %3758  ;;  %v3950_v29 = vpop.permute.xlu1 %3949  ;;  %v4578_v18 = vld [vmem:[#allocation3 + $0x18] sm:$0xf]  ;;  %v4576_v31 = vld [vmem:[#allocation3 + $0x8] sm:$0xf]  ;;  %v4684_v24 = vrot.slane %v4682_v32, 4  ;;  %v4687_v59 = vrot.slane %v4685_v63, 5 }
 0x24d   :  { %3793 = vst.msk [vmem:[#allocation4 + $0x38] sm:$0xf] %vm3778_vm14, %v3759_v37  ;;  %vm12077_vm14 = vmmov %vm12075_vm9  ;;  %v4501_v33 = vld [vmem:[#allocation3 + $0x28] sm:$0xf]  ;;  %v4504_v27 = vld [vmem:[#allocation3 + $0x2c] sm:$0x1] }
 0x24e   :  { %3985 = vst.msk [vmem:[#allocation4 + $0x34] sm:$0xf] %vm12075_vm9, %v3950_v29  ;;  %v4577_v16 = vld [vmem:[#allocation3 + $0x10] sm:$0xf]  ;;  %v4933_v48 = vld [vmem:[#allocation3 + $0x14] sm:$0x1] }
 0x24f   :  { %6283 = vrot.lane.b32.xlu0 %v6226_v17, %s7483_s18  ;;  %5673 = vrot.lane.b32.xlu1 %v5618_v53, %s7484_s23  ;;  %v4579_v53 = vld [vmem:[#allocation3 + $0x20] sm:$0xf]  ;;  %v4932_v5 = vld [vmem:[#allocation3 + $0x10] sm:$0xe] }
 0x250   :  { %v3948_v13 = vpop.permute.xlu0 %3947  ;;  %v3954_v1 = vpop.permute.xlu1 %3953 }
 0x251   :  { %3984 = vst.msk [vmem:[#allocation4 + $0x30] sm:$0xf] %vm12076_vm10, %v3948_v13 }
 0x252   :  { %3987 = vst.msk [vmem:[#allocation4 + $0x3c] sm:$0xf] %vm12077_vm14, %v3954_v1 }
 0x253   :  { %5064 = vrot.lane.b32.xlu0 %v5011_v62, %s7477_s25  ;;  %v5282_v62 = vshll.u32 %v5222_v36, 16 }
 0x254   :  { %v3952_v15 = vpop.permute.xlu0 %3951 }
 0x255   :  { %3986 = vst.msk [vmem:[#allocation4 + $0x38] sm:$0xf] %vm12078_vm5, %v3952_v15  ;;  %v5284_v63 = vrot.slane %v5282_v62, 5  ;;  %vm5201_vm5 = vcmask 257216  }
 0x258   :  { %v7455_v58 = vld [vmem:[#allocation4 + $0x30] sm:$0xff]   ;;  %v4864_v56 = vpop.permute.xlu0 %4863 }
 0x259   :  { %7401 = vmatprep.mubr.msk.bf16.mxu0 %vm4064_vm2, %v7455_v58  ;;  %4912 = vst.msk [vmem:[#allocation5] sm:$0xf] %vm4911_vm3, %v4864_v56 }
 0x25c   :  { %v7456_v39 = vld [vmem:[#allocation4 + $0x38] sm:$0xff]   ;;  %v5057_v35 = vpop.permute.xlu0 %5056 }
 0x25d   :  { %7402 = vmatmul.mubr.msk.bf16.gmra.mxu0 %vm4064_vm2, %v7456_v39  ;;  %5105 = vst.msk [vmem:[#allocation5] sm:$0xf] %vm5104_vm0, %v5057_v35  ;;  %vm12080_vm2 = vmmov %vm12079_vm11  ;;  %v5279_v39 = vshrl.u32 %v5222_v36, 16  ;;  %v4688_v35 = vor.u32 %v4687_v59, %v4684_v24  ;;  %v5542_v36 = vld [vmem:[#allocation3 + $0x14] sm:$0x1]  ;;  %vm5522_vm11 = vcmask 322816  }
 0x25e   :  { %v7395_v9 = vpop.f32.mrf.mxu0  ;;  %4594 = vst.msk [vmem:[#allocation5 + $0xc] sm:$0xf] %vm12080_vm2, %v4578_v18  ;;  %vm12081_vm4 = vmmov %vm12080_vm2  ;;  %v5218_v24 = vld [vmem:[#allocation3 + $0x8] sm:$0xf] }
 0x25f   :  { %v4202_v12 = vmul.f32 %v7395_v9, %v11052_v23  ;;  %4592 = vst.msk [vmem:[#allocation5 + $0x4] sm:$0xf] %vm12081_vm4, %v4576_v31  ;;  %v5832_v9 = vld [vmem:[#allocation3 + $0x18] sm:$0xf]  ;;  %vm12082_vm6 = vmmov %vm12080_vm2  ;;  %v5281_v32 = vrot.slane %v5279_v39, 4  ;;  %v5254_v39 = vshll.u32 %v5218_v24, 16 }
 0x260   :  { %v4143_v46 = vpop.f32.mrf.mxu0  ;;  %4595 = vst.msk [vmem:[#allocation5 + $0x10] sm:$0xf] %vm12082_vm6, %v4579_v53  ;;  %vm12083_vm1 = vmmov %vm12080_vm2  ;;  %v5880_v6 = vshll.u32 %v5832_v9, 16  ;;  %v4609_v31 = vld [vmem:[#allocation3 + $0x8] sm:$0xf]  ;;  %vm5715_vm2 = vcmask 388416  }
 0x261   :  { %v4224_v21 = vadd.f32 %v11059_v54, %v4202_v12  ;;  %v4200_v38 = vmul.f32 %v11052_v23, %v4143_v46  ;;  %4593 = vst.msk [vmem:[#allocation5 + $0x8] sm:$0xf] %vm12083_vm1, %v4577_v16  ;;  %v4654_v53 = vshrl.u32 %v4609_v31, 16  ;;  %v4610_v16 = vld [vmem:[#allocation3 + $0xc] sm:$0x1]  ;;  %vm12084_vm9 = vmmov %vm12083_vm1  ;;  %vm5813_vm4 = vcmask 454016  }
 0x262   :  { %v7396_v44 = vpop.f32.mrf.mxu0  ;;  %vm12085_vm10 = vmmov %vm12083_vm1  ;;  %vm6461_vm6 = vcmask 1043456  }
 0x263   :  { %v4240_v40 = vmax.f32 %v4224_v21, 0.0  ;;  %v4222_v10 = vadd.f32 %v11059_v54, %v4200_v38  ;;  %v4203_v2 = vmul.f32 %v7396_v44, %v11052_v23  ;;  %v4519_v21 = vld [vmem:[#allocation3 + $0x40] sm:$0xf]  ;;  %v4614_v38 = vld [vmem:[#allocation3 + $0x1c] sm:$0x1]  ;;  %vm12086_vm14 = vmmov %vm12083_vm1 }
 0x264   :  { %v4146_v42 = vpop.f32.mrf.mxu0  ;;  %v4880_v56 = vpop.permute.xlu0 %4879 }
 0x265   :  { %v7349_v57 = vpack.c.bf16 %v4240_v40, %v4240_v40  ;;  %v4238_v37 = vmax.f32 %v4222_v10, 0.0  ;;  %v4225_v43 = vadd.f32 %v11059_v54, %v4203_v2  ;;  %v4201_v41 = vmul.f32 %v11052_v23, %v4146_v42  ;;  %4920 = vst.msk [vmem:[#allocation5 + $0x20] sm:$0xf] %vm4911_vm3, %v4880_v56  ;;  %v4522_v40 = vld [vmem:[#allocation3 + $0x44] sm:$0x1] }
 0x266   :  { %v4507_v10 = vld [vmem:[#allocation3 + $0x30] sm:$0xf]  ;;  %v5877_v2 = vshrl.u32 %v5832_v9, 16 }
 0x267   :  { %v4363_v29 = vshrl.u32 %v7349_v57, 16  ;;  %v7347_v13 = vpack.c.bf16 %v4238_v37, %v4238_v37  ;;  %v4241_v14 = vmax.f32 %v4225_v43, 0.0  ;;  %v4223_v1 = vadd.f32 %v11059_v54, %v4201_v41  ;;  %v4510_v37 = vld [vmem:[#allocation3 + $0x34] sm:$0x1] }
 0x268   :  { %v4366_v23 = vshll.u32 %v7349_v57, 16  ;;  %v5073_v57 = vpop.permute.xlu0 %5072  ;;  %v4691_v43 = vshll.u32 %v4614_v38, 16  ;;  %v7130_v41 = vrot.slane %v4932_v5, 9  ;;  %v5256_v5 = vrot.slane %v5254_v39, 5 }
 0x269   :  { %v4365_v26 = vrot.slane %v4363_v29, 7  ;;  %v4347_v61 = vshrl.u32 %v7347_v13, 16  ;;  %v7350_v15 = vpack.c.bf16 %v4241_v14, %v4241_v14  ;;  %v4350_v49 = vshll.u32 %v7347_v13, 16  ;;  %5113 = vst.msk [vmem:[#allocation5 + $0x20] sm:$0xf] %vm5104_vm0, %v5073_v57 }
 0x26a   :  { %v4239_v50 = vmax.f32 %v4223_v1, 0.0  ;;  %v5541_v1 = vld [vmem:[#allocation3 + $0x10] sm:$0xe]  ;;  %v4693_v59 = vrot.slane %v4691_v43, 5 }
 0x26b   :  { %v4368_v30 = vor.u32 %v4366_v23, %v4365_v26  ;;  %v4369_v58 = vrot.slane %v4365_v26, 4  ;;  %v4349_v17 = vrot.slane %v4347_v61, 7  ;;  %v4371_v54 = vshrl.u32 %v7350_v15, 16  ;;  %v5223_v23 = vld [vmem:[#allocation3 + $0x1c] sm:$0x1] }
 0x26c   :  { %v7348_v47 = vpack.c.bf16 %v4239_v50, %v4239_v50  ;;  %v4374_v44 = vshll.u32 %v7350_v15, 16  ;;  %v5879_v61 = vrot.slane %v5877_v2, 4  ;;  %v5882_v15 = vrot.slane %v5880_v6, 5 }
 0x26d   :  { %v4514_v12 = vsel %vm11075_vm8, %v4368_v30, %v4513_v8  ;;  %v4517_v46 = vsel %vm10932_vm15, %v4369_v58, %v4516_v34  ;;  %v4352_v60 = vor.u32 %v4350_v49, %v4349_v17  ;;  %v4353_v20 = vrot.slane %v4349_v17, 4 }
 0x26e   :  { %4515 = vst [vmem:[#allocation3 + $0x38] sm:$0xf] %v4514_v12  ;;  %4518 = vst [vmem:[#allocation3 + $0x3c] sm:$0x1] %v4517_v46  ;;  %v4373_v19 = vrot.slane %v4371_v54, 7  ;;  %v4355_v0 = vshrl.u32 %v7348_v47, 16  ;;  %v5285_v50 = vor.u32 %v5284_v63, %v5281_v32  ;;  %v5883_v12 = vor.u32 %v5882_v15, %v5879_v61 }
 0x26f   :  { %v4502_v55 = vsel %vm11075_vm8, %v4352_v60, %v4501_v33  ;;  %v4505_v22 = vsel %vm10932_vm15, %v4353_v20, %v4504_v27  ;;  %v4358_v51 = vshll.u32 %v7348_v47, 16  ;;  %v4689_v8 = vrot.slane %v4688_v35, 4  ;;  %v5833_v54 = vld [vmem:[#allocation3 + $0x1c] sm:$0x1]  ;;  %v6151_v46 = vld [vmem:[#allocation3 + $0x10] sm:$0xe] }
 0x270   :  { %4503 = vst [vmem:[#allocation3 + $0x28] sm:$0xf] %v4502_v55  ;;  %4506 = vst [vmem:[#allocation3 + $0x2c] sm:$0x1] %v4505_v22  ;;  %v4376_v3 = vor.u32 %v4374_v44, %v4373_v19  ;;  %v4377_v42 = vrot.slane %v4373_v19, 4  ;;  %v4357_v25 = vrot.slane %v4355_v0, 7 }
 0x271   :  { %v5002_v34 = vrot.slane %v4933_v48, 5  ;;  %v7145_v30 = vrot.slane %v5541_v1, 9  ;;  %v5609_v58 = vrot.slane %v5542_v36, 5  ;;  %v5288_v17 = vshll.u32 %v5223_v23, 16  ;;  %v6152_v60 = vld [vmem:[#allocation3 + $0x14] sm:$0x1] }
 0x272   :  { %v4520_v28 = vsel %vm11075_vm8, %v4376_v3, %v4519_v21  ;;  %v4523_v29 = vsel %vm10932_vm15, %v4377_v42, %v4522_v40  ;;  %v4360_v13 = vor.u32 %v4358_v51, %v4357_v25  ;;  %v4361_v14 = vrot.slane %v4357_v25, 4  ;;  %v5219_v0 = vld [vmem:[#allocation3 + $0xc] sm:$0x1]  ;;  %v5834_v51 = vld [vmem:[#allocation3 + $0x20] sm:$0xf] }
 0x273   :  { %4521 = vst [vmem:[#allocation3 + $0x40] sm:$0xf] %v4520_v28  ;;  %4524 = vst [vmem:[#allocation3 + $0x44] sm:$0x1] %v4523_v29  ;;  %v4657_v27 = vshll.u32 %v4609_v31, 16  ;;  %v5251_v47 = vshrl.u32 %v5218_v24, 16  ;;  %v4694_v62 = vsel %vm7664_vm7, %v4689_v8, %v4693_v59  ;;  %v5003_v9 = vsel %vm7656_vm12, %v7130_v41, %v5002_v34 }
 0x274   :  { %v4508_v18 = vsel %vm11075_vm8, %v4360_v13, %v4507_v10  ;;  %v4511_v26 = vsel %vm10932_vm15, %v4361_v14, %v4510_v37  ;;  %v5286_v56 = vrot.slane %v5285_v50, 4  ;;  %v5610_v20 = vsel %vm7656_vm12, %v7145_v30, %v5609_v58  ;;  %v4615_v29 = vld [vmem:[#allocation3 + $0x20] sm:$0xf] }
 0x275   :  { %4509 = vst [vmem:[#allocation3 + $0x30] sm:$0xf] %v4508_v18  ;;  %4512 = vst [vmem:[#allocation3 + $0x34] sm:$0x1] %v4511_v26  ;;  %v5738_v49 = vld [vmem:[#allocation3 + $0x38] sm:$0xf] }
 0x276   :  { %v5127_v33 = vld [vmem:[#allocation3 + $0x38] sm:$0xf]  ;;  %5775 = vrot.lane.b32.xlu1 %v5738_v49, %s7481_s0  ;;  %v5290_v21 = vrot.slane %v5288_v17, 5  ;;  %v5886_v38 = vshll.u32 %v5833_v54, 16  ;;  %v4656_v19 = vrot.slane %v4654_v53, 4  ;;  %v4659_v44 = vrot.slane %v4657_v27, 5 }
 0x277   :  { %5165 = vrot.lane.b32.xlu0 %v5127_v33, %s7478_s13  ;;  %v5253_v35 = vrot.slane %v5251_v47, 4  ;;  %v5884_v22 = vrot.slane %v5883_v12, 4  ;;  %v7160_v40 = vrot.slane %v6151_v46, 9  ;;  %v6217_v10 = vrot.slane %v6152_v60, 5  ;;  %v5224_v13 = vld [vmem:[#allocation3 + $0x20] sm:$0xf] }
 0x278   :  { %v5291_v55 = vsel %vm7664_vm7, %v5286_v56, %v5290_v21  ;;  %v5888_v2 = vrot.slane %v5886_v38, 5  ;;  %v4663_v6 = vshll.u32 %v4610_v16, 16  ;;  %v5260_v3 = vshll.u32 %v5219_v0, 16  ;;  %v5736_v14 = vld [vmem:[#allocation3 + $0x28] sm:$0xf] }
 0x279   :  { %v4660_v42 = vor.u32 %v4659_v44, %v4656_v19  ;;  %v5257_v25 = vor.u32 %v5256_v5, %v5253_v35  ;;  %v6218_v57 = vsel %vm7656_vm12, %v7160_v40, %v6217_v10  ;;  %v5891_v41 = vshrl.u32 %v5834_v51, 16  ;;  %v5125_v8 = vld [vmem:[#allocation3 + $0x28] sm:$0xf]  ;;  %v4942_v34 = vld [vmem:[#allocation3 + $0x38] sm:$0xe] }
 0x27a   :  { %4869 = vrot.lane.b32.xlu1 %v4694_v62, %s7473_s11  ;;  %v5889_v48 = vsel %vm7664_vm7, %v5884_v22, %v5888_v2  ;;  %v4665_v37 = vrot.slane %v4663_v6, 5  ;;  %v5262_v43 = vrot.slane %v5260_v3, 5  ;;  %v5894_v32 = vshll.u32 %v5834_v51, 16  ;;  %v4943_v1 = vld [vmem:[#allocation3 + $0x3c] sm:$0x1] }
 0x27b   :  { %5060 = vrot.lane.b32.xlu0 %v5003_v9, %s7477_s25  ;;  %v4661_v63 = vrot.slane %v4660_v42, 4  ;;  %v5258_v28 = vrot.slane %v5257_v25, 4  ;;  %v5551_v36 = vld [vmem:[#allocation3 + $0x38] sm:$0xe]  ;;  %v5552_v18 = vld [vmem:[#allocation3 + $0x3c] sm:$0x1] }
 0x27c   :  { %v5893_v26 = vrot.slane %v5891_v41, 4  ;;  %v5896_v23 = vrot.slane %v5894_v32, 5  ;;  %v4696_v61 = vshrl.u32 %v4615_v29, 16  ;;  %v4699_v15 = vshll.u32 %v4615_v29, 16  ;;  %v6161_v17 = vld [vmem:[#allocation3 + $0x38] sm:$0xe] }
 0x27d   :  { %v4666_v31 = vsel %vm7664_vm7, %v4661_v63, %v4665_v37  ;;  %v5263_v49 = vsel %vm7664_vm7, %v5258_v28, %v5262_v43  ;;  %v5293_v33 = vshrl.u32 %v5224_v13, 16  ;;  %v5296_v50 = vshll.u32 %v5224_v13, 16  ;;  %v6162_v54 = vld [vmem:[#allocation3 + $0x3c] sm:$0x1]  ;;  %v5835_v53 = vld [vmem:[#allocation3 + $0x24] sm:$0x1] }
 0x27e   :  { %5669 = vrot.lane.b32.xlu1 %v5610_v20, %s7484_s23  ;;  %v7135_v24 = vrot.slane %v4942_v34, 9  ;;  %v5022_v59 = vrot.slane %v4943_v1, 5  ;;  %v7150_v30 = vrot.slane %v5551_v36, 9  ;;  %v5629_v58 = vrot.slane %v5552_v18, 5  ;;  %v4616_v62 = vld [vmem:[#allocation3 + $0x24] sm:$0x1] }
 0x27f   :  { %5478 = vrot.lane.b32.xlu0 %v5291_v55, %s7480_s20  ;;  %v4698_v27 = vrot.slane %v4696_v61, 4  ;;  %v4701_v47 = vrot.slane %v4699_v15, 5  ;;  %v5897_v39 = vor.u32 %v5896_v23, %v5893_v26  ;;  %v5225_v9 = vld [vmem:[#allocation3 + $0x24] sm:$0x1]  ;;  %v5295_v56 = vrot.slane %v5293_v33, 4 }
 0x280   :  { %v5298_v12 = vrot.slane %v5296_v50, 5  ;;  %v5023_v46 = vsel %vm7656_vm12, %v7135_v24, %v5022_v59  ;;  %v5630_v60 = vsel %vm7656_vm12, %v7150_v30, %v5629_v58  ;;  %v7165_v20 = vrot.slane %v6161_v17, 9  ;;  %v4611_v16 = vld [vmem:[#allocation3 + $0x10] sm:$0xf]  ;;  %v5739_v55 = vld [vmem:[#allocation3 + $0x40] sm:$0xf] }
 0x281   :  { %v6237_v21 = vrot.slane %v6162_v54, 5  ;;  %v5900_v38 = vshll.u32 %v5835_v53, 16  ;;  %v4702_v19 = vor.u32 %v4701_v47, %v4698_v27  ;;  %v4705_v44 = vshll.u32 %v4616_v62, 16  ;;  %v5830_v6 = vld [vmem:[#allocation3 + $0x10] sm:$0xf] }
 0x282   :  { %6088 = vrot.lane.b32.xlu1 %v5889_v48, %s7482_s9  ;;  %v5302_v0 = vshll.u32 %v5225_v9, 16  ;;  %v5898_v35 = vrot.slane %v5897_v39, 4  ;;  %v5299_v22 = vor.u32 %v5298_v12, %v5295_v56  ;;  %v4668_v40 = vshrl.u32 %v4611_v16, 16  ;;  %v5547_v48 = vld [vmem:[#allocation3 + $0x28] sm:$0xe] }
 0x283   :  { %6279 = vrot.lane.b32.xlu0 %v6218_v57, %s7483_s18  ;;  %v6238_v5 = vsel %vm7656_vm12, %v7165_v20, %v6237_v21  ;;  %v4671_v10 = vshll.u32 %v4611_v16, 16  ;;  %v5902_v2 = vrot.slane %v5900_v38, 5  ;;  %v4703_v3 = vrot.slane %v4702_v19, 4  ;;  %v5548_v57 = vld [vmem:[#allocation3 + $0x2c] sm:$0x1] }
 0x284   :  { %v4707_v42 = vrot.slane %v4705_v44, 5  ;;  %v5304_v25 = vrot.slane %v5302_v0, 5  ;;  %v5220_v37 = vld [vmem:[#allocation3 + $0x10] sm:$0xf]  ;;  %v5128_v43 = vld [vmem:[#allocation3 + $0x40] sm:$0xf] }
 0x285   :  { %v5903_v51 = vsel %vm7664_vm7, %v5898_v35, %v5902_v2  ;;  %v5300_v41 = vrot.slane %v5299_v22, 4  ;;  %v4670_v32 = vrot.slane %v4668_v40, 4  ;;  %v4673_v63 = vrot.slane %v4671_v10, 5  ;;  %v6157_v29 = vld [vmem:[#allocation3 + $0x28] sm:$0xe] }
 0x286   :  { %5771 = vrot.lane.b32.xlu1 %v5736_v14, %s7481_s0  ;;  %v5863_v28 = vshrl.u32 %v5830_v6, 16  ;;  %v6158_v13 = vld [vmem:[#allocation3 + $0x2c] sm:$0x1]  ;;  %v4582_v14 = vld [vmem:[#allocation3 + $0x38] sm:$0xf]  ;;  %v5621_v34 = vrot.slane %v5548_v57, 5  ;;  %v4708_v26 = vsel %vm7664_vm7, %v4703_v3, %v4707_v42 }
 0x287   :  { %5161 = vrot.lane.b32.xlu0 %v5125_v8, %s7478_s13  ;;  %v7148_v8 = vrot.slane %v5547_v48, 9  ;;  %v5866_v1 = vshll.u32 %v5830_v6, 16  ;;  %v5265_v36 = vshrl.u32 %v5220_v37, 16  ;;  %4598 = vst.msk [vmem:[#allocation5 + $0x1c] sm:$0xf] %vm12084_vm9, %v4582_v14  ;;  %v6229_v33 = vrot.slane %v6158_v13, 5  ;;  %vm12087_vm9 = vmmov %vm12083_vm1 }
 0x288   :  { %v4580_v18 = vld [vmem:[#allocation3 + $0x28] sm:$0xf]  ;;  %v288_v61 = vld [vmem:[#allocation3 + $0x8c] sm:$0x1]  ;;  %v4581_v15 = vld [vmem:[#allocation3 + $0x30] sm:$0xf]  ;;  %v4674_v39 = vor.u32 %v4673_v63, %v4670_v32 }
 0x289   :  { %v227_v23 = vld [vmem:[#allocation3 + $0x88] sm:$0x1]  ;;  %4596 = vst.msk [vmem:[#allocation5 + $0x14] sm:$0xf] %vm12085_vm10, %v4580_v18  ;;  %v5268_v50 = vshll.u32 %v5220_v37, 16  ;;  %v5865_v17 = vrot.slane %v5863_v28, 4  ;;  %v5622_v47 = vsel %vm7656_vm12, %v7148_v8, %v5621_v34  ;;  %vm12088_vm10 = vmmov %vm12083_vm1 }
 0x28a   :  { %4865 = vrot.lane.b32.xlu1 %v4666_v31, %s7473_s11  ;;  %v5305_v31 = vsel %vm7664_vm7, %v5300_v41, %v5304_v25  ;;  %4597 = vst.msk [vmem:[#allocation5 + $0x18] sm:$0xf] %vm12086_vm14, %v4581_v15  ;;  %v4938_v24 = vld [vmem:[#allocation3 + $0x28] sm:$0xe]  ;;  %v4939_v59 = vld [vmem:[#allocation3 + $0x2c] sm:$0x1]  ;;  %vm12089_vm14 = vmmov %vm12083_vm1 }
 0x28b   :  { %5474 = vrot.lane.b32.xlu0 %v5263_v49, %s7480_s20  ;;  %v7163_v49 = vrot.slane %v6157_v29, 9  ;;  %v4612_v30 = vld [vmem:[#allocation3 + $0x14] sm:$0x1]  ;;  %v5868_v54 = vrot.slane %v5866_v1, 5  ;;  %v228_v53 = vsel %vm10932_vm15, 0, %v227_v23  ;;  %v289_v27 = vsel %vm10948_vm13, 0, %v288_v61 }
 0x28c   :  { %v5831_v58 = vld [vmem:[#allocation3 + $0x14] sm:$0x1]  ;;  %v5267_v9 = vrot.slane %v5265_v36, 4  ;;  %229 = vst [vmem:[#allocation3 + $0x88] sm:$0x1] %v228_v53  ;;  %v7133_v12 = vrot.slane %v4938_v24, 9 }
 0x28d   :  { %v5221_v62 = vld [vmem:[#allocation3 + $0x14] sm:$0x1]  ;;  %290 = vst [vmem:[#allocation3 + $0x8c] sm:$0x1] %v289_v27  ;;  %v6230_v56 = vsel %vm7656_vm12, %v7163_v49, %v6229_v33  ;;  %v4621_v20 = vld [vmem:[#allocation3 + $0x38] sm:$0xf]  ;;  %v5869_v16 = vor.u32 %v5868_v54, %v5865_v17 }
 0x28e   :  { %5070 = vrot.lane.b32.xlu1 %v5023_v46, %s7477_s25  ;;  %v5014_v46 = vrot.slane %v4939_v59, 5  ;;  %v4677_v21 = vshll.u32 %v4612_v30, 16  ;;  %v5872_v38 = vshll.u32 %v5831_v58, 16  ;;  %v5274_v19 = vshll.u32 %v5221_v62, 16  ;;  %v6163_v2 = vld [vmem:[#allocation3 + $0x40] sm:$0xe] }
 0x28f   :  { %5679 = vrot.lane.b32.xlu0 %v5630_v60, %s7484_s23  ;;  %v5270_v60 = vrot.slane %v5268_v50, 5  ;;  %v4738_v44 = vshrl.u32 %v4621_v20, 16  ;;  %v4741_v0 = vshll.u32 %v4621_v20, 16  ;;  %v5126_v6 = vld [vmem:[#allocation3 + $0x30] sm:$0xf]  ;;  %v5870_v3 = vrot.slane %v5869_v16, 4 }
 0x290   :  { %v5015_v35 = vsel %vm7656_vm12, %v7133_v12, %v5014_v46  ;;  %v4679_v40 = vrot.slane %v4677_v21, 5  ;;  %v5874_v10 = vrot.slane %v5872_v38, 5  ;;  %v5276_v42 = vrot.slane %v5274_v19, 5  ;;  %v6164_v25 = vld [vmem:[#allocation3 + $0x44] sm:$0x1] }
 0x291   :  { %v5271_v22 = vor.u32 %v5270_v60, %v5267_v9  ;;  %v4740_v48 = vrot.slane %v4738_v44, 4  ;;  %v4743_v57 = vrot.slane %v4741_v0, 5  ;;  %v5840_v37 = vld [vmem:[#allocation3 + $0x38] sm:$0xf]  ;;  %v7166_v32 = vrot.slane %v6163_v2, 9  ;;  %v11281_v60 = vpop.permute.xlu1 %5779 }
 0x292   :  { %6289 = vrot.lane.b32.xlu1 %v6238_v5, %s7483_s18  ;;  %v5737_v5 = vld [vmem:[#allocation3 + $0x30] sm:$0xf]  ;;  %v5554_v63 = vld [vmem:[#allocation3 + $0x44] sm:$0x1]  ;;  %v221_v28 = vld [vmem:[#allocation3 + $0x78] sm:$0x1]  ;;  %v5875_v34 = vsel %vm7664_vm7, %v5870_v3, %v5874_v10 }
 0x293   :  { %5777 = vrot.lane.b32.xlu0 %v5739_v55, %s7481_s0  ;;  %v4675_v55 = vrot.slane %v4674_v39, 4  ;;  %v5272_v41 = vrot.slane %v5271_v22, 4  ;;  %v6241_v29 = vrot.slane %v6164_v25, 5  ;;  %v4622_v13 = vld [vmem:[#allocation3 + $0x3c] sm:$0x1]  ;;  %v222_v14 = vsel %vm10932_vm15, 0, %v221_v28 }
 0x294   :  { %v282_v8 = vld [vmem:[#allocation3 + $0x7c] sm:$0x1]  ;;  %v5933_v1 = vshrl.u32 %v5840_v37, 16  ;;  %223 = vst [vmem:[#allocation3 + $0x78] sm:$0x1] %v222_v14  ;;  %v4744_v23 = vor.u32 %v4743_v57, %v4740_v48  ;;  %v5936_v61 = vshll.u32 %v5840_v37, 16 }
 0x295   :  { %v283_v36 = vsel %vm10948_vm13, 0, %v282_v8  ;;  %v230_v18 = vld [vmem:[#allocation3 + $0x90] sm:$0x1]  ;;  %v5277_v49 = vsel %vm7664_vm7, %v5272_v41, %v5276_v42  ;;  %v5633_v50 = vrot.slane %v5554_v63, 5  ;;  %v4747_v24 = vshll.u32 %v4622_v13, 16  ;;  %v11290_v2 = vpop.permute.xlu1 %6100 }
 0x296   :  { %5167 = vrot.lane.b32.xlu1 %v5128_v43, %s7478_s13  ;;  %v4680_v43 = vsel %vm7664_vm7, %v4675_v55, %v4679_v40  ;;  %284 = vst [vmem:[#allocation3 + $0x7c] sm:$0x1] %v283_v36  ;;  %v231_v15 = vsel %vm10932_vm15, 0, %v230_v18  ;;  %v5836_v59 = vld [vmem:[#allocation3 + $0x28] sm:$0xf]  ;;  %v4745_v53 = vrot.slane %v4744_v23, 4  ;;  %v6242_v39 = vsel %vm7656_vm12, %v7166_v32, %v6241_v29 }
 0x297   :  { %6090 = vrot.lane.b32.xlu0 %v5903_v51, %s7482_s9  ;;  %v5553_v51 = vld [vmem:[#allocation3 + $0x40] sm:$0xe]  ;;  %232 = vst [vmem:[#allocation3 + $0x90] sm:$0x1] %v231_v15  ;;  %v224_v30 = vld [vmem:[#allocation3 + $0x80] sm:$0x1] }
 0x298   :  { %v7151_v33 = vrot.slane %v5553_v51, 9  ;;  %v285_v58 = vld [vmem:[#allocation3 + $0x84] sm:$0x1]  ;;  %v225_v17 = vsel %vm10932_vm15, 0, %v224_v30  ;;  %v5935_v27 = vrot.slane %v5933_v1, 4  ;;  %v5905_v12 = vshrl.u32 %v5836_v59, 16 }
 0x299   :  { %v286_v54 = vsel %vm10948_vm13, 0, %v285_v58  ;;  %226 = vst [vmem:[#allocation3 + $0x80] sm:$0x1] %v225_v17  ;;  %v5549_v9 = vld [vmem:[#allocation3 + $0x30] sm:$0xe]  ;;  %v5908_v46 = vshll.u32 %v5836_v59, 16  ;;  %v11298_v29 = vpop.permute.xlu1 %6293 }
 0x29a   :  { %5480 = vrot.lane.b32.xlu1 %v5305_v31, %s7480_s20  ;;  %287 = vst [vmem:[#allocation3 + $0x84] sm:$0x1] %v286_v54  ;;  %v5634_v62 = vsel %vm7656_vm12, %v7151_v33, %v5633_v50  ;;  %v4749_v20 = vrot.slane %v4747_v24, 5  ;;  %v4617_v21 = vld [vmem:[#allocation3 + $0x28] sm:$0xf]  ;;  %v7149_v16 = vrot.slane %v5549_v9, 9 }
 0x29b   :  { %4871 = vrot.lane.b32.xlu0 %v4708_v26, %s7473_s11  ;;  %v291_v26 = vld [vmem:[#allocation3 + $0x94] sm:$0x1]  ;;  %v5841_v44 = vld [vmem:[#allocation3 + $0x3c] sm:$0x1]  ;;  %v4710_v55 = vshrl.u32 %v4617_v21, 16  ;;  %v4713_v22 = vshll.u32 %v4617_v21, 16 }
 0x29c   :  { %v292_v31 = vsel %vm10948_vm13, 0, %v291_v26  ;;  %v4750_v38 = vsel %vm7664_vm7, %v4745_v53, %v4749_v20  ;;  %v5942_v10 = vshll.u32 %v5841_v44, 16  ;;  %v5837_v3 = vld [vmem:[#allocation3 + $0x2c] sm:$0x1]  ;;  %v11306_v36 = vld [vmem:[%s11977_s2] ss:$0 sm:$0xff] }
 0x29d   :  { %293 = vst [vmem:[#allocation3 + $0x94] sm:$0x1] %v292_v31  ;;  %v4712_v51 = vrot.slane %v4710_v55, 4  ;;  %v4715_v48 = vrot.slane %v4713_v22, 5  ;;  %v4618_v41 = vld [vmem:[#allocation3 + $0x2c] sm:$0x1] }
 0x29e   :  { %6285 = vrot.lane.b32.xlu1 %v6230_v56, %s7483_s18  ;;  %v5550_v56 = vld [vmem:[#allocation3 + $0x34] sm:$0x1]  ;;  %v5944_v37 = vrot.slane %v5942_v10, 5  ;;  %v4719_v14 = vshll.u32 %v4618_v41, 16  ;;  %v4537_v44 = vld [vmem:[#allocation3 + $0x68] sm:$0xf] }
 0x29f   :  { %5675 = vrot.lane.b32.xlu0 %v5622_v47, %s7484_s23  ;;  %v5938_v47 = vrot.slane %v5936_v61, 5  ;;  %v5625_v19 = vrot.slane %v5550_v56, 5  ;;  %v4716_v28 = vor.u32 %v4715_v48, %v4712_v51  ;;  %v11313_v61 = vld [vmem:[%s11978_s3] ss:$0 sm:$0xff]  ;;  %v4525_v10 = vld [vmem:[#allocation3 + $0x58] sm:$0xf] }
 0x2a0   :  { %v4721_v23 = vrot.slane %v4719_v14, 5  ;;  %v5232_v48 = vld [vmem:[#allocation3 + $0x40] sm:$0xf]  ;;  %v4543_v14 = vld [vmem:[#allocation3 + $0x70] sm:$0xf] }
 0x2a1   :  { %v5939_v0 = vor.u32 %v5938_v47, %v5935_v27  ;;  %v4717_v1 = vrot.slane %v4716_v28, 4 }
 0x2a2   :  { %5066 = vrot.lane.b32.xlu1 %v5015_v35, %s7477_s25  ;;  %v5907_v35 = vrot.slane %v5905_v12, 4 }
 0x2a3   :  { %5773 = vrot.lane.b32.xlu0 %v5737_v5, %s7481_s0  ;;  %v5910_v5 = vrot.slane %v5908_v46, 5  ;;  %v5940_v42 = vrot.slane %v5939_v0, 4  ;;  %v4722_v50 = vsel %vm7664_vm7, %v4717_v1, %v4721_v23  ;;  %v4540_v0 = vld [vmem:[#allocation3 + $0x6c] sm:$0x1]  ;;  %v5349_v23 = vshrl.u32 %v5232_v48, 16 }
 0x2a5   :  { %v5911_v25 = vor.u32 %v5910_v5, %v5907_v35  ;;  %v5945_v32 = vsel %vm7664_vm7, %v5940_v42, %v5944_v37 }
 0x2a6   :  { %5163 = vrot.lane.b32.xlu1 %v5126_v6, %s7478_s13  ;;  %v5626_v6 = vsel %vm7656_vm12, %v7149_v16, %v5625_v19  ;;  %v5230_v19 = vld [vmem:[#allocation3 + $0x38] sm:$0xf] }
 0x2a7   :  { %4867 = vrot.lane.b32.xlu0 %v4680_v43, %s7473_s11  ;;  %v5914_v43 = vshll.u32 %v5837_v3, 16  ;;  %v5912_v63 = vrot.slane %v5911_v25, 4  ;;  %v4528_v3 = vld [vmem:[#allocation3 + $0x5c] sm:$0x1]  ;;  %v5335_v25 = vshrl.u32 %v5230_v19, 16  ;;  %v5338_v51 = vshll.u32 %v5230_v19, 16 }
 0x2a8   :  { %v5231_v19 = vld [vmem:[#allocation3 + $0x3c] sm:$0x1] }
 0x2a9   :  { %v11288_v40 = vpop.permute.xlu0 %5157  ;;  %v5916_v13 = vrot.slane %v5914_v43, 5 }
 0x2aa   :  { %5476 = vrot.lane.b32.xlu1 %v5277_v49, %s7480_s20  ;;  %v11317_v49 = vpop.permute.xlu1 %5767 }
 0x2ab   :  { %6086 = vrot.lane.b32.xlu0 %v5875_v34, %s7482_s9  ;;  %v5917_v34 = vsel %vm7664_vm7, %v5912_v63, %v5916_v13 }
 0x2ad   :  { %v5154_v57 = vpop.permute.xlu0 %5153 }
 0x2ae   :  { %5681 = vrot.lane.b32.xlu1 %v5634_v62, %s7484_s23  ;;  %5202 = vst.msk [vmem:[#allocation5] sm:$0xf] %vm5201_vm5, %v5154_v57  ;;  %v11326_v56 = vpop.permute.xlu1 %5062 }
 0x2af   :  { %6291 = vrot.lane.b32.xlu0 %v6242_v39, %s7483_s18 }
 0x2b1   :  { %v11328_v12 = vpop.permute.xlu0 %5671 }
 0x2b2   :  { %4877 = vrot.lane.b32.xlu1 %v4750_v38, %s7473_s11 }
 0x2b5   :  { %v11337_v63 = vpop.permute.xlu0 %5769 }
 0x2b6   :  { %5677 = vrot.lane.b32.xlu1 %v5626_v6, %s7484_s23 }
 0x2b8   :  { %v7399_v8 = vpop.f32.mrf.mxu0 }
 0x2b9   :  { %v4206_v18 = vmul.f32 %v11306_v36, %v7399_v8 }
 0x2ba   :  { %6096 = vrot.lane.b32.xlu1 %v5945_v32, %s7482_s9  ;;  %v4159_v26 = vpop.f32.mrf.mxu0  ;;  %v11335_v32 = vpop.permute.xlu1 %6281 }
 0x2bb   :  { %v4228_v15 = vadd.f32 %v11313_v61, %v4206_v18  ;;  %v4204_v31 = vmul.f32 %v11306_v36, %v4159_v26  ;;  %v4546_v18 = vld [vmem:[#allocation3 + $0x74] sm:$0x1]  ;;  %v4940_v26 = vld [vmem:[#allocation3 + $0x30] sm:$0xe] }
 0x2bc   :  { %v7400_v33 = vpop.f32.mrf.mxu0 }
 0x2bd   :  { %v4244_v24 = vmax.f32 %v4228_v15, 0.0  ;;  %v4226_v59 = vadd.f32 %v11313_v61, %v4204_v31  ;;  %v4207_v30 = vmul.f32 %v11306_v36, %v7400_v33  ;;  %v5352_v15 = vshll.u32 %v5232_v48, 16  ;;  %v5233_v48 = vld [vmem:[#allocation3 + $0x44] sm:$0x1] }
 0x2be   :  { %6092 = vrot.lane.b32.xlu1 %v5917_v34, %s7482_s9  ;;  %v4162_v58 = vpop.f32.mrf.mxu0 }
 0x2bf   :  { %v7353_v17 = vpack.c.bf16 %v4244_v24, %v4244_v24  ;;  %v4242_v54 = vmax.f32 %v4226_v59, 0.0  ;;  %v4229_v53 = vadd.f32 %v11313_v61, %v4207_v30  ;;  %v4205_v27 = vmul.f32 %v11306_v36, %v4162_v58  ;;  %v4941_v59 = vld [vmem:[#allocation3 + $0x34] sm:$0x1]  ;;  %v4531_v30 = vld [vmem:[#allocation3 + $0x60] sm:$0xf] }
 0x2c0   :  { %v4534_v58 = vld [vmem:[#allocation3 + $0x64] sm:$0x1] }
 0x2c1   :  { %v4395_v47 = vshrl.u32 %v7353_v17, 16  ;;  %v4398_v39 = vshll.u32 %v7353_v17, 16  ;;  %v7351_v62 = vpack.c.bf16 %v4242_v54, %v4242_v54  ;;  %v4245_v9 = vmax.f32 %v4229_v53, 0.0 }
 0x2c2   :  { %4873 = vrot.lane.b32.xlu1 %v4722_v50, %s7473_s11  ;;  %v4227_v46 = vadd.f32 %v11313_v61, %v4205_v27  ;;  %v5337_v17 = vrot.slane %v5335_v25, 4  ;;  %v5340_v54 = vrot.slane %v5338_v51, 5  ;;  %v5842_v25 = vld [vmem:[#allocation3 + $0x40] sm:$0xf]  ;;  %v5344_v51 = vshll.u32 %v5231_v19, 16 }
 0x2c3   :  { %v4397_v20 = vrot.slane %v4395_v47, 7  ;;  %v4379_v21 = vshrl.u32 %v7351_v62, 16  ;;  %v4382_v38 = vshll.u32 %v7351_v62, 16  ;;  %v7354_v16 = vpack.c.bf16 %v4245_v9, %v4245_v9  ;;  %v11347_v62 = vpop.permute.xlu1 %5159  ;;  %v11349_v9 = vpop.permute.xlu0 %5667 }
 0x2c4   :  { %v4243_v35 = vmax.f32 %v4227_v46, 0.0  ;;  %v7134_v46 = vrot.slane %v4940_v26, 9 }
 0x2c5   :  { %v4400_v5 = vor.u32 %v4398_v39, %v4397_v20  ;;  %v4401_v55 = vrot.slane %v4397_v20, 4  ;;  %v4381_v22 = vrot.slane %v4379_v21, 7  ;;  %v4403_v6 = vshrl.u32 %v7354_v16, 16  ;;  %v5226_v21 = vld [vmem:[#allocation3 + $0x28] sm:$0xf] }
 0x2c6   :  { %v7352_v42 = vpack.c.bf16 %v4243_v35, %v4243_v35  ;;  %v4406_v13 = vshll.u32 %v7354_v16, 16  ;;  %v5018_v20 = vrot.slane %v4941_v59, 5 }
 0x2c7   :  { %v4538_v57 = vsel %vm11075_vm8, %v4400_v5, %v4537_v44  ;;  %v4541_v37 = vsel %vm10932_vm15, %v4401_v55, %v4540_v0  ;;  %v4384_v43 = vor.u32 %v4382_v38, %v4381_v22  ;;  %v4385_v41 = vrot.slane %v4381_v22, 4 }
 0x2c8   :  { %4539 = vst [vmem:[#allocation3 + $0x68] sm:$0xf] %v4538_v57  ;;  %4542 = vst [vmem:[#allocation3 + $0x6c] sm:$0x1] %v4541_v37  ;;  %v4405_v28 = vrot.slane %v4403_v6, 7  ;;  %v4387_v8 = vshrl.u32 %v7352_v42, 16  ;;  %v5341_v5 = vor.u32 %v5340_v54, %v5337_v17 }
 0x2c9   :  { %v4526_v34 = vsel %vm11075_vm8, %v4384_v43, %v4525_v10  ;;  %v4529_v1 = vsel %vm10932_vm15, %v4385_v41, %v4528_v3  ;;  %v4390_v24 = vshll.u32 %v7352_v42, 16  ;;  %v5351_v44 = vrot.slane %v5349_v23, 4  ;;  %v6159_v57 = vld [vmem:[#allocation3 + $0x30] sm:$0xe] }
 0x2ca   :  { %4527 = vst [vmem:[#allocation3 + $0x58] sm:$0xf] %v4526_v34  ;;  %4530 = vst [vmem:[#allocation3 + $0x5c] sm:$0x1] %v4529_v1  ;;  %v4408_v31 = vor.u32 %v4406_v13, %v4405_v28  ;;  %v4409_v33 = vrot.slane %v4405_v28, 4  ;;  %v4389_v50 = vrot.slane %v4387_v8, 7  ;;  %v11358_v28 = vpop.permute.xlu1 %5058  ;;  %v5019_v13 = vsel %vm7656_vm12, %v7134_v46, %v5018_v20 }
 0x2cb   :  { %v5354_v0 = vrot.slane %v5352_v15, 5  ;;  %v5307_v3 = vshrl.u32 %v5226_v21, 16  ;;  %v5310_v42 = vshll.u32 %v5226_v21, 16  ;;  %v5228_v41 = vld [vmem:[#allocation3 + $0x30] sm:$0xf]  ;;  %v5342_v8 = vrot.slane %v5341_v5, 4 }
 0x2cc   :  { %v4544_v53 = vsel %vm11075_vm8, %v4408_v31, %v4543_v14  ;;  %v4547_v27 = vsel %vm10932_vm15, %v4409_v33, %v4546_v18  ;;  %v4392_v47 = vor.u32 %v4390_v24, %v4389_v50  ;;  %v4393_v39 = vrot.slane %v4389_v50, 4  ;;  %v11362_v14 = vpop.permute.xlu0 %5765  ;;  %v6160_v34 = vld [vmem:[#allocation3 + $0x34] sm:$0x1]  ;;  %v5227_v18 = vld [vmem:[#allocation3 + $0x2c] sm:$0x1] }
 0x2cd   :  { %4545 = vst [vmem:[#allocation3 + $0x70] sm:$0xf] %v4544_v53  ;;  %4548 = vst [vmem:[#allocation3 + $0x74] sm:$0x1] %v4547_v27  ;;  %v5355_v43 = vor.u32 %v5354_v0, %v5351_v44  ;;  %v5947_v1 = vshrl.u32 %v5842_v25, 16  ;;  %v5309_v26 = vrot.slane %v5307_v3, 4 }
 0x2ce   :  { %v4532_v38 = vsel %vm11075_vm8, %v4392_v47, %v4531_v30  ;;  %v4535_v16 = vsel %vm10932_vm15, %v4393_v39, %v4534_v58  ;;  %v5312_v23 = vrot.slane %v5310_v42, 5  ;;  %v5950_v15 = vshll.u32 %v5842_v25, 16  ;;  %v4619_v24 = vld [vmem:[#allocation3 + $0x30] sm:$0xf]  ;;  %v11370_v44 = vpop.permute.xlu1 %5155 }
 0x2cf   :  { %4533 = vst [vmem:[#allocation3 + $0x60] sm:$0xf] %v4532_v38  ;;  %4536 = vst [vmem:[#allocation3 + $0x64] sm:$0x1] %v4535_v16  ;;  %v5131_v35 = vld [vmem:[#allocation3 + $0x68] sm:$0xf] }
 0x2d0   :  { %v4950_v55 = vld [vmem:[#allocation3 + $0x68] sm:$0xe]  ;;  %v4951_v22 = vld [vmem:[#allocation3 + $0x6c] sm:$0x1]  ;;  %5173 = vrot.lane.b32.xlu0 %v5131_v35, %s7478_s13  ;;  %v5358_v31 = vshll.u32 %v5233_v48, 16  ;;  %v5346_v33 = vrot.slane %v5344_v51, 5  ;;  %v5313_v21 = vor.u32 %v5312_v23, %v5309_v26  ;;  %v11372_v0 = vpop.permute.xlu0 %6283 }
 0x2d1   :  { %v7139_v10 = vrot.slane %v4950_v55, 9  ;;  %v5038_v6 = vrot.slane %v4951_v22, 5  ;;  %v7164_v50 = vrot.slane %v6159_v57, 9  ;;  %v5321_v59 = vshrl.u32 %v5228_v41, 16  ;;  %v4629_v53 = vld [vmem:[#allocation3 + $0x68] sm:$0xf] }
 0x2d2   :  { %v5324_v30 = vshll.u32 %v5228_v41, 16  ;;  %v6233_v58 = vrot.slane %v6160_v34, 5  ;;  %v5356_v54 = vrot.slane %v5355_v43, 4  ;;  %v5347_v27 = vsel %vm7664_vm7, %v5342_v8, %v5346_v33  ;;  %v4946_v46 = vld [vmem:[#allocation3 + $0x58] sm:$0xe] }
 0x2d3   :  { %v5039_v37 = vsel %vm7656_vm12, %v7139_v10, %v5038_v6  ;;  %v5316_v47 = vshll.u32 %v5227_v18, 16  ;;  %v5949_v39 = vrot.slane %v5947_v1, 4  ;;  %v4947_v20 = vld [vmem:[#allocation3 + $0x5c] sm:$0x1]  ;;  %v5952_v38 = vrot.slane %v5950_v15, 5 }
 0x2d4   :  { %5078 = vrot.lane.b32.xlu1 %v5039_v37, %s7477_s25  ;;  %5068 = vrot.lane.b32.xlu0 %v5019_v13, %s7477_s25  ;;  %v5132_v17 = vld [vmem:[#allocation3 + $0x70] sm:$0xf]  ;;  %v5360_v16 = vrot.slane %v5358_v31, 5  ;;  %v4724_v19 = vshrl.u32 %v4619_v24, 16  ;;  %v5843_v35 = vld [vmem:[#allocation3 + $0x44] sm:$0x1]  ;;  %v6234_v51 = vsel %vm7656_vm12, %v7164_v50, %v6233_v58 }
 0x2d5   :  { %v5323_v5 = vrot.slane %v5321_v59, 4  ;;  %v5326_v55 = vrot.slane %v5324_v30, 5  ;;  %v4794_v22 = vshrl.u32 %v4629_v53, 16  ;;  %v4797_v10 = vshll.u32 %v4629_v53, 16  ;;  %v5838_v48 = vld [vmem:[#allocation3 + $0x30] sm:$0xf]  ;;  %v11386_v59 = vpop.permute.xlu0 %5064 }
 0x2d6   :  { %v5361_v6 = vsel %vm7664_vm7, %v5356_v54, %v5360_v16  ;;  %v7137_v3 = vrot.slane %v4946_v46, 9  ;;  %v5030_v42 = vrot.slane %v4947_v20, 5  ;;  %v4727_v25 = vshll.u32 %v4619_v24, 16  ;;  %v5229_v41 = vld [vmem:[#allocation3 + $0x34] sm:$0x1]  ;;  %v11384_v24 = vpop.permute.xlu1 %5673 }
 0x2d7   :  { %v5314_v57 = vrot.slane %v5313_v21, 4  ;;  %v5318_v37 = vrot.slane %v5316_v47, 5  ;;  %v5956_v43 = vshll.u32 %v5843_v35, 16  ;;  %v5953_v13 = vor.u32 %v5952_v38, %v5949_v39  ;;  %v4620_v8 = vld [vmem:[#allocation3 + $0x34] sm:$0x1] }
 0x2d8   :  { %5175 = vrot.lane.b32.xlu1 %v5132_v17, %s7478_s13  ;;  %5486 = vrot.lane.b32.xlu0 %v5347_v27, %s7480_s20  ;;  %v11380_v34 = vld [vmem:[#allocation3 + $0x34] sm:$0x1]  ;;  %v5327_v1 = vor.u32 %v5326_v55, %v5323_v5  ;;  %v4796_v18 = vrot.slane %v4794_v22, 4  ;;  %v4799_v26 = vrot.slane %v4797_v10, 5  ;;  %v5031_v23 = vsel %vm7656_vm12, %v7137_v3, %v5030_v42  ;;  %v4630_v50 = vld [vmem:[#allocation3 + $0x6c] sm:$0x1] }
 0x2d9   :  { %v4726_v15 = vrot.slane %v4724_v19, 4  ;;  %v4729_v31 = vrot.slane %v4727_v25, 5  ;;  %v5919_v33 = vshrl.u32 %v5838_v48, 16  ;;  %v5129_v30 = vld [vmem:[#allocation3 + $0x58] sm:$0xf]  ;;  %v5922_v58 = vshll.u32 %v5838_v48, 16 }
 0x2da   :  { %v5330_v17 = vshll.u32 %v5229_v41, 16  ;;  %v4625_v54 = vld [vmem:[#allocation3 + $0x58] sm:$0xf]  ;;  %v5319_v53 = vsel %vm7664_vm7, %v5314_v57, %v5318_v37  ;;  %v5958_v27 = vrot.slane %v5956_v43, 5  ;;  %v4733_v47 = vshll.u32 %v4620_v8, 16 }
 0x2db   :  { %v5328_v39 = vrot.slane %v5327_v1, 4  ;;  %v4800_v46 = vor.u32 %v4799_v26, %v4796_v18  ;;  %v4803_v20 = vshll.u32 %v4630_v50, 16  ;;  %v5238_v21 = vld [vmem:[#allocation3 + $0x68] sm:$0xf]  ;;  %v5954_v38 = vrot.slane %v5953_v13, 4 }
 0x2dc   :  { %5488 = vrot.lane.b32.xlu1 %v5361_v6, %s7480_s20  ;;  %6287 = vrot.lane.b32.xlu0 %v6234_v51, %s7483_s18  ;;  %v5130_v16 = vld [vmem:[#allocation3 + $0x60] sm:$0xf]  ;;  %v5928_v19 = vshll.u32 %v11380_v34, 16  ;;  %v4766_v35 = vshrl.u32 %v4625_v54, 16  ;;  %v4769_v5 = vshll.u32 %v4625_v54, 16  ;;  %v4730_v55 = vor.u32 %v4729_v31, %v4726_v15 }
 0x2dd   :  { %v5921_v22 = vrot.slane %v5919_v33, 4  ;;  %v5924_v10 = vrot.slane %v5922_v58, 5  ;;  %v5332_v6 = vrot.slane %v5330_v17, 5  ;;  %v5240_v25 = vld [vmem:[#allocation3 + $0x70] sm:$0xf]  ;;  %v5391_v57 = vshrl.u32 %v5238_v21, 16 }
 0x2de   :  { %v5555_v51 = vld [vmem:[#allocation3 + $0x58] sm:$0xe]  ;;  %v5556_v48 = vld [vmem:[#allocation3 + $0x5c] sm:$0x1]  ;;  %v5394_v37 = vshll.u32 %v5238_v21, 16  ;;  %v4801_v41 = vrot.slane %v4800_v46, 4  ;;  %v5959_v31 = vsel %vm7664_vm7, %v5954_v38, %v5958_v27 }
 0x2df   :  { %v5333_v43 = vsel %vm7664_vm7, %v5328_v39, %v5332_v6  ;;  %v4805_v13 = vrot.slane %v4803_v20, 5  ;;  %v5557_v8 = vld [vmem:[#allocation3 + $0x60] sm:$0xe]  ;;  %v5558_v1 = vld [vmem:[#allocation3 + $0x64] sm:$0x1]  ;;  %v4768_v18 = vrot.slane %v4766_v35, 4 }
 0x2e0   :  { %5074 = vrot.lane.b32.xlu1 %v5031_v23, %s7477_s25  ;;  %5169 = vrot.lane.b32.xlu0 %v5129_v30, %s7478_s13  ;;  %v5236_v34 = vld [vmem:[#allocation3 + $0x60] sm:$0xf]  ;;  %v4771_v26 = vrot.slane %v4769_v5, 5  ;;  %v5405_v23 = vshrl.u32 %v5240_v25, 16  ;;  %v5408_v15 = vshll.u32 %v5240_v25, 16  ;;  %v7152_v33 = vrot.slane %v5555_v51, 9 }
 0x2e1   :  { %v5637_v50 = vrot.slane %v5556_v48, 5  ;;  %v4731_v30 = vrot.slane %v4730_v55, 4  ;;  %v4735_v54 = vrot.slane %v4733_v47, 5  ;;  %v5377_v39 = vshrl.u32 %v5236_v34, 16  ;;  %v4626_v38 = vld [vmem:[#allocation3 + $0x5c] sm:$0x1] }
 0x2e2   :  { %v5380_v46 = vshll.u32 %v5236_v34, 16  ;;  %v7153_v20 = vrot.slane %v5557_v8, 9  ;;  %v5641_v21 = vrot.slane %v5558_v1, 5  ;;  %v5396_v27 = vrot.slane %v5394_v37, 5  ;;  %v5239_v5 = vld [vmem:[#allocation3 + $0x6c] sm:$0x1] }
 0x2e3   :  { %v4806_v35 = vsel %vm7664_vm7, %v4801_v41, %v4805_v13  ;;  %v4772_v55 = vor.u32 %v4771_v26, %v4768_v18  ;;  %v5234_v6 = vld [vmem:[#allocation3 + $0x58] sm:$0xf]  ;;  %v5407_v47 = vrot.slane %v5405_v23, 4  ;;  %v4736_v25 = vsel %vm7664_vm7, %v4731_v30, %v4735_v54  ;;  %v5241_v48 = vld [vmem:[#allocation3 + $0x74] sm:$0x1] }
 0x2e4   :  { %5171 = vrot.lane.b32.xlu1 %v5130_v16, %s7478_s13  ;;  %5482 = vrot.lane.b32.xlu0 %v5319_v53, %s7480_s20  ;;  %v5925_v53 = vor.u32 %v5924_v10, %v5921_v22  ;;  %v5393_v16 = vrot.slane %v5391_v57, 4  ;;  %v5410_v22 = vrot.slane %v5408_v15, 5  ;;  %v5638_v10 = vsel %vm7656_vm12, %v7152_v33, %v5637_v50  ;;  %v4627_v41 = vld [vmem:[#allocation3 + $0x60] sm:$0xf]  ;;  %v4949_v34 = vld [vmem:[#allocation3 + $0x64] sm:$0x1] }
 0x2e5   :  { %v5930_v51 = vrot.slane %v5928_v19, 5  ;;  %v5379_v13 = vrot.slane %v5377_v39, 4  ;;  %v5382_v8 = vrot.slane %v5380_v46, 5  ;;  %v5400_v18 = vshll.u32 %v5239_v5, 16 }
 0x2e6   :  { %v5397_v1 = vor.u32 %v5396_v27, %v5393_v16  ;;  %v5363_v19 = vshrl.u32 %v5234_v6, 16  ;;  %v5366_v26 = vshll.u32 %v5234_v6, 16  ;;  %v5642_v23 = vsel %vm7656_vm12, %v7153_v20, %v5641_v21  ;;  %v5237_v20 = vld [vmem:[#allocation3 + $0x64] sm:$0x1] }
 0x2e7   :  { %v4773_v15 = vrot.slane %v4772_v55, 4  ;;  %v5414_v33 = vshll.u32 %v5241_v48, 16  ;;  %v4780_v50 = vshrl.u32 %v4627_v41, 16  ;;  %v4783_v30 = vshll.u32 %v4627_v41, 16  ;;  %v7459_v41 = vld [vmem:[%s11979_s4 + $0x18] sm:$0xff]  }
 0x2e8   :  { %v11394_v3 = vpop.permute.xlu1 %5775  ;;  %5484 = vrot.lane.b32.xlu1 %v5333_v43, %s7480_s20  ;;  %6098 = vrot.lane.b32.xlu0 %v5959_v31, %s7482_s9  ;;  %v5926_v43 = vrot.slane %v5925_v53, 4  ;;  %v5411_v31 = vor.u32 %v5410_v22, %v5407_v47  ;;  %v5034_v39 = vrot.slane %v4949_v34, 5  ;;  %v5383_v21 = vor.u32 %v5382_v8, %v5379_v13  ;;  %v7457_v47 = vld [vmem:[%s11979_s4 + $0x20] ss:$0 sps:$4 sm:$0xff]   ;;  %v5235_v13 = vld [vmem:[#allocation3 + $0x5c] sm:$0x1] }
 0x2e9   :  { %v11396_v42 = vpop.permute.xlu0 %5165  ;;  %v11435_v16 = vrot.slane %v5397_v1, 4  ;;  %v11437_v27 = vrot.slane %v5400_v18, 5  ;;  %v5416_v6 = vrot.slane %v5414_v33, 5  ;;  %7432 = vmatprep.subr.msk.bf16.mxu1 %vm6461_vm6, %v7457_v47  ;;  %v6463_v34 = vsel %vm6461_vm6, %v7457_v47, 0  ;;  %v7460_v1 = vld [vmem:[%s11979_s4 + $0x10] sm:$0xff]  }
 0x2ea   :  { %v5412_v55 = vrot.slane %v5411_v31, 4  ;;  %v5931_v22 = vsel %vm7664_vm7, %v5926_v43, %v5930_v51  ;;  %v5384_v8 = vrot.slane %v5383_v21, 4  ;;  %v5561_v51 = vld [vmem:[#allocation3 + $0x70] sm:$0xe]  ;;  %v5562_v43 = vld [vmem:[#allocation3 + $0x74] sm:$0x1]  ;;  %7406 = vmatpush3.bf16.msra.mxu1 %v6463_v34 }
 0x2eb   :  { %7407 = vmatprep.subr.bf16.mxu1 %v7459_v41  ;;  %v233_v31 = vld [vmem:[#allocation3 + $0x98] sm:$0x1]  ;;  %v4586_v33 = vld [vmem:[#allocation3 + $0x68] sm:$0xf]  ;;  %v5403_v4 = vsel %vm7664_vm7, %v11435_v16, %v11437_v27  ;;  %vm6327_vm6 = vcmask 585216  }
 0x2ec   :  { %v4870_v58 = vpop.permute.xlu1 %4869  ;;  %4885 = vrot.lane.b32.xlu1 %v4806_v35, %s7473_s11  ;;  %5683 = vrot.lane.b32.xlu0 %v5638_v10, %s7484_s23  ;;  %v5368_v35 = vrot.slane %v5366_v26, 5  ;;  %v11447_v10 = vrot.slane %v4780_v50, 4  ;;  %v5417_v18 = vsel %vm7664_vm7, %v5412_v55, %v5416_v6  ;;  %v4584_v50 = vld [vmem:[#allocation3 + $0x58] sm:$0xf]  ;;  %4602 = vst.msk [vmem:[#allocation5 + $0x2c] sm:$0xf] %vm12083_vm1, %v4586_v33 }
 0x2ed   :  { %v11404_v17 = vpop.permute.xlu0 %5060  ;;  %4915 = vst.msk [vmem:[#allocation5 + $0xc] sm:$0xf] %vm4911_vm3, %v4870_v58  ;;  %v7155_v55 = vrot.slane %v5561_v51, 9  ;;  %v5649_v6 = vrot.slane %v5562_v43, 5  ;;  %v7462_v51 = vld [vmem:[%s11979_s4] sm:$0xff]   ;;  %vm6436_vm1 = vcmask 588800  }
 0x2ee   :  { %5108 = vst.msk [vmem:[#allocation5 + $0xc] sm:$0xf] %vm5104_vm0, %v11326_v56  ;;  %v11419_v56 = vld [vmem:[#allocation3 + $0x60] sm:$0xe]  ;;  %7408 = vmatpush3.bf16.msra.mxu1 %v7459_v41  ;;  %v5560_v41 = vld [vmem:[#allocation3 + $0x6c] sm:$0x1] }
 0x2ef   :  { %5205 = vst.msk [vmem:[#allocation5 + $0xc] sm:$0xf] %vm5201_vm5, %v11347_v62  ;;  %v4775_v62 = vshll.u32 %v4626_v38, 16  ;;  %v7138_v53 = vrot.slane %v11419_v56, 9  ;;  %v5365_v38 = vrot.slane %v5363_v19, 4  ;;  %v5386_v56 = vshll.u32 %v5237_v20, 16  ;;  %7409 = vmatprep.subr.bf16.mxu1 %v7460_v1 }
 0x2f0   :  { %v11421_v57 = vpop.permute.xlu1 %5669  ;;  %5685 = vrot.lane.b32.xlu1 %v5642_v23, %s7484_s23  ;;  %4875 = vrot.lane.b32.xlu0 %v4736_v25, %s7473_s11  ;;  %v11449_v25 = vrot.slane %v4783_v30, 5  ;;  %4600 = vst.msk [vmem:[#allocation5 + $0x24] sm:$0xf] %vm12087_vm9, %v4584_v50  ;;  %v5372_v20 = vshll.u32 %v5235_v13, 16  ;;  %v5650_v16 = vsel %vm7656_vm12, %v7155_v55, %v5649_v6  ;;  %v5846_v43 = vld [vmem:[#allocation3 + $0x60] sm:$0xf] }
 0x2f1   :  { %v11423_v37 = vpop.permute.xlu0 %5478  ;;  %v4777_v46 = vrot.slane %v4775_v62, 5  ;;  %v5035_v19 = vsel %vm7656_vm12, %v7138_v53, %v5034_v39  ;;  %v5369_v26 = vor.u32 %v5368_v35, %v5365_v38  ;;  %v5388_v30 = vrot.slane %v5386_v56, 5  ;;  %v294_v53 = vld [vmem:[#allocation3 + $0x9c] sm:$0x1]  ;;  %v4585_v39 = vld [vmem:[#allocation3 + $0x60] sm:$0xf] }
 0x2f2   :  { %v295_v21 = vsel %vm10948_vm13, 0, %v294_v53  ;;  %4601 = vst.msk [vmem:[#allocation5 + $0x28] sm:$0xf] %vm12088_vm10, %v4585_v39  ;;  %v4587_v38 = vld [vmem:[#allocation3 + $0x70] sm:$0xf]  ;;  %7410 = vmatpush3.bf16.msra.mxu1 %v7460_v1  ;;  %vm6134_vm13 = vcmask 519616  }
 0x2f3   :  { %v4778_v5 = vsel %vm7664_vm7, %v4773_v15, %v4777_v46  ;;  %v234_v46 = vsel %vm10932_vm15, 0, %v233_v31  ;;  %v4628_v35 = vld [vmem:[#allocation3 + $0x64] sm:$0x1]  ;;  %296 = vst [vmem:[#allocation3 + $0x9c] sm:$0x1] %v295_v21 }
 0x2f4   :  { %v11429_v58 = vpop.permute.xlu1 %6088  ;;  %4881 = vrot.lane.b32.xlu1 %v4778_v5, %s7473_s11  ;;  %6094 = vrot.lane.b32.xlu0 %v5931_v22, %s7482_s9  ;;  %235 = vst [vmem:[#allocation3 + $0x98] sm:$0x1] %v234_v46  ;;  %v5389_v5 = vsel %vm7664_vm7, %v5384_v8, %v5388_v30  ;;  %4603 = vst.msk [vmem:[#allocation5 + $0x30] sm:$0xf] %vm12089_vm14, %v4587_v38  ;;  %v5374_v22 = vrot.slane %v5372_v20, 5  ;;  %v4789_v56 = vshll.u32 %v4628_v35, 16 }
 0x2f5   :  { %v11431_v54 = vpop.permute.xlu0 %6279  ;;  %v5850_v50 = vld [vmem:[#allocation3 + $0x70] sm:$0xf]  ;;  %v5847_v35 = vld [vmem:[#allocation3 + $0x64] sm:$0x1] }
 0x2f6   :  { %v4791_v34 = vrot.slane %v4789_v56, 5  ;;  %v6003_v39 = vshrl.u32 %v5850_v50, 16  ;;  %v6006_v20 = vshll.u32 %v5850_v50, 16  ;;  %v4632_v50 = vld [vmem:[#allocation3 + $0x74] sm:$0x1] }
 0x2f8   :  { %v11451_v48 = vpop.permute.xlu1 %5771  ;;  %5496 = vrot.lane.b32.xlu1 %v5417_v18, %s7480_s20  ;;  %5076 = vrot.lane.b32.xlu0 %v5035_v19, %s7477_s25  ;;  %v5645_v18 = vrot.slane %v5560_v41, 5  ;;  %v5742_v19 = vld [vmem:[#allocation3 + $0x68] sm:$0xf]  ;;  %v6005_v6 = vrot.slane %v6003_v39, 4 }
 0x2f9   :  { %v11453_v62 = vpop.permute.xlu0 %5161 }
 0x2fc   :  { %v4866_v23 = vpop.permute.xlu1 %4865  ;;  %5492 = vrot.lane.b32.xlu1 %v5389_v5, %s7480_s20  ;;  %5494 = vrot.lane.b32.xlu0 %v5403_v4, %s7480_s20  ;;  %v5741_v5 = vld [vmem:[#allocation3 + $0x60] sm:$0xf]  ;;  %v6008_v4 = vrot.slane %v6006_v20, 5 }
 0x2fd   :  { %v5475_v15 = vpop.permute.xlu0 %5474  ;;  %4913 = vst.msk [vmem:[#allocation5 + $0x4] sm:$0xf] %vm4911_vm3, %v4866_v23  ;;  %v5975_v23 = vshrl.u32 %v5846_v43, 16 }
 0x2fe   :  { %5523 = vst.msk [vmem:[#allocation5] sm:$0xf] %vm5522_vm11, %v5475_v15  ;;  %v5978_v15 = vshll.u32 %v5846_v43, 16 }
 0x2ff   :  { %5106 = vst.msk [vmem:[#allocation5 + $0x4] sm:$0xf] %vm5104_vm0, %v11358_v28  ;;  %v4786_v28 = vor.u32 %v11449_v25, %v11447_v10  ;;  %v5559_v25 = vld [vmem:[#allocation3 + $0x68] sm:$0xe]  ;;  %v5977_v46 = vrot.slane %v5975_v23, 4 }
 0x300   :  { %5716 = vst.msk [vmem:[#allocation5] sm:$0xf] %vm5715_vm2, %v11349_v9  ;;  %v5370_v9 = vrot.slane %v5369_v26, 4  ;;  %v11495_v47 = vpop.permute.xlu1 %5070  ;;  %5689 = vrot.lane.b32.xlu1 %v5650_v16, %s7484_s23  ;;  %v7154_v1 = vrot.slane %v5559_v25, 9  ;;  %v5980_v53 = vrot.slane %v5978_v15, 5  ;;  %v6009_v16 = vor.u32 %v6008_v4, %v6005_v6 }
 0x301   :  { %5203 = vst.msk [vmem:[#allocation5 + $0x4] sm:$0xf] %vm5201_vm5, %v11370_v44  ;;  %v11497_v44 = vpop.permute.xlu0 %5679  ;;  %v4787_v10 = vrot.slane %v4786_v28, 4  ;;  %v6168_v23 = vld [vmem:[#allocation3 + $0x64] sm:$0x1] }
 0x302   :  { %5814 = vst.msk [vmem:[#allocation5] sm:$0xf] %vm5813_vm4, %v11362_v14  ;;  %v7461_v14 = vld [vmem:[%s11979_s4 + $0x8] sm:$0xff]   ;;  %v5375_v27 = vsel %vm7664_vm7, %v5370_v9, %v5374_v22  ;;  %v5646_v30 = vsel %vm7656_vm12, %v7154_v1, %v5645_v18  ;;  %v5981_v55 = vor.u32 %v5980_v53, %v5977_v46  ;;  %v5743_v22 = vld [vmem:[#allocation3 + $0x70] sm:$0xf]  ;;  %v6010_v43 = vrot.slane %v6009_v16, 4 }
 0x303   :  { %7411 = vmatprep.subr.bf16.mxu1 %v7461_v14  ;;  %5490 = vrot.lane.b32.xlu0 %v5375_v27, %s7480_s20  ;;  %v4792_v26 = vsel %vm7664_vm7, %v4787_v10, %v4791_v34  ;;  %v6249_v53 = vrot.slane %v6168_v23, 5 }
 0x304   :  { %v11508_v13 = vpop.permute.xlu1 %6289  ;;  %7412 = vmatpush3.bf16.msra.mxu1 %v7461_v14  ;;  %5783 = vrot.lane.b32.xlu1 %v5742_v19, %s7481_s0  ;;  %v5984_v14 = vshll.u32 %v5847_v35, 16  ;;  %v5982_v56 = vrot.slane %v5981_v55, 4 }
 0x305   :  { %v11510_v8 = vpop.permute.xlu0 %5777  ;;  %7413 = vmatprep.subr.bf16.mxu1 %v7462_v51 }
 0x306   :  { %v5986_v25 = vrot.slane %v5984_v14, 5 }
 0x307   :  { %4883 = vrot.lane.b32.xlu0 %v4792_v26, %s7473_s11  ;;  %v6167_v26 = vld [vmem:[#allocation3 + $0x60] sm:$0xe] }
 0x308   :  { %v11521_v33 = vpop.permute.xlu1 %5167  ;;  %7414 = vmatpush3.bf16.msra.mxu1 %v7462_v51  ;;  %v5987_v51 = vsel %vm7664_vm7, %v5982_v56, %v5986_v25  ;;  %v7168_v46 = vrot.slane %v6167_v26, 9 }
 0x309   :  { %v11519_v31 = vpop.permute.xlu0 %6090 }
 0x30b   :  { %5687 = vrot.lane.b32.xlu0 %v5646_v30, %s7484_s23 }
 0x30c   :  { %v5481_v38 = vpop.permute.xlu1 %5480 }
 0x30d   :  { %v4872_v21 = vpop.permute.xlu0 %4871  ;;  %5526 = vst.msk [vmem:[#allocation5 + $0xc] sm:$0xf] %vm5522_vm11, %v5481_v38  ;;  %v6250_v38 = vsel %vm7656_vm12, %v7168_v46, %v6249_v53  ;;  %v4564_v53 = vld [vmem:[#allocation3 + $0x8c] sm:$0x1] }
 0x30e   :  { %4916 = vst.msk [vmem:[#allocation5 + $0x10] sm:$0xf] %vm4911_vm3, %v4872_v21 }
 0x30f   :  { %5109 = vst.msk [vmem:[#allocation5 + $0x10] sm:$0xf] %vm5104_vm0, %v11386_v59  ;;  %5781 = vrot.lane.b32.xlu0 %v5741_v5, %s7481_s0  ;;  %v4631_v59 = vld [vmem:[#allocation3 + $0x70] sm:$0xf] }
 0x310   :  { %5719 = vst.msk [vmem:[#allocation5 + $0xc] sm:$0xf] %vm5715_vm2, %v11384_v24  ;;  %v11539_v28 = vpop.permute.xlu1 %6285  ;;  %v5851_v24 = vld [vmem:[#allocation3 + $0x74] sm:$0x1]  ;;  %v4811_v27 = vshll.u32 %v4631_v59, 16 }
 0x311   :  { %5206 = vst.msk [vmem:[#allocation5 + $0x10] sm:$0xf] %vm5201_vm5, %v11453_v62  ;;  %v11537_v9 = vpop.permute.xlu0 %5675  ;;  %v4808_v62 = vshrl.u32 %v4631_v59, 16  ;;  %v6012_v41 = vshll.u32 %v5851_v24, 16 }
 0x312   :  { %5817 = vst.msk [vmem:[#allocation5 + $0xc] sm:$0xf] %vm5813_vm4, %v11451_v48  ;;  %v4813_v1 = vrot.slane %v4811_v27, 5 }
 0x313   :  { %5785 = vrot.lane.b32.xlu0 %v5743_v22, %s7481_s0  ;;  %v4810_v34 = vrot.slane %v4808_v62, 4  ;;  %v6014_v15 = vrot.slane %v6012_v41, 5  ;;  %v5848_v62 = vld [vmem:[#allocation3 + $0x68] sm:$0xf] }
 0x314   :  { %v11542_v10 = vpop.permute.xlu1 %5066 }
 0x315   :  { %v11544_v48 = vpop.permute.xlu0 %5773  ;;  %v6015_v30 = vsel %vm7664_vm7, %v6010_v43, %v6014_v15  ;;  %v4814_v39 = vor.u32 %v4813_v1, %v4810_v34  ;;  %v5989_v1 = vshrl.u32 %v5848_v62, 16 }
 0x317   :  { %6102 = vrot.lane.b32.xlu0 %v5987_v51, %s7482_s9  ;;  %v4815_v35 = vrot.slane %v4814_v39, 4 }
 0x318   :  { %v11549_v19 = vpop.permute.xlu1 %5163 }
 0x319   :  { %v4868_v18 = vpop.permute.xlu0 %4867 }
 0x31a   :  { %4914 = vst.msk [vmem:[#allocation5 + $0x8] sm:$0xf] %vm4911_vm3, %v4868_v18  ;;  %v5992_v18 = vshll.u32 %v5848_v62, 16  ;;  %v4558_v62 = vld [vmem:[#allocation3 + $0x84] sm:$0x1] }
 0x31b   :  { %5107 = vst.msk [vmem:[#allocation5 + $0x8] sm:$0xf] %vm5104_vm0, %v11404_v17  ;;  %6106 = vrot.lane.b32.xlu0 %v6015_v30, %s7482_s9  ;;  %v4817_v17 = vshll.u32 %v4632_v50, 16 }
 0x31c   :  { %5204 = vst.msk [vmem:[#allocation5 + $0x8] sm:$0xf] %vm5201_vm5, %v11288_v40  ;;  %v5477_v21 = vpop.permute.xlu1 %5476 }
 0x31d   :  { %5525 = vst.msk [vmem:[#allocation5 + $0x8] sm:$0xf] %vm5522_vm11, %v11423_v37  ;;  %v6087_v20 = vpop.permute.xlu0 %6086  ;;  %5524 = vst.msk [vmem:[#allocation5 + $0x4] sm:$0xf] %vm5522_vm11, %v5477_v21  ;;  %v7403_v40 = vpop.f32.mrf.mxu0  ;;  %v4819_v55 = vrot.slane %v4817_v17, 5 }
 0x31e   :  { %5718 = vst.msk [vmem:[#allocation5 + $0x8] sm:$0xf] %vm5715_vm2, %v11328_v12  ;;  %5717 = vst.msk [vmem:[#allocation5 + $0x4] sm:$0xf] %vm5715_vm2, %v11421_v57  ;;  %v4210_v37 = vmul.f32 %v11306_v36, %v7403_v40  ;;  %v4549_v40 = vld [vmem:[#allocation3 + $0x78] sm:$0xf] }
 0x31f   :  { %6135 = vst.msk [vmem:[#allocation5] sm:$0xf] %vm6134_vm13, %v6087_v20  ;;  %v4175_v12 = vpop.f32.mrf.mxu0  ;;  %6295 = vrot.lane.b32.xlu0 %v6250_v38, %s7483_s18  ;;  %v4820_v59 = vsel %vm7664_vm7, %v4815_v35, %v4819_v55  ;;  %v5991_v38 = vrot.slane %v5989_v1, 4  ;;  %v5994_v35 = vrot.slane %v5992_v18, 5 }
 0x320   :  { %5816 = vst.msk [vmem:[#allocation5 + $0x8] sm:$0xf] %vm5813_vm4, %v11337_v63  ;;  %5815 = vst.msk [vmem:[#allocation5 + $0x4] sm:$0xf] %vm5813_vm4, %v11317_v49  ;;  %v4232_v63 = vadd.f32 %v11313_v61, %v4210_v37  ;;  %v4208_v57 = vmul.f32 %v11306_v36, %v4175_v12  ;;  %v11588_v49 = vpop.permute.xlu1 %5681 }
 0x321   :  { %6328 = vst.msk [vmem:[#allocation5] sm:$0xf] %vm6327_vm6, %v11431_v54  ;;  %v6171_v54 = vld [vmem:[#allocation3 + $0x70] sm:$0xe]  ;;  %v7404_v5 = vpop.f32.mrf.mxu0 }
 0x322   :  { %6137 = vst.msk [vmem:[#allocation5 + $0x8] sm:$0xf] %vm6134_vm13, %v11519_v31  ;;  %6136 = vst.msk [vmem:[#allocation5 + $0x4] sm:$0xf] %vm6134_vm13, %v11429_v58  ;;  %v6172_v31 = vld [vmem:[#allocation3 + $0x74] sm:$0x1]  ;;  %v4211_v58 = vmul.f32 %v11306_v36, %v7404_v5 }
 0x323   :  { %6330 = vst.msk [vmem:[#allocation5 + $0x8] sm:$0xf] %vm6327_vm6, %v11372_v0  ;;  %6329 = vst.msk [vmem:[#allocation5 + $0x4] sm:$0xf] %vm6327_vm6, %v11335_v32  ;;  %v4248_v6 = vmax.f32 %v4232_v63, 0.0  ;;  %v4230_v0 = vadd.f32 %v11313_v61, %v4208_v57  ;;  %v4178_v4 = vpop.f32.mrf.mxu0  ;;  %v7170_v14 = vrot.slane %v6171_v54, 9  ;;  %4887 = vrot.lane.b32.xlu0 %v4820_v59, %s7473_s11 }
 0x324   :  { %v6257_v24 = vrot.slane %v6172_v31, 5  ;;  %v4233_v16 = vadd.f32 %v11313_v61, %v4211_v58  ;;  %v4209_v32 = vmul.f32 %v11306_v36, %v4178_v4  ;;  %v4878_v27 = vpop.permute.xlu1 %4877  ;;  %v4567_v59 = vld [vmem:[#allocation3 + $0x90] sm:$0xf] }
 0x325   :  { %v7357_v22 = vpack.c.bf16 %v4248_v6, %v4248_v6  ;;  %v4246_v56 = vmax.f32 %v4230_v0, 0.0  ;;  %4919 = vst.msk [vmem:[#allocation5 + $0x1c] sm:$0xf] %vm4911_vm3, %v4878_v27  ;;  %v5849_v0 = vld [vmem:[#allocation3 + $0x6c] sm:$0x1]  ;;  %v5995_v27 = vor.u32 %v5994_v35, %v5991_v38 }
 0x326   :  { %v4249_v43 = vmax.f32 %v4233_v16, 0.0  ;;  %5112 = vst.msk [vmem:[#allocation5 + $0x1c] sm:$0xf] %vm5104_vm0, %v11495_v47  ;;  %v4231_v34 = vadd.f32 %v11313_v61, %v4209_v32  ;;  %v6258_v36 = vsel %vm7656_vm12, %v7170_v14, %v6257_v24  ;;  %v4561_v47 = vld [vmem:[#allocation3 + $0x88] sm:$0xf] }
 0x327   :  { %v4427_v25 = vshrl.u32 %v7357_v22, 16  ;;  %v4430_v41 = vshll.u32 %v7357_v22, 16  ;;  %v7355_v51 = vpack.c.bf16 %v4246_v56, %v4246_v56  ;;  %5209 = vst.msk [vmem:[#allocation5 + $0x1c] sm:$0xf] %vm5201_vm5, %v11521_v33  ;;  %6299 = vrot.lane.b32.xlu0 %v6258_v36, %s7483_s18  ;;  %v4552_v33 = vld [vmem:[#allocation3 + $0x7c] sm:$0x1] }
 0x328   :  { %v7358_v30 = vpack.c.bf16 %v4249_v43, %v4249_v43  ;;  %v11606_v46 = vpop.permute.xlu1 %5677  ;;  %v4247_v61 = vmax.f32 %v4231_v34, 0.0  ;;  %v4570_v14 = vld [vmem:[#allocation3 + $0x94] sm:$0x1]  ;;  %v4555_v32 = vld [vmem:[#allocation3 + $0x80] sm:$0xf] }
 0x329   :  { %v4429_v23 = vrot.slane %v4427_v25, 7  ;;  %v4411_v15 = vshrl.u32 %v7355_v51, 16  ;;  %v4414_v50 = vshll.u32 %v7355_v51, 16  ;;  %v5998_v25 = vshll.u32 %v5849_v0, 16 }
 0x32a   :  { %v7458_v26 = vld [vmem:[#allocation5] sm:$0xff]   ;;  %v4435_v17 = vshrl.u32 %v7358_v30, 16  ;;  %v4438_v37 = vshll.u32 %v7358_v30, 16  ;;  %v7356_v12 = vpack.c.bf16 %v4247_v61, %v4247_v61 }
 0x32b   :  { %7415 = vmatprep.mubr.msk.bf16.mxu1 %vm6436_vm1, %v7458_v26  ;;  %v4432_v39 = vor.u32 %v4430_v41, %v4429_v23  ;;  %v4433_v20 = vrot.slane %v4429_v23, 4  ;;  %v4413_v21 = vrot.slane %v4411_v15, 7  ;;  %v5996_v23 = vrot.slane %v5995_v27, 4  ;;  %v4952_v27 = vld [vmem:[#allocation3 + $0x70] sm:$0xe] }
 0x32c   :  { %v11613_v5 = vpop.permute.xlu1 %6096  ;;  %v4437_v55 = vrot.slane %v4435_v17, 7  ;;  %v4419_v6 = vshrl.u32 %v7356_v12, 16  ;;  %v4422_v16 = vshll.u32 %v7356_v12, 16  ;;  %v6000_v15 = vrot.slane %v5998_v25, 5  ;;  %v4953_v25 = vld [vmem:[#allocation3 + $0x74] sm:$0x1] }
 0x32d   :  { %v4562_v63 = vsel %vm11075_vm8, %v4432_v39, %v4561_v47  ;;  %v4565_v57 = vsel %vm10932_vm15, %v4433_v20, %v4564_v53  ;;  %v4416_v54 = vor.u32 %v4414_v50, %v4413_v21  ;;  %v4417_v31 = vrot.slane %v4413_v21, 4 }
 0x32e   :  { %4563 = vst [vmem:[#allocation3 + $0x88] sm:$0xf] %v4562_v63  ;;  %4566 = vst [vmem:[#allocation3 + $0x8c] sm:$0x1] %v4565_v57  ;;  %v4440_v24 = vor.u32 %v4438_v37, %v4437_v55  ;;  %v4441_v22 = vrot.slane %v4437_v55, 4  ;;  %v4421_v56 = vrot.slane %v4419_v6, 7  ;;  %v6001_v17 = vsel %vm7664_vm7, %v5996_v23, %v6000_v15 }
 0x32f   :  { %v4550_v58 = vsel %vm11075_vm8, %v4416_v54, %v4549_v40  ;;  %v4553_v4 = vsel %vm10932_vm15, %v4417_v31, %v4552_v33  ;;  %v6169_v40 = vld [vmem:[#allocation3 + $0x68] sm:$0xe]  ;;  %v6170_v37 = vld [vmem:[#allocation3 + $0x6c] sm:$0x1] }
 0x330   :  { %4551 = vst [vmem:[#allocation3 + $0x78] sm:$0xf] %v4550_v58  ;;  %4554 = vst [vmem:[#allocation3 + $0x7c] sm:$0x1] %v4553_v4  ;;  %v6093_v41 = vpop.permute.xlu1 %6092  ;;  %v4568_v51 = vsel %vm11075_vm8, %v4440_v24, %v4567_v59  ;;  %v4571_v43 = vsel %vm10932_vm15, %v4441_v22, %v4570_v14  ;;  %v4424_v34 = vor.u32 %v4422_v16, %v4421_v56  ;;  %v4425_v1 = vrot.slane %v4421_v56, 4 }
 0x331   :  { %6138 = vst.msk [vmem:[#allocation5 + $0xc] sm:$0xf] %vm6134_vm13, %v6093_v41  ;;  %4569 = vst [vmem:[#allocation3 + $0x90] sm:$0xf] %v4568_v51  ;;  %v7169_v6 = vrot.slane %v6169_v40, 9  ;;  %v6253_v0 = vrot.slane %v6170_v37, 5 }
 0x332   :  { %4572 = vst [vmem:[#allocation3 + $0x94] sm:$0x1] %v4571_v43  ;;  %6331 = vst.msk [vmem:[#allocation5 + $0xc] sm:$0xf] %vm6327_vm6, %v11539_v28  ;;  %v4556_v18 = vsel %vm11075_vm8, %v4424_v34, %v4555_v32  ;;  %v4559_v36 = vsel %vm10932_vm15, %v4425_v1, %v4558_v62 }
 0x333   :  { %4557 = vst [vmem:[#allocation3 + $0x80] sm:$0xf] %v4556_v18  ;;  %4560 = vst [vmem:[#allocation3 + $0x84] sm:$0x1] %v4559_v36  ;;  %v6254_v41 = vsel %vm7656_vm12, %v7169_v6, %v6253_v0  ;;  %v11645_v18 = vpop.permute.xlu0 %6291 }
 0x334   :  { %v4874_v26 = vpop.permute.xlu1 %4873  ;;  %vm12090_vm15 = vmmov %vm12087_vm9 }
 0x335   :  { %4917 = vst.msk [vmem:[#allocation5 + $0x14] sm:$0xf] %vm4911_vm3, %v4874_v26  ;;  %v4638_v1 = vld [vmem:[#allocation3 + $0x8c] sm:$0x1]  ;;  %vm12091_vm8 = vmmov %vm12087_vm9 }
 0x336   :  { %5110 = vst.msk [vmem:[#allocation5 + $0x14] sm:$0xf] %vm5104_vm0, %v11542_v10  ;;  %v4637_v10 = vld [vmem:[#allocation3 + $0x88] sm:$0xf]  ;;  %vm12092_vm9 = vmmov %vm12091_vm8 }
 0x337   :  { %v5744_v50 = vld [vmem:[#allocation3 + $0x78] sm:$0xf]  ;;  %v5853_v47 = vld [vmem:[#allocation3 + $0x7c] sm:$0x1]  ;;  %5207 = vst.msk [vmem:[#allocation5 + $0x14] sm:$0xf] %vm5201_vm5, %v11549_v19 }
 0x338   :  { %v5852_v30 = vld [vmem:[#allocation3 + $0x78] sm:$0xf]  ;;  %5787 = vrot.lane.b32.xlu1 %v5744_v50, %s7481_s0  ;;  %v6026_v53 = vshll.u32 %v5853_v47, 16  ;;  %v4634_v54 = vld [vmem:[#allocation3 + $0x7c] sm:$0x1]  ;;  %v4850_v24 = vshrl.u32 %v4637_v10, 16 }
 0x339   :  { %v6017_v45 = vshrl.u32 %v5852_v30, 16  ;;  %v6020_v28 = vshll.u32 %v5852_v30, 16  ;;  %v4633_v7 = vld [vmem:[#allocation3 + $0x78] sm:$0xf]  ;;  %v7463_v58 = vld [vmem:[#allocation5 + $0x8] sm:$0xff]   ;;  %v4831_v16 = vshll.u32 %v4634_v54, 16 }
 0x33a   :  { %v4822_v61 = vshrl.u32 %v4633_v7, 16  ;;  %v4825_v39 = vshll.u32 %v4633_v7, 16  ;;  %v6028_v33 = vrot.slane %v6026_v53, 5  ;;  %v4635_v63 = vld [vmem:[#allocation3 + $0x80] sm:$0xf]  ;;  %v4853_v32 = vshll.u32 %v4637_v10, 16  ;;  %7416 = vmatmul.mubr.msk.bf16.vlgmr.msra.gmra.mxu1 %vm6436_vm1, %v7463_v58 }
 0x33b   :  { %v6019_v20 = vrot.slane %v6017_v45, 4  ;;  %v6022_v21 = vrot.slane %v6020_v28, 5  ;;  %v4636_v57 = vld [vmem:[#allocation3 + $0x84] sm:$0x1]  ;;  %v4836_v19 = vshrl.u32 %v4635_v63, 16  ;;  %v4839_v31 = vshll.u32 %v4635_v63, 16 }
 0x33c   :  { %6104 = vrot.lane.b32.xlu1 %v6001_v17, %s7482_s9  ;;  %v4824_v38 = vrot.slane %v4822_v61, 4  ;;  %v4827_v35 = vrot.slane %v4825_v39, 5  ;;  %v4845_v14 = vshll.u32 %v4636_v57, 16  ;;  %v6173_v51 = vld [vmem:[#allocation3 + $0x78] sm:$0xe]  ;;  %v4833_v26 = vrot.slane %v4831_v16, 5 }
 0x33d   :  { %v6023_v12 = vor.u32 %v6022_v21, %v6019_v20  ;;  %v4838_v4 = vrot.slane %v4836_v19, 4  ;;  %v4841_v59 = vrot.slane %v4839_v31, 5  ;;  %v6174_v23 = vld [vmem:[#allocation3 + $0x7c] sm:$0x1]  ;;  %v4852_v15 = vrot.slane %v4850_v24, 4 }
 0x33e   :  { %v4828_v56 = vor.u32 %v4827_v35, %v4824_v38  ;;  %v4847_v34 = vrot.slane %v4845_v14, 5  ;;  %v4855_v50 = vrot.slane %v4853_v32, 5  ;;  %v7140_v47 = vrot.slane %v4952_v27, 9  ;;  %v4956_v28 = vld [vmem:[#allocation3 + $0x80] sm:$0xe] }
 0x33f   :  { %v6024_v55 = vrot.slane %v6023_v12, 4  ;;  %v4842_v62 = vor.u32 %v4841_v59, %v4838_v4  ;;  %v5042_v45 = vrot.slane %v4953_v25, 5  ;;  %v4957_v53 = vld [vmem:[#allocation3 + $0x84] sm:$0x1]  ;;  %v5242_v7 = vld [vmem:[#allocation3 + $0x78] sm:$0xf] }
 0x340   :  { %v4829_v36 = vrot.slane %v4828_v56, 4  ;;  %v7171_v61 = vrot.slane %v6173_v51, 9  ;;  %v6261_v39 = vrot.slane %v6174_v23, 5  ;;  %v4859_v20 = vshll.u32 %v4638_v1, 16  ;;  %v5246_v35 = vld [vmem:[#allocation3 + $0x88] sm:$0xf] }
 0x341   :  { %v6029_v22 = vsel %vm7664_vm7, %v6024_v55, %v6028_v33  ;;  %v4843_v43 = vrot.slane %v4842_v62, 4  ;;  %v4856_v17 = vor.u32 %v4855_v50, %v4852_v15  ;;  %v7142_v33 = vrot.slane %v4956_v28, 9  ;;  %v4954_v55 = vld [vmem:[#allocation3 + $0x78] sm:$0xe]  ;;  %v4955_v0 = vld [vmem:[#allocation3 + $0x7c] sm:$0x1] }
 0x342   :  { %6108 = vrot.lane.b32.xlu1 %v6029_v22, %s7482_s9  ;;  %v11651_v21 = vpop.permute.xlu0 %5173  ;;  %v4834_v40 = vsel %vm7664_vm7, %v4829_v36, %v4833_v26  ;;  %v5050_v37 = vrot.slane %v4957_v53, 5  ;;  %v5043_v10 = vsel %vm7656_vm12, %v7140_v47, %v5042_v45  ;;  %v5419_v12 = vshrl.u32 %v5242_v7, 16  ;;  %v5243_v24 = vld [vmem:[#allocation3 + $0x7c] sm:$0x1]  ;;  %v4958_v56 = vld [vmem:[#allocation3 + $0x88] sm:$0xe] }
 0x343   :  { %v4848_v30 = vsel %vm7664_vm7, %v4843_v43, %v4847_v34  ;;  %v5422_v38 = vshll.u32 %v5242_v7, 16  ;;  %v6262_v54 = vsel %vm7656_vm12, %v7171_v61, %v6261_v39  ;;  %v4857_v19 = vrot.slane %v4856_v17, 4  ;;  %v4959_v16 = vld [vmem:[#allocation3 + $0x8c] sm:$0x1]  ;;  %v5244_v34 = vld [vmem:[#allocation3 + $0x80] sm:$0xf] }
 0x344   :  { %4891 = vrot.lane.b32.xlu0 %v4848_v30, %s7473_s11  ;;  %v4861_v31 = vrot.slane %v4859_v20, 5  ;;  %v5051_v6 = vsel %vm7656_vm12, %v7142_v33, %v5050_v37  ;;  %v5421_v58 = vrot.slane %v5419_v12, 4  ;;  %v5447_v59 = vshrl.u32 %v5246_v35, 16  ;;  %v5247_v26 = vld [vmem:[#allocation3 + $0x8c] sm:$0x1] }
 0x345   :  { %v5424_v4 = vrot.slane %v5422_v38, 5  ;;  %v5450_v14 = vshll.u32 %v5246_v35, 16  ;;  %v7141_v27 = vrot.slane %v4954_v55, 9  ;;  %v5046_v25 = vrot.slane %v4955_v0, 5  ;;  %v5135_v45 = vld [vmem:[#allocation3 + $0x88] sm:$0xf] }
 0x346   :  { %6297 = vrot.lane.b32.xlu1 %v6254_v41, %s7483_s18  ;;  %v11659_v63 = vpop.permute.xlu1 %5078  ;;  %v11661_v57 = vpop.permute.xlu0 %5068  ;;  %v4862_v62 = vsel %vm7664_vm7, %v4857_v19, %v4861_v31  ;;  %v5133_v41 = vld [vmem:[#allocation3 + $0x78] sm:$0xf]  ;;  %v5428_v43 = vshll.u32 %v5243_v24, 16  ;;  %v5449_v1 = vrot.slane %v5447_v59, 4  ;;  %v7143_v15 = vrot.slane %v4958_v56, 9 }
 0x347   :  { %v5425_v51 = vor.u32 %v5424_v4, %v5421_v58  ;;  %v5452_v36 = vrot.slane %v5450_v14, 5  ;;  %v5054_v50 = vrot.slane %v4959_v16, 5  ;;  %v5047_v47 = vsel %vm7656_vm12, %v7141_v27, %v5046_v25  ;;  %v4589_v19 = vld [vmem:[#allocation3 + $0x80] sm:$0xf]  ;;  %v5563_v31 = vld [vmem:[#allocation3 + $0x78] sm:$0xe] }
 0x348   :  { %5080 = vrot.lane.b32.xlu0 %v5043_v10, %s7477_s25  ;;  %v5433_v28 = vshrl.u32 %v5244_v34, 16  ;;  %v5436_v53 = vshll.u32 %v5244_v34, 16  ;;  %v5430_v61 = vrot.slane %v5428_v43, 5  ;;  %v5456_v20 = vshll.u32 %v5247_v26, 16  ;;  %v5564_v55 = vld [vmem:[#allocation3 + $0x7c] sm:$0x1] }
 0x349   :  { %v5426_v7 = vrot.slane %v5425_v51, 4  ;;  %v5453_v39 = vor.u32 %v5452_v36, %v5449_v1  ;;  %4605 = vst.msk [vmem:[#allocation5 + $0x38] sm:$0xf] %vm12091_vm8, %v4589_v19  ;;  %v5245_v0 = vld [vmem:[#allocation3 + $0x84] sm:$0x1]  ;;  %v7156_v16 = vrot.slane %v5563_v31, 9 }
 0x34a   :  { %4889 = vrot.lane.b32.xlu1 %v4834_v40, %s7473_s11  ;;  %v11669_v22 = vpop.permute.xlu1 %5175  ;;  %v11671_v32 = vpop.permute.xlu0 %5486  ;;  %v5248_v40 = vld [vmem:[#allocation3 + $0x90] sm:$0xf]  ;;  %v5435_v37 = vrot.slane %v5433_v28, 4  ;;  %v5438_v10 = vrot.slane %v5436_v53, 5  ;;  %v5458_v35 = vrot.slane %v5456_v20, 5 }
 0x34b   :  { %v5461_v12 = vshrl.u32 %v5248_v40, 16  ;;  %v5464_v38 = vshll.u32 %v5248_v40, 16  ;;  %v5134_v4 = vld [vmem:[#allocation3 + $0x80] sm:$0xf]  ;;  %v5567_v27 = vld [vmem:[#allocation3 + $0x88] sm:$0xe] }
 0x34c   :  { %5084 = vrot.lane.b32.xlu0 %v5051_v6, %s7477_s25  ;;  %v4590_v6 = vld [vmem:[#allocation3 + $0x88] sm:$0xf]  ;;  %v5439_v59 = vor.u32 %v5438_v10, %v5435_v37  ;;  %v5568_v25 = vld [vmem:[#allocation3 + $0x8c] sm:$0x1]  ;;  %v5854_v51 = vld [vmem:[#allocation3 + $0x80] sm:$0xf] }
 0x34d   :  { %4606 = vst.msk [vmem:[#allocation5 + $0x3c] sm:$0xf] %vm12092_vm9, %v4590_v6  ;;  %v5463_v14 = vrot.slane %v5461_v12, 4  ;;  %v5466_v24 = vrot.slane %v5464_v38, 5  ;;  %v5249_v34 = vld [vmem:[#allocation3 + $0x94] sm:$0x1] }
 0x34e   :  { %6301 = vrot.lane.b32.xlu1 %v6262_v54, %s7483_s18  ;;  %v5489_v23 = vpop.permute.xlu1 %5488  ;;  %v11677_v30 = vpop.permute.xlu0 %6287  ;;  %v4588_v54 = vld [vmem:[#allocation3 + $0x78] sm:$0xf]  ;;  %v5136_v36 = vld [vmem:[#allocation3 + $0x90] sm:$0xf]  ;;  %v5440_v26 = vrot.slane %v5439_v59, 4  ;;  %v5470_v28 = vshll.u32 %v5249_v34, 16 }
 0x34f   :  { %5530 = vst.msk [vmem:[#allocation5 + $0x1c] sm:$0xf] %vm5522_vm11, %v5489_v23  ;;  %v5467_v23 = vor.u32 %v5466_v24, %v5463_v14  ;;  %v5858_v53 = vld [vmem:[#allocation3 + $0x90] sm:$0xf]  ;;  %v5566_v20 = vld [vmem:[#allocation3 + $0x84] sm:$0x1] }
 0x350   :  { %5177 = vrot.lane.b32.xlu0 %v5133_v41, %s7478_s13  ;;  %5723 = vst.msk [vmem:[#allocation5 + $0x1c] sm:$0xf] %vm5715_vm2, %v11588_v49  ;;  %v5055_v49 = vsel %vm7656_vm12, %v7143_v15, %v5054_v50  ;;  %v5442_v41 = vshll.u32 %v5245_v0, 16  ;;  %v7158_v15 = vrot.slane %v5567_v27, 9  ;;  %v5661_v50 = vrot.slane %v5568_v25, 5 }
 0x351   :  { %5821 = vst.msk [vmem:[#allocation5 + $0x1c] sm:$0xf] %vm5813_vm4, %v11281_v60  ;;  %v5431_v60 = vsel %vm7664_vm7, %v5426_v7, %v5430_v61  ;;  %v5472_v37 = vrot.slane %v5470_v28, 5  ;;  %v5657_v38 = vrot.slane %v5566_v20, 5  ;;  %v5745_v19 = vld [vmem:[#allocation3 + $0x80] sm:$0xf] }
 0x352   :  { %4893 = vrot.lane.b32.xlu1 %v4862_v62, %s7473_s11  ;;  %6142 = vst.msk [vmem:[#allocation5 + $0x1c] sm:$0xf] %vm6134_vm13, %v11290_v2  ;;  %v11690_v17 = vpop.permute.xlu1 %5074  ;;  %v5170_v33 = vpop.permute.xlu0 %5169  ;;  %v5454_v2 = vrot.slane %v5453_v39, 4  ;;  %v5653_v62 = vrot.slane %v5564_v55, 5  ;;  %v5565_v39 = vld [vmem:[#allocation3 + $0x80] sm:$0xe]  ;;  %v5662_v40 = vsel %vm7656_vm12, %v7158_v15, %v5661_v50 }
 0x353   :  { %6335 = vst.msk [vmem:[#allocation5 + $0x1c] sm:$0xf] %vm6327_vm6, %v11298_v29  ;;  %v7157_v12 = vrot.slane %v5565_v39, 9  ;;  %v5856_v31 = vld [vmem:[#allocation3 + $0x88] sm:$0xf] }
 0x354   :  { %5181 = vrot.lane.b32.xlu0 %v5135_v45, %s7478_s13  ;;  %5210 = vst.msk [vmem:[#allocation5 + $0x20] sm:$0xf] %vm5201_vm5, %v5170_v33  ;;  %v5459_v56 = vsel %vm7664_vm7, %v5454_v2, %v5458_v35  ;;  %v5444_v45 = vrot.slane %v5442_v41, 5  ;;  %v6059_v33 = vshrl.u32 %v5858_v53, 16  ;;  %v5569_v2 = vld [vmem:[#allocation3 + $0x90] sm:$0xe] }
 0x355   :  { %4604 = vst.msk [vmem:[#allocation5 + $0x34] sm:$0xf] %vm12090_vm15, %v4588_v54  ;;  %v5570_v35 = vld [vmem:[#allocation3 + $0x94] sm:$0x1]  ;;  %v5855_v54 = vld [vmem:[#allocation3 + $0x84] sm:$0x1] }
 0x356   :  { %5082 = vrot.lane.b32.xlu1 %v5047_v47, %s7477_s25  ;;  %v11701_v29 = vpop.permute.xlu1 %5171  ;;  %v5483_v58 = vpop.permute.xlu0 %5482  ;;  %v6034_v47 = vshll.u32 %v5854_v51, 16  ;;  %v5445_v61 = vsel %vm7664_vm7, %v5440_v26, %v5444_v45  ;;  %v6061_v55 = vrot.slane %v6059_v33, 4  ;;  %v5860_v59 = vld [vmem:[#allocation3 + $0x98] sm:$0xf]  ;;  %v7159_v24 = vrot.slane %v5569_v2, 9 }
 0x357   :  { %5527 = vst.msk [vmem:[#allocation5 + $0x10] sm:$0xf] %vm5522_vm11, %v5483_v58  ;;  %v5658_v58 = vsel %vm7656_vm12, %v7157_v12, %v5657_v38  ;;  %v6076_v25 = vshll.u32 %v5860_v59, 16  ;;  %v6176_v15 = vld [vmem:[#allocation3 + $0x84] sm:$0x1] }
 0x358   :  { %5498 = vrot.lane.b32.xlu0 %v5431_v60, %s7480_s20  ;;  %5720 = vst.msk [vmem:[#allocation5 + $0x10] sm:$0xf] %vm5715_vm2, %v11537_v9  ;;  %v5654_v9 = vsel %vm7656_vm12, %v7156_v16, %v5653_v62  ;;  %v6048_v16 = vshll.u32 %v5856_v31, 16  ;;  %v5859_v62 = vld [vmem:[#allocation3 + $0x94] sm:$0x1]  ;;  %v6265_v20 = vrot.slane %v6176_v15, 5 }
 0x359   :  { %5818 = vst.msk [vmem:[#allocation5 + $0x10] sm:$0xf] %vm5813_vm4, %v11544_v48  ;;  %v6031_v48 = vshrl.u32 %v5854_v51, 16  ;;  %v6068_v51 = vshll.u32 %v5859_v62, 16  ;;  %v5746_v45 = vld [vmem:[#allocation3 + $0x88] sm:$0xf] }
 0x35a   :  { %5086 = vrot.lane.b32.xlu1 %v5055_v49, %s7477_s25  ;;  %v5485_v43 = vpop.permute.xlu1 %5484  ;;  %v11715_v1 = vpop.permute.xlu0 %6098  ;;  %v6036_v49 = vrot.slane %v6034_v47, 5  ;;  %v6180_v33 = vld [vmem:[#allocation3 + $0x94] sm:$0x1] }
 0x35b   :  { %5528 = vst.msk [vmem:[#allocation5 + $0x14] sm:$0xf] %vm5522_vm11, %v5485_v43  ;;  %v6050_v43 = vrot.slane %v6048_v16, 5  ;;  %v6273_v2 = vrot.slane %v6180_v33, 5 }
 0x35c   :  { %5502 = vrot.lane.b32.xlu0 %v5459_v56, %s7480_s20  ;;  %5721 = vst.msk [vmem:[#allocation5 + $0x14] sm:$0xf] %vm5715_vm2, %v11606_v46  ;;  %v5665_v56 = vrot.slane %v5570_v35, 5 }
 0x35d   :  { %5819 = vst.msk [vmem:[#allocation5 + $0x14] sm:$0xf] %vm5813_vm4, %v11394_v3  ;;  %v5468_v3 = vrot.slane %v5467_v23, 4  ;;  %v6078_v23 = vrot.slane %v6076_v25, 5 }
 0x35e   :  { %5179 = vrot.lane.b32.xlu1 %v5134_v4, %s7478_s13  ;;  %6140 = vst.msk [vmem:[#allocation5 + $0x14] sm:$0xf] %vm6134_vm13, %v11613_v5  ;;  %v4886_v7 = vpop.permute.xlu1 %4885  ;;  %v11728_v46 = vpop.permute.xlu0 %5683  ;;  %v6033_v5 = vrot.slane %v6031_v48, 4  ;;  %v6040_v4 = vshll.u32 %v5855_v54, 16  ;;  %v5861_v48 = vld [vmem:[#allocation3 + $0x9c] sm:$0x1] }
 0x35f   :  { %6333 = vst.msk [vmem:[#allocation5 + $0x14] sm:$0xf] %vm6327_vm6, %v11508_v13  ;;  %v6062_v13 = vshll.u32 %v5858_v53, 16 }
 0x360   :  { %5691 = vrot.lane.b32.xlu0 %v5654_v9, %s7484_s23  ;;  %4923 = vst.msk [vmem:[#allocation5 + $0x2c] sm:$0xf] %vm4911_vm3, %v4886_v7  ;;  %v6042_v41 = vrot.slane %v6040_v4, 5  ;;  %v6070_v9 = vrot.slane %v6068_v51, 5  ;;  %v6182_v4 = vld [vmem:[#allocation3 + $0x9c] sm:$0x1] }
 0x361   :  { %5116 = vst.msk [vmem:[#allocation5 + $0x2c] sm:$0xf] %vm5104_vm0, %v11659_v63  ;;  %v5473_v63 = vsel %vm7664_vm7, %v5468_v3, %v5472_v37  ;;  %v6064_v6 = vrot.slane %v6062_v13, 5 }
 0x362   :  { %5183 = vrot.lane.b32.xlu1 %v5136_v36, %s7478_s13  ;;  %5213 = vst.msk [vmem:[#allocation5 + $0x2c] sm:$0xf] %vm5201_vm5, %v11669_v22  ;;  %v11743_v10 = vpop.permute.xlu1 %5685  ;;  %v4876_v60 = vpop.permute.xlu0 %4875  ;;  %v6037_v22 = vor.u32 %v6036_v49, %v6033_v5  ;;  %v6082_v49 = vshll.u32 %v5861_v48, 16 }
 0x363   :  { %4918 = vst.msk [vmem:[#allocation5 + $0x18] sm:$0xf] %vm4911_vm3, %v4876_v60  ;;  %v6065_v27 = vor.u32 %v6064_v6, %v6061_v55  ;;  %v6177_v55 = vld [vmem:[#allocation3 + $0x88] sm:$0xe]  ;;  %v6178_v6 = vld [vmem:[#allocation3 + $0x8c] sm:$0x1] }
 0x364   :  { %5695 = vrot.lane.b32.xlu0 %v5662_v40, %s7484_s23  ;;  %5111 = vst.msk [vmem:[#allocation5 + $0x18] sm:$0xf] %vm5104_vm0, %v11661_v57  ;;  %v6045_v57 = vshrl.u32 %v5856_v31, 16  ;;  %v6179_v40 = vld [vmem:[#allocation3 + $0x90] sm:$0xe]  ;;  %v6084_v54 = vrot.slane %v6082_v49, 5 }
 0x365   :  { %5208 = vst.msk [vmem:[#allocation5 + $0x18] sm:$0xf] %vm5201_vm5, %v11396_v42  ;;  %v5747_v42 = vld [vmem:[#allocation3 + $0x90] sm:$0xf]  ;;  %v6066_v36 = vrot.slane %v6065_v27, 4 }
 0x366   :  { %5500 = vrot.lane.b32.xlu1 %v5445_v61, %s7480_s20  ;;  %v4882_v0 = vpop.permute.xlu1 %4881  ;;  %5529 = vst.msk [vmem:[#allocation5 + $0x18] sm:$0xf] %vm5522_vm11, %v11671_v32  ;;  %v6095_v14 = vpop.permute.xlu0 %6094  ;;  %v6038_v32 = vrot.slane %v6037_v22, 4  ;;  %v5748_v61 = vld [vmem:[#allocation3 + $0x98] sm:$0xf] }
 0x367   :  { %4921 = vst.msk [vmem:[#allocation5 + $0x24] sm:$0xf] %vm4911_vm3, %v4882_v0  ;;  %v6071_v3 = vsel %vm7664_vm7, %v6066_v36, %v6070_v9 }
 0x368   :  { %5789 = vrot.lane.b32.xlu0 %v5745_v19, %s7481_s0  ;;  %5722 = vst.msk [vmem:[#allocation5 + $0x18] sm:$0xf] %vm5715_vm2, %v11497_v44  ;;  %v6073_v44 = vshrl.u32 %v5860_v59, 16  ;;  %v6043_v34 = vsel %vm7664_vm7, %v6038_v32, %v6042_v41 }
 0x369   :  { %6139 = vst.msk [vmem:[#allocation5 + $0x10] sm:$0xf] %vm6134_vm13, %v6095_v14  ;;  %v7173_v14 = vrot.slane %v6177_v55, 9 }
 0x36a   :  { %5504 = vrot.lane.b32.xlu1 %v5473_v63, %s7480_s20  ;;  %5114 = vst.msk [vmem:[#allocation5 + $0x24] sm:$0xf] %vm5104_vm0, %v11690_v17  ;;  %v5497_v17 = vpop.permute.xlu1 %5496  ;;  %v6075_v26 = vrot.slane %v6073_v44, 4  ;;  %v7174_v63 = vrot.slane %v6179_v40, 9 }
 0x36b   :  { %5820 = vst.msk [vmem:[#allocation5 + $0x18] sm:$0xf] %vm5813_vm4, %v11510_v8  ;;  %v5077_v8 = vpop.permute.xlu0 %5076 }
 0x36c   :  { %6332 = vst.msk [vmem:[#allocation5 + $0x10] sm:$0xf] %vm6327_vm6, %v11677_v30  ;;  %5793 = vrot.lane.b32.xlu0 %v5747_v42, %s7481_s0  ;;  %v5666_v30 = vsel %vm7656_vm12, %v7159_v24, %v5665_v56  ;;  %v6079_v5 = vor.u32 %v6078_v23, %v6075_v26  ;;  %v6269_v24 = vrot.slane %v6178_v6, 5 }
 0x36d   :  { %5211 = vst.msk [vmem:[#allocation5 + $0x24] sm:$0xf] %vm5201_vm5, %v11701_v29  ;;  %v6047_v29 = vrot.slane %v6045_v57, 4  ;;  %v6277_v57 = vrot.slane %v6182_v4, 5 }
 0x36e   :  { %5693 = vrot.lane.b32.xlu1 %v5658_v58, %s7484_s23  ;;  %6141 = vst.msk [vmem:[#allocation5 + $0x18] sm:$0xf] %vm6134_vm13, %v11715_v1  ;;  %v5857_v1 = vld [vmem:[#allocation3 + $0x8c] sm:$0x1]  ;;  %v5493_v50 = vpop.permute.xlu1 %5492  ;;  %v6080_v35 = vrot.slane %v6079_v5, 4  ;;  %v6270_v16 = vsel %vm7656_vm12, %v7173_v14, %v6269_v24 }
 0x36f   :  { %6334 = vst.msk [vmem:[#allocation5 + $0x18] sm:$0xf] %vm6327_vm6, %v11645_v18  ;;  %v6175_v18 = vld [vmem:[#allocation3 + $0x80] sm:$0xe]  ;;  %v5495_v47 = vpop.permute.xlu0 %5494  ;;  %v6051_v28 = vor.u32 %v6050_v43, %v6047_v29  ;;  %v6054_v53 = vshll.u32 %v5857_v1, 16 }
 0x370   :  { %5534 = vst.msk [vmem:[#allocation5 + $0x2c] sm:$0xf] %vm5522_vm11, %v5497_v17  ;;  %6110 = vrot.lane.b32.xlu0 %v6043_v34, %s7482_s9  ;;  %5532 = vst.msk [vmem:[#allocation5 + $0x24] sm:$0xf] %vm5522_vm11, %v5493_v50  ;;  %v7172_v39 = vrot.slane %v6175_v18, 9  ;;  %v6085_v0 = vsel %vm7664_vm7, %v6080_v35, %v6084_v54 }
 0x371   :  { %5725 = vst.msk [vmem:[#allocation5 + $0x24] sm:$0xf] %vm5715_vm2, %v11743_v10  ;;  %v6052_v10 = vrot.slane %v6051_v28, 4  ;;  %v6056_v38 = vrot.slane %v6054_v53, 5  ;;  %v6181_v58 = vld [vmem:[#allocation3 + $0x98] sm:$0xe] }
 0x372   :  { %5697 = vrot.lane.b32.xlu1 %v5666_v30, %s7484_s23  ;;  %v5690_v37 = vpop.permute.xlu1 %5689  ;;  %v6266_v60 = vsel %vm7656_vm12, %v7172_v39, %v6265_v20  ;;  %v7175_v56 = vrot.slane %v6181_v58, 9  ;;  %v11875_v54 = vld [vmem:[%s11981_s6] ss:$0 sm:$0xff] }
 0x373   :  { %v7464_v7 = vld [vmem:[#allocation5 + $0x10] sm:$0xff]   ;;  %5727 = vst.msk [vmem:[#allocation5 + $0x2c] sm:$0xf] %vm5715_vm2, %v5690_v37  ;;  %v6057_v31 = vsel %vm7664_vm7, %v6052_v10, %v6056_v38 }
 0x374   :  { %6114 = vrot.lane.b32.xlu0 %v6071_v3, %s7482_s9  ;;  %7419 = vmatprep.mubr.msk.bf16.mxu1 %vm6436_vm1, %v7464_v7 }
 0x375   :  { %v5491_v12 = vpop.permute.xlu0 %5490 }
 0x376   :  { %5791 = vrot.lane.b32.xlu1 %v5746_v45, %s7481_s0  ;;  %v7465_v13 = vld [vmem:[#allocation5 + $0x18] sm:$0xff]   ;;  %5531 = vst.msk [vmem:[#allocation5 + $0x20] sm:$0xf] %vm5522_vm11, %v5491_v12  ;;  %v5784_v19 = vpop.permute.xlu1 %5783 }
 0x377   :  { %7420 = vmatmul.mubr.msk.bf16.gmra.mxu1 %vm6436_vm1, %v7465_v13  ;;  %5724 = vst.msk [vmem:[#allocation5 + $0x20] sm:$0xf] %vm5715_vm2, %v11728_v46  ;;  %v6274_v46 = vsel %vm7656_vm12, %v7174_v63, %v6273_v2  ;;  %v11870_v2 = vld [vmem:[%s11980_s5] ss:$0 sm:$0xff] }
 0x378   :  { %6303 = vrot.lane.b32.xlu0 %v6266_v60, %s7483_s18  ;;  %5823 = vst.msk [vmem:[#allocation5 + $0x24] sm:$0xf] %vm5813_vm4, %v5784_v19 }
 0x379   :  { %v4884_v22 = vpop.permute.xlu0 %4883 }
 0x37a   :  { %5795 = vrot.lane.b32.xlu1 %v5748_v61, %s7481_s0  ;;  %4922 = vst.msk [vmem:[#allocation5 + $0x28] sm:$0xf] %vm4911_vm3, %v4884_v22 }
 0x37b   :  { %5115 = vst.msk [vmem:[#allocation5 + $0x28] sm:$0xf] %vm5104_vm0, %v5077_v8 }
 0x37c   :  { %6307 = vrot.lane.b32.xlu0 %v6274_v46, %s7483_s18  ;;  %5212 = vst.msk [vmem:[#allocation5 + $0x28] sm:$0xf] %vm5201_vm5, %v11651_v21  ;;  %v6278_v21 = vsel %vm7656_vm12, %v7175_v56, %v6277_v57  ;;  %vm6622_vm12 = vcmask 64512  }
 0x37d   :  { %5533 = vst.msk [vmem:[#allocation5 + $0x28] sm:$0xf] %vm5522_vm11, %v5495_v47  ;;  %v5688_v59 = vpop.permute.xlu0 %5687 }
 0x37e   :  { %6112 = vrot.lane.b32.xlu1 %v6057_v31, %s7482_s9  ;;  %5726 = vst.msk [vmem:[#allocation5 + $0x28] sm:$0xf] %vm5715_vm2, %v5688_v59 }
 0x381   :  { %v5782_v11 = vpop.permute.xlu0 %5781 }
 0x382   :  { %6116 = vrot.lane.b32.xlu1 %v6085_v0, %s7482_s9  ;;  %5822 = vst.msk [vmem:[#allocation5 + $0x20] sm:$0xf] %vm5813_vm4, %v5782_v11 }
 0x385   :  { %v5786_v62 = vpop.permute.xlu0 %5785 }
 0x386   :  { %6305 = vrot.lane.b32.xlu1 %v6270_v16, %s7483_s18  ;;  %5824 = vst.msk [vmem:[#allocation5 + $0x28] sm:$0xf] %vm5813_vm4, %v5786_v62 }
 0x389   :  { %v6103_v42 = vpop.permute.xlu0 %6102 }
 0x38a   :  { %6309 = vrot.lane.b32.xlu1 %v6278_v21, %s7483_s18  ;;  %6143 = vst.msk [vmem:[#allocation5 + $0x20] sm:$0xf] %vm6134_vm13, %v6103_v42 }
 0x38d   :  { %v6107_v32 = vpop.permute.xlu0 %6106 }
 0x38e   :  { %6145 = vst.msk [vmem:[#allocation5 + $0x28] sm:$0xf] %vm6134_vm13, %v6107_v32 }
 0x391   :  { %v6296_v27 = vpop.permute.xlu0 %6295 }
 0x392   :  { %6336 = vst.msk [vmem:[#allocation5 + $0x20] sm:$0xf] %vm6327_vm6, %v6296_v27 }
 0x395   :  { %v4888_v44 = vpop.permute.xlu0 %4887 }
 0x396   :  { %4924 = vst.msk [vmem:[#allocation5 + $0x30] sm:$0xf] %vm4911_vm3, %v4888_v44 }
 0x399   :  { %v6300_v25 = vpop.permute.xlu0 %6299 }
 0x39a   :  { %6338 = vst.msk [vmem:[#allocation5 + $0x28] sm:$0xf] %vm6327_vm6, %v6300_v25 }
 0x3aa   :  { %v5788_v52 = vpop.permute.xlu1 %5787 }
 0x3ab   :  { %5825 = vst.msk [vmem:[#allocation5 + $0x2c] sm:$0xf] %vm5813_vm4, %v5788_v52 }
 0x3ae   :  { %v6105_v17 = vpop.permute.xlu1 %6104 }
 0x3af   :  { %6144 = vst.msk [vmem:[#allocation5 + $0x24] sm:$0xf] %vm6134_vm13, %v6105_v17 }
 0x3b4   :  { %v6109_v41 = vpop.permute.xlu1 %6108 }
 0x3b5   :  { %6146 = vst.msk [vmem:[#allocation5 + $0x2c] sm:$0xf] %vm6134_vm13, %v6109_v41 }
 0x3b6   :  { %v4892_v8 = vpop.permute.xlu0 %4891 }
 0x3b7   :  { %4926 = vst.msk [vmem:[#allocation5 + $0x38] sm:$0xf] %vm4911_vm3, %v4892_v8 }
 0x3b8   :  { %v6298_v51 = vpop.permute.xlu1 %6297 }
 0x3b9   :  { %6337 = vst.msk [vmem:[#allocation5 + $0x24] sm:$0xf] %vm6327_vm6, %v6298_v51 }
 0x3ba   :  { %v5081_v29 = vpop.permute.xlu0 %5080 }
 0x3bb   :  { %5117 = vst.msk [vmem:[#allocation5 + $0x30] sm:$0xf] %vm5104_vm0, %v5081_v29 }
 0x3bc   :  { %v4890_v30 = vpop.permute.xlu1 %4889 }
 0x3bd   :  { %4925 = vst.msk [vmem:[#allocation5 + $0x34] sm:$0xf] %vm4911_vm3, %v4890_v30 }
 0x3be   :  { %v5085_v1 = vpop.permute.xlu0 %5084 }
 0x3bf   :  { %5119 = vst.msk [vmem:[#allocation5 + $0x38] sm:$0xf] %vm5104_vm0, %v5085_v1 }
 0x3c0   :  { %v6302_v43 = vpop.permute.xlu1 %6301  ;;  %v7466_v34 = vld [vmem:[#allocation5 + $0x20] sm:$0xff]  }
 0x3c1   :  { %6339 = vst.msk [vmem:[#allocation5 + $0x2c] sm:$0xf] %vm6327_vm6, %v6302_v43  ;;  %7423 = vmatprep.mubr.msk.bf16.mxu1 %vm6436_vm1, %v7466_v34 }
 0x3c2   :  { %v5178_v26 = vpop.permute.xlu0 %5177 }
 0x3c3   :  { %5214 = vst.msk [vmem:[#allocation5 + $0x30] sm:$0xf] %vm5201_vm5, %v5178_v26 }
 0x3c4   :  { %v4894_v36 = vpop.permute.xlu1 %4893 }
 0x3c5   :  { %4927 = vst.msk [vmem:[#allocation5 + $0x3c] sm:$0xf] %vm4911_vm3, %v4894_v36 }
 0x3c6   :  { %v5182_v15 = vpop.permute.xlu0 %5181 }
 0x3c7   :  { %5216 = vst.msk [vmem:[#allocation5 + $0x38] sm:$0xf] %vm5201_vm5, %v5182_v15 }
 0x3c8   :  { %v5083_v23 = vpop.permute.xlu1 %5082  ;;  %v7467_v18 = vld [vmem:[#allocation5 + $0x28] sm:$0xff]  }
 0x3c9   :  { %5118 = vst.msk [vmem:[#allocation5 + $0x34] sm:$0xf] %vm5104_vm0, %v5083_v23  ;;  %7424 = vmatmul.mubr.msk.bf16.gmra.mxu1 %vm6436_vm1, %v7467_v18 }
 0x3ca   :  { %v5499_v9 = vpop.permute.xlu0 %5498 }
 0x3cb   :  { %5535 = vst.msk [vmem:[#allocation5 + $0x30] sm:$0xf] %vm5522_vm11, %v5499_v9 }
 0x3cc   :  { %v5087_v50 = vpop.permute.xlu1 %5086 }
 0x3cd   :  { %5120 = vst.msk [vmem:[#allocation5 + $0x3c] sm:$0xf] %vm5104_vm0, %v5087_v50 }
 0x3ce   :  { %v5503_v47 = vpop.permute.xlu0 %5502 }
 0x3cf   :  { %5537 = vst.msk [vmem:[#allocation5 + $0x38] sm:$0xf] %vm5522_vm11, %v5503_v47 }
 0x3d0   :  { %v5180_v48 = vpop.permute.xlu1 %5179 }
 0x3d1   :  { %5215 = vst.msk [vmem:[#allocation5 + $0x34] sm:$0xf] %vm5201_vm5, %v5180_v48 }
 0x3d2   :  { %v5692_v28 = vpop.permute.xlu0 %5691 }
 0x3d3   :  { %5728 = vst.msk [vmem:[#allocation5 + $0x30] sm:$0xf] %vm5715_vm2, %v5692_v28 }
 0x3d4   :  { %v5184_v45 = vpop.permute.xlu1 %5183 }
 0x3d5   :  { %5217 = vst.msk [vmem:[#allocation5 + $0x3c] sm:$0xf] %vm5201_vm5, %v5184_v45 }
 0x3d6   :  { %v5696_v7 = vpop.permute.xlu0 %5695 }
 0x3d7   :  { %5730 = vst.msk [vmem:[#allocation5 + $0x38] sm:$0xf] %vm5715_vm2, %v5696_v7 }
 0x3d8   :  { %v5501_v53 = vpop.permute.xlu1 %5500 }
 0x3d9   :  { %5536 = vst.msk [vmem:[#allocation5 + $0x34] sm:$0xf] %vm5522_vm11, %v5501_v53 }
 0x3da   :  { %v5790_v3 = vpop.permute.xlu0 %5789 }
 0x3db   :  { %5826 = vst.msk [vmem:[#allocation5 + $0x30] sm:$0xf] %vm5813_vm4, %v5790_v3 }
 0x3dc   :  { %v5505_v61 = vpop.permute.xlu1 %5504 }
 0x3dd   :  { %5538 = vst.msk [vmem:[#allocation5 + $0x3c] sm:$0xf] %vm5522_vm11, %v5505_v61 }
 0x3de   :  { %v5794_v20 = vpop.permute.xlu0 %5793 }
 0x3df   :  { %5828 = vst.msk [vmem:[#allocation5 + $0x38] sm:$0xf] %vm5813_vm4, %v5794_v20 }
 0x3e0   :  { %v5694_v39 = vpop.permute.xlu1 %5693 }
 0x3e1   :  { %5729 = vst.msk [vmem:[#allocation5 + $0x34] sm:$0xf] %vm5715_vm2, %v5694_v39 }
 0x3e2   :  { %v6111_v5 = vpop.permute.xlu0 %6110 }
 0x3e3   :  { %6147 = vst.msk [vmem:[#allocation5 + $0x30] sm:$0xf] %vm6134_vm13, %v6111_v5 }
 0x3e4   :  { %v5698_v40 = vpop.permute.xlu1 %5697 }
 0x3e5   :  { %5731 = vst.msk [vmem:[#allocation5 + $0x3c] sm:$0xf] %vm5715_vm2, %v5698_v40 }
 0x3e6   :  { %v6115_v33 = vpop.permute.xlu0 %6114 }
 0x3e7   :  { %6149 = vst.msk [vmem:[#allocation5 + $0x38] sm:$0xf] %vm6134_vm13, %v6115_v33 }
 0x3e8   :  { %v5792_v49 = vpop.permute.xlu1 %5791 }
 0x3e9   :  { %5827 = vst.msk [vmem:[#allocation5 + $0x34] sm:$0xf] %vm5813_vm4, %v5792_v49 }
 0x3ea   :  { %v6304_v37 = vpop.permute.xlu0 %6303 }
 0x3eb   :  { %6340 = vst.msk [vmem:[#allocation5 + $0x30] sm:$0xf] %vm6327_vm6, %v6304_v37 }
 0x3ec   :  { %v5796_v13 = vpop.permute.xlu1 %5795 }
 0x3ed   :  { %5829 = vst.msk [vmem:[#allocation5 + $0x3c] sm:$0xf] %vm5813_vm4, %v5796_v13 }
 0x3ee   :  { %v6308_v10 = vpop.permute.xlu0 %6307 }
 0x3ef   :  { %6342 = vst.msk [vmem:[#allocation5 + $0x38] sm:$0xf] %vm6327_vm6, %v6308_v10 }
 0x3f0   :  { %v6113_v12 = vpop.permute.xlu1 %6112 }
 0x3f1   :  { %6148 = vst.msk [vmem:[#allocation5 + $0x34] sm:$0xf] %vm6134_vm13, %v6113_v12 }
 0x3f4   :  { %v6117_v38 = vpop.permute.xlu1 %6116 }
 0x3f5   :  { %6150 = vst.msk [vmem:[#allocation5 + $0x3c] sm:$0xf] %vm6134_vm13, %v6117_v38 }
 0x3f8   :  { %v6306_v60 = vpop.permute.xlu1 %6305 }
 0x3f9   :  { %6341 = vst.msk [vmem:[#allocation5 + $0x34] sm:$0xf] %vm6327_vm6, %v6306_v60 }
 0x3fa   :  { %v7417_v19 = vpop.f32.mrf.mxu1 }
 0x3fb   :  { %v6570_v22 = vmul.f32 %v7417_v19, %v11870_v2 }
 0x3fc   :  { %v6310_v63 = vpop.permute.xlu1 %6309  ;;  %v6499_v31 = vpop.f32.mrf.mxu1 }
 0x3fd   :  { %6343 = vst.msk [vmem:[#allocation5 + $0x3c] sm:$0xf] %vm6327_vm6, %v6310_v63  ;;  %v6592_v6 = vadd.f32 %v11875_v54, %v6570_v22  ;;  %v6568_v46 = vmul.f32 %v11870_v2, %v6499_v31 }
 0x3fe   :  { %v7418_v0 = vpop.f32.mrf.mxu1 }
 0x3ff   :  { %v6608_v58 = vmax.f32 %v6592_v6, 0.0  ;;  %v6590_v4 = vadd.f32 %v11875_v54, %v6568_v46  ;;  %v6571_v59 = vmul.f32 %v7418_v0, %v11870_v2 }
 0x400   :  { %v7468_v35 = vld [vmem:[#allocation5 + $0x30] sm:$0xff]   ;;  %v6502_v14 = vpop.f32.mrf.mxu1 }
 0x401   :  { %7427 = vmatprep.mubr.msk.bf16.mxu1 %vm6436_vm1, %v7468_v35  ;;  %6625 = vst.msk [vmem:[%s11982_s7 + $0x10] sm:$0xff] %vm6622_vm12, %v6608_v58  ;;  %v6606_v24 = vmax.f32 %v6590_v4, 0.0  ;;  %v6593_v56 = vadd.f32 %v11875_v54, %v6571_v59  ;;  %v6569_v57 = vmul.f32 %v11870_v2, %v6502_v14 }
 0x403   :  { %6623 = vst.msk [vmem:[%s11982_s7] sm:$0xff] %vm6622_vm12, %v6606_v24  ;;  %v6609_v11 = vmax.f32 %v6593_v56, 0.0  ;;  %v6591_v16 = vadd.f32 %v11875_v54, %v6569_v57 }
 0x404   :  { %v7469_v55 = vld [vmem:[#allocation5 + $0x38] sm:$0xff]  }
 0x405   :  { %7428 = vmatmul.mubr.msk.bf16.gmra.mxu1 %vm6436_vm1, %v7469_v55  ;;  %6626 = vst.msk [vmem:[%s11982_s7 + $0x18] sm:$0xff] %vm6622_vm12, %v6609_v11  ;;  %v6607_v21 = vmax.f32 %v6591_v16, 0.0 }
 0x407   :  { %6624 = vst.msk [vmem:[%s11982_s7 + $0x8] sm:$0xff] %vm6622_vm12, %v6607_v21 }
 0x437   :  { %v7421_v62 = vpop.f32.mrf.mxu1 }
 0x438   :  { %v6574_v42 = vmul.f32 %v7421_v62, %v11870_v2 }
 0x439   :  { %v6515_v32 = vpop.f32.mrf.mxu1 }
 0x43a   :  { %v6596_v27 = vadd.f32 %v11875_v54, %v6574_v42  ;;  %v6572_v44 = vmul.f32 %v11870_v2, %v6515_v32 }
 0x43b   :  { %v7422_v25 = vpop.f32.mrf.mxu1 }
 0x43c   :  { %v6612_v52 = vmax.f32 %v6596_v27, 0.0  ;;  %v6594_v17 = vadd.f32 %v11875_v54, %v6572_v44  ;;  %v6575_v41 = vmul.f32 %v7422_v25, %v11870_v2 }
 0x43d   :  { %v6518_v51 = vpop.f32.mrf.mxu1 }
 0x43e   :  { %6629 = vst.msk [vmem:[%s11982_s7 + $0x30] sm:$0xff] %vm6622_vm12, %v6612_v52  ;;  %v6610_v8 = vmax.f32 %v6594_v17, 0.0  ;;  %v6597_v30 = vadd.f32 %v11875_v54, %v6575_v41  ;;  %v6573_v29 = vmul.f32 %v11870_v2, %v6518_v51 }
 0x440   :  { %6627 = vst.msk [vmem:[%s11982_s7 + $0x20] sm:$0xff] %vm6622_vm12, %v6610_v8  ;;  %v6613_v43 = vmax.f32 %v6597_v30, 0.0  ;;  %v6595_v34 = vadd.f32 %v11875_v54, %v6573_v29 }
 0x442   :  { %6630 = vst.msk [vmem:[%s11982_s7 + $0x38] sm:$0xff] %vm6622_vm12, %v6613_v43  ;;  %v6611_v1 = vmax.f32 %v6595_v34, 0.0 }
 0x444   :  { %6628 = vst.msk [vmem:[%s11982_s7 + $0x28] sm:$0xff] %vm6622_vm12, %v6611_v1 }
 0x489   :  { %v7425_v36 = vpop.f32.mrf.mxu1 }
 0x48a   :  { %v6578_v26 = vmul.f32 %v7425_v36, %v11870_v2 }
 0x48b   :  { %v6531_v23 = vpop.f32.mrf.mxu1 }
 0x48c   :  { %v6600_v18 = vadd.f32 %v11875_v54, %v6578_v26  ;;  %v6576_v15 = vmul.f32 %v11870_v2, %v6531_v23 }
 0x48d   :  { %v7426_v50 = vpop.f32.mrf.mxu1 }
 0x48e   :  { %v6616_v9 = vmax.f32 %v6600_v18, 0.0  ;;  %v6598_v48 = vadd.f32 %v11875_v54, %v6576_v15  ;;  %v6579_v47 = vmul.f32 %v7426_v50, %v11870_v2 }
 0x48f   :  { %v6534_v45 = vpop.f32.mrf.mxu1 }
 0x490   :  { %6633 = vst.msk [vmem:[%s11982_s7 + $0x50] sm:$0xff] %vm6622_vm12, %v6616_v9  ;;  %v6614_v28 = vmax.f32 %v6598_v48, 0.0  ;;  %v6601_v53 = vadd.f32 %v11875_v54, %v6579_v47  ;;  %v6577_v7 = vmul.f32 %v11870_v2, %v6534_v45 }
 0x492   :  { %6631 = vst.msk [vmem:[%s11982_s7 + $0x40] sm:$0xff] %vm6622_vm12, %v6614_v28  ;;  %v6617_v61 = vmax.f32 %v6601_v53, 0.0  ;;  %v6599_v3 = vadd.f32 %v11875_v54, %v6577_v7 }
 0x494   :  { %6634 = vst.msk [vmem:[%s11982_s7 + $0x58] sm:$0xff] %vm6622_vm12, %v6617_v61  ;;  %v6615_v39 = vmax.f32 %v6599_v3, 0.0 }
 0x496   :  { %6632 = vst.msk [vmem:[%s11982_s7 + $0x48] sm:$0xff] %vm6622_vm12, %v6615_v39 }
 0x4c5   :  { %v7429_v20 = vpop.f32.mrf.mxu1 }
 0x4c6   :  { %v6582_v40 = vmul.f32 %v7429_v20, %v11870_v2 }
 0x4c7   :  { %v6547_v5 = vpop.f32.mrf.mxu1 }
 0x4c8   :  { %v6604_v49 = vadd.f32 %v11875_v54, %v6582_v40  ;;  %v6580_v33 = vmul.f32 %v11870_v2, %v6547_v5 }
 0x4c9   :  { %v7430_v13 = vpop.f32.mrf.mxu1 }
 0x4ca   :  { %v6620_v37 = vmax.f32 %v6604_v49, 0.0  ;;  %v6602_v12 = vadd.f32 %v11875_v54, %v6580_v33  ;;  %v6583_v10 = vmul.f32 %v7430_v13, %v11870_v2 }
 0x4cb   :  { %v6550_v38 = vpop.f32.mrf.mxu1 }
 0x4cc   :  { %6637 = vst.msk [vmem:[%s11982_s7 + $0x70] sm:$0xff] %vm6622_vm12, %v6620_v37  ;;  %v6618_v60 = vmax.f32 %v6602_v12, 0.0  ;;  %v6605_v63 = vadd.f32 %v11875_v54, %v6583_v10  ;;  %v6581_v35 = vmul.f32 %v11870_v2, %v6550_v38 }
 0x4ce   :  { %6635 = vst.msk [vmem:[%s11982_s7 + $0x60] sm:$0xff] %vm6622_vm12, %v6618_v60  ;;  %v6621_v19 = vmax.f32 %v6605_v63, 0.0  ;;  %v6603_v22 = vadd.f32 %v11875_v54, %v6581_v35 }
 0x4d0   :  { %6638 = vst.msk [vmem:[%s11982_s7 + $0x78] sm:$0xff] %vm6622_vm12, %v6621_v19  ;;  %v6619_v31 = vmax.f32 %v6603_v22, 0.0 }
 0x4d2   :  { %6636 = vst.msk [vmem:[%s11982_s7 + $0x68] sm:$0xff] %vm6622_vm12, %v6619_v31 }

</bundles_post_ra>
